<compile_context>
chip_gen: v7x
topology: tpu7x:2x2x1
jax: 0.10.0
libtpu: 0.0.40
codegen_flags: <defaults>
</compile_context>

<pallas_src>
import jax
import jax.numpy as jnp
from jax import lax
from jax.experimental import pallas as pl
from jax.experimental.pallas import tpu as pltpu


# ---------------------------------------------------------------------------
# Fused kernel: phase 0 = upsample+pad+im2col+conv+BN partials (per batch),
#               phase 1 = BN affine (batch stats) + ReLU + lane-dense store.
# ---------------------------------------------------------------------------
def _make_upblock_kernel(n_batch, hw2, eps, use_relu):
    inv_cnt = 1.0 / float(n_batch * hw2)

    def kernel(x_ref, w_ref, gb_ref, o_ref,
               conv_ref, stats_ref, xpad_ref, patches_ref):
        # x_ref      : (1, H, W, Cin)        pre-upsample input block (NHWC)
        # w_ref      : (9*Cin, Cout)         conv taps, row = (dy*3+dx)*Cin + c
        # gb_ref     : (Cout, 2)             [gamma, beta]
        # o_ref      : (1, Cout, HW2)        final activation, lane-dense
        # conv_ref   : (N, Cout, HW2)        VMEM-resident conv output (both phases)
        # stats_ref  : (2, Cout, 1)          running [sum, sum_sq] over batch
        # xpad_ref   : (H2+2, W2+2, Cin)     upsampled + zero "same"-padded image
        # patches_ref: (HW2, 9*Cin)          im2col slab
        p = pl.program_id(0)
        n = pl.program_id(1)
        H, W, Cin = x_ref.shape[1], x_ref.shape[2], x_ref.shape[3]
        Cout = o_ref.shape[1]
        H2, W2 = 2 * H, 2 * W

        @pl.when((p == 0) & (n == 0))
        def _init():
            # One-time: zero the padded scratch (border stays zero forever,
            # interior is fully overwritten every step) and the BN partials.
            xpad_ref[...] = jnp.zeros_like(xpad_ref)
            stats_ref[...] = jnp.zeros_like(stats_ref)

        @pl.when(p == 0)
        def _conv_phase():
            xin = x_ref[0]                                           # (H, W, Cin)

            # nearest x2 upsample: broadcast + collapse of dims above the lane
            # dim (layout no-ops) -- no MXU, no duplication-matrix input.
            xw = jnp.broadcast_to(xin[:, :, None, :],
                                  (H, W, 2, Cin)).reshape(H, W2, Cin)
            xu = jnp.broadcast_to(xw[:, None, :, :],
                                  (H, 2, W2, Cin)).reshape(H2, W2, Cin)
            xpad_ref[1:H2 + 1, 1:W2 + 1, :] = xu                     # interior only

            # im2col slab -> single K = 9*Cin contraction on the MXU.
            for dy in range(3):
                for dx in range(3):
                    k = dy * 3 + dx
                    patches_ref[:, k * Cin:(k + 1) * Cin] = (
                        xpad_ref[dy:dy + H2, dx:dx + W2, :].reshape(hw2, Cin))

            acc = jnp.dot(patches_ref[...], w_ref[...],
                          preferred_element_type=jnp.float32)        # (HW2, Cout)
            acc_t = jnp.transpose(acc)                               # (Cout, HW2)
            conv_ref[n] = acc_t

            # BN partial sums as dense lane reductions on the (Cout, HW2) tile.
            # TODO(synk): E[y^2]-E[y]^2 can cancel when |mean| >> std; switch to
            #             a shifted / Welford accumulation if operands go bf16.
            stats_ref[0] = stats_ref[0] + jnp.sum(acc_t, axis=1, keepdims=True)
            stats_ref[1] = stats_ref[1] + jnp.sum(acc_t * acc_t, axis=1,
                                                  keepdims=True)

        @pl.when(p == 1)
        def _bn_phase():
            mean = stats_ref[0] * inv_cnt                            # (Cout, 1)
            var = jnp.maximum(stats_ref[1] * inv_cnt - mean * mean, 0.0)
            scale = gb_ref[:, 0:1] * lax.rsqrt(var + eps)
            shift = gb_ref[:, 1:2] - mean * scale
            y = conv_ref[n] * scale + shift
            if use_relu:
                y = jnp.maximum(y, 0.0)
            o_ref[0] = y.astype(o_ref.dtype)

    return kernel


# ---------------------------------------------------------------------------
# Wrapper
# ---------------------------------------------------------------------------
def up_block_forward(x_nchw, w_oihw, bias, gamma, beta, *, eps=1e-5, use_relu=True):
    """UpBlock forward. x_nchw: (N, Cin, H, W), weight: (Cout, Cin, 3, 3)."""
    N, Cin, H, W = x_nchw.shape
    Cout = w_oihw.shape[0]
    H2, W2 = 2 * H, 2 * W
    HW2 = H2 * W2

    # Per-channel conv bias shifts the batch mean by the same amount and is
    # removed exactly by training-mode BatchNorm -> drop it.
    del bias

    # Only the small pre-upsample input is transposed in XLA; all big
    # activations stay inside the kernel between conv and BN/ReLU.
    x_nhwc = jnp.transpose(x_nchw, (0, 2, 3, 1)).astype(jnp.float32)       # (N,H,W,Cin)
    # (Cout, Cin, 3, 3) -> (9*Cin, Cout) with rows ordered (dy*3+dx)*Cin + c.
    w2d = jnp.transpose(w_oihw, (2, 3, 1, 0)).reshape(9 * Cin, Cout).astype(jnp.float32)
    gb = jnp.stack([gamma.astype(jnp.float32), beta.astype(jnp.float32)], axis=1)

    kernel = _make_upblock_kernel(N, HW2, float(eps), bool(use_relu))

    out_flat = pl.pallas_call(
        kernel,
        out_shape=jax.ShapeDtypeStruct((N, Cout, HW2), jnp.float32),
        grid_spec=pltpu.PrefetchScalarGridSpec(
            num_scalar_prefetch=0,
            grid=(2, N),                                   # (phase, batch), phase major
            in_specs=[
                # phase 0: walk the batch; phase 1: stick to the last-fetched block
                # (input is unused in phase 1 -> no re-fetch DMA).
                pl.BlockSpec((1, H, W, Cin),
                             lambda p, n: (n * (1 - p) + (N - 1) * p, 0, 0, 0)),
                pl.BlockSpec((9 * Cin, Cout), lambda p, n: (0, 0)),
                pl.BlockSpec((Cout, 2), lambda p, n: (0, 0)),
            ],
            # phase 0: constant block index -> never flushed; phase 1: written once.
            out_specs=pl.BlockSpec((1, Cout, HW2), lambda p, n: (n * p, 0, 0)),
            scratch_shapes=[
                pltpu.VMEM((N, Cout, HW2), jnp.float32),       # conv output (resident)
                pltpu.VMEM((2, Cout, 1), jnp.float32),         # BN [sum, sum_sq]
                pltpu.VMEM((H2 + 2, W2 + 2, Cin), jnp.float32),  # padded upsampled image
                pltpu.VMEM((HW2, 9 * Cin), jnp.float32),       # im2col slab
            ],
        ),
        compiler_params=pltpu.CompilerParams(
            dimension_semantics=("arbitrary", "arbitrary")),
    )(x_nhwc, w2d, gb)

    # (N, Cout, H2*W2) -> (N, Cout, H2, W2): contiguous reshape, no HBM transpose.
    return out_flat.reshape(N, Cout, H2, W2)


# ---------------------------------------------------------------------------
# Pure-JAX reference (PyTorch semantics, incl. the conv bias)
# ---------------------------------------------------------------------------
def up_block_reference(x_nchw, w_oihw, bias, gamma, beta, eps=1e-5):
    x = jnp.repeat(jnp.repeat(x_nchw, 2, axis=2), 2, axis=3)    # nearest x2
    y = lax.conv_general_dilated(
        x, w_oihw, window_strides=(1, 1), padding=((1, 1), (1, 1)),
        dimension_numbers=("NCHW", "OIHW", "NCHW"))
    y = y + bias[None, :, None, None]
    mean = jnp.mean(y, axis=(0, 2, 3), keepdims=True)
    var = jnp.mean((y - mean) ** 2, axis=(0, 2, 3), keepdims=True)
    y = (y - mean) / jnp.sqrt(var + eps)
    y = y * gamma[None, :, None, None] + beta[None, :, None, None]
    return jnp.maximum(y, 0.0)


if __name__ == "__main__":
    key = jax.random.PRNGKey(0)
    k_x, k_w, k_b, k_g, k_be = jax.random.split(key, 5)

    N, Cin, Cout, H, W = 2, 4, 8, 16, 16        # input 16x16 -> upsampled 32x32

    x = jax.random.normal(k_x, (N, Cin, H, W), jnp.float32)
    w = jax.random.normal(k_w, (Cout, Cin, 3, 3), jnp.float32) * 0.2   # OIHW
    b = jax.random.normal(k_b, (Cout,), jnp.float32) * 0.1
    gamma = 1.0 + 0.1 * jax.random.normal(k_g, (Cout,), jnp.float32)
    beta = 0.1 * jax.random.normal(k_be, (Cout,), jnp.float32)

    out = up_block_forward(x, w, b, gamma, beta)
    out = jax.block_until_ready(out)

    ref = up_block_reference(x, w, b, gamma, beta)
    assert out.shape == (N, Cout, 2 * H, 2 * W)
    max_err = jnp.max(jnp.abs(out - ref))
    assert jnp.allclose(out, ref, atol=5e-4, rtol=5e-4), f"mismatch vs reference (max err {max_err})"

    print("KERNEL_OK")
</pallas_src>

<mosaic_0001>
module attributes {stable_mosaic.version = 11 : i64} {
  func.func @kernel(%arg0: i32, %arg1: i32, %arg2: memref<1x16x16x4xf32, #tpu.memory_space<vmem>>, %arg3: memref<36x8xf32, #tpu.memory_space<vmem>>, %arg4: memref<8x2xf32, #tpu.memory_space<vmem>>, %arg5: memref<1x8x1024xf32, #tpu.memory_space<vmem>>, %arg6: memref<2x8x1024xf32, #tpu.memory_space<vmem>>, %arg7: memref<2x8x1xf32, #tpu.memory_space<vmem>>, %arg8: memref<34x34x4xf32, #tpu.memory_space<vmem>>, %arg9: memref<1024x36xf32, #tpu.memory_space<vmem>>) attributes {dimension_semantics = [#tpu.dimension_semantics<arbitrary>, #tpu.dimension_semantics<arbitrary>], iteration_bounds = array<i64: 2, 2>, scalar_prefetch = 0 : i64, scratch_operands = 4 : i64, tpu.core_type = #tpu.core_type<tc>, window_params = [{transform_indices = @transform_0, window_bounds = array<i64: 1, 16, 16, 4>}, {pipeline_mode = #tpu.pipeline_mode<synchronous>, transform_indices = @transform_1, window_bounds = array<i64: 36, 8>}, {pipeline_mode = #tpu.pipeline_mode<synchronous>, transform_indices = @transform_2, window_bounds = array<i64: 8, 2>}, {transform_indices = @transform_3, window_bounds = array<i64: 1, 8, 1024>}]} {
    %c0_i32 = arith.constant 0 : i32
    %0 = arith.cmpi eq, %arg0, %c0_i32 : i32
    %c0_i32_0 = arith.constant 0 : i32
    %1 = arith.cmpi eq, %arg1, %c0_i32_0 : i32
    %2 = arith.andi %0, %1 : i1
    %3 = arith.extui %2 : i1 to i32
    %c0_i32_1 = arith.constant 0 : i32
    %4 = arith.cmpi ne, %3, %c0_i32_1 : i32
    scf.if %4 {
      %cst = arith.constant 0.000000e+00 : f32
      %11 = vector.broadcast %cst : f32 to vector<34x34x4xf32>
      %c0 = arith.constant 0 : index
      %c0_5 = arith.constant 0 : index
      %c0_6 = arith.constant 0 : index
      %12 = vector.load %arg8[%c0, %c0_5, %c0_6] : memref<34x34x4xf32, #tpu.memory_space<vmem>>, vector<34x34x4xf32>
      tpu.vector_store %arg8[%c0, %c0_5, %c0_6], %11 {strides = array<i32>} : memref<34x34x4xf32, #tpu.memory_space<vmem>>, vector<34x34x4xf32>,
      %cst_7 = arith.constant 0.000000e+00 : f32
      %13 = vector.broadcast %cst_7 : f32 to vector<2x8x1xf32>
      %c0_8 = arith.constant 0 : index
      %c0_9 = arith.constant 0 : index
      %c0_10 = arith.constant 0 : index
      %14 = vector.load %arg7[%c0_8, %c0_9, %c0_10] : memref<2x8x1xf32, #tpu.memory_space<vmem>>, vector<2x8x1xf32>
      tpu.vector_store %arg7[%c0_8, %c0_9, %c0_10], %13 {strides = array<i32>} : memref<2x8x1xf32, #tpu.memory_space<vmem>>, vector<2x8x1xf32>,
    } else {
    }
    %c0_i32_2 = arith.constant 0 : i32
    %5 = arith.cmpi eq, %arg0, %c0_i32_2 : i32
    %6 = arith.extui %5 : i1 to i32
    %c0_i32_3 = arith.constant 0 : i32
    %7 = arith.cmpi ne, %6, %c0_i32_3 : i32
    scf.if %7 {
      %c0 = arith.constant 0 : index
      %c0_5 = arith.constant 0 : index
      %c0_6 = arith.constant 0 : index
      %c0_7 = arith.constant 0 : index
      %11 = vector.load %arg2[%c0, %c0_5, %c0_6, %c0_7] : memref<1x16x16x4xf32, #tpu.memory_space<vmem>>, vector<1x16x16x4xf32>
      %12 = vector.shape_cast %11 : vector<1x16x16x4xf32> to vector<16x16x4xf32>
      %13 = vector.shape_cast %12 : vector<16x16x4xf32> to vector<16x16x1x4xf32>
      %14 = vector.shape_cast %13 : vector<16x16x1x4xf32> to vector<16x16x1x4xf32>
      %15 = vector.broadcast %14 : vector<16x16x1x4xf32> to vector<16x16x2x4xf32>
      %16 = vector.shape_cast %15 : vector<16x16x2x4xf32> to vector<16x32x4xf32>
      %17 = vector.shape_cast %16 : vector<16x32x4xf32> to vector<16x1x32x4xf32>
      %18 = vector.shape_cast %17 : vector<16x1x32x4xf32> to vector<16x1x32x4xf32>
      %19 = vector.broadcast %18 : vector<16x1x32x4xf32> to vector<16x2x32x4xf32>
      %20 = vector.shape_cast %19 : vector<16x2x32x4xf32> to vector<32x32x4xf32>
      %c1 = arith.constant 1 : index
      %c1_8 = arith.constant 1 : index
      %c0_9 = arith.constant 0 : index
      %21 = vector.load %arg8[%c1, %c1_8, %c0_9] : memref<34x34x4xf32, #tpu.memory_space<vmem>>, vector<32x32x4xf32>
      tpu.vector_store %arg8[%c1, %c1_8, %c0_9], %20 {strides = array<i32>} : memref<34x34x4xf32, #tpu.memory_space<vmem>>, vector<32x32x4xf32>,
      %c0_10 = arith.constant 0 : index
      %c0_11 = arith.constant 0 : index
      %c0_12 = arith.constant 0 : index
      %22 = vector.load %arg8[%c0_10, %c0_11, %c0_12] : memref<34x34x4xf32, #tpu.memory_space<vmem>>, vector<32x32x4xf32>
      %23 = vector.shape_cast %22 : vector<32x32x4xf32> to vector<1024x4xf32>
      %c0_13 = arith.constant 0 : index
      %c0_14 = arith.constant 0 : index
      %24 = vector.load %arg9[%c0_13, %c0_14] : memref<1024x36xf32, #tpu.memory_space<vmem>>, vector<1024x4xf32>
      tpu.vector_store %arg9[%c0_13, %c0_14], %23 {strides = array<i32>} : memref<1024x36xf32, #tpu.memory_space<vmem>>, vector<1024x4xf32>,
      %c0_15 = arith.constant 0 : index
      %c1_16 = arith.constant 1 : index
      %c0_17 = arith.constant 0 : index
      %25 = vector.load %arg8[%c0_15, %c1_16, %c0_17] : memref<34x34x4xf32, #tpu.memory_space<vmem>>, vector<32x32x4xf32>
      %26 = vector.shape_cast %25 : vector<32x32x4xf32> to vector<1024x4xf32>
      %c0_18 = arith.constant 0 : index
      %c4 = arith.constant 4 : index
      %27 = vector.load %arg9[%c0_18, %c4] : memref<1024x36xf32, #tpu.memory_space<vmem>>, vector<1024x4xf32>
      tpu.vector_store %arg9[%c0_18, %c4], %26 {strides = array<i32>} : memref<1024x36xf32, #tpu.memory_space<vmem>>, vector<1024x4xf32>,
      %c0_19 = arith.constant 0 : index
      %c2 = arith.constant 2 : index
      %c0_20 = arith.constant 0 : index
      %28 = vector.load %arg8[%c0_19, %c2, %c0_20] : memref<34x34x4xf32, #tpu.memory_space<vmem>>, vector<32x32x4xf32>
      %29 = vector.shape_cast %28 : vector<32x32x4xf32> to vector<1024x4xf32>
      %c0_21 = arith.constant 0 : index
      %c8 = arith.constant 8 : index
      %30 = vector.load %arg9[%c0_21, %c8] : memref<1024x36xf32, #tpu.memory_space<vmem>>, vector<1024x4xf32>
      tpu.vector_store %arg9[%c0_21, %c8], %29 {strides = array<i32>} : memref<1024x36xf32, #tpu.memory_space<vmem>>, vector<1024x4xf32>,
      %c1_22 = arith.constant 1 : index
      %c0_23 = arith.constant 0 : index
      %c0_24 = arith.constant 0 : index
      %31 = vector.load %arg8[%c1_22, %c0_23, %c0_24] : memref<34x34x4xf32, #tpu.memory_space<vmem>>, vector<32x32x4xf32>
      %32 = vector.shape_cast %31 : vector<32x32x4xf32> to vector<1024x4xf32>
      %c0_25 = arith.constant 0 : index
      %c12 = arith.constant 12 : index
      %33 = vector.load %arg9[%c0_25, %c12] : memref<1024x36xf32, #tpu.memory_space<vmem>>, vector<1024x4xf32>
      tpu.vector_store %arg9[%c0_25, %c12], %32 {strides = array<i32>} : memref<1024x36xf32, #tpu.memory_space<vmem>>, vector<1024x4xf32>,
      %c1_26 = arith.constant 1 : index
      %c1_27 = arith.constant 1 : index
      %c0_28 = arith.constant 0 : index
      %34 = vector.load %arg8[%c1_26, %c1_27, %c0_28] : memref<34x34x4xf32, #tpu.memory_space<vmem>>, vector<32x32x4xf32>
      %35 = vector.shape_cast %34 : vector<32x32x4xf32> to vector<1024x4xf32>
      %c0_29 = arith.constant 0 : index
      %c16 = arith.constant 16 : index
      %36 = vector.load %arg9[%c0_29, %c16] : memref<1024x36xf32, #tpu.memory_space<vmem>>, vector<1024x4xf32>
      tpu.vector_store %arg9[%c0_29, %c16], %35 {strides = array<i32>} : memref<1024x36xf32, #tpu.memory_space<vmem>>, vector<1024x4xf32>,
      %c1_30 = arith.constant 1 : index
      %c2_31 = arith.constant 2 : index
      %c0_32 = arith.constant 0 : index
      %37 = vector.load %arg8[%c1_30, %c2_31, %c0_32] : memref<34x34x4xf32, #tpu.memory_space<vmem>>, vector<32x32x4xf32>
      %38 = vector.shape_cast %37 : vector<32x32x4xf32> to vector<1024x4xf32>
      %c0_33 = arith.constant 0 : index
      %c20 = arith.constant 20 : index
      %39 = vector.load %arg9[%c0_33, %c20] : memref<1024x36xf32, #tpu.memory_space<vmem>>, vector<1024x4xf32>
      tpu.vector_store %arg9[%c0_33, %c20], %38 {strides = array<i32>} : memref<1024x36xf32, #tpu.memory_space<vmem>>, vector<1024x4xf32>,
      %c2_34 = arith.constant 2 : index
      %c0_35 = arith.constant 0 : index
      %c0_36 = arith.constant 0 : index
      %40 = vector.load %arg8[%c2_34, %c0_35, %c0_36] : memref<34x34x4xf32, #tpu.memory_space<vmem>>, vector<32x32x4xf32>
      %41 = vector.shape_cast %40 : vector<32x32x4xf32> to vector<1024x4xf32>
      %c0_37 = arith.constant 0 : index
      %c24 = arith.constant 24 : index
      %42 = vector.load %arg9[%c0_37, %c24] : memref<1024x36xf32, #tpu.memory_space<vmem>>, vector<1024x4xf32>
      tpu.vector_store %arg9[%c0_37, %c24], %41 {strides = array<i32>} : memref<1024x36xf32, #tpu.memory_space<vmem>>, vector<1024x4xf32>,
      %c2_38 = arith.constant 2 : index
      %c1_39 = arith.constant 1 : index
      %c0_40 = arith.constant 0 : index
      %43 = vector.load %arg8[%c2_38, %c1_39, %c0_40] : memref<34x34x4xf32, #tpu.memory_space<vmem>>, vector<32x32x4xf32>
      %44 = vector.shape_cast %43 : vector<32x32x4xf32> to vector<1024x4xf32>
      %c0_41 = arith.constant 0 : index
      %c28 = arith.constant 28 : index
      %45 = vector.load %arg9[%c0_41, %c28] : memref<1024x36xf32, #tpu.memory_space<vmem>>, vector<1024x4xf32>
      tpu.vector_store %arg9[%c0_41, %c28], %44 {strides = array<i32>} : memref<1024x36xf32, #tpu.memory_space<vmem>>, vector<1024x4xf32>,
      %c2_42 = arith.constant 2 : index
      %c2_43 = arith.constant 2 : index
      %c0_44 = arith.constant 0 : index
      %46 = vector.load %arg8[%c2_42, %c2_43, %c0_44] : memref<34x34x4xf32, #tpu.memory_space<vmem>>, vector<32x32x4xf32>
      %47 = vector.shape_cast %46 : vector<32x32x4xf32> to vector<1024x4xf32>
      %c0_45 = arith.constant 0 : index
      %c32 = arith.constant 32 : index
      %48 = vector.load %arg9[%c0_45, %c32] : memref<1024x36xf32, #tpu.memory_space<vmem>>, vector<1024x4xf32>
      tpu.vector_store %arg9[%c0_45, %c32], %47 {strides = array<i32>} : memref<1024x36xf32, #tpu.memory_space<vmem>>, vector<1024x4xf32>,
      %c0_46 = arith.constant 0 : index
      %c0_47 = arith.constant 0 : index
      %49 = vector.load %arg9[%c0_46, %c0_47] : memref<1024x36xf32, #tpu.memory_space<vmem>>, vector<1024x36xf32>
      %c0_48 = arith.constant 0 : index
      %c0_49 = arith.constant 0 : index
      %50 = vector.load %arg3[%c0_48, %c0_49] : memref<36x8xf32, #tpu.memory_space<vmem>>, vector<36x8xf32>
      %cst = arith.constant dense<0.000000e+00> : vector<1024x8xf32>
      %51 = tpu.matmul %49, %50, %cst {dimension_numbers = #tpu.dot_dimension_numbers<[1], [0], [0], [1], [0, 0, 1, 1], [], []>} : vector<1024x36xf32>, vector<36x8xf32>, vector<1024x8xf32> -> vector<1024x8xf32>
      %52 = tpu.transpose %51, [1, 0] : vector<1024x8xf32> -> vector<8x1024xf32>
      %53 = arith.index_cast %arg1 : i32 to index
      %c0_50 = arith.constant 0 : index
      %c0_51 = arith.constant 0 : index
      %54 = vector.load %arg6[%53, %c0_50, %c0_51] : memref<2x8x1024xf32, #tpu.memory_space<vmem>>, vector<1x8x1024xf32>
      %55 = vector.shape_cast %54 : vector<1x8x1024xf32> to vector<8x1024xf32>
      %56 = vector.shape_cast %52 : vector<8x1024xf32> to vector<1x8x1024xf32>
      tpu.vector_store %arg6[%53, %c0_50, %c0_51], %56 {strides = array<i32>} : memref<2x8x1024xf32, #tpu.memory_space<vmem>>, vector<1x8x1024xf32>,
      %c0_52 = arith.constant 0 : index
      %c0_53 = arith.constant 0 : index
      %c0_54 = arith.constant 0 : index
      %57 = vector.load %arg7[%c0_52, %c0_53, %c0_54] : memref<2x8x1xf32, #tpu.memory_space<vmem>>, vector<1x8x1xf32>
      %58 = vector.shape_cast %57 : vector<1x8x1xf32> to vector<8x1xf32>
      %cst_55 = arith.constant dense<0.000000e+00> : vector<8xf32>
      %59 = vector.multi_reduction <add>, %52, %cst_55 [1] : vector<8x1024xf32> to vector<8xf32>
      %60 = vector.shape_cast %59 : vector<8xf32> to vector<8x1xf32>
      %61 = arith.addf %58, %60 : vector<8x1xf32>
      %c0_56 = arith.constant 0 : index
      %c0_57 = arith.constant 0 : index
      %c0_58 = arith.constant 0 : index
      %62 = vector.load %arg7[%c0_56, %c0_57, %c0_58] : memref<2x8x1xf32, #tpu.memory_space<vmem>>, vector<1x8x1xf32>
      %63 = vector.shape_cast %62 : vector<1x8x1xf32> to vector<8x1xf32>
      %64 = vector.shape_cast %61 : vector<8x1xf32> to vector<1x8x1xf32>
      tpu.vector_store %arg7[%c0_56, %c0_57, %c0_58], %64 {strides = array<i32>} : memref<2x8x1xf32, #tpu.memory_space<vmem>>, vector<1x8x1xf32>,
      %c1_59 = arith.constant 1 : index
      %c0_60 = arith.constant 0 : index
      %c0_61 = arith.constant 0 : index
      %65 = vector.load %arg7[%c1_59, %c0_60, %c0_61] : memref<2x8x1xf32, #tpu.memory_space<vmem>>, vector<1x8x1xf32>
      %66 = vector.shape_cast %65 : vector<1x8x1xf32> to vector<8x1xf32>
      %67 = arith.mulf %52, %52 : vector<8x1024xf32>
      %cst_62 = arith.constant dense<0.000000e+00> : vector<8xf32>
      %68 = vector.multi_reduction <add>, %67, %cst_62 [1] : vector<8x1024xf32> to vector<8xf32>
      %69 = vector.shape_cast %68 : vector<8xf32> to vector<8x1xf32>
      %70 = arith.addf %66, %69 : vector<8x1xf32>
      %c1_63 = arith.constant 1 : index
      %c0_64 = arith.constant 0 : index
      %c0_65 = arith.constant 0 : index
      %71 = vector.load %arg7[%c1_63, %c0_64, %c0_65] : memref<2x8x1xf32, #tpu.memory_space<vmem>>, vector<1x8x1xf32>
      %72 = vector.shape_cast %71 : vector<1x8x1xf32> to vector<8x1xf32>
      %73 = vector.shape_cast %70 : vector<8x1xf32> to vector<1x8x1xf32>
      tpu.vector_store %arg7[%c1_63, %c0_64, %c0_65], %73 {strides = array<i32>} : memref<2x8x1xf32, #tpu.memory_space<vmem>>, vector<1x8x1xf32>,
    } else {
    }
    %c1_i32 = arith.constant 1 : i32
    %8 = arith.cmpi eq, %arg0, %c1_i32 : i32
    %9 = arith.extui %8 : i1 to i32
    %c0_i32_4 = arith.constant 0 : i32
    %10 = arith.cmpi ne, %9, %c0_i32_4 : i32
    scf.if %10 {
      %c0 = arith.constant 0 : index
      %c0_5 = arith.constant 0 : index
      %c0_6 = arith.constant 0 : index
      %11 = vector.load %arg7[%c0, %c0_5, %c0_6] : memref<2x8x1xf32, #tpu.memory_space<vmem>>, vector<1x8x1xf32>
      %12 = vector.shape_cast %11 : vector<1x8x1xf32> to vector<8x1xf32>
      %cst = arith.constant 4.8828125E-4 : f32
      %13 = vector.broadcast %cst : f32 to vector<8x1xf32>
      %14 = arith.mulf %12, %13 : vector<8x1xf32>
      %c1 = arith.constant 1 : index
      %c0_7 = arith.constant 0 : index
      %c0_8 = arith.constant 0 : index
      %15 = vector.load %arg7[%c1, %c0_7, %c0_8] : memref<2x8x1xf32, #tpu.memory_space<vmem>>, vector<1x8x1xf32>
      %16 = vector.shape_cast %15 : vector<1x8x1xf32> to vector<8x1xf32>
      %cst_9 = arith.constant 4.8828125E-4 : f32
      %17 = vector.broadcast %cst_9 : f32 to vector<8x1xf32>
      %18 = arith.mulf %16, %17 : vector<8x1xf32>
      %19 = arith.mulf %14, %14 : vector<8x1xf32>
      %20 = arith.subf %18, %19 : vector<8x1xf32>
      %cst_10 = arith.constant 0.000000e+00 : f32
      %21 = vector.broadcast %cst_10 : f32 to vector<8x1xf32>
      %22 = arith.maximumf %20, %21 : vector<8x1xf32>
      %c0_11 = arith.constant 0 : index
      %c0_12 = arith.constant 0 : index
      %23 = vector.load %arg4[%c0_11, %c0_12] : memref<8x2xf32, #tpu.memory_space<vmem>>, vector<8x1xf32>
      %cst_13 = arith.constant 9.99999974E-6 : f32
      %24 = vector.broadcast %cst_13 : f32 to vector<8x1xf32>
      %25 = arith.addf %22, %24 : vector<8x1xf32>
      %26 = math.rsqrt %25 : vector<8x1xf32>
      %27 = arith.mulf %23, %26 : vector<8x1xf32>
      %c0_14 = arith.constant 0 : index
      %c1_15 = arith.constant 1 : index
      %28 = vector.load %arg4[%c0_14, %c1_15] : memref<8x2xf32, #tpu.memory_space<vmem>>, vector<8x1xf32>
      %29 = arith.mulf %14, %27 : vector<8x1xf32>
      %30 = arith.subf %28, %29 : vector<8x1xf32>
      %31 = arith.index_cast %arg1 : i32 to index
      %c0_16 = arith.constant 0 : index
      %c0_17 = arith.constant 0 : index
      %32 = vector.load %arg6[%31, %c0_16, %c0_17] : memref<2x8x1024xf32, #tpu.memory_space<vmem>>, vector<1x8x1024xf32>
      %33 = vector.shape_cast %32 : vector<1x8x1024xf32> to vector<8x1024xf32>
      %34 = vector.broadcast %27 : vector<8x1xf32> to vector<8x1024xf32>
      %35 = arith.mulf %33, %34 : vector<8x1024xf32>
      %36 = vector.broadcast %30 : vector<8x1xf32> to vector<8x1024xf32>
      %37 = arith.addf %35, %36 : vector<8x1024xf32>
      %cst_18 = arith.constant 0.000000e+00 : f32
      %38 = vector.broadcast %cst_18 : f32 to vector<8x1024xf32>
      %39 = arith.maximumf %37, %38 : vector<8x1024xf32>
      %c0_19 = arith.constant 0 : index
      %c0_20 = arith.constant 0 : index
      %c0_21 = arith.constant 0 : index
      %40 = vector.load %arg5[%c0_19, %c0_20, %c0_21] : memref<1x8x1024xf32, #tpu.memory_space<vmem>>, vector<1x8x1024xf32>
      %41 = vector.shape_cast %40 : vector<1x8x1024xf32> to vector<8x1024xf32>
      %42 = vector.shape_cast %39 : vector<8x1024xf32> to vector<1x8x1024xf32>
      tpu.vector_store %arg5[%c0_19, %c0_20, %c0_21], %42 {strides = array<i32>} : memref<1x8x1024xf32, #tpu.memory_space<vmem>>, vector<1x8x1024xf32>,
    } else {
    }
    return
  }
  func.func @transform_0(%arg0: i32, %arg1: i32) -> (i32, i32, i32, i32) {
    %c1_i32 = arith.constant 1 : i32
    %0 = arith.subi %c1_i32, %arg0 : i32
    %1 = arith.muli %arg1, %0 : i32
    %c1_i32_0 = arith.constant 1 : i32
    %2 = arith.muli %c1_i32_0, %arg0 : i32
    %3 = arith.addi %1, %2 : i32
    %c0_i32 = arith.constant 0 : i32
    %c0_i32_1 = arith.constant 0 : i32
    %c0_i32_2 = arith.constant 0 : i32
    %c0_i32_3 = arith.constant 0 : i32
    return %3, %c0_i32, %c0_i32_1, %c0_i32_2 : i32, i32, i32, i32
  }
  func.func @transform_1(%arg0: i32, %arg1: i32) -> (i32, i32) {
    %c0_i32 = arith.constant 0 : i32
    %c0_i32_0 = arith.constant 0 : i32
    %c0_i32_1 = arith.constant 0 : i32
    return %c0_i32, %c0_i32_0 : i32, i32
  }
  func.func @transform_2(%arg0: i32, %arg1: i32) -> (i32, i32) {
    %c0_i32 = arith.constant 0 : i32
    %c0_i32_0 = arith.constant 0 : i32
    %c0_i32_1 = arith.constant 0 : i32
    return %c0_i32, %c0_i32_0 : i32, i32
  }
  func.func @transform_3(%arg0: i32, %arg1: i32) -> (i32, i32, i32) {
    %0 = arith.muli %arg1, %arg0 : i32
    %c0_i32 = arith.constant 0 : i32
    %c0_i32_0 = arith.constant 0 : i32
    %c0_i32_1 = arith.constant 0 : i32
    return %0, %c0_i32, %c0_i32_0 : i32, i32, i32
  }
}

</mosaic_0001>

<bundles_post_ra>
// kernel: tpu_custom_call.1
= control target key start
LH: loop header
LB: loop body
LE: loop exit
PB: predicated region body
PF: predicated region fallthrough
CT: control target
= control target key end

     0   :  { %8 = vsyncpa [#allocation7], 0  ;;  %s17034_s0 = inlined_call_operand.vmem [shape: f32[2,16,16,4], index: 0, kind: input, shape index: {}]   ;;  %s17035_s1 = inlined_call_operand.vmem [shape: f32[36,8], index: 1, kind: input, shape index: {}]   ;;  %s17036_s2 = inlined_call_operand.vmem [shape: f32[8,2], index: 2, kind: input, shape index: {}]   ;;  %s17037_s3 = inlined_call_operand.hbm [shape: f32[2,8,1024], index: 3, kind: output, shape index: {}]  }
   0x1   :  { %10 = vsyncpa [#allocation7 + $0x1], 0  ;;  %s13151_s12 = smov 0   ;;  %s13153_s13 = smov 0  }
   0x2   :  { %s13155_s14 = smov 0   ;;  %s13157_s15 = smov 0  }
   0x3   :  { %s13159_s16 = smov 0   ;;  %s13161_s17 = smov 0  }
   0x4   :  { %s13163_s18 = smov 0   ;;  %s13165_s19 = smov 0  }
   0x5 LB: > { %s12429_s20 = sadd.s32 4294967295, %s13114_s19   ;;  %s12430_s21 = sadd.s32 4294967294, %s13114_s19   ;;  %s13114_s19 = sphi %s13165_s19, %s16_s19   ;;  %s13110_s18 = sphi %s13163_s18, %s17046_s18   ;;  %s13106_s17 = sphi %s13161_s17, %s17045_s17   ;;  %s13102_s16 = sphi %s13159_s16, %s17044_s16   ;;  %s13098_s15 = sphi %s13157_s15, %s17043_s15   ;;  %s13094_s14 = sphi %s13155_s14, %s17042_s14   ;;  %s13090_s13 = sphi %s13153_s13, %s17041_s13   ;;  %s13086_s12 = sphi %s13151_s12, %s17040_s12  }
   0x6   : > { %s25_s22 = sadd.s32 1, %s13106_s17  ;;  %s28_s23 = sadd.s32 1, %s13110_s18 }
   0x7   : > { %p26_p0 = scmp.ge.s32.totalorder %s25_s22, 2  ;;  %s106_s24 = smul.u32 %s13106_s17, %s13110_s18 }
   0x8   : > { %p121_p1 = scmp.ne.s32.totalorder %s13094_s14, %s13090_s13  ;;  %p122_p2 = scmp.eq.s32.totalorder %s12429_s20, 3 }
   0x9   : > { %s17048_s22 = smov (%p26_p0, %s25_s22), 0  ;;  %s17050_s23 = smov (!%p26_p0, %s28_s23), %s13110_s18 }
   0xa   : > { %p127_p3 = scmp.ne.s32.totalorder %s13090_s13, %s13086_s12  ;;  %p30_p4 = scmp.ge.s32.totalorder %s17050_s23, 2 }
   0xb   : > { %p128_p5 = scmp.eq.s32.totalorder %s12430_s21, 3  ;;  %p13204_p6 = por %p122_p2, %p121_p1 }
   0xc   : > { %p12433_p7 = scmp.ge.s32.totalorder %s13114_s19, 1  ;;  %s17052_s23 = smov (%p30_p4, %s17050_s23), 0 }
   0xd   : > { %p13211_p8 = por %p128_p5, %p127_p3  ;;  %p166_p9 = scmp.lt.s32.totalorder %s13114_s19, 5 }
   0xe   : > { %s107_s27 = smul.u32 %s17052_s23, %s17048_s22  ;;  %s111_s29 = sadd.s32 1, %s13094_s14 }
   0xf   : > { %p167_p10 = pnand %p12433_p7, %p166_p9 }
  0x10   : > { %s108_s28 = ssub.s32 %s106_s24, %s107_s27  ;;  %s190_s4 = sand.u32 (!%p167_p10), 1, %s13090_s13  }
  0x11   : > { %p109_p11 = scmp.eq.s32.totalorder %s108_s28, 0  ;;  %170 = sbr.rel (%p167_p10) target bundleno = 3191 (0xc77), region = 32 }
  0x12   : > { %s193_s5 = ssub.s32 (!%p167_p10), 1, %s13102_s16  ;;  %s12434_s6 = sshll.u32 (!%p167_p10), %s190_s4, 6 }
  0x13   : > { %s13220_s30 = scalar_select %p109_p11, %s13094_s14, %s111_s29  }
  0x14   : > { %s194_s7 = smul.u32 (!%p167_p10), %s13098_s15, %s193_s5  ;;  %p205_p12 = scmp.eq.s32.totalorder (!%p167_p10), %s13102_s16, 0 }
  0x15   : > { %p206_p13 = scmp.eq.s32.totalorder (!%p167_p10), %s13098_s15, 0  ;;  %s13235_s21 = scalar_lea.vmem (!%p167_p10), [#allocation6], %s12434_s6 }
  0x16   : > { %s195_s8 = sadd.s32 (!%p167_p10), %s13102_s16, %s194_s7 }
  0x17   : > { %p196_p0 = scmp.lt.s32.totalorder (!%p167_p10), %s195_s8, 1  ;;  %p207_p1 = pnand (!%p167_p10), %p206_p13, %p205_p12 }
  0x18   : > { %vm211_vm0 = vcmask (!%p207_p1), 31744   ;;  %vm216_vm1 = vcmask (!%p207_p1), 25600   ;;  %vm383_vm2 = vcmask (!%p207_p1), 7168   ;;  %v13116_v0 = vmov (!%p207_p1), 0.0  }
  0x19   : > { %s17054_s8 = smov (!%p196_p0, %s195_s8), 1  ;;  %210 = sbr.rel (%p207_p1) target bundleno = 112 (0x70), region = 36 }
  0x1a   : > { %s12577_s9 = sshll.u32 %s17054_s8, 8  ;;  %212 = vst.msk [vmem:[#allocation4] sm:$0xff] (!%p207_p1), %vm211_vm0, %v13116_v0  ;;  %213 = vst.msk [vmem:[#allocation4 + $0x8] sm:$0xff] (!%p207_p1), %vm211_vm0, %v13116_v0 }
  0x1b   : > { %s13233_s20 = scalar_lea.vmem %s17034_s0, %s12577_s9  ;;  %214 = vst.msk [vmem:[#allocation4 + $0x10] sm:$0xff] (!%p207_p1), %vm211_vm0, %v13116_v0  ;;  %215 = vst.msk [vmem:[#allocation4 + $0x18] sm:$0xff] (!%p207_p1), %vm211_vm0, %v13116_v0 }
  0x1c   : > { %218 = vst.msk [vmem:[#allocation4 + $0x28] sm:$0xff] (!%p207_p1), %vm211_vm0, %v13116_v0  ;;  %219 = vst.msk [vmem:[#allocation4 + $0x30] sm:$0xff] (!%p207_p1), %vm211_vm0, %v13116_v0 }
  0x1d   : > { %220 = vst.msk [vmem:[#allocation4 + $0x38] sm:$0xff] (!%p207_p1), %vm211_vm0, %v13116_v0  ;;  %221 = vst.msk [vmem:[#allocation4 + $0x40] sm:$0xff] (!%p207_p1), %vm211_vm0, %v13116_v0 }
  0x1e   : > { %223 = vst.msk [vmem:[#allocation4 + $0x50] sm:$0xff] (!%p207_p1), %vm211_vm0, %v13116_v0  ;;  %224 = vst.msk [vmem:[#allocation4 + $0x58] sm:$0xff] (!%p207_p1), %vm211_vm0, %v13116_v0 }
  0x1f   : > { %225 = vst.msk [vmem:[#allocation4 + $0x60] sm:$0xff] (!%p207_p1), %vm211_vm0, %v13116_v0  ;;  %226 = vst.msk [vmem:[#allocation4 + $0x68] sm:$0xff] (!%p207_p1), %vm211_vm0, %v13116_v0 }
  0x20   : > { %228 = vst.msk [vmem:[#allocation4 + $0x78] sm:$0xff] %vm211_vm0, %v13116_v0  ;;  %229 = vst.msk [vmem:[#allocation4 + $0x80] sm:$0xff] %vm211_vm0, %v13116_v0 }
  0x21   : > { %230 = vst.msk [vmem:[#allocation4 + $0x88] sm:$0xff] %vm211_vm0, %v13116_v0  ;;  %231 = vst.msk [vmem:[#allocation4 + $0x90] sm:$0xff] %vm211_vm0, %v13116_v0 }
  0x22   : > { %233 = vst.msk [vmem:[#allocation4 + $0xa0] sm:$0xff] %vm211_vm0, %v13116_v0  ;;  %234 = vst.msk [vmem:[#allocation4 + $0xa8] sm:$0xff] %vm211_vm0, %v13116_v0 }
  0x23   : > { %235 = vst.msk [vmem:[#allocation4 + $0xb0] sm:$0xff] %vm211_vm0, %v13116_v0  ;;  %236 = vst.msk [vmem:[#allocation4 + $0xb8] sm:$0xff] %vm211_vm0, %v13116_v0 }
  0x24   : > { %238 = vst.msk [vmem:[#allocation4 + $0xc8] sm:$0xff] %vm211_vm0, %v13116_v0  ;;  %239 = vst.msk [vmem:[#allocation4 + $0xd0] sm:$0xff] %vm211_vm0, %v13116_v0 }
  0x25   : > { %240 = vst.msk [vmem:[#allocation4 + $0xd8] sm:$0xff] %vm211_vm0, %v13116_v0  ;;  %241 = vst.msk [vmem:[#allocation4 + $0xe0] sm:$0xff] %vm211_vm0, %v13116_v0 }
  0x26   : > { %243 = vst.msk [vmem:[#allocation4 + $0xf0] sm:$0xff] %vm211_vm0, %v13116_v0  ;;  %244 = vst.msk [vmem:[#allocation4 + $0xf8] sm:$0xff] %vm211_vm0, %v13116_v0 }
  0x27   : > { %245 = vst.msk [vmem:[#allocation4 + $0x100] sm:$0xff] %vm211_vm0, %v13116_v0  ;;  %246 = vst.msk [vmem:[#allocation4 + $0x108] sm:$0xff] %vm211_vm0, %v13116_v0 }
  0x28   : > { %248 = vst.msk [vmem:[#allocation4 + $0x118] sm:$0xff] %vm211_vm0, %v13116_v0  ;;  %249 = vst.msk [vmem:[#allocation4 + $0x120] sm:$0xff] %vm211_vm0, %v13116_v0 }
  0x29   : > { %250 = vst.msk [vmem:[#allocation4 + $0x128] sm:$0xff] %vm211_vm0, %v13116_v0  ;;  %251 = vst.msk [vmem:[#allocation4 + $0x130] sm:$0xff] %vm211_vm0, %v13116_v0 }
  0x2a   : > { %253 = vst.msk [vmem:[#allocation4 + $0x140] sm:$0xff] %vm211_vm0, %v13116_v0  ;;  %254 = vst.msk [vmem:[#allocation4 + $0x148] sm:$0xff] %vm211_vm0, %v13116_v0 }
  0x2b   : > { %255 = vst.msk [vmem:[#allocation4 + $0x150] sm:$0xff] %vm211_vm0, %v13116_v0  ;;  %256 = vst.msk [vmem:[#allocation4 + $0x158] sm:$0xff] %vm211_vm0, %v13116_v0 }
  0x2c   : > { %258 = vst.msk [vmem:[#allocation4 + $0x168] sm:$0xff] %vm211_vm0, %v13116_v0  ;;  %259 = vst.msk [vmem:[#allocation4 + $0x170] sm:$0xff] %vm211_vm0, %v13116_v0 }
  0x2d   : > { %260 = vst.msk [vmem:[#allocation4 + $0x178] sm:$0xff] %vm211_vm0, %v13116_v0  ;;  %261 = vst.msk [vmem:[#allocation4 + $0x180] sm:$0xff] %vm211_vm0, %v13116_v0 }
  0x2e   : > { %263 = vst.msk [vmem:[#allocation4 + $0x190] sm:$0xff] %vm211_vm0, %v13116_v0  ;;  %264 = vst.msk [vmem:[#allocation4 + $0x198] sm:$0xff] %vm211_vm0, %v13116_v0 }
  0x2f   : > { %265 = vst.msk [vmem:[#allocation4 + $0x1a0] sm:$0xff] %vm211_vm0, %v13116_v0  ;;  %266 = vst.msk [vmem:[#allocation4 + $0x1a8] sm:$0xff] %vm211_vm0, %v13116_v0 }
  0x30   : > { %268 = vst.msk [vmem:[#allocation4 + $0x1b8] sm:$0xff] %vm211_vm0, %v13116_v0  ;;  %269 = vst.msk [vmem:[#allocation4 + $0x1c0] sm:$0xff] %vm211_vm0, %v13116_v0 }
  0x31   : > { %270 = vst.msk [vmem:[#allocation4 + $0x1c8] sm:$0xff] %vm211_vm0, %v13116_v0  ;;  %271 = vst.msk [vmem:[#allocation4 + $0x1d0] sm:$0xff] %vm211_vm0, %v13116_v0 }
  0x32   : > { %273 = vst.msk [vmem:[#allocation4 + $0x1e0] sm:$0xff] %vm211_vm0, %v13116_v0  ;;  %274 = vst.msk [vmem:[#allocation4 + $0x1e8] sm:$0xff] %vm211_vm0, %v13116_v0 }
  0x33   : > { %275 = vst.msk [vmem:[#allocation4 + $0x1f0] sm:$0xff] %vm211_vm0, %v13116_v0  ;;  %276 = vst.msk [vmem:[#allocation4 + $0x1f8] sm:$0xff] %vm211_vm0, %v13116_v0 }
  0x34   : > { %278 = vst.msk [vmem:[#allocation4 + $0x208] sm:$0xff] %vm211_vm0, %v13116_v0  ;;  %279 = vst.msk [vmem:[#allocation4 + $0x210] sm:$0xff] %vm211_vm0, %v13116_v0 }
  0x35   : > { %280 = vst.msk [vmem:[#allocation4 + $0x218] sm:$0xff] %vm211_vm0, %v13116_v0  ;;  %281 = vst.msk [vmem:[#allocation4 + $0x220] sm:$0xff] %vm211_vm0, %v13116_v0 }
  0x36   : > { %283 = vst.msk [vmem:[#allocation4 + $0x230] sm:$0xff] %vm211_vm0, %v13116_v0  ;;  %284 = vst.msk [vmem:[#allocation4 + $0x238] sm:$0xff] %vm211_vm0, %v13116_v0 }
  0x37   : > { %285 = vst.msk [vmem:[#allocation4 + $0x240] sm:$0xff] %vm211_vm0, %v13116_v0  ;;  %286 = vst.msk [vmem:[#allocation4 + $0x248] sm:$0xff] %vm211_vm0, %v13116_v0 }
  0x38   : > { %288 = vst.msk [vmem:[#allocation4 + $0x258] sm:$0xff] %vm211_vm0, %v13116_v0  ;;  %289 = vst.msk [vmem:[#allocation4 + $0x260] sm:$0xff] %vm211_vm0, %v13116_v0 }
  0x39   : > { %290 = vst.msk [vmem:[#allocation4 + $0x268] sm:$0xff] %vm211_vm0, %v13116_v0  ;;  %291 = vst.msk [vmem:[#allocation4 + $0x270] sm:$0xff] %vm211_vm0, %v13116_v0 }
  0x3a   : > { %293 = vst.msk [vmem:[#allocation4 + $0x280] sm:$0xff] %vm211_vm0, %v13116_v0  ;;  %294 = vst.msk [vmem:[#allocation4 + $0x288] sm:$0xff] %vm211_vm0, %v13116_v0 }
  0x3b   : > { %295 = vst.msk [vmem:[#allocation4 + $0x290] sm:$0xff] %vm211_vm0, %v13116_v0  ;;  %296 = vst.msk [vmem:[#allocation4 + $0x298] sm:$0xff] %vm211_vm0, %v13116_v0 }
  0x3c   : > { %298 = vst.msk [vmem:[#allocation4 + $0x2a8] sm:$0xff] %vm211_vm0, %v13116_v0  ;;  %299 = vst.msk [vmem:[#allocation4 + $0x2b0] sm:$0xff] %vm211_vm0, %v13116_v0 }
  0x3d   : > { %300 = vst.msk [vmem:[#allocation4 + $0x2b8] sm:$0xff] %vm211_vm0, %v13116_v0  ;;  %301 = vst.msk [vmem:[#allocation4 + $0x2c0] sm:$0xff] %vm211_vm0, %v13116_v0 }
  0x3e   : > { %303 = vst.msk [vmem:[#allocation4 + $0x2d0] sm:$0xff] %vm211_vm0, %v13116_v0  ;;  %304 = vst.msk [vmem:[#allocation4 + $0x2d8] sm:$0xff] %vm211_vm0, %v13116_v0 }
  0x3f   : > { %305 = vst.msk [vmem:[#allocation4 + $0x2e0] sm:$0xff] %vm211_vm0, %v13116_v0  ;;  %306 = vst.msk [vmem:[#allocation4 + $0x2e8] sm:$0xff] %vm211_vm0, %v13116_v0 }
  0x40   : > { %308 = vst.msk [vmem:[#allocation4 + $0x2f8] sm:$0xff] %vm211_vm0, %v13116_v0  ;;  %309 = vst.msk [vmem:[#allocation4 + $0x300] sm:$0xff] %vm211_vm0, %v13116_v0 }
  0x41   : > { %310 = vst.msk [vmem:[#allocation4 + $0x308] sm:$0xff] %vm211_vm0, %v13116_v0  ;;  %311 = vst.msk [vmem:[#allocation4 + $0x310] sm:$0xff] %vm211_vm0, %v13116_v0 }
  0x42   : > { %313 = vst.msk [vmem:[#allocation4 + $0x320] sm:$0xff] %vm211_vm0, %v13116_v0  ;;  %314 = vst.msk [vmem:[#allocation4 + $0x328] sm:$0xff] %vm211_vm0, %v13116_v0 }
  0x43   : > { %315 = vst.msk [vmem:[#allocation4 + $0x330] sm:$0xff] %vm211_vm0, %v13116_v0  ;;  %316 = vst.msk [vmem:[#allocation4 + $0x338] sm:$0xff] %vm211_vm0, %v13116_v0 }
  0x44   : > { %318 = vst.msk [vmem:[#allocation4 + $0x348] sm:$0xff] %vm211_vm0, %v13116_v0  ;;  %319 = vst.msk [vmem:[#allocation4 + $0x350] sm:$0xff] %vm211_vm0, %v13116_v0 }
  0x45   : > { %320 = vst.msk [vmem:[#allocation4 + $0x358] sm:$0xff] %vm211_vm0, %v13116_v0  ;;  %321 = vst.msk [vmem:[#allocation4 + $0x360] sm:$0xff] %vm211_vm0, %v13116_v0 }
  0x46   : > { %323 = vst.msk [vmem:[#allocation4 + $0x370] sm:$0xff] %vm211_vm0, %v13116_v0  ;;  %324 = vst.msk [vmem:[#allocation4 + $0x378] sm:$0xff] %vm211_vm0, %v13116_v0 }
  0x47   : > { %325 = vst.msk [vmem:[#allocation4 + $0x380] sm:$0xff] %vm211_vm0, %v13116_v0  ;;  %326 = vst.msk [vmem:[#allocation4 + $0x388] sm:$0xff] %vm211_vm0, %v13116_v0 }
  0x48   : > { %328 = vst.msk [vmem:[#allocation4 + $0x398] sm:$0xff] %vm211_vm0, %v13116_v0  ;;  %329 = vst.msk [vmem:[#allocation4 + $0x3a0] sm:$0xff] %vm211_vm0, %v13116_v0 }
  0x49   : > { %330 = vst.msk [vmem:[#allocation4 + $0x3a8] sm:$0xff] %vm211_vm0, %v13116_v0  ;;  %331 = vst.msk [vmem:[#allocation4 + $0x3b0] sm:$0xff] %vm211_vm0, %v13116_v0 }
  0x4a   : > { %333 = vst.msk [vmem:[#allocation4 + $0x3c0] sm:$0xff] %vm211_vm0, %v13116_v0  ;;  %334 = vst.msk [vmem:[#allocation4 + $0x3c8] sm:$0xff] %vm211_vm0, %v13116_v0 }
  0x4b   : > { %335 = vst.msk [vmem:[#allocation4 + $0x3d0] sm:$0xff] %vm211_vm0, %v13116_v0  ;;  %336 = vst.msk [vmem:[#allocation4 + $0x3d8] sm:$0xff] %vm211_vm0, %v13116_v0 }
  0x4c   : > { %338 = vst.msk [vmem:[#allocation4 + $0x3e8] sm:$0xff] %vm211_vm0, %v13116_v0  ;;  %339 = vst.msk [vmem:[#allocation4 + $0x3f0] sm:$0xff] %vm211_vm0, %v13116_v0 }
  0x4d   : > { %340 = vst.msk [vmem:[#allocation4 + $0x3f8] sm:$0xff] %vm211_vm0, %v13116_v0  ;;  %341 = vst.msk [vmem:[#allocation4 + $0x400] sm:$0xff] %vm211_vm0, %v13116_v0 }
  0x4e   : > { %343 = vst.msk [vmem:[#allocation4 + $0x410] sm:$0xff] %vm211_vm0, %v13116_v0  ;;  %344 = vst.msk [vmem:[#allocation4 + $0x418] sm:$0xff] %vm211_vm0, %v13116_v0 }
  0x4f   : > { %345 = vst.msk [vmem:[#allocation4 + $0x420] sm:$0xff] %vm211_vm0, %v13116_v0  ;;  %346 = vst.msk [vmem:[#allocation4 + $0x428] sm:$0xff] %vm211_vm0, %v13116_v0 }
  0x50   : > { %348 = vst.msk [vmem:[#allocation4 + $0x438] sm:$0xff] %vm211_vm0, %v13116_v0  ;;  %349 = vst.msk [vmem:[#allocation4 + $0x440] sm:$0xff] %vm211_vm0, %v13116_v0 }
  0x51   : > { %350 = vst.msk [vmem:[#allocation4 + $0x448] sm:$0xff] %vm211_vm0, %v13116_v0  ;;  %351 = vst.msk [vmem:[#allocation4 + $0x450] sm:$0xff] %vm211_vm0, %v13116_v0 }
  0x52   : > { %353 = vst.msk [vmem:[#allocation4 + $0x460] sm:$0xff] %vm211_vm0, %v13116_v0  ;;  %354 = vst.msk [vmem:[#allocation4 + $0x468] sm:$0xff] %vm211_vm0, %v13116_v0 }
  0x53   : > { %355 = vst.msk [vmem:[#allocation4 + $0x470] sm:$0xff] %vm211_vm0, %v13116_v0  ;;  %356 = vst.msk [vmem:[#allocation4 + $0x478] sm:$0xff] %vm211_vm0, %v13116_v0 }
  0x54   : > { %358 = vst.msk [vmem:[#allocation4 + $0x488] sm:$0xff] %vm211_vm0, %v13116_v0  ;;  %359 = vst.msk [vmem:[#allocation4 + $0x490] sm:$0xff] %vm211_vm0, %v13116_v0 }
  0x55   : > { %360 = vst.msk [vmem:[#allocation4 + $0x498] sm:$0xff] %vm211_vm0, %v13116_v0  ;;  %361 = vst.msk [vmem:[#allocation4 + $0x4a0] sm:$0xff] %vm211_vm0, %v13116_v0 }
  0x56   : > { %363 = vst.msk [vmem:[#allocation4 + $0x4b0] sm:$0xff] %vm211_vm0, %v13116_v0  ;;  %364 = vst.msk [vmem:[#allocation4 + $0x4b8] sm:$0xff] %vm211_vm0, %v13116_v0 }
  0x57   : > { %365 = vst.msk [vmem:[#allocation4 + $0x4c0] sm:$0xff] %vm211_vm0, %v13116_v0  ;;  %366 = vst.msk [vmem:[#allocation4 + $0x4c8] sm:$0xff] %vm211_vm0, %v13116_v0 }
  0x58   : > { %368 = vst.msk [vmem:[#allocation4 + $0x4d8] sm:$0xff] %vm211_vm0, %v13116_v0  ;;  %369 = vst.msk [vmem:[#allocation4 + $0x4e0] sm:$0xff] %vm211_vm0, %v13116_v0 }
  0x59   : > { %370 = vst.msk [vmem:[#allocation4 + $0x4e8] sm:$0xff] %vm211_vm0, %v13116_v0  ;;  %371 = vst.msk [vmem:[#allocation4 + $0x4f0] sm:$0xff] %vm211_vm0, %v13116_v0 }
  0x5a   : > { %373 = vst.msk [vmem:[#allocation4 + $0x500] sm:$0xff] %vm211_vm0, %v13116_v0  ;;  %374 = vst.msk [vmem:[#allocation4 + $0x508] sm:$0xff] %vm211_vm0, %v13116_v0 }
  0x5b   : > { %375 = vst.msk [vmem:[#allocation4 + $0x510] sm:$0xff] %vm211_vm0, %v13116_v0  ;;  %376 = vst.msk [vmem:[#allocation4 + $0x518] sm:$0xff] %vm211_vm0, %v13116_v0 }
  0x5c   : > { %378 = vst.msk [vmem:[#allocation4 + $0x528] sm:$0xff] %vm211_vm0, %v13116_v0  ;;  %379 = vst.msk [vmem:[#allocation4 + $0x530] sm:$0xff] %vm211_vm0, %v13116_v0 }
  0x5d   : > { %380 = vst.msk [vmem:[#allocation4 + $0x538] sm:$0xff] %vm211_vm0, %v13116_v0  ;;  %381 = vst.msk [vmem:[#allocation4 + $0x540] sm:$0xff] %vm211_vm0, %v13116_v0 }
  0x5e   : > { %217 = vst.msk [vmem:[#allocation4 + $0x20] sm:$0x3] %vm216_vm1, %v13116_v0  ;;  %222 = vst.msk [vmem:[#allocation4 + $0x48] sm:$0x3] %vm216_vm1, %v13116_v0 }
  0x5f   : > { %227 = vst.msk [vmem:[#allocation4 + $0x70] sm:$0x3] %vm216_vm1, %v13116_v0  ;;  %232 = vst.msk [vmem:[#allocation4 + $0x98] sm:$0x3] %vm216_vm1, %v13116_v0 }
  0x60   : > { %237 = vst.msk [vmem:[#allocation4 + $0xc0] sm:$0x3] %vm216_vm1, %v13116_v0  ;;  %242 = vst.msk [vmem:[#allocation4 + $0xe8] sm:$0x3] %vm216_vm1, %v13116_v0 }
  0x61   : > { %247 = vst.msk [vmem:[#allocation4 + $0x110] sm:$0x3] %vm216_vm1, %v13116_v0  ;;  %252 = vst.msk [vmem:[#allocation4 + $0x138] sm:$0x3] %vm216_vm1, %v13116_v0 }
  0x62   : > { %257 = vst.msk [vmem:[#allocation4 + $0x160] sm:$0x3] %vm216_vm1, %v13116_v0  ;;  %262 = vst.msk [vmem:[#allocation4 + $0x188] sm:$0x3] %vm216_vm1, %v13116_v0 }
  0x63   : > { %267 = vst.msk [vmem:[#allocation4 + $0x1b0] sm:$0x3] %vm216_vm1, %v13116_v0  ;;  %272 = vst.msk [vmem:[#allocation4 + $0x1d8] sm:$0x3] %vm216_vm1, %v13116_v0 }
  0x64   : > { %277 = vst.msk [vmem:[#allocation4 + $0x200] sm:$0x3] %vm216_vm1, %v13116_v0  ;;  %282 = vst.msk [vmem:[#allocation4 + $0x228] sm:$0x3] %vm216_vm1, %v13116_v0 }
  0x65   : > { %287 = vst.msk [vmem:[#allocation4 + $0x250] sm:$0x3] %vm216_vm1, %v13116_v0  ;;  %292 = vst.msk [vmem:[#allocation4 + $0x278] sm:$0x3] %vm216_vm1, %v13116_v0 }
  0x66   : > { %297 = vst.msk [vmem:[#allocation4 + $0x2a0] sm:$0x3] %vm216_vm1, %v13116_v0  ;;  %302 = vst.msk [vmem:[#allocation4 + $0x2c8] sm:$0x3] %vm216_vm1, %v13116_v0 }
  0x67   : > { %307 = vst.msk [vmem:[#allocation4 + $0x2f0] sm:$0x3] %vm216_vm1, %v13116_v0  ;;  %312 = vst.msk [vmem:[#allocation4 + $0x318] sm:$0x3] %vm216_vm1, %v13116_v0 }
  0x68   : > { %317 = vst.msk [vmem:[#allocation4 + $0x340] sm:$0x3] %vm216_vm1, %v13116_v0  ;;  %322 = vst.msk [vmem:[#allocation4 + $0x368] sm:$0x3] %vm216_vm1, %v13116_v0 }
  0x69   : > { %327 = vst.msk [vmem:[#allocation4 + $0x390] sm:$0x3] %vm216_vm1, %v13116_v0  ;;  %332 = vst.msk [vmem:[#allocation4 + $0x3b8] sm:$0x3] %vm216_vm1, %v13116_v0 }
  0x6a   : > { %337 = vst.msk [vmem:[#allocation4 + $0x3e0] sm:$0x3] %vm216_vm1, %v13116_v0  ;;  %342 = vst.msk [vmem:[#allocation4 + $0x408] sm:$0x3] %vm216_vm1, %v13116_v0 }
  0x6b   : > { %347 = vst.msk [vmem:[#allocation4 + $0x430] sm:$0x3] %vm216_vm1, %v13116_v0  ;;  %352 = vst.msk [vmem:[#allocation4 + $0x458] sm:$0x3] %vm216_vm1, %v13116_v0 }
  0x6c   : > { %357 = vst.msk [vmem:[#allocation4 + $0x480] sm:$0x3] %vm216_vm1, %v13116_v0  ;;  %362 = vst.msk [vmem:[#allocation4 + $0x4a8] sm:$0x3] %vm216_vm1, %v13116_v0 }
  0x6d   : > { %367 = vst.msk [vmem:[#allocation4 + $0x4d0] sm:$0x3] %vm216_vm1, %v13116_v0  ;;  %372 = vst.msk [vmem:[#allocation4 + $0x4f8] sm:$0x3] %vm216_vm1, %v13116_v0 }
  0x6e   : > { %377 = vst.msk [vmem:[#allocation4 + $0x520] sm:$0x3] %vm216_vm1, %v13116_v0  ;;  %382 = vst.msk [vmem:[#allocation4 + $0x548] sm:$0x3] %vm216_vm1, %v13116_v0 }
  0x6f   : > { %384 = vst.msk [vmem:[#allocation3] sm:$0xff] %vm383_vm2, %v13116_v0  ;;  %385 = vst.msk [vmem:[#allocation3 + $0x8] sm:$0xff] %vm383_vm2, %v13116_v0 }
  0x70 PF: > { %p12437_p2 = scmp.ne.s32.totalorder %s13102_s16, 0 }
  0x71   : > { %v4583_v1 = vld [vmem:[#allocation4 + $0x1] sm:$0xff] (!%p12437_p2)  ;;  %v457_v4 = vlaneseq (!%p12437_p2)  ;;  %s13117_s24 = smov (!%p12437_p2), 4   ;;  %v389_v6 = vld [vmem:[%s13233_s20] sm:$0xff] (!%p12437_p2)  ;;  %v13118_v7 = vmov (!%p12437_p2), 1966171168   ;;  %v390_v9 = vld [vmem:[%s13233_s20 + $0x8] sm:$0xff] (!%p12437_p2) }
  0x72   : > { %388 = sbr.rel (%p12437_p2) target bundleno = 2883 (0xb43), region = 40  ;;  %v4585_v2 = vld [vmem:[#allocation4 + $0x11] sm:$0xff] (!%p12437_p2)  ;;  %v4584_v3 = vld [vmem:[#allocation4 + $0x9] sm:$0xff] (!%p12437_p2)  ;;  %4839 = vrot.lane.b32.xlu0 (!%p12437_p2), %v4583_v1, %s13117_s24  ;;  %v4586_v5 = vld [vmem:[#allocation4 + $0x19] sm:$0xff] (!%p12437_p2)  ;;  %v455_v8 = vunpack.c.l.s4 (!%p12437_p2), %v13118_v7  ;;  %v13119_v11 = vmov (!%p12437_p2), 1983009808   ;;  %v453_v13 = vcombine.high (!%p12437_p2), %v389_v6, %v389_v6  ;;  %v502_v18 = vcombine.high (!%p12437_p2), %v390_v9, %v390_v9 }
  0x73   : > { %4843 = vrot.lane.b32.xlu1 (!%p12437_p2), %v4585_v2, %s13117_s24  ;;  %v458_v10 = vshrl.u32 (!%p12437_p2), %v457_v4, 7  ;;  %v3048_v12 = vunpack.c.l.s4 (!%p12437_p2), %v13119_v11  ;;  %vm4198_vm3 = vcmask (!%p12437_p2), 31744   ;;  %v391_v14 = vld [vmem:[%s13233_s20 + $0x10] sm:$0xff] (!%p12437_p2)  ;;  %v392_v15 = vld [vmem:[%s13233_s20 + $0x18] sm:$0xff] (!%p12437_p2)  ;;  %v13589_v16 = vld [vmem:[%s13233_s20 + $0x20] sm:$0xff] (!%p12437_p2)  ;;  %vm5223_vm4 = vcmask (!%p12437_p2), 64544  }
  0x74   : > { %v456_v17 = vunpack.c.0.s8 (!%p12437_p2), %v455_v8  ;;  %v551_v19 = vcombine.high (!%p12437_p2), %v391_v14, %v391_v14  ;;  %v600_v20 = vcombine.high (!%p12437_p2), %v392_v15, %v392_v15  ;;  %v13592_v21 = vld [vmem:[%s13233_s20 + $0x28] sm:$0xff] (!%p12437_p2)  ;;  %v13595_v22 = vld [vmem:[%s13233_s20 + $0x30] sm:$0xff] (!%p12437_p2)  ;;  %v13598_v23 = vld [vmem:[%s13233_s20 + $0x38] sm:$0xff] (!%p12437_p2)  ;;  %v649_v25 = vcombine.high (!%p12437_p2), %v13589_v16, %v13589_v16  ;;  %s13120_s27 = smov (!%p12437_p2), 8   ;;  %s13121_s28 = smov (!%p12437_p2), 12  }
  0x75   : > { %v3049_v24 = vunpack.c.0.s8 (!%p12437_p2), %v3048_v12  ;;  %v698_v26 = vcombine.high (!%p12437_p2), %v13592_v21, %v13592_v21  ;;  %v747_v27 = vcombine.high (!%p12437_p2), %v13595_v22, %v13595_v22  ;;  %v13607_v28 = vld [vmem:[%s13233_s20 + $0x40] sm:$0xff] (!%p12437_p2)  ;;  %v13610_v29 = vld [vmem:[%s13233_s20 + $0x48] sm:$0xff] (!%p12437_p2)  ;;  %v13613_v30 = vld [vmem:[%s13233_s20 + $0x50] sm:$0xff] (!%p12437_p2)  ;;  %v13619_v32 = vsub.s32 (!%p12437_p2), 0, %v458_v10  ;;  %s13122_s29 = smov (!%p12437_p2), 16   ;;  %s13123_s5 = smov (!%p12437_p2), 20  }
  0x76   : > { %4841 = vrot.lane.b32.xlu0 (!%p12437_p2), %v4584_v3, %s13117_s24  ;;  %v13617_v31 = vsub.s32 (!%p12437_p2), %v456_v17, %v458_v10  ;;  %v796_v33 = vcombine.high (!%p12437_p2), %v13598_v23, %v13598_v23  ;;  %v845_v34 = vcombine.high (!%p12437_p2), %v13607_v28, %v13607_v28  ;;  %v13626_v35 = vld [vmem:[%s13233_s20 + $0x58] sm:$0xff] (!%p12437_p2)  ;;  %v894_v37 = vcombine.high (!%p12437_p2), %v13610_v29, %v13610_v29  ;;  %v4327_v44 = vld [vmem:[#allocation4] sm:$0xff] (!%p12437_p2)  ;;  %v4329_v61 = vld [vmem:[#allocation4 + $0x10] sm:$0xff] (!%p12437_p2)  ;;  %s13124_s6 = smov (!%p12437_p2), 24   ;;  %s13125_s7 = smov (!%p12437_p2), 28  }
  0x77   : > { %4845 = vrot.lane.b32.xlu1 (!%p12437_p2), %v4586_v5, %s13117_s24  ;;  %v13628_v36 = vsub.s32 (!%p12437_p2), %v3049_v24, %v458_v10  ;;  %v943_v38 = vcombine.high (!%p12437_p2), %v13613_v30, %v13613_v30  ;;  %v992_v39 = vcombine.high (!%p12437_p2), %v13626_v35, %v13626_v35  ;;  %4455 = vst.msk [vmem:[#allocation5] sm:$0xff] (!%p12437_p2), %vm4198_vm3, %v4327_v44  ;;  %v4328_v62 = vld [vmem:[#allocation4 + $0x8] sm:$0xff] (!%p12437_p2)  ;;  %4457 = vst.msk [vmem:[#allocation5 + $0x10] sm:$0xff] (!%p12437_p2), %vm4198_vm3, %v4329_v61  ;;  %vm5992_vm5 = vcmask (!%p12437_p2), 97344  }
  0x78   : > { %v460_v40 = vrot.slane (!%p12437_p2), %v389_v6, %v13617_v31  ;;  %v467_v41 = vrot.slane (!%p12437_p2), %v453_v13, %v13617_v31  ;;  %v509_v42 = vrot.slane (!%p12437_p2), %v390_v9, %v13617_v31  ;;  %v516_v43 = vrot.slane (!%p12437_p2), %v502_v18, %v13617_v31  ;;  %4456 = vst.msk [vmem:[#allocation5 + $0x8] sm:$0xff] (!%p12437_p2), %vm4198_vm3, %v4328_v62 }
  0x79   : > { %v13641_v45 = vrot.slane %v391_v14, %v13617_v31  ;;  %v13644_v46 = vrot.slane %v551_v19, %v13617_v31  ;;  %v13647_v47 = vrot.slane %v392_v15, %v13617_v31  ;;  %v13650_v48 = vrot.slane %v600_v20, %v13617_v31  ;;  %v4330_v15 = vld [vmem:[#allocation4 + $0x18] sm:$0xff] }
  0x7a   : > { %v468_v49 = vcombine.high %v460_v40, %v460_v40  ;;  %v476_v50 = vrot.slane %v460_v40, %v13617_v31  ;;  %v469_v51 = vcombine.high %v467_v41, %v467_v41  ;;  %v483_v52 = vrot.slane %v467_v41, %v13617_v31  ;;  %4458 = vst.msk [vmem:[#allocation5 + $0x18] sm:$0xff] %vm4198_vm3, %v4330_v15 }
  0x7b   : > { %v517_v53 = vcombine.high %v509_v42, %v509_v42  ;;  %v525_v54 = vrot.slane %v509_v42, %v13617_v31  ;;  %v518_v55 = vcombine.high %v516_v43, %v516_v43  ;;  %v532_v56 = vrot.slane %v516_v43, %v13617_v31 }
  0x7c   : > { %v490_v57 = vrot.slane %v468_v49, %v13617_v31  ;;  %v498_v58 = vcombine.high %v476_v50, %v476_v50  ;;  %v2024_v59 = vrot.slane %v476_v50, %v13619_v32  ;;  %v497_v60 = vrot.slane %v469_v51, %v13617_v31 }
  0x7d   : > { %v499_v63 = vcombine.high %v483_v52, %v483_v52  ;;  %v2040_v0 = vrot.slane %v483_v52, %v13619_v32  ;;  %v539_v1 = vrot.slane %v517_v53, %v13617_v31  ;;  %v547_v2 = vcombine.high %v525_v54, %v525_v54 }
  0x7e   : > { %v500_v3 = vcombine.high %v490_v57, %v490_v57  ;;  %v2028_v4 = vrot.slane %v490_v57, %v13619_v32  ;;  %v2032_v5 = vrot.slane %v498_v58, %v13619_v32  ;;  %v501_v6 = vcombine.high %v497_v60, %v497_v60 }
  0x7f   : > { %v2044_v7 = vrot.slane %v497_v60, %v13619_v32  ;;  %v2048_v8 = vrot.slane %v499_v63, %v13619_v32  ;;  %v549_v9 = vcombine.high %v539_v1, %v539_v1  ;;  %v2056_v10 = vrot.slane %v525_v54, %v13619_v32 }
  0x80   : > { %v2036_v11 = vrot.slane %v500_v3, %v13619_v32  ;;  %v3045_v12 = vcombine.low %v2024_v59, %v2028_v4  ;;  %v2052_v13 = vrot.slane %v501_v6, %v13619_v32  ;;  %v2060_v14 = vrot.slane %v539_v1, %v13619_v32 }
  0x81   : > { %v3062_v17 = vcombine.low %v2040_v0, %v2044_v7  ;;  %v2064_v18 = vrot.slane %v547_v2, %v13619_v32  ;;  %v2068_v19 = vrot.slane %v549_v9, %v13619_v32  ;;  %v546_v20 = vrot.slane %v518_v55, %v13617_v31 }
  0x82   : > { %v3046_v24 = vcombine.low %v2032_v5, %v2036_v11  ;;  %v3053_v40 = vrot.slane %v3045_v12, %v13628_v36  ;;  %v3063_v41 = vcombine.low %v2048_v8, %v2052_v13  ;;  %v3079_v42 = vcombine.low %v2056_v10, %v2060_v14 }
  0x83   : > { %v3070_v43 = vrot.slane %v3062_v17, %v13628_v36  ;;  %v3080_v44 = vcombine.low %v2064_v18, %v2068_v19  ;;  %v548_v49 = vcombine.high %v532_v56, %v532_v56  ;;  %v550_v50 = vcombine.high %v546_v20, %v546_v20 }
  0x84   : > { %v3060_v51 = vrot.slane %v3046_v24, %v13628_v36  ;;  %v3077_v52 = vrot.slane %v3063_v41, %v13628_v36  ;;  %v3087_v53 = vrot.slane %v3079_v42, %v13628_v36  ;;  %v2072_v54 = vrot.slane %v532_v56, %v13619_v32 }
  0x85   : > { %v3094_v55 = vrot.slane %v3080_v44, %v13628_v36  ;;  %v2076_v57 = vrot.slane %v546_v20, %v13619_v32  ;;  %v2080_v58 = vrot.slane %v548_v49, %v13619_v32  ;;  %v2084_v59 = vrot.slane %v550_v50, %v13619_v32 }
  0x86   : > { %v3061_v60 = vcombine.low %v3053_v40, %v3060_v51  ;;  %v3078_v61 = vcombine.low %v3070_v43, %v3077_v52  ;;  %v566_v62 = vcombine.high %v13641_v45, %v13641_v45  ;;  %v574_v63 = vrot.slane %v13641_v45, %v13617_v31 }
  0x87   : > { %v3095_v0 = vcombine.low %v3087_v53, %v3094_v55  ;;  %v3096_v1 = vcombine.low %v2072_v54, %v2076_v57  ;;  %v3097_v2 = vcombine.low %v2080_v58, %v2084_v59  ;;  %v567_v56 = vcombine.high %v13644_v46, %v13644_v46 }
  0x88   : > { %4199 = vst.msk [vmem:[#allocation4 + $0x29] sm:$0xff] %vm4198_vm3, %v3061_v60  ;;  %4203 = vst.msk [vmem:[#allocation4 + $0x51] sm:$0xff] %vm4198_vm3, %v3061_v60  ;;  %v588_v3 = vrot.slane %v566_v62, %v13617_v31  ;;  %v596_v4 = vcombine.high %v574_v63, %v574_v63  ;;  %v2088_v5 = vrot.slane %v574_v63, %v13619_v32  ;;  %vm6761_vm6 = vcmask 130144  }
  0x89   : > { %4200 = vst.msk [vmem:[#allocation4 + $0x31] sm:$0xff] %vm4198_vm3, %v3078_v61  ;;  %4204 = vst.msk [vmem:[#allocation4 + $0x59] sm:$0xff] %vm4198_vm3, %v3078_v61  ;;  %v581_v45 = vrot.slane %v13644_v46, %v13617_v31  ;;  %v3104_v6 = vrot.slane %v3096_v1, %v13628_v36  ;;  %v3111_v7 = vrot.slane %v3097_v2, %v13628_v36  ;;  %vm7530_vm7 = vcmask 162944  }
  0x8a   : > { %4201 = vst.msk [vmem:[#allocation4 + $0x39] sm:$0xff] %vm4198_vm3, %v3095_v0  ;;  %4205 = vst.msk [vmem:[#allocation4 + $0x61] sm:$0xff] %vm4198_vm3, %v3095_v0  ;;  %v595_v8 = vrot.slane %v567_v56, %v13617_v31  ;;  %v615_v9 = vcombine.high %v13647_v47, %v13647_v47  ;;  %v598_v10 = vcombine.high %v588_v3, %v588_v3  ;;  %vm8299_vm8 = vcmask 195744  }
  0x8b   : > { %v2092_v11 = vrot.slane %v588_v3, %v13619_v32  ;;  %v2096_v12 = vrot.slane %v596_v4, %v13619_v32  ;;  %v597_v13 = vcombine.high %v581_v45, %v581_v45  ;;  %v3112_v46 = vcombine.low %v3104_v6, %v3111_v7 }
  0x8c   : > { %v599_v14 = vcombine.high %v595_v8, %v595_v8  ;;  %v2104_v15 = vrot.slane %v581_v45, %v13619_v32  ;;  %v2108_v17 = vrot.slane %v595_v8, %v13619_v32  ;;  %v2100_v18 = vrot.slane %v598_v10, %v13619_v32 }
  0x8d   : > { %v3113_v19 = vcombine.low %v2088_v5, %v2092_v11  ;;  %v2112_v20 = vrot.slane %v597_v13, %v13619_v32  ;;  %v623_v24 = vrot.slane %v13647_v47, %v13617_v31  ;;  %4202 = vst.msk [vmem:[#allocation4 + $0x41] sm:$0xff] %vm4198_vm3, %v3112_v46  ;;  %4206 = vst.msk [vmem:[#allocation4 + $0x69] sm:$0xff] %vm4198_vm3, %v3112_v46  ;;  %vm9069_vm9 = vcmask 228544  }
  0x8e   : > { %v2116_v40 = vrot.slane %v599_v14, %v13619_v32  ;;  %v3130_v41 = vcombine.low %v2104_v15, %v2108_v17  ;;  %v637_v42 = vrot.slane %v615_v9, %v13617_v31  ;;  %v616_v43 = vcombine.high %v13650_v48, %v13650_v48 }
  0x8f   : > { %v3114_v44 = vcombine.low %v2096_v12, %v2100_v18  ;;  %v3121_v49 = vrot.slane %v3113_v19, %v13628_v36  ;;  %v645_v50 = vcombine.high %v623_v24, %v623_v24  ;;  %v2120_v51 = vrot.slane %v623_v24, %v13619_v32  ;;  %v4587_v52 = vld [vmem:[#allocation4 + $0x29] sm:$0xff]  ;;  %v4591_v19 = vld [vmem:[#allocation4 + $0x51] sm:$0xff] }
  0x90   : > { %v4588_v47 = vld [vmem:[#allocation4 + $0x31] sm:$0xff]  ;;  %v3131_v53 = vcombine.low %v2112_v20, %v2116_v40  ;;  %v3138_v54 = vrot.slane %v3130_v41, %v13628_v36  ;;  %v647_v55 = vcombine.high %v637_v42, %v637_v42  ;;  %v2124_v57 = vrot.slane %v637_v42, %v13619_v32  ;;  %4847 = vrot.lane.b32.xlu0 %v4587_v52, %s13117_s24  ;;  %v4331_v2 = vld [vmem:[#allocation4 + $0x28] sm:$0xff] }
  0x91   : > { %4849 = vrot.lane.b32.xlu1 %v4588_v47, %s13117_s24  ;;  %v4589_v58 = vld [vmem:[#allocation4 + $0x39] sm:$0xff]  ;;  %v3128_v59 = vrot.slane %v3114_v44, %v13628_v36  ;;  %v2128_v60 = vrot.slane %v645_v50, %v13619_v32  ;;  %v630_v61 = vrot.slane %v13650_v48, %v13617_v31  ;;  %v644_v1 = vrot.slane %v616_v43, %v13617_v31  ;;  %v4332_v56 = vld [vmem:[#allocation4 + $0x30] sm:$0xff] }
  0x92   : > { %v3145_v62 = vrot.slane %v3131_v53, %v13628_v36  ;;  %v2132_v63 = vrot.slane %v647_v55, %v13619_v32  ;;  %v3147_v0 = vcombine.low %v2120_v51, %v2124_v57  ;;  %v4333_v3 = vld [vmem:[#allocation4 + $0x38] sm:$0xff]  ;;  %v656_v6 = vrot.slane %v13589_v16, %v13617_v31  ;;  %4459 = vst.msk [vmem:[#allocation5 + $0x20] sm:$0xff] %vm4198_vm3, %v4331_v2  ;;  %v4335_v48 = vld [vmem:[#allocation4 + $0x50] sm:$0xff]  ;;  %v4337_v8 = vld [vmem:[#allocation4 + $0x60] sm:$0xff] }
  0x93   : > { %v3129_v4 = vcombine.low %v3121_v49, %v3128_v59  ;;  %v646_v5 = vcombine.high %v630_v61, %v630_v61  ;;  %v2136_v45 = vrot.slane %v630_v61, %v13619_v32  ;;  %4460 = vst.msk [vmem:[#allocation5 + $0x28] sm:$0xff] %vm4198_vm3, %v4332_v56  ;;  %4461 = vst.msk [vmem:[#allocation5 + $0x30] sm:$0xff] %vm4198_vm3, %v4333_v3  ;;  %v4336_v7 = vld [vmem:[#allocation4 + $0x58] sm:$0xff]  ;;  %vm9838_vm10 = vcmask 261344  }
  0x94   : > { %v3146_v9 = vcombine.low %v3138_v54, %v3145_v62  ;;  %v3148_v10 = vcombine.low %v2128_v60, %v2132_v63  ;;  %v3155_v11 = vrot.slane %v3147_v0, %v13628_v36  ;;  %v648_v12 = vcombine.high %v644_v1, %v644_v1  ;;  %4463 = vst.msk [vmem:[#allocation5 + $0x40] sm:$0xff] %vm4198_vm3, %v4335_v48  ;;  %v4590_v13 = vld [vmem:[#allocation4 + $0x41] sm:$0xff]  ;;  %v4592_v43 = vld [vmem:[#allocation4 + $0x59] sm:$0xff]  ;;  %v4594_v63 = vld [vmem:[#allocation4 + $0x69] sm:$0xff] }
  0x95   : > { %4464 = vst.msk [vmem:[#allocation5 + $0x48] sm:$0xff] %vm4198_vm3, %v4336_v7  ;;  %4465 = vst.msk [vmem:[#allocation5 + $0x50] sm:$0xff] %vm4198_vm3, %v4337_v8  ;;  %4851 = vrot.lane.b32.xlu0 %v4589_v58, %s13117_s24  ;;  %v2140_v46 = vrot.slane %v644_v1, %v13619_v32  ;;  %v2144_v14 = vrot.slane %v646_v5, %v13619_v32  ;;  %v664_v15 = vcombine.high %v656_v6, %v656_v6  ;;  %v4334_v18 = vld [vmem:[#allocation4 + $0x40] sm:$0xff]  ;;  %v4338_v42 = vld [vmem:[#allocation4 + $0x68] sm:$0xff]  ;;  %vm11254_vm11 = vcmask 1043456  }
  0x96   : > { %4207 = vst.msk [vmem:[#allocation4 + $0x79] sm:$0xff] %vm4198_vm3, %v3129_v4  ;;  %4211 = vst.msk [vmem:[#allocation4 + $0xa1] sm:$0xff] %vm4198_vm3, %v3129_v4  ;;  %v672_v17 = vrot.slane %v656_v6, %v13617_v31  ;;  %4853 = vrot.lane.b32.xlu1 %v4590_v13, %s13117_s24  ;;  %v3162_v20 = vrot.slane %v3148_v10, %v13628_v36  ;;  %v2148_v24 = vrot.slane %v648_v12, %v13619_v32  ;;  %v4593_v58 = vld [vmem:[#allocation4 + $0x61] sm:$0xff]  ;;  %vm10607_vm12 = vcmask 294144  }
  0x97   : > { %4208 = vst.msk [vmem:[#allocation4 + $0x81] sm:$0xff] %vm4198_vm3, %v3146_v9  ;;  %4212 = vst.msk [vmem:[#allocation4 + $0xa9] sm:$0xff] %vm4198_vm3, %v3146_v9  ;;  %v663_v40 = vrot.slane %v649_v25, %v13617_v31  ;;  %v705_v41 = vrot.slane %v13592_v21, %v13617_v31  ;;  %v3164_v44 = vcombine.low %v2136_v45, %v2140_v46  ;;  %vm10869_vm13 = vcmask 293888  }
  0x98   : > { %4462 = vst.msk [vmem:[#allocation5 + $0x38] sm:$0xff] %vm4198_vm3, %v4334_v18  ;;  %v686_v49 = vrot.slane %v664_v15, %v13617_v31  ;;  %v694_v50 = vcombine.high %v672_v17, %v672_v17  ;;  %v2152_v51 = vrot.slane %v672_v17, %v13619_v32  ;;  %4466 = vst.msk [vmem:[#allocation5 + $0x58] sm:$0xff] %vm4198_vm3, %v4338_v42  ;;  %vm12241_vm14 = vcmask 7168  }
  0x99   : > { %v3163_v52 = vcombine.low %v3155_v11, %v3162_v20  ;;  %v3165_v47 = vcombine.low %v2144_v14, %v2148_v24  ;;  %v665_v53 = vcombine.high %v663_v40, %v663_v40  ;;  %v679_v16 = vrot.slane %v663_v40, %v13617_v31  ;;  %4855 = vrot.lane.b32.xlu0 %v4591_v19, %s13117_s24 }
  0x9a   : > { %v3172_v25 = vrot.slane %v3164_v44, %v13628_v36  ;;  %v696_v54 = vcombine.high %v686_v49, %v686_v49  ;;  %v2156_v55 = vrot.slane %v686_v49, %v13619_v32  ;;  %v2160_v57 = vrot.slane %v694_v50, %v13619_v32  ;;  %4857 = vrot.lane.b32.xlu1 %v4592_v43, %s13117_s24 }
  0x9b   : > { %4209 = vst.msk [vmem:[#allocation4 + $0x89] sm:$0xff] %vm4198_vm3, %v3163_v52  ;;  %4213 = vst.msk [vmem:[#allocation4 + $0xb1] sm:$0xff] %vm4198_vm3, %v3163_v52  ;;  %v3179_v59 = vrot.slane %v3165_v47, %v13628_v36  ;;  %v693_v60 = vrot.slane %v665_v53, %v13617_v31  ;;  %v695_v61 = vcombine.high %v679_v16, %v679_v16 }
  0x9c   : > { %v2168_v62 = vrot.slane %v679_v16, %v13619_v32  ;;  %v2164_v0 = vrot.slane %v696_v54, %v13619_v32  ;;  %v3181_v1 = vcombine.low %v2152_v51, %v2156_v55  ;;  %v713_v2 = vcombine.high %v705_v41, %v705_v41 }
  0x9d   : > { %v721_v56 = vrot.slane %v705_v41, %v13617_v31  ;;  %v3180_v3 = vcombine.low %v3172_v25, %v3179_v59  ;;  %v697_v4 = vcombine.high %v693_v60, %v693_v60  ;;  %v2172_v5 = vrot.slane %v693_v60, %v13619_v32  ;;  %v4339_v6 = vld [vmem:[#allocation4 + $0x78] sm:$0xff]  ;;  %4859 = vrot.lane.b32.xlu0 %v4593_v58, %s13117_s24  ;;  %v4343_v15 = vld [vmem:[#allocation4 + $0xa0] sm:$0xff] }
  0x9e   : > { %v2176_v45 = vrot.slane %v695_v61, %v13619_v32  ;;  %v3182_v48 = vcombine.low %v2160_v57, %v2164_v0  ;;  %v3189_v7 = vrot.slane %v3181_v1, %v13628_v36  ;;  %v735_v8 = vrot.slane %v713_v2, %v13617_v31  ;;  %4467 = vst.msk [vmem:[#allocation5 + $0x60] sm:$0xff] %vm4198_vm3, %v4339_v6  ;;  %v4340_v10 = vld [vmem:[#allocation4 + $0x80] sm:$0xff]  ;;  %v4344_v17 = vld [vmem:[#allocation4 + $0xa8] sm:$0xff] }
  0x9f   : > { %v743_v9 = vcombine.high %v721_v56, %v721_v56  ;;  %4861 = vrot.lane.b32.xlu1 %v4594_v63, %s13117_s24  ;;  %v4595_v11 = vld [vmem:[#allocation4 + $0x79] sm:$0xff]  ;;  %4210 = vst.msk [vmem:[#allocation4 + $0x91] sm:$0xff] %vm4198_vm3, %v3180_v3  ;;  %4214 = vst.msk [vmem:[#allocation4 + $0xb9] sm:$0xff] %vm4198_vm3, %v3180_v3  ;;  %v2180_v12 = vrot.slane %v697_v4, %v13619_v32  ;;  %v3198_v13 = vcombine.low %v2168_v62, %v2172_v5  ;;  %v4596_v18 = vld [vmem:[#allocation4 + $0x81] sm:$0xff] }
  0xa0   : > { %v2184_v46 = vrot.slane %v721_v56, %v13619_v32  ;;  %v712_v14 = vrot.slane %v698_v26, %v13617_v31  ;;  %4468 = vst.msk [vmem:[#allocation5 + $0x68] sm:$0xff] %vm4198_vm3, %v4340_v10  ;;  %v3196_v19 = vrot.slane %v3182_v48, %v13628_v36  ;;  %v745_v20 = vcombine.high %v735_v8, %v735_v8  ;;  %v4599_v5 = vld [vmem:[#allocation4 + $0xa1] sm:$0xff] }
  0xa1   : > { %v2188_v24 = vrot.slane %v735_v8, %v13619_v32  ;;  %v2192_v40 = vrot.slane %v743_v9, %v13619_v32  ;;  %4471 = vst.msk [vmem:[#allocation5 + $0x80] sm:$0xff] %vm4198_vm3, %v4343_v15  ;;  %4472 = vst.msk [vmem:[#allocation5 + $0x88] sm:$0xff] %vm4198_vm3, %v4344_v17  ;;  %v3199_v41 = vcombine.low %v2176_v45, %v2180_v12  ;;  %4863 = vrot.lane.b32.xlu0 %v4595_v11, %s13117_s24  ;;  %v4600_v9 = vld [vmem:[#allocation4 + $0xa9] sm:$0xff] }
  0xa2   : > { %v3206_v21 = vrot.slane %v3198_v13, %v13628_v36  ;;  %v714_v26 = vcombine.high %v712_v14, %v712_v14  ;;  %v728_v42 = vrot.slane %v712_v14, %v13617_v31  ;;  %v3197_v43 = vcombine.low %v3189_v7, %v3196_v19  ;;  %v4341_v51 = vld [vmem:[#allocation4 + $0x88] sm:$0xff]  ;;  %v4345_v54 = vld [vmem:[#allocation4 + $0xb0] sm:$0xff] }
  0xa3   : > { %v2196_v44 = vrot.slane %v745_v20, %v13619_v32  ;;  %v3215_v49 = vcombine.low %v2184_v46, %v2188_v24  ;;  %v754_v50 = vrot.slane %v13595_v22, %v13617_v31  ;;  %4865 = vrot.lane.b32.xlu1 %v4596_v18, %s13117_s24  ;;  %v4597_v52 = vld [vmem:[#allocation4 + $0x89] sm:$0xff]  ;;  %v3213_v47 = vrot.slane %v3199_v41, %v13628_v36  ;;  %v4601_v20 = vld [vmem:[#allocation4 + $0xb1] sm:$0xff] }
  0xa4   : > { %v742_v53 = vrot.slane %v714_v26, %v13617_v31  ;;  %v744_v16 = vcombine.high %v728_v42, %v728_v42  ;;  %v2200_v25 = vrot.slane %v728_v42, %v13619_v32  ;;  %4469 = vst.msk [vmem:[#allocation5 + $0x70] sm:$0xff] %vm4198_vm3, %v4341_v51  ;;  %4215 = vst.msk [vmem:[#allocation4 + $0xc9] sm:$0xff] %vm4198_vm3, %v3197_v43 }
  0xa5   : > { %4219 = vst.msk [vmem:[#allocation4 + $0xf1] sm:$0xff] %vm4198_vm3, %v3197_v43  ;;  %v3216_v55 = vcombine.low %v2192_v40, %v2196_v44  ;;  %v3223_v57 = vrot.slane %v3215_v49, %v13628_v36  ;;  %v762_v58 = vcombine.high %v754_v50, %v754_v50  ;;  %v770_v59 = vrot.slane %v754_v50, %v13617_v31 }
  0xa6   : > { %4473 = vst.msk [vmem:[#allocation5 + $0x90] sm:$0xff] %vm4198_vm3, %v4345_v54  ;;  %v3214_v60 = vcombine.low %v3206_v21, %v3213_v47  ;;  %v746_v61 = vcombine.high %v742_v53, %v742_v53  ;;  %v2204_v62 = vrot.slane %v742_v53, %v13619_v32  ;;  %v2208_v63 = vrot.slane %v744_v16, %v13619_v32  ;;  %v4598_v0 = vld [vmem:[#allocation4 + $0x91] sm:$0xff]  ;;  %v4602_v42 = vld [vmem:[#allocation4 + $0xb9] sm:$0xff] }
  0xa7   : > { %4867 = vrot.lane.b32.xlu0 %v4597_v52, %s13117_s24  ;;  %v3230_v1 = vrot.slane %v3216_v55, %v13628_v36  ;;  %v784_v2 = vrot.slane %v762_v58, %v13617_v31  ;;  %v792_v56 = vcombine.high %v770_v59, %v770_v59  ;;  %v2216_v3 = vrot.slane %v770_v59, %v13619_v32  ;;  %v4342_v4 = vld [vmem:[#allocation4 + $0x90] sm:$0xff]  ;;  %v4346_v8 = vld [vmem:[#allocation4 + $0xb8] sm:$0xff] }
  0xa8   : > { %4869 = vrot.lane.b32.xlu1 %v4598_v0, %s13117_s24  ;;  %4216 = vst.msk [vmem:[#allocation4 + $0xd1] sm:$0xff] %vm4198_vm3, %v3214_v60  ;;  %4220 = vst.msk [vmem:[#allocation4 + $0xf9] sm:$0xff] %vm4198_vm3, %v3214_v60  ;;  %v2212_v45 = vrot.slane %v746_v61, %v13619_v32  ;;  %v3232_v6 = vcombine.low %v2200_v25, %v2204_v62  ;;  %v761_v48 = vrot.slane %v747_v27, %v13617_v31 }
  0xa9   : > { %v803_v7 = vrot.slane %v13598_v23, %v13617_v31  ;;  %4470 = vst.msk [vmem:[#allocation5 + $0x78] sm:$0xff] %vm4198_vm3, %v4342_v4  ;;  %v3231_v10 = vcombine.low %v3223_v57, %v3230_v1  ;;  %v794_v11 = vcombine.high %v784_v2, %v784_v2  ;;  %v2220_v12 = vrot.slane %v784_v2, %v13619_v32 }
  0xaa   : > { %v2224_v13 = vrot.slane %v792_v56, %v13619_v32  ;;  %4474 = vst.msk [vmem:[#allocation5 + $0x98] sm:$0xff] %vm4198_vm3, %v4346_v8  ;;  %v3233_v46 = vcombine.low %v2208_v63, %v2212_v45  ;;  %v3240_v14 = vrot.slane %v3232_v6, %v13628_v36  ;;  %v763_v22 = vcombine.high %v761_v48, %v761_v48 }
  0xab   : > { %v777_v27 = vrot.slane %v761_v48, %v13617_v31  ;;  %4871 = vrot.lane.b32.xlu0 %v4599_v5, %s13117_s24  ;;  %4217 = vst.msk [vmem:[#allocation4 + $0xd9] sm:$0xff] %vm4198_vm3, %v3231_v10  ;;  %4221 = vst.msk [vmem:[#allocation4 + $0x101] sm:$0xff] %vm4198_vm3, %v3231_v10  ;;  %v2228_v15 = vrot.slane %v794_v11, %v13619_v32  ;;  %v3249_v17 = vcombine.low %v2216_v3, %v2220_v12  ;;  %v4347_v26 = vld [vmem:[#allocation4 + $0xc8] sm:$0xff] }
  0xac   : > { %v811_v18 = vcombine.high %v803_v7, %v803_v7  ;;  %v819_v19 = vrot.slane %v803_v7, %v13617_v31  ;;  %4873 = vrot.lane.b32.xlu1 %v4600_v9, %s13117_s24  ;;  %v3247_v24 = vrot.slane %v3233_v46, %v13628_v36  ;;  %v791_v40 = vrot.slane %v763_v22, %v13617_v31  ;;  %v4351_v51 = vld [vmem:[#allocation4 + $0xf0] sm:$0xff] }
  0xad   : > { %v793_v41 = vcombine.high %v777_v27, %v777_v27  ;;  %v2232_v21 = vrot.slane %v777_v27, %v13619_v32  ;;  %v3250_v43 = vcombine.low %v2224_v13, %v2228_v15  ;;  %v3257_v44 = vrot.slane %v3249_v17, %v13628_v36  ;;  %4475 = vst.msk [vmem:[#allocation5 + $0xa0] sm:$0xff] %vm4198_vm3, %v4347_v26  ;;  %v4603_v59 = vld [vmem:[#allocation4 + $0xc9] sm:$0xff] }
  0xae   : > { %v833_v49 = vrot.slane %v811_v18, %v13617_v31  ;;  %v841_v50 = vcombine.high %v819_v19, %v819_v19  ;;  %v3248_v52 = vcombine.low %v3240_v14, %v3247_v24  ;;  %v795_v47 = vcombine.high %v791_v40, %v791_v40  ;;  %4479 = vst.msk [vmem:[#allocation5 + $0xc0] sm:$0xff] %vm4198_vm3, %v4351_v51 }
  0xaf   : > { %v2236_v53 = vrot.slane %v791_v40, %v13619_v32  ;;  %v2240_v16 = vrot.slane %v793_v41, %v13619_v32  ;;  %4875 = vrot.lane.b32.xlu0 %v4601_v20, %s13117_s24  ;;  %v3264_v25 = vrot.slane %v3250_v43, %v13628_v36  ;;  %v2248_v55 = vrot.slane %v819_v19, %v13619_v32  ;;  %v4348_v58 = vld [vmem:[#allocation4 + $0xd0] sm:$0xff]  ;;  %v4352_v0 = vld [vmem:[#allocation4 + $0xf8] sm:$0xff] }
  0xb0   : > { %v843_v54 = vcombine.high %v833_v49, %v833_v49  ;;  %v2252_v57 = vrot.slane %v833_v49, %v13619_v32  ;;  %4877 = vrot.lane.b32.xlu1 %v4602_v42, %s13117_s24  ;;  %4218 = vst.msk [vmem:[#allocation4 + $0xe1] sm:$0xff] %vm4198_vm3, %v3248_v52  ;;  %4222 = vst.msk [vmem:[#allocation4 + $0x109] sm:$0xff] %vm4198_vm3, %v3248_v52  ;;  %v2244_v60 = vrot.slane %v795_v47, %v13619_v32  ;;  %v4604_v1 = vld [vmem:[#allocation4 + $0xd1] sm:$0xff] }
  0xb1   : > { %v3266_v61 = vcombine.low %v2232_v21, %v2236_v53  ;;  %v2256_v62 = vrot.slane %v841_v50, %v13619_v32  ;;  %v810_v63 = vrot.slane %v796_v33, %v13617_v31  ;;  %4476 = vst.msk [vmem:[#allocation5 + $0xa8] sm:$0xff] %vm4198_vm3, %v4348_v58  ;;  %v3265_v2 = vcombine.low %v3257_v44, %v3264_v25  ;;  %v4607_v44 = vld [vmem:[#allocation4 + $0xf1] sm:$0xff]  ;;  %v4608_v53 = vld [vmem:[#allocation4 + $0xf9] sm:$0xff] }
  0xb2   : > { %v2260_v56 = vrot.slane %v843_v54, %v13619_v32  ;;  %v3283_v3 = vcombine.low %v2248_v55, %v2252_v57  ;;  %v852_v4 = vrot.slane %v13607_v28, %v13617_v31  ;;  %4480 = vst.msk [vmem:[#allocation5 + $0xc8] sm:$0xff] %vm4198_vm3, %v4352_v0  ;;  %v3267_v5 = vcombine.low %v2240_v16, %v2244_v60  ;;  %v4349_v33 = vld [vmem:[#allocation4 + $0xd8] sm:$0xff]  ;;  %v4353_v10 = vld [vmem:[#allocation4 + $0x100] sm:$0xff] }
  0xb3   : > { %v3274_v45 = vrot.slane %v3266_v61, %v13628_v36  ;;  %v812_v6 = vcombine.high %v810_v63, %v810_v63  ;;  %v826_v23 = vrot.slane %v810_v63, %v13617_v31  ;;  %4879 = vrot.lane.b32.xlu0 %v4603_v59, %s13117_s24  ;;  %4223 = vst.msk [vmem:[#allocation4 + $0x119] sm:$0xff] %vm4198_vm3, %v3265_v2  ;;  %4227 = vst.msk [vmem:[#allocation4 + $0x141] sm:$0xff] %vm4198_vm3, %v3265_v2  ;;  %v4605_v11 = vld [vmem:[#allocation4 + $0xd9] sm:$0xff]  ;;  %v4609_v63 = vld [vmem:[#allocation4 + $0x101] sm:$0xff] }
  0xb4   : > { %v3284_v48 = vcombine.low %v2256_v62, %v2260_v56  ;;  %v3291_v7 = vrot.slane %v3283_v3, %v13628_v36  ;;  %v860_v8 = vcombine.high %v852_v4, %v852_v4  ;;  %v868_v9 = vrot.slane %v852_v4, %v13617_v31  ;;  %4477 = vst.msk [vmem:[#allocation5 + $0xb0] sm:$0xff] %vm4198_vm3, %v4349_v33 }
  0xb5   : > { %4881 = vrot.lane.b32.xlu1 %v4604_v1, %s13117_s24  ;;  %v3281_v12 = vrot.slane %v3267_v5, %v13628_v36  ;;  %v840_v13 = vrot.slane %v812_v6, %v13617_v31  ;;  %v842_v46 = vcombine.high %v826_v23, %v826_v23  ;;  %v2264_v14 = vrot.slane %v826_v23, %v13619_v32 }
  0xb6   : > { %4481 = vst.msk [vmem:[#allocation5 + $0xd0] sm:$0xff] %vm4198_vm3, %v4353_v10  ;;  %v3298_v22 = vrot.slane %v3284_v48, %v13628_v36  ;;  %v882_v27 = vrot.slane %v860_v8, %v13617_v31  ;;  %v890_v15 = vcombine.high %v868_v9, %v868_v9  ;;  %v2280_v17 = vrot.slane %v868_v9, %v13619_v32 }
  0xb7   : > { %v3282_v18 = vcombine.low %v3274_v45, %v3281_v12  ;;  %v844_v19 = vcombine.high %v840_v13, %v840_v13  ;;  %v2268_v20 = vrot.slane %v840_v13, %v13619_v32  ;;  %v2272_v24 = vrot.slane %v842_v46, %v13619_v32  ;;  %4883 = vrot.lane.b32.xlu0 %v4605_v11, %s13117_s24  ;;  %v4606_v40 = vld [vmem:[#allocation4 + $0xe1] sm:$0xff]  ;;  %v4610_v3 = vld [vmem:[#allocation4 + $0x109] sm:$0xff] }
  0xb8   : > { %v3299_v41 = vcombine.low %v3291_v7, %v3298_v22  ;;  %v892_v21 = vcombine.high %v882_v27, %v882_v27  ;;  %v2284_v26 = vrot.slane %v882_v27, %v13619_v32  ;;  %v2288_v42 = vrot.slane %v890_v15, %v13619_v32  ;;  %v4350_v43 = vld [vmem:[#allocation4 + $0xe0] sm:$0xff]  ;;  %v4354_v47 = vld [vmem:[#allocation4 + $0x108] sm:$0xff] }
  0xb9   : > { %4885 = vrot.lane.b32.xlu1 %v4606_v40, %s13117_s24  ;;  %4224 = vst.msk [vmem:[#allocation4 + $0x121] sm:$0xff] %vm4198_vm3, %v3282_v18  ;;  %4228 = vst.msk [vmem:[#allocation4 + $0x149] sm:$0xff] %vm4198_vm3, %v3282_v18  ;;  %v2276_v49 = vrot.slane %v844_v19, %v13619_v32  ;;  %v3300_v50 = vcombine.low %v2264_v14, %v2268_v20  ;;  %v859_v51 = vrot.slane %v845_v34, %v13617_v31 }
  0xba   : > { %v901_v52 = vrot.slane %v13610_v29, %v13617_v31  ;;  %4478 = vst.msk [vmem:[#allocation5 + $0xb8] sm:$0xff] %vm4198_vm3, %v4350_v43  ;;  %4225 = vst.msk [vmem:[#allocation4 + $0x129] sm:$0xff] %vm4198_vm3, %v3299_v41  ;;  %v2292_v16 = vrot.slane %v892_v21, %v13619_v32  ;;  %v3317_v25 = vcombine.low %v2280_v17, %v2284_v26  ;;  %v4355_v59 = vld [vmem:[#allocation4 + $0x118] sm:$0xff]  ;;  %v4359_v62 = vld [vmem:[#allocation4 + $0x140] sm:$0xff] }
  0xbb   : > { %4229 = vst.msk [vmem:[#allocation4 + $0x151] sm:$0xff] %vm4198_vm3, %v3299_v41  ;;  %v908_v28 = vrot.slane %v894_v37, %v13617_v31  ;;  %v13911_v34 = vrot.slane %v13613_v30, %v13617_v31  ;;  %4482 = vst.msk [vmem:[#allocation5 + $0xd8] sm:$0xff] %vm4198_vm3, %v4354_v47  ;;  %v3301_v54 = vcombine.low %v2272_v24, %v2276_v49  ;;  %4887 = vrot.lane.b32.xlu0 %v4607_v44, %s13117_s24  ;;  %v4611_v13 = vld [vmem:[#allocation4 + $0x119] sm:$0xff] }
  0xbc   : > { %v3308_v55 = vrot.slane %v3300_v50, %v13628_v36  ;;  %v861_v57 = vcombine.high %v859_v51, %v859_v51  ;;  %v875_v58 = vrot.slane %v859_v51, %v13617_v31  ;;  %v3318_v60 = vcombine.low %v2288_v42, %v2292_v16  ;;  %4483 = vst.msk [vmem:[#allocation5 + $0xe0] sm:$0xff] %vm4198_vm3, %v4355_v59 }
  0xbd   : > { %v3325_v61 = vrot.slane %v3317_v25, %v13628_v36  ;;  %v909_v29 = vcombine.high %v901_v52, %v901_v52  ;;  %v917_v37 = vrot.slane %v901_v52, %v13617_v31  ;;  %4889 = vrot.lane.b32.xlu1 %v4608_v53, %s13117_s24  ;;  %v3315_v0 = vrot.slane %v3301_v54, %v13628_v36 }
  0xbe   : > { %v889_v1 = vrot.slane %v861_v57, %v13617_v31  ;;  %v891_v2 = vcombine.high %v875_v58, %v875_v58  ;;  %v2296_v56 = vrot.slane %v875_v58, %v13619_v32  ;;  %4487 = vst.msk [vmem:[#allocation5 + $0x100] sm:$0xff] %vm4198_vm3, %v4359_v62  ;;  %v3332_v4 = vrot.slane %v3318_v60, %v13628_v36 }
  0xbf   : > { %v931_v5 = vrot.slane %v909_v29, %v13617_v31  ;;  %v939_v45 = vcombine.high %v917_v37, %v917_v37  ;;  %v2312_v6 = vrot.slane %v917_v37, %v13619_v32  ;;  %v3316_v23 = vcombine.low %v3308_v55, %v3315_v0  ;;  %4891 = vrot.lane.b32.xlu0 %v4609_v63, %s13117_s24 }
  0xc0   : > { %v893_v33 = vcombine.high %v889_v1, %v889_v1  ;;  %v2300_v48 = vrot.slane %v889_v1, %v13619_v32  ;;  %v2304_v7 = vrot.slane %v891_v2, %v13619_v32  ;;  %v3333_v8 = vcombine.low %v3325_v61, %v3332_v4  ;;  %v4356_v12 = vld [vmem:[#allocation4 + $0x120] sm:$0xff]  ;;  %v4360_v40 = vld [vmem:[#allocation4 + $0x148] sm:$0xff] }
  0xc1   : > { %v941_v9 = vcombine.high %v931_v5, %v931_v5  ;;  %v2316_v10 = vrot.slane %v931_v5, %v13619_v32  ;;  %v2320_v11 = vrot.slane %v939_v45, %v13619_v32  ;;  %4893 = vrot.lane.b32.xlu1 %v4610_v3, %s13117_s24  ;;  %4226 = vst.msk [vmem:[#allocation4 + $0x131] sm:$0xff] %vm4198_vm3, %v3316_v23  ;;  %4230 = vst.msk [vmem:[#allocation4 + $0x159] sm:$0xff] %vm4198_vm3, %v3316_v23  ;;  %v4357_v15 = vld [vmem:[#allocation4 + $0x128] sm:$0xff] }
  0xc2   : > { %v2308_v46 = vrot.slane %v893_v33, %v13619_v32  ;;  %v3334_v14 = vcombine.low %v2296_v56, %v2300_v48  ;;  %v910_v22 = vcombine.high %v908_v28, %v908_v28  ;;  %v924_v27 = vrot.slane %v908_v28, %v13617_v31  ;;  %4484 = vst.msk [vmem:[#allocation5 + $0xe8] sm:$0xff] %vm4198_vm3, %v4356_v12  ;;  %v4612_v17 = vld [vmem:[#allocation4 + $0x121] sm:$0xff]  ;;  %v4361_v41 = vld [vmem:[#allocation4 + $0x150] sm:$0xff] }
  0xc3   : > { %4231 = vst.msk [vmem:[#allocation4 + $0x169] sm:$0xff] %vm4198_vm3, %v3333_v8  ;;  %4235 = vst.msk [vmem:[#allocation4 + $0x191] sm:$0xff] %vm4198_vm3, %v3333_v8  ;;  %v2324_v18 = vrot.slane %v941_v9, %v13619_v32  ;;  %v3351_v19 = vcombine.low %v2312_v6, %v2316_v10  ;;  %v958_v20 = vcombine.high %v13911_v34, %v13911_v34  ;;  %4895 = vrot.lane.b32.xlu0 %v4611_v13, %s13117_s24  ;;  %v4613_v52 = vld [vmem:[#allocation4 + $0x129] sm:$0xff]  ;;  %v4615_v1 = vld [vmem:[#allocation4 + $0x141] sm:$0xff] }
  0xc4   : > { %v966_v24 = vrot.slane %v13911_v34, %v13617_v31  ;;  %4485 = vst.msk [vmem:[#allocation5 + $0xf0] sm:$0xff] %vm4198_vm3, %v4357_v15  ;;  %v3335_v21 = vcombine.low %v2304_v7, %v2308_v46  ;;  %v3342_v26 = vrot.slane %v3334_v14, %v13628_v36  ;;  %v938_v42 = vrot.slane %v910_v22, %v13617_v31  ;;  %v4616_v30 = vld [vmem:[#allocation4 + $0x149] sm:$0xff]  ;;  %v4617_v13 = vld [vmem:[#allocation4 + $0x151] sm:$0xff] }
  0xc5   : > { %v940_v43 = vcombine.high %v924_v27, %v924_v27  ;;  %4488 = vst.msk [vmem:[#allocation5 + $0x108] sm:$0xff] %vm4198_vm3, %v4360_v40  ;;  %4489 = vst.msk [vmem:[#allocation5 + $0x110] sm:$0xff] %vm4198_vm3, %v4361_v41  ;;  %v3352_v44 = vcombine.low %v2320_v11, %v2324_v18  ;;  %v3359_v49 = vrot.slane %v3351_v19, %v13628_v36  ;;  %4897 = vrot.lane.b32.xlu1 %v4612_v17, %s13117_s24  ;;  %v401_v15 = vld [vmem:[%s13233_s20 + $0x60] sm:$0xff] }
  0xc6   : > { %v2328_v50 = vrot.slane %v924_v27, %v13619_v32  ;;  %v980_v51 = vrot.slane %v958_v20, %v13617_v31  ;;  %v3349_v47 = vrot.slane %v3335_v21, %v13628_v36  ;;  %v942_v53 = vcombine.high %v938_v42, %v938_v42 }
  0xc7   : > { %v2332_v16 = vrot.slane %v938_v42, %v13619_v32  ;;  %v2336_v25 = vrot.slane %v940_v43, %v13619_v32  ;;  %v3366_v28 = vrot.slane %v3352_v44, %v13628_v36  ;;  %v988_v34 = vcombine.high %v966_v24, %v966_v24  ;;  %4899 = vrot.lane.b32.xlu0 %v4613_v52, %s13117_s24 }
  0xc8   : > { %v990_v54 = vcombine.high %v980_v51, %v980_v51  ;;  %v2344_v55 = vrot.slane %v966_v24, %v13619_v32  ;;  %v3350_v57 = vcombine.low %v3342_v26, %v3349_v47  ;;  %v2340_v58 = vrot.slane %v942_v53, %v13619_v32  ;;  %v4614_v61 = vld [vmem:[#allocation4 + $0x131] sm:$0xff]  ;;  %v4618_v17 = vld [vmem:[#allocation4 + $0x159] sm:$0xff] }
  0xc9   : > { %v3368_v59 = vcombine.low %v2328_v50, %v2332_v16  ;;  %v2348_v60 = vrot.slane %v980_v51, %v13619_v32  ;;  %v3367_v29 = vcombine.low %v3359_v49, %v3366_v28  ;;  %v2352_v37 = vrot.slane %v988_v34, %v13619_v32  ;;  %v4358_v0 = vld [vmem:[#allocation4 + $0x130] sm:$0xff]  ;;  %4901 = vrot.lane.b32.xlu1 %v4614_v61, %s13117_s24  ;;  %v4362_v5 = vld [vmem:[#allocation4 + $0x158] sm:$0xff] }
  0xca   : > { %v2356_v62 = vrot.slane %v990_v54, %v13619_v32  ;;  %v957_v63 = vrot.slane %v943_v38, %v13617_v31  ;;  %4232 = vst.msk [vmem:[#allocation4 + $0x171] sm:$0xff] %vm4198_vm3, %v3350_v57  ;;  %4236 = vst.msk [vmem:[#allocation4 + $0x199] sm:$0xff] %vm4198_vm3, %v3350_v57  ;;  %v3369_v2 = vcombine.low %v2336_v25, %v2340_v58  ;;  %v4363_v33 = vld [vmem:[#allocation4 + $0x168] sm:$0xff]  ;;  %v4367_v12 = vld [vmem:[#allocation4 + $0x190] sm:$0xff] }
  0xcb   : > { %v3376_v56 = vrot.slane %v3368_v59, %v13628_v36  ;;  %v3385_v3 = vcombine.low %v2344_v55, %v2348_v60  ;;  %v999_v4 = vrot.slane %v13626_v35, %v13617_v31  ;;  %4486 = vst.msk [vmem:[#allocation5 + $0xf8] sm:$0xff] %vm4198_vm3, %v4358_v0  ;;  %4233 = vst.msk [vmem:[#allocation4 + $0x179] sm:$0xff] %vm4198_vm3, %v3367_v29  ;;  %4903 = vrot.lane.b32.xlu0 %v4615_v1, %s13117_s24  ;;  %v4619_v51 = vld [vmem:[#allocation4 + $0x169] sm:$0xff] }
  0xcc   : > { %4237 = vst.msk [vmem:[#allocation4 + $0x1a1] sm:$0xff] %vm4198_vm3, %v3367_v29  ;;  %v3386_v38 = vcombine.low %v2352_v37, %v2356_v62  ;;  %v959_v45 = vcombine.high %v957_v63, %v957_v63  ;;  %v973_v6 = vrot.slane %v957_v63, %v13617_v31  ;;  %v1006_v23 = vrot.slane %v992_v39, %v13617_v31 }
  0xcd   : > { %4490 = vst.msk [vmem:[#allocation5 + $0x118] sm:$0xff] %vm4198_vm3, %v4362_v5  ;;  %v3383_v48 = vrot.slane %v3369_v2, %v13628_v36  ;;  %v3393_v7 = vrot.slane %v3385_v3, %v13628_v36  ;;  %v1007_v8 = vcombine.high %v999_v4, %v999_v4  ;;  %v1015_v9 = vrot.slane %v999_v4, %v13617_v31 }
  0xce   : > { %4491 = vst.msk [vmem:[#allocation5 + $0x120] sm:$0xff] %vm4198_vm3, %v4363_v33  ;;  %v3400_v10 = vrot.slane %v3386_v38, %v13628_v36  ;;  %v987_v35 = vrot.slane %v959_v45, %v13617_v31  ;;  %v989_v39 = vcombine.high %v973_v6, %v973_v6  ;;  %v2360_v11 = vrot.slane %v973_v6, %v13619_v32  ;;  %v402_v33 = vld [vmem:[%s13233_s20 + $0x68] sm:$0xff] }
  0xcf   : > { %4905 = vrot.lane.b32.xlu1 %v4616_v30, %s13117_s24  ;;  %v3384_v46 = vcombine.low %v3376_v56, %v3383_v48  ;;  %v1029_v14 = vrot.slane %v1007_v8, %v13617_v31  ;;  %v1037_v22 = vcombine.high %v1015_v9, %v1015_v9  ;;  %v2376_v27 = vrot.slane %v1015_v9, %v13619_v32 }
  0xd0   : > { %4495 = vst.msk [vmem:[#allocation5 + $0x140] sm:$0xff] %vm4198_vm3, %v4367_v12  ;;  %v3401_v18 = vcombine.low %v3393_v7, %v3400_v10  ;;  %v991_v19 = vcombine.high %v987_v35, %v987_v35  ;;  %v2364_v20 = vrot.slane %v987_v35, %v13619_v32  ;;  %v2368_v24 = vrot.slane %v989_v39, %v13619_v32 }
  0xd1   : > { %4234 = vst.msk [vmem:[#allocation4 + $0x181] sm:$0xff] %vm4198_vm3, %v3384_v46  ;;  %4238 = vst.msk [vmem:[#allocation4 + $0x1a9] sm:$0xff] %vm4198_vm3, %v3384_v46  ;;  %v1039_v40 = vcombine.high %v1029_v14, %v1029_v14  ;;  %v2380_v41 = vrot.slane %v1029_v14, %v13619_v32  ;;  %v2384_v21 = vrot.slane %v1037_v22, %v13619_v32  ;;  %4907 = vrot.lane.b32.xlu0 %v4617_v13, %s13117_s24  ;;  %v4364_v50 = vld [vmem:[#allocation4 + $0x170] sm:$0xff]  ;;  %v4368_v58 = vld [vmem:[#allocation4 + $0x198] sm:$0xff] }
  0xd2   : > { %v1008_v26 = vcombine.high %v1006_v23, %v1006_v23  ;;  %4239 = vst.msk [vmem:[#allocation4 + $0x1b9] sm:$0xff] %vm4198_vm3, %v3401_v18  ;;  %4243 = vst.msk [vmem:[#allocation4 + $0x1e1] sm:$0xff] %vm4198_vm3, %v3401_v18  ;;  %v2372_v42 = vrot.slane %v991_v19, %v13619_v32  ;;  %v3402_v43 = vcombine.low %v2360_v11, %v2364_v20  ;;  %v4365_v25 = vld [vmem:[#allocation4 + $0x178] sm:$0xff] }
  0xd3   : > { %v1022_v44 = vrot.slane %v1006_v23, %v13617_v31  ;;  %v1048_v49 = vrot.slane %v401_v15, %v13617_v31  ;;  %4909 = vrot.lane.b32.xlu1 %v4618_v17, %s13117_s24  ;;  %v2388_v52 = vrot.slane %v1039_v40, %v13619_v32  ;;  %v3419_v47 = vcombine.low %v2376_v27, %v2380_v41  ;;  %v4620_v28 = vld [vmem:[#allocation4 + $0x171] sm:$0xff]  ;;  %v4369_v59 = vld [vmem:[#allocation4 + $0x1a0] sm:$0xff] }
  0xd4   : > { %v1036_v53 = vrot.slane %v1008_v26, %v13617_v31  ;;  %v1041_v16 = vcombine.high %v401_v15, %v401_v15  ;;  %4492 = vst.msk [vmem:[#allocation5 + $0x128] sm:$0xff] %vm4198_vm3, %v4364_v50  ;;  %v3403_v34 = vcombine.low %v2368_v24, %v2372_v42  ;;  %v3410_v54 = vrot.slane %v3402_v43, %v13628_v36  ;;  %v4621_v2 = vld [vmem:[#allocation4 + $0x179] sm:$0xff]  ;;  %v4623_v14 = vld [vmem:[#allocation4 + $0x191] sm:$0xff] }
  0xd5   : > { %v1038_v55 = vcombine.high %v1022_v44, %v1022_v44  ;;  %v2392_v57 = vrot.slane %v1022_v44, %v13619_v32  ;;  %4493 = vst.msk [vmem:[#allocation5 + $0x130] sm:$0xff] %vm4198_vm3, %v4365_v25  ;;  %v3420_v60 = vcombine.low %v2384_v21, %v2388_v52  ;;  %v3427_v61 = vrot.slane %v3419_v47, %v13628_v36  ;;  %v4624_v18 = vld [vmem:[#allocation4 + $0x199] sm:$0xff]  ;;  %v4625_v47 = vld [vmem:[#allocation4 + $0x1a1] sm:$0xff] }
  0xd6   : > { %v1040_v29 = vcombine.high %v1036_v53, %v1036_v53  ;;  %v2396_v37 = vrot.slane %v1036_v53, %v13619_v32  ;;  %4496 = vst.msk [vmem:[#allocation5 + $0x148] sm:$0xff] %vm4198_vm3, %v4368_v58  ;;  %4497 = vst.msk [vmem:[#allocation5 + $0x150] sm:$0xff] %vm4198_vm3, %v4369_v59  ;;  %4911 = vrot.lane.b32.xlu0 %v4619_v51, %s13117_s24  ;;  %v3417_v62 = vrot.slane %v3403_v34, %v13628_v36  ;;  %v14052_v43 = vld [vmem:[%s13233_s20 + $0x70] sm:$0xff] }
  0xd7   : > { %v2400_v63 = vrot.slane %v1038_v55, %v13619_v32  ;;  %v1056_v0 = vcombine.high %v1048_v49, %v1048_v49  ;;  %v1064_v1 = vrot.slane %v1048_v49, %v13617_v31  ;;  %4913 = vrot.lane.b32.xlu1 %v4620_v28, %s13117_s24  ;;  %v3434_v56 = vrot.slane %v3420_v60, %v13628_v36 }
  0xd8   : > { %v2404_v3 = vrot.slane %v1040_v29, %v13619_v32  ;;  %v3436_v4 = vcombine.low %v2392_v57, %v2396_v37  ;;  %v1055_v5 = vrot.slane %v1041_v16, %v13617_v31  ;;  %v4622_v30 = vld [vmem:[#allocation4 + $0x181] sm:$0xff]  ;;  %v3418_v38 = vcombine.low %v3410_v54, %v3417_v62  ;;  %v4626_v34 = vld [vmem:[#allocation4 + $0x1a9] sm:$0xff] }
  0xd9   : > { %v1078_v45 = vrot.slane %v1056_v0, %v13617_v31  ;;  %v1086_v6 = vcombine.high %v1064_v1, %v1064_v1  ;;  %v2408_v23 = vrot.slane %v1064_v1, %v13619_v32  ;;  %v4366_v48 = vld [vmem:[#allocation4 + $0x180] sm:$0xff]  ;;  %v3435_v7 = vcombine.low %v3427_v61, %v3434_v56  ;;  %v4370_v35 = vld [vmem:[#allocation4 + $0x1a8] sm:$0xff]  ;;  %v4371_v46 = vld [vmem:[#allocation4 + $0x1b8] sm:$0xff] }
  0xda   : > { %v3437_v8 = vcombine.low %v2400_v63, %v2404_v3  ;;  %v3444_v9 = vrot.slane %v3436_v4, %v13628_v36  ;;  %v1057_v10 = vcombine.high %v1055_v5, %v1055_v5  ;;  %4494 = vst.msk [vmem:[#allocation5 + $0x138] sm:$0xff] %vm4198_vm3, %v4366_v48  ;;  %4915 = vrot.lane.b32.xlu0 %v4621_v2, %s13117_s24  ;;  %4240 = vst.msk [vmem:[#allocation4 + $0x1c1] sm:$0xff] %vm4198_vm3, %v3418_v38  ;;  %v4375_v52 = vld [vmem:[#allocation4 + $0x1e0] sm:$0xff] }
  0xdb   : > { %4244 = vst.msk [vmem:[#allocation4 + $0x1e9] sm:$0xff] %vm4198_vm3, %v3418_v38  ;;  %v1088_v39 = vcombine.high %v1078_v45, %v1078_v45  ;;  %v2412_v11 = vrot.slane %v1078_v45, %v13619_v32  ;;  %v2416_v12 = vrot.slane %v1086_v6, %v13619_v32  ;;  %v1071_v13 = vrot.slane %v1055_v5, %v13617_v31  ;;  %v4627_v56 = vld [vmem:[#allocation4 + $0x1b9] sm:$0xff] }
  0xdc   : > { %4498 = vst.msk [vmem:[#allocation5 + $0x158] sm:$0xff] %vm4198_vm3, %v4370_v35  ;;  %4917 = vrot.lane.b32.xlu1 %v4622_v30, %s13117_s24  ;;  %4241 = vst.msk [vmem:[#allocation4 + $0x1c9] sm:$0xff] %vm4198_vm3, %v3435_v7  ;;  %v3451_v22 = vrot.slane %v3437_v8, %v13628_v36  ;;  %v1085_v27 = vrot.slane %v1057_v10, %v13617_v31  ;;  %v1097_v15 = vrot.slane %v402_v33, %v13617_v31 }
  0xdd   : > { %4245 = vst.msk [vmem:[#allocation4 + $0x1f1] sm:$0xff] %vm4198_vm3, %v3435_v7  ;;  %v1090_v17 = vcombine.high %v402_v33, %v402_v33  ;;  %4499 = vst.msk [vmem:[#allocation5 + $0x160] sm:$0xff] %vm4198_vm3, %v4371_v46  ;;  %v2420_v19 = vrot.slane %v1088_v39, %v13619_v32  ;;  %v3453_v20 = vcombine.low %v2408_v23, %v2412_v11  ;;  %v404_v46 = vld [vmem:[%s13233_s20 + $0x78] sm:$0xff] }
  0xde   : > { %v1087_v24 = vcombine.high %v1071_v13, %v1071_v13  ;;  %v2424_v40 = vrot.slane %v1071_v13, %v13619_v32  ;;  %v3452_v41 = vcombine.low %v3444_v9, %v3451_v22  ;;  %v1089_v21 = vcombine.high %v1085_v27, %v1085_v27  ;;  %4919 = vrot.lane.b32.xlu0 %v4623_v14, %s13117_s24 }
  0xdf   : > { %v2428_v26 = vrot.slane %v1085_v27, %v13619_v32  ;;  %v1105_v42 = vcombine.high %v1097_v15, %v1097_v15  ;;  %v3454_v44 = vcombine.low %v2416_v12, %v2420_v19  ;;  %v3461_v49 = vrot.slane %v3453_v20, %v13628_v36  ;;  %4503 = vst.msk [vmem:[#allocation5 + $0x180] sm:$0xff] %vm4198_vm3, %v4375_v52 }
  0xe0   : > { %v2432_v50 = vrot.slane %v1087_v24, %v13619_v32  ;;  %v1113_v51 = vrot.slane %v1097_v15, %v13617_v31  ;;  %4921 = vrot.lane.b32.xlu1 %v4624_v18, %s13117_s24  ;;  %4242 = vst.msk [vmem:[#allocation4 + $0x1d1] sm:$0xff] %vm4198_vm3, %v3452_v41  ;;  %4246 = vst.msk [vmem:[#allocation4 + $0x1f9] sm:$0xff] %vm4198_vm3, %v3452_v41  ;;  %v2436_v53 = vrot.slane %v1089_v21, %v13619_v32 }
  0xe1   : > { %v3470_v16 = vcombine.low %v2424_v40, %v2428_v26  ;;  %v1127_v25 = vrot.slane %v1105_v42, %v13617_v31  ;;  %v1104_v28 = vrot.slane %v1090_v17, %v13617_v31  ;;  %v3468_v54 = vrot.slane %v3454_v44, %v13628_v36  ;;  %v4372_v37 = vld [vmem:[#allocation4 + $0x1c0] sm:$0xff] }
  0xe2   : > { %v1135_v55 = vcombine.high %v1113_v51, %v1113_v51  ;;  %v2440_v57 = vrot.slane %v1113_v51, %v13619_v32  ;;  %v1146_v58 = vrot.slane %v14052_v43, %v13617_v31  ;;  %v3471_v59 = vcombine.low %v2432_v50, %v2436_v53  ;;  %4923 = vrot.lane.b32.xlu0 %v4625_v47, %s13117_s24  ;;  %v4376_v38 = vld [vmem:[#allocation4 + $0x1e8] sm:$0xff] }
  0xe3   : > { %v3478_v60 = vrot.slane %v3470_v16, %v13628_v36  ;;  %v1137_v61 = vcombine.high %v1127_v25, %v1127_v25  ;;  %v2444_v29 = vrot.slane %v1127_v25, %v13619_v32  ;;  %v3469_v62 = vcombine.low %v3461_v49, %v3468_v54  ;;  %4500 = vst.msk [vmem:[#allocation5 + $0x168] sm:$0xff] %vm4198_vm3, %v4372_v37  ;;  %v4373_v2 = vld [vmem:[#allocation4 + $0x1c8] sm:$0xff] }
  0xe4   : > { %v2448_v63 = vrot.slane %v1135_v55, %v13619_v32  ;;  %v1106_v0 = vcombine.high %v1104_v28, %v1104_v28  ;;  %v1120_v1 = vrot.slane %v1104_v28, %v13617_v31  ;;  %4925 = vrot.lane.b32.xlu1 %v4626_v34, %s13117_s24  ;;  %v3485_v3 = vrot.slane %v3471_v59, %v13628_v36  ;;  %v4377_v45 = vld [vmem:[#allocation4 + $0x1f0] sm:$0xff]  ;;  %v4628_v6 = vld [vmem:[#allocation4 + $0x1c1] sm:$0xff]  ;;  %v4840_v52 = vpop.permute.xlu0 %4839 }
  0xe5   : > { %v2452_v4 = vrot.slane %v1137_v61, %v13619_v32  ;;  %v3487_v5 = vcombine.low %v2440_v57, %v2444_v29  ;;  %v1154_v30 = vcombine.high %v1146_v58, %v1146_v58  ;;  %4501 = vst.msk [vmem:[#allocation5 + $0x170] sm:$0xff] %vm4198_vm3, %v4373_v2  ;;  %4247 = vst.msk [vmem:[#allocation4 + $0x209] sm:$0xff] %vm4198_vm3, %v3469_v62  ;;  %v4629_v22 = vld [vmem:[#allocation4 + $0x1c9] sm:$0xff]  ;;  %v4844_v47 = vpop.permute.xlu1 %4843 }
  0xe6   : > { %4251 = vst.msk [vmem:[#allocation4 + $0x231] sm:$0xff] %vm4198_vm3, %v3469_v62  ;;  %v1134_v23 = vrot.slane %v1106_v0, %v13617_v31  ;;  %v1136_v33 = vcombine.high %v1120_v1, %v1120_v1  ;;  %v2456_v48 = vrot.slane %v1120_v1, %v13619_v32  ;;  %v1162_v7 = vrot.slane %v1146_v58, %v13617_v31  ;;  %v4632_v57 = vld [vmem:[#allocation4 + $0x1e9] sm:$0xff] }
  0xe7   : > { %4504 = vst.msk [vmem:[#allocation5 + $0x188] sm:$0xff] %vm4198_vm3, %v4376_v38  ;;  %4505 = vst.msk [vmem:[#allocation5 + $0x190] sm:$0xff] %vm4198_vm3, %v4377_v45  ;;  %v3486_v8 = vcombine.low %v3478_v60, %v3485_v3  ;;  %v3488_v9 = vcombine.low %v2448_v63, %v2452_v4  ;;  %v3495_v10 = vrot.slane %v3487_v5, %v13628_v36  ;;  %4927 = vrot.lane.b32.xlu0 %v4627_v56, %s13117_s24  ;;  %v4374_v14 = vld [vmem:[#allocation4 + $0x1d0] sm:$0xff]  ;;  %v4378_v19 = vld [vmem:[#allocation4 + $0x1f8] sm:$0xff] }
  0xe8   : > { %v1176_v35 = vrot.slane %v1154_v30, %v13617_v31  ;;  %v1138_v39 = vcombine.high %v1134_v23, %v1134_v23  ;;  %v2460_v11 = vrot.slane %v1134_v23, %v13619_v32  ;;  %v2464_v12 = vrot.slane %v1136_v33, %v13619_v32  ;;  %4929 = vrot.lane.b32.xlu1 %v4628_v6, %s13117_s24  ;;  %v4630_v20 = vld [vmem:[#allocation4 + $0x1d1] sm:$0xff]  ;;  %v4842_v1 = vpop.permute.xlu0 %4841 }
  0xe9   : > { %v1184_v13 = vcombine.high %v1162_v7, %v1162_v7  ;;  %4248 = vst.msk [vmem:[#allocation4 + $0x211] sm:$0xff] %vm4198_vm3, %v3486_v8  ;;  %4252 = vst.msk [vmem:[#allocation4 + $0x239] sm:$0xff] %vm4198_vm3, %v3486_v8  ;;  %v3502_v27 = vrot.slane %v3488_v9, %v13628_v36  ;;  %v2472_v17 = vrot.slane %v1162_v7, %v13619_v32  ;;  %v4846_v2 = vpop.permute.xlu1 %4845  ;;  %v405_v5 = vld [vmem:[%s13233_s20 + $0x80] sm:$0xff]  ;;  %v4634_v7 = vld [vmem:[#allocation4 + $0x1f9] sm:$0xff] }
  0xea   : > { %v1186_v15 = vcombine.high %v1176_v35, %v1176_v35  ;;  %v2476_v18 = vrot.slane %v1176_v35, %v13619_v32  ;;  %4502 = vst.msk [vmem:[#allocation5 + $0x178] sm:$0xff] %vm4198_vm3, %v4374_v14  ;;  %v2468_v24 = vrot.slane %v1138_v39, %v13619_v32  ;;  %v3504_v40 = vcombine.low %v2456_v48, %v2460_v11  ;;  %v4633_v38 = vld [vmem:[#allocation4 + $0x1f1] sm:$0xff] }
  0xeb   : > { %v2480_v41 = vrot.slane %v1184_v13, %v13619_v32  ;;  %v1139_v21 = vcombine.high %v14052_v43, %v14052_v43  ;;  %4506 = vst.msk [vmem:[#allocation5 + $0x198] sm:$0xff] %vm4198_vm3, %v4378_v19  ;;  %v3503_v26 = vcombine.low %v3495_v10, %v3502_v27  ;;  %v1195_v49 = vrot.slane %v404_v46, %v13617_v31  ;;  %v4631_v43 = vld [vmem:[#allocation4 + $0x1e1] sm:$0xff] }
  0xec   : > { %v2484_v42 = vrot.slane %v1186_v15, %v13619_v32  ;;  %v3521_v44 = vcombine.low %v2472_v17, %v2476_v18  ;;  %4931 = vrot.lane.b32.xlu0 %v4629_v22, %s13117_s24  ;;  %v3505_v50 = vcombine.low %v2464_v12, %v2468_v24  ;;  %v3512_v51 = vrot.slane %v3504_v40, %v13628_v36  ;;  %v4379_v55 = vld [vmem:[#allocation4 + $0x208] sm:$0xff] }
  0xed   : > { %v1153_v53 = vrot.slane %v1139_v21, %v13617_v31  ;;  %v1188_v16 = vcombine.high %v404_v46, %v404_v46  ;;  %4933 = vrot.lane.b32.xlu1 %v4630_v20, %s13117_s24  ;;  %4249 = vst.msk [vmem:[#allocation4 + $0x219] sm:$0xff] %vm4198_vm3, %v3503_v26  ;;  %4253 = vst.msk [vmem:[#allocation4 + $0x241] sm:$0xff] %vm4198_vm3, %v3503_v26  ;;  %v1203_v34 = vcombine.high %v1195_v49, %v1195_v49  ;;  %v4383_v48 = vld [vmem:[#allocation4 + $0x230] sm:$0xff] }
  0xee   : > { %5224 = vst.msk [vmem:[#allocation5] sm:$0xff] %vm5223_vm4, %v4840_v52  ;;  %5226 = vst.msk [vmem:[#allocation5 + $0x10] sm:$0xff] %vm5223_vm4, %v4844_v47  ;;  %v3522_v25 = vcombine.low %v2480_v41, %v2484_v42  ;;  %v3529_v28 = vrot.slane %v3521_v44, %v13628_v36  ;;  %v1211_v54 = vrot.slane %v1195_v49, %v13617_v31  ;;  %v4635_v17 = vld [vmem:[#allocation4 + $0x209] sm:$0xff] }
  0xef   : > { %v3519_v58 = vrot.slane %v3505_v50, %v13628_v36  ;;  %v1155_v59 = vcombine.high %v1153_v53, %v1153_v53  ;;  %v1169_v60 = vrot.slane %v1153_v53, %v13617_v31  ;;  %v1202_v61 = vrot.slane %v1188_v16, %v13617_v31  ;;  %4507 = vst.msk [vmem:[#allocation5 + $0x1a0] sm:$0xff] %vm4198_vm3, %v4379_v55 }
  0xf0   : > { %v3536_v29 = vrot.slane %v3522_v25, %v13628_v36  ;;  %v1225_v37 = vrot.slane %v1203_v34, %v13617_v31  ;;  %v1233_v62 = vcombine.high %v1211_v54, %v1211_v54  ;;  %v2504_v63 = vrot.slane %v1211_v54, %v13619_v32  ;;  %4935 = vrot.lane.b32.xlu0 %v4631_v43, %s13117_s24  ;;  %v4380_v30 = vld [vmem:[#allocation4 + $0x210] sm:$0xff]  ;;  %v4384_v40 = vld [vmem:[#allocation4 + $0x238] sm:$0xff] }
  0xf1   : > { %v3520_v0 = vcombine.low %v3512_v51, %v3519_v58  ;;  %v1183_v56 = vrot.slane %v1155_v59, %v13617_v31  ;;  %v1185_v3 = vcombine.high %v1169_v60, %v1169_v60  ;;  %v2488_v4 = vrot.slane %v1169_v60, %v13619_v32  ;;  %4937 = vrot.lane.b32.xlu1 %v4632_v57, %s13117_s24  ;;  %v4636_v21 = vld [vmem:[#allocation4 + $0x211] sm:$0xff] }
  0xf2   : > { %5225 = vst.msk [vmem:[#allocation5 + $0x8] sm:$0xff] %vm5223_vm4, %v4842_v1  ;;  %v3537_v45 = vcombine.low %v3529_v28, %v3536_v29  ;;  %5227 = vst.msk [vmem:[#allocation5 + $0x18] sm:$0xff] %vm5223_vm4, %v4846_v2  ;;  %v1235_v6 = vcombine.high %v1225_v37, %v1225_v37  ;;  %v2508_v23 = vrot.slane %v1225_v37, %v13619_v32  ;;  %v406_v58 = vld [vmem:[%s13233_s20 + $0x88] sm:$0xff] }
  0xf3   : > { %v2512_v33 = vrot.slane %v1233_v62, %v13619_v32  ;;  %4508 = vst.msk [vmem:[#allocation5 + $0x1a8] sm:$0xff] %vm4198_vm3, %v4380_v30  ;;  %4250 = vst.msk [vmem:[#allocation4 + $0x221] sm:$0xff] %vm4198_vm3, %v3520_v0  ;;  %v1187_v8 = vcombine.high %v1183_v56, %v1183_v56  ;;  %v2492_v9 = vrot.slane %v1183_v56, %v13619_v32 }
  0xf4   : > { %4254 = vst.msk [vmem:[#allocation4 + $0x249] sm:$0xff] %vm4198_vm3, %v3520_v0  ;;  %v2496_v10 = vrot.slane %v1185_v3, %v13619_v32  ;;  %v1204_v35 = vcombine.high %v1202_v61, %v1202_v61  ;;  %4511 = vst.msk [vmem:[#allocation5 + $0x1c0] sm:$0xff] %vm4198_vm3, %v4383_v48  ;;  %v2516_v39 = vrot.slane %v1235_v6, %v13619_v32  ;;  %4939 = vrot.lane.b32.xlu0 %v4633_v38, %s13117_s24  ;;  %v4381_v15 = vld [vmem:[#allocation4 + $0x218] sm:$0xff]  ;;  %v4385_v41 = vld [vmem:[#allocation4 + $0x240] sm:$0xff] }
  0xf5   : > { %4255 = vst.msk [vmem:[#allocation4 + $0x259] sm:$0xff] %vm4198_vm3, %v3537_v45  ;;  %4259 = vst.msk [vmem:[#allocation4 + $0x281] sm:$0xff] %vm4198_vm3, %v3537_v45  ;;  %v3555_v11 = vcombine.low %v2504_v63, %v2508_v23  ;;  %v1218_v12 = vrot.slane %v1202_v61, %v13617_v31  ;;  %v1244_v13 = vrot.slane %v405_v5, %v13617_v31  ;;  %4941 = vrot.lane.b32.xlu1 %v4634_v7, %s13117_s24  ;;  %v4637_v28 = vld [vmem:[#allocation4 + $0x219] sm:$0xff]  ;;  %v4639_v45 = vld [vmem:[#allocation4 + $0x231] sm:$0xff] }
  0xf6   : > { %v2500_v46 = vrot.slane %v1187_v8, %v13619_v32  ;;  %v3538_v14 = vcombine.low %v2488_v4, %v2492_v9  ;;  %v1232_v22 = vrot.slane %v1204_v35, %v13617_v31  ;;  %v1237_v27 = vcombine.high %v405_v5, %v405_v5  ;;  %4509 = vst.msk [vmem:[#allocation5 + $0x1b0] sm:$0xff] %vm4198_vm3, %v4381_v15  ;;  %v4640_v7 = vld [vmem:[#allocation4 + $0x239] sm:$0xff] }
  0xf7   : > { %v3556_v18 = vcombine.low %v2512_v33, %v2516_v39  ;;  %v3563_v19 = vrot.slane %v3555_v11, %v13628_v36  ;;  %v1234_v20 = vcombine.high %v1218_v12, %v1218_v12  ;;  %v2520_v24 = vrot.slane %v1218_v12, %v13619_v32  ;;  %4512 = vst.msk [vmem:[#allocation5 + $0x1c8] sm:$0xff] %vm4198_vm3, %v4384_v40  ;;  %v14185_v39 = vld [vmem:[%s13233_s20 + $0x90] sm:$0xff] }
  0xf8   : > { %v3539_v26 = vcombine.low %v2496_v10, %v2500_v46  ;;  %v3546_v42 = vrot.slane %v3538_v14, %v13628_v36  ;;  %v1236_v44 = vcombine.high %v1232_v22, %v1232_v22  ;;  %v2524_v49 = vrot.slane %v1232_v22, %v13619_v32  ;;  %4513 = vst.msk [vmem:[#allocation5 + $0x1d0] sm:$0xff] %vm4198_vm3, %v4385_v41 }
  0xf9   : > { %v3570_v50 = vrot.slane %v3556_v18, %v13628_v36  ;;  %v2528_v51 = vrot.slane %v1234_v20, %v13619_v32  ;;  %v1252_v52 = vcombine.high %v1244_v13, %v1244_v13  ;;  %v1260_v47 = vrot.slane %v1244_v13, %v13617_v31  ;;  %4943 = vrot.lane.b32.xlu0 %v4635_v17, %s13117_s24  ;;  %v4641_v18 = vld [vmem:[#allocation4 + $0x241] sm:$0xff] }
  0xfa   : > { %v3553_v53 = vrot.slane %v3539_v26, %v13628_v36  ;;  %v2532_v16 = vrot.slane %v1236_v44, %v13619_v32  ;;  %v3572_v43 = vcombine.low %v2520_v24, %v2524_v49  ;;  %v1251_v25 = vrot.slane %v1237_v27, %v13617_v31  ;;  %4945 = vrot.lane.b32.xlu1 %v4636_v21, %s13117_s24  ;;  %v4382_v59 = vld [vmem:[#allocation4 + $0x220] sm:$0xff] }
  0xfb   : > { %v3571_v34 = vcombine.low %v3563_v19, %v3570_v50  ;;  %v1274_v54 = vrot.slane %v1252_v52, %v13617_v31  ;;  %v1282_v55 = vcombine.high %v1260_v47, %v1260_v47  ;;  %v2536_v57 = vrot.slane %v1260_v47, %v13619_v32  ;;  %v4638_v60 = vld [vmem:[#allocation4 + $0x221] sm:$0xff]  ;;  %4510 = vst.msk [vmem:[#allocation5 + $0x1b8] sm:$0xff] %vm4198_vm3, %v4382_v59  ;;  %v4642_v41 = vld [vmem:[#allocation4 + $0x249] sm:$0xff] }
  0xfc   : > { %v3554_v61 = vcombine.low %v3546_v42, %v3553_v53  ;;  %v3573_v29 = vcombine.low %v2528_v51, %v2532_v16  ;;  %v3580_v37 = vrot.slane %v3572_v43, %v13628_v36  ;;  %v1253_v62 = vcombine.high %v1251_v25, %v1251_v25  ;;  %v4386_v63 = vld [vmem:[#allocation4 + $0x248] sm:$0xff]  ;;  %v4387_v3 = vld [vmem:[#allocation4 + $0x258] sm:$0xff]  ;;  %v4391_v17 = vld [vmem:[#allocation4 + $0x280] sm:$0xff] }
  0xfd   : > { %4257 = vst.msk [vmem:[#allocation4 + $0x269] sm:$0xff] %vm4198_vm3, %v3571_v34  ;;  %4261 = vst.msk [vmem:[#allocation4 + $0x291] sm:$0xff] %vm4198_vm3, %v3571_v34  ;;  %v1284_v0 = vcombine.high %v1274_v54, %v1274_v54  ;;  %v2540_v1 = vrot.slane %v1274_v54, %v13619_v32  ;;  %v2544_v2 = vrot.slane %v1282_v55, %v13619_v32  ;;  %4947 = vrot.lane.b32.xlu0 %v4637_v28, %s13117_s24  ;;  %v4643_v55 = vld [vmem:[#allocation4 + $0x259] sm:$0xff] }
  0xfe   : > { %v1267_v56 = vrot.slane %v1251_v25, %v13617_v31  ;;  %4514 = vst.msk [vmem:[#allocation5 + $0x1d8] sm:$0xff] %vm4198_vm3, %v4386_v63  ;;  %4256 = vst.msk [vmem:[#allocation4 + $0x261] sm:$0xff] %vm4198_vm3, %v3554_v61  ;;  %v3587_v4 = vrot.slane %v3573_v29, %v13628_v36  ;;  %v1281_v5 = vrot.slane %v1253_v62, %v13617_v31  ;;  %4949 = vrot.lane.b32.xlu1 %v4638_v60, %s13117_s24 }
  0xff   : > { %4260 = vst.msk [vmem:[#allocation4 + $0x289] sm:$0xff] %vm4198_vm3, %v3554_v61  ;;  %v1293_v30 = vrot.slane %v406_v58, %v13617_v31  ;;  %v1286_v38 = vcombine.high %v406_v58, %v406_v58  ;;  %4515 = vst.msk [vmem:[#allocation5 + $0x1e0] sm:$0xff] %vm4198_vm3, %v4387_v3  ;;  %v2548_v6 = vrot.slane %v1284_v0, %v13619_v32  ;;  %v408_v3 = vld [vmem:[%s13233_s20 + $0x98] sm:$0xff] }
 0x100   : > { %v3589_v23 = vcombine.low %v2536_v57, %v2540_v1  ;;  %v1283_v33 = vcombine.high %v1267_v56, %v1267_v56  ;;  %v2552_v48 = vrot.slane %v1267_v56, %v13619_v32  ;;  %v3588_v8 = vcombine.low %v3580_v37, %v3587_v4  ;;  %4519 = vst.msk [vmem:[#allocation5 + $0x200] sm:$0xff] %vm4198_vm3, %v4391_v17 }
 0x101   : > { %v1285_v9 = vcombine.high %v1281_v5, %v1281_v5  ;;  %v2556_v10 = vrot.slane %v1281_v5, %v13619_v32  ;;  %v1301_v35 = vcombine.high %v1293_v30, %v1293_v30  ;;  %v3590_v11 = vcombine.low %v2544_v2, %v2548_v6  ;;  %4951 = vrot.lane.b32.xlu0 %v4639_v45, %s13117_s24 }
 0x102   : > { %v3597_v12 = vrot.slane %v3589_v23, %v13628_v36  ;;  %v2560_v13 = vrot.slane %v1283_v33, %v13619_v32  ;;  %v1309_v46 = vrot.slane %v1293_v30, %v13617_v31  ;;  %4258 = vst.msk [vmem:[#allocation4 + $0x271] sm:$0xff] %vm4198_vm3, %v3588_v8  ;;  %4262 = vst.msk [vmem:[#allocation4 + $0x299] sm:$0xff] %vm4198_vm3, %v3588_v8  ;;  %4953 = vrot.lane.b32.xlu1 %v4640_v7, %s13117_s24 }
 0x103   : > { %v2564_v14 = vrot.slane %v1285_v9, %v13619_v32  ;;  %v3606_v22 = vcombine.low %v2552_v48, %v2556_v10  ;;  %v1323_v27 = vrot.slane %v1301_v35, %v13617_v31  ;;  %v1300_v15 = vrot.slane %v1286_v38, %v13617_v31  ;;  %v4848_v9 = vpop.permute.xlu0 %4847  ;;  %v4850_v10 = vpop.permute.xlu1 %4849 }
 0x104   : > { %v3604_v19 = vrot.slane %v3590_v11, %v13628_v36  ;;  %v1331_v20 = vcombine.high %v1309_v46, %v1309_v46  ;;  %v2568_v24 = vrot.slane %v1309_v46, %v13619_v32  ;;  %v1342_v40 = vrot.slane %v14185_v39, %v13617_v31  ;;  %v4645_v23 = vld [vmem:[#allocation4 + $0x269] sm:$0xff]  ;;  %5228 = vst.msk [vmem:[#allocation5 + $0x20] sm:$0xff] %vm5223_vm4, %v4848_v9 }
 0x105   : > { %v3607_v21 = vcombine.low %v2560_v13, %v2564_v14  ;;  %v3614_v26 = vrot.slane %v3606_v22, %v13628_v36  ;;  %v1333_v42 = vcombine.high %v1323_v27, %v1323_v27  ;;  %v2572_v44 = vrot.slane %v1323_v27, %v13619_v32  ;;  %v4388_v47 = vld [vmem:[#allocation4 + $0x260] sm:$0xff]  ;;  %4955 = vrot.lane.b32.xlu0 %v4641_v18, %s13117_s24  ;;  %v4389_v28 = vld [vmem:[#allocation4 + $0x268] sm:$0xff] }
 0x106   : > { %v3605_v49 = vcombine.low %v3597_v12, %v3604_v19  ;;  %v2576_v50 = vrot.slane %v1331_v20, %v13619_v32  ;;  %v1302_v51 = vcombine.high %v1300_v15, %v1300_v15  ;;  %v1316_v52 = vrot.slane %v1300_v15, %v13617_v31  ;;  %4516 = vst.msk [vmem:[#allocation5 + $0x1e8] sm:$0xff] %vm4198_vm3, %v4388_v47  ;;  %v4392_v34 = vld [vmem:[#allocation4 + $0x288] sm:$0xff]  ;;  %v4393_v54 = vld [vmem:[#allocation4 + $0x290] sm:$0xff] }
 0x107   : > { %v3621_v53 = vrot.slane %v3607_v21, %v13628_v36  ;;  %v2580_v16 = vrot.slane %v1333_v42, %v13619_v32  ;;  %v3623_v43 = vcombine.low %v2568_v24, %v2572_v44  ;;  %v1350_v25 = vcombine.high %v1342_v40, %v1342_v40  ;;  %4957 = vrot.lane.b32.xlu1 %v4642_v41, %s13117_s24  ;;  %v4644_v61 = vld [vmem:[#allocation4 + $0x261] sm:$0xff]  ;;  %v4852_v42 = vpop.permute.xlu0 %4851  ;;  %v4648_v44 = vld [vmem:[#allocation4 + $0x289] sm:$0xff] }
 0x108   : > { %4263 = vst.msk [vmem:[#allocation4 + $0x2a9] sm:$0xff] %vm4198_vm3, %v3605_v49  ;;  %4267 = vst.msk [vmem:[#allocation4 + $0x2d1] sm:$0xff] %vm4198_vm3, %v3605_v49  ;;  %v1330_v57 = vrot.slane %v1302_v51, %v13617_v31  ;;  %v1332_v58 = vcombine.high %v1316_v52, %v1316_v52  ;;  %v2584_v59 = vrot.slane %v1316_v52, %v13619_v32  ;;  %v4647_v24 = vld [vmem:[#allocation4 + $0x281] sm:$0xff]  ;;  %v4854_v47 = vpop.permute.xlu1 %4853 }
 0x109   : > { %v1358_v60 = vrot.slane %v1342_v40, %v13617_v31  ;;  %4517 = vst.msk [vmem:[#allocation5 + $0x1f0] sm:$0xff] %vm4198_vm3, %v4389_v28  ;;  %4520 = vst.msk [vmem:[#allocation5 + $0x208] sm:$0xff] %vm4198_vm3, %v4392_v34  ;;  %v3622_v29 = vcombine.low %v3614_v26, %v3621_v53  ;;  %v3624_v37 = vcombine.low %v2576_v50, %v2580_v16  ;;  %v4390_v4 = vld [vmem:[#allocation4 + $0x270] sm:$0xff]  ;;  %4959 = vrot.lane.b32.xlu0 %v4643_v55, %s13117_s24  ;;  %v4394_v6 = vld [vmem:[#allocation4 + $0x298] sm:$0xff] }
 0x10a   : > { %4521 = vst.msk [vmem:[#allocation5 + $0x210] sm:$0xff] %vm4198_vm3, %v4393_v54  ;;  %v3631_v62 = vrot.slane %v3623_v43, %v13628_v36  ;;  %v1372_v63 = vrot.slane %v1350_v25, %v13617_v31  ;;  %v1334_v0 = vcombine.high %v1330_v57, %v1330_v57  ;;  %v2588_v1 = vrot.slane %v1330_v57, %v13619_v32  ;;  %v4646_v35 = vld [vmem:[#allocation4 + $0x271] sm:$0xff] }
 0x10b   : > { %v2592_v2 = vrot.slane %v1332_v58, %v13619_v32  ;;  %v1380_v56 = vcombine.high %v1358_v60, %v1358_v60  ;;  %4264 = vst.msk [vmem:[#allocation4 + $0x2b1] sm:$0xff] %vm4198_vm3, %v3622_v29  ;;  %4268 = vst.msk [vmem:[#allocation4 + $0x2d9] sm:$0xff] %vm4198_vm3, %v3622_v29  ;;  %v3638_v5 = vrot.slane %v3624_v37, %v13628_v36  ;;  %4961 = vrot.lane.b32.xlu1 %v4644_v61, %s13117_s24  ;;  %v14260_v28 = vld [vmem:[%s13233_s20 + $0xa0] sm:$0xff] }
 0x10c   : > { %v1382_v30 = vcombine.high %v1372_v63, %v1372_v63  ;;  %v2600_v38 = vrot.slane %v1358_v60, %v13619_v32  ;;  %v2604_v45 = vrot.slane %v1372_v63, %v13619_v32  ;;  %4518 = vst.msk [vmem:[#allocation5 + $0x1f8] sm:$0xff] %vm4198_vm3, %v4390_v4  ;;  %v2596_v33 = vrot.slane %v1334_v0, %v13619_v32  ;;  %v4649_v60 = vld [vmem:[#allocation4 + $0x291] sm:$0xff]  ;;  %v4856_v63 = vpop.permute.xlu0 %4855  ;;  %v4650_v0 = vld [vmem:[#allocation4 + $0x299] sm:$0xff]  ;;  %v4858_v4 = vpop.permute.xlu1 %4857 }
 0x10d   : > { %v3640_v48 = vcombine.low %v2584_v59, %v2588_v1  ;;  %v2608_v7 = vrot.slane %v1380_v56, %v13619_v32  ;;  %v1335_v8 = vcombine.high %v14185_v39, %v14185_v39  ;;  %4522 = vst.msk [vmem:[#allocation5 + $0x218] sm:$0xff] %vm4198_vm3, %v4394_v6  ;;  %v3639_v11 = vcombine.low %v3631_v62, %v3638_v5 }
 0x10e   : > { %v2612_v12 = vrot.slane %v1382_v30, %v13619_v32  ;;  %v3657_v13 = vcombine.low %v2600_v38, %v2604_v45  ;;  %v1391_v46 = vrot.slane %v408_v3, %v13617_v31  ;;  %5229 = vst.msk [vmem:[#allocation5 + $0x28] sm:$0xff] %vm5223_vm4, %v4850_v10  ;;  %v3641_v14 = vcombine.low %v2592_v2, %v2596_v33 }
 0x10f   : > { %v3648_v22 = vrot.slane %v3640_v48, %v13628_v36  ;;  %v1349_v39 = vrot.slane %v1335_v8, %v13617_v31  ;;  %v1384_v27 = vcombine.high %v408_v3, %v408_v3  ;;  %4963 = vrot.lane.b32.xlu0 %v4645_v23, %s13117_s24  ;;  %4265 = vst.msk [vmem:[#allocation4 + $0x2b9] sm:$0xff] %vm4198_vm3, %v3639_v11  ;;  %4269 = vst.msk [vmem:[#allocation4 + $0x2e1] sm:$0xff] %vm4198_vm3, %v3639_v11  ;;  %v4395_v20 = vld [vmem:[#allocation4 + $0x2a8] sm:$0xff]  ;;  %v4399_v59 = vld [vmem:[#allocation4 + $0x2d0] sm:$0xff] }
 0x110   : > { %v3658_v15 = vcombine.low %v2608_v7, %v2612_v12  ;;  %v3665_v17 = vrot.slane %v3657_v13, %v13628_v36  ;;  %v1399_v18 = vcombine.high %v1391_v46, %v1391_v46  ;;  %v1407_v19 = vrot.slane %v1391_v46, %v13617_v31  ;;  %4965 = vrot.lane.b32.xlu1 %v4646_v35, %s13117_s24  ;;  %v4651_v10 = vld [vmem:[#allocation4 + $0x2a9] sm:$0xff]  ;;  %v4860_v46 = vpop.permute.xlu0 %4859 }
 0x111   : > { %v3655_v40 = vrot.slane %v3641_v14, %v13628_v36  ;;  %v1351_v41 = vcombine.high %v1349_v39, %v1349_v39  ;;  %v1365_v21 = vrot.slane %v1349_v39, %v13617_v31  ;;  %v1398_v26 = vrot.slane %v1384_v27, %v13617_v31  ;;  %4523 = vst.msk [vmem:[#allocation5 + $0x220] sm:$0xff] %vm4198_vm3, %v4395_v20 }
 0x112   : > { %v3672_v49 = vrot.slane %v3658_v15, %v13628_v36  ;;  %v1421_v50 = vrot.slane %v1399_v18, %v13617_v31  ;;  %v1429_v51 = vcombine.high %v1407_v19, %v1407_v19  ;;  %v2632_v52 = vrot.slane %v1407_v19, %v13619_v32  ;;  %5230 = vst.msk [vmem:[#allocation5 + $0x30] sm:$0xff] %vm5223_vm4, %v4852_v42  ;;  %v4396_v34 = vld [vmem:[#allocation4 + $0x2b0] sm:$0xff]  ;;  %v4400_v8 = vld [vmem:[#allocation4 + $0x2d8] sm:$0xff] }
 0x113   : > { %v3656_v53 = vcombine.low %v3648_v22, %v3655_v40  ;;  %v1379_v16 = vrot.slane %v1351_v41, %v13617_v31  ;;  %v1381_v43 = vcombine.high %v1365_v21, %v1365_v21  ;;  %v2616_v25 = vrot.slane %v1365_v21, %v13619_v32  ;;  %4967 = vrot.lane.b32.xlu0 %v4647_v24, %s13117_s24  ;;  %v4652_v14 = vld [vmem:[#allocation4 + $0x2b1] sm:$0xff] }
 0x114   : > { %5231 = vst.msk [vmem:[#allocation5 + $0x38] sm:$0xff] %vm5223_vm4, %v4854_v47  ;;  %v3673_v54 = vcombine.low %v3665_v17, %v3672_v49  ;;  %v1431_v55 = vcombine.high %v1421_v50, %v1421_v50  ;;  %v2636_v57 = vrot.slane %v1421_v50, %v13619_v32  ;;  %v2640_v58 = vrot.slane %v1429_v51, %v13619_v32  ;;  %v4862_v17 = vpop.permute.xlu1 %4861  ;;  %v410_v42 = vld [vmem:[%s13233_s20 + $0xa8] sm:$0xff] }
 0x115   : > { %4524 = vst.msk [vmem:[#allocation5 + $0x228] sm:$0xff] %vm4198_vm3, %v4396_v34  ;;  %4969 = vrot.lane.b32.xlu1 %v4648_v44, %s13117_s24  ;;  %4266 = vst.msk [vmem:[#allocation4 + $0x2c1] sm:$0xff] %vm4198_vm3, %v3656_v53  ;;  %v1383_v61 = vcombine.high %v1379_v16, %v1379_v16  ;;  %v2620_v29 = vrot.slane %v1379_v16, %v13619_v32  ;;  %v2624_v37 = vrot.slane %v1381_v43, %v13619_v32  ;;  %v4864_v16 = vpop.permute.xlu0 %4863 }
 0x116   : > { %4270 = vst.msk [vmem:[#allocation4 + $0x2e9] sm:$0xff] %vm4198_vm3, %v3656_v53  ;;  %v1400_v62 = vcombine.high %v1398_v26, %v1398_v26  ;;  %4527 = vst.msk [vmem:[#allocation5 + $0x240] sm:$0xff] %vm4198_vm3, %v4399_v59  ;;  %v2644_v1 = vrot.slane %v1431_v55, %v13619_v32  ;;  %v3691_v2 = vcombine.low %v2632_v52, %v2636_v57  ;;  %v4397_v6 = vld [vmem:[#allocation4 + $0x2b8] sm:$0xff]  ;;  %v4401_v9 = vld [vmem:[#allocation4 + $0x2e0] sm:$0xff] }
 0x117   : > { %4271 = vst.msk [vmem:[#allocation4 + $0x2f9] sm:$0xff] %vm4198_vm3, %v3673_v54  ;;  %4275 = vst.msk [vmem:[#allocation4 + $0x321] sm:$0xff] %vm4198_vm3, %v3673_v54  ;;  %v1414_v56 = vrot.slane %v1398_v26, %v13617_v31  ;;  %v1440_v3 = vrot.slane %v14260_v28, %v13617_v31  ;;  %v2628_v5 = vrot.slane %v1383_v61, %v13619_v32  ;;  %4971 = vrot.lane.b32.xlu0 %v4649_v60, %s13117_s24  ;;  %v4653_v49 = vld [vmem:[#allocation4 + $0x2b9] sm:$0xff] }
 0x118   : > { %5232 = vst.msk [vmem:[#allocation5 + $0x40] sm:$0xff] %vm5223_vm4, %v4856_v63  ;;  %v3674_v30 = vcombine.low %v2616_v25, %v2620_v29  ;;  %v1428_v38 = vrot.slane %v1400_v62, %v13617_v31  ;;  %v1433_v45 = vcombine.high %v14260_v28, %v14260_v28  ;;  %5233 = vst.msk [vmem:[#allocation5 + $0x48] sm:$0xff] %vm5223_vm4, %v4858_v4  ;;  %v4866_v57 = vpop.permute.xlu1 %4865  ;;  %v14329_v4 = vld [vmem:[%s13233_s20 + $0xb0] sm:$0xff] }
 0x119   : > { %v3692_v23 = vcombine.low %v2640_v58, %v2644_v1  ;;  %v3699_v33 = vrot.slane %v3691_v2, %v13628_v36  ;;  %v1430_v48 = vcombine.high %v1414_v56, %v1414_v56  ;;  %v2648_v7 = vrot.slane %v1414_v56, %v13619_v32  ;;  %4525 = vst.msk [vmem:[#allocation5 + $0x230] sm:$0xff] %vm4198_vm3, %v4397_v6 }
 0x11a   : > { %4973 = vrot.lane.b32.xlu1 %v4650_v0, %s13117_s24  ;;  %v3675_v35 = vcombine.low %v2624_v37, %v2628_v5  ;;  %v3682_v11 = vrot.slane %v3674_v30, %v13628_v36  ;;  %v1432_v12 = vcombine.high %v1428_v38, %v1428_v38  ;;  %v2652_v13 = vrot.slane %v1428_v38, %v13619_v32  ;;  %v4655_v0 = vld [vmem:[#allocation4 + $0x2d1] sm:$0xff]  ;;  %v4868_v5 = vpop.permute.xlu0 %4867  ;;  %v4656_v30 = vld [vmem:[#allocation4 + $0x2d9] sm:$0xff] }
 0x11b   : > { %4528 = vst.msk [vmem:[#allocation5 + $0x248] sm:$0xff] %vm4198_vm3, %v4400_v8  ;;  %4529 = vst.msk [vmem:[#allocation5 + $0x250] sm:$0xff] %vm4198_vm3, %v4401_v9  ;;  %v3706_v22 = vrot.slane %v3692_v23, %v13628_v36  ;;  %v2656_v39 = vrot.slane %v1430_v48, %v13619_v32  ;;  %v1448_v27 = vcombine.high %v1440_v3, %v1440_v3  ;;  %4975 = vrot.lane.b32.xlu0 %v4651_v10, %s13117_s24 }
 0x11c   : > { %v1456_v15 = vrot.slane %v1440_v3, %v13617_v31  ;;  %5234 = vst.msk [vmem:[#allocation5 + $0x50] sm:$0xff] %vm5223_vm4, %v4860_v46  ;;  %v3689_v18 = vrot.slane %v3675_v35, %v13628_v36  ;;  %v2660_v19 = vrot.slane %v1432_v12, %v13619_v32  ;;  %v3708_v20 = vcombine.low %v2648_v7, %v2652_v13  ;;  %v4398_v44 = vld [vmem:[#allocation4 + $0x2c0] sm:$0xff] }
 0x11d   : > { %v1447_v24 = vrot.slane %v1433_v45, %v13617_v31  ;;  %5235 = vst.msk [vmem:[#allocation5 + $0x58] sm:$0xff] %vm5223_vm4, %v4862_v17  ;;  %v3707_v40 = vcombine.low %v3699_v33, %v3706_v22  ;;  %v1470_v41 = vrot.slane %v1448_v27, %v13617_v31  ;;  %v4402_v53 = vld [vmem:[#allocation4 + $0x2e8] sm:$0xff]  ;;  %5236 = vst.msk [vmem:[#allocation5 + $0x60] sm:$0xff] %vm5223_vm4, %v4864_v16  ;;  %v4870_v33 = vpop.permute.xlu1 %4869 }
 0x11e   : > { %v1478_v21 = vcombine.high %v1456_v15, %v1456_v15  ;;  %v2664_v26 = vrot.slane %v1456_v15, %v13619_v32  ;;  %4977 = vrot.lane.b32.xlu1 %v4652_v14, %s13117_s24  ;;  %v3690_v50 = vcombine.low %v3682_v11, %v3689_v18  ;;  %v3709_v51 = vcombine.low %v2656_v39, %v2660_v19  ;;  %v4654_v43 = vld [vmem:[#allocation4 + $0x2c1] sm:$0xff]  ;;  %v4403_v55 = vld [vmem:[#allocation4 + $0x2f8] sm:$0xff]  ;;  %v4872_v15 = vpop.permute.xlu0 %4871  ;;  %v4658_v17 = vld [vmem:[#allocation4 + $0x2e9] sm:$0xff] }
 0x11f   : > { %v3716_v52 = vrot.slane %v3708_v20, %v13628_v36  ;;  %v1449_v47 = vcombine.high %v1447_v24, %v1447_v24  ;;  %4526 = vst.msk [vmem:[#allocation5 + $0x238] sm:$0xff] %vm4198_vm3, %v4398_v44  ;;  %4273 = vst.msk [vmem:[#allocation4 + $0x309] sm:$0xff] %vm4198_vm3, %v3707_v40  ;;  %v1480_v25 = vcombine.high %v1470_v41, %v1470_v41  ;;  %4979 = vrot.lane.b32.xlu0 %v4653_v49, %s13117_s24  ;;  %v4407_v13 = vld [vmem:[#allocation4 + $0x320] sm:$0xff] }
 0x120   : > { %4277 = vst.msk [vmem:[#allocation4 + $0x331] sm:$0xff] %vm4198_vm3, %v3707_v40  ;;  %v2668_v28 = vrot.slane %v1470_v41, %v13619_v32  ;;  %v2672_v34 = vrot.slane %v1478_v21, %v13619_v32  ;;  %v1463_v54 = vrot.slane %v1447_v24, %v13617_v31  ;;  %4530 = vst.msk [vmem:[#allocation5 + $0x258] sm:$0xff] %vm4198_vm3, %v4402_v53  ;;  %v4657_v46 = vld [vmem:[#allocation4 + $0x2e1] sm:$0xff] }
 0x121   : > { %4272 = vst.msk [vmem:[#allocation4 + $0x301] sm:$0xff] %vm4198_vm3, %v3690_v50  ;;  %4276 = vst.msk [vmem:[#allocation4 + $0x329] sm:$0xff] %vm4198_vm3, %v3690_v50  ;;  %v3723_v58 = vrot.slane %v3709_v51, %v13628_v36  ;;  %v1477_v59 = vrot.slane %v1449_v47, %v13617_v31  ;;  %v1489_v60 = vrot.slane %v410_v42, %v13617_v31  ;;  %v4874_v41 = vpop.permute.xlu1 %4873 }
 0x122   : > { %v1482_v61 = vcombine.high %v410_v42, %v410_v42  ;;  %4531 = vst.msk [vmem:[#allocation5 + $0x260] sm:$0xff] %vm4198_vm3, %v4403_v55  ;;  %v2676_v29 = vrot.slane %v1480_v25, %v13619_v32  ;;  %v3725_v37 = vcombine.low %v2664_v26, %v2668_v28  ;;  %v1479_v62 = vcombine.high %v1463_v54, %v1463_v54  ;;  %v4876_v55 = vpop.permute.xlu0 %4875 }
 0x123   : > { %5237 = vst.msk [vmem:[#allocation5 + $0x68] sm:$0xff] %vm5223_vm4, %v4866_v57  ;;  %v2680_v63 = vrot.slane %v1463_v54, %v13619_v32  ;;  %4981 = vrot.lane.b32.xlu1 %v4654_v43, %s13117_s24  ;;  %v3724_v1 = vcombine.low %v3716_v52, %v3723_v58  ;;  %v1481_v2 = vcombine.high %v1477_v59, %v1477_v59  ;;  %5238 = vst.msk [vmem:[#allocation5 + $0x70] sm:$0xff] %vm5223_vm4, %v4868_v5  ;;  %v4659_v43 = vld [vmem:[#allocation4 + $0x2f9] sm:$0xff] }
 0x124   : > { %v2684_v56 = vrot.slane %v1477_v59, %v13619_v32  ;;  %v1497_v3 = vcombine.high %v1489_v60, %v1489_v60  ;;  %v3726_v38 = vcombine.low %v2672_v34, %v2676_v29  ;;  %v3733_v45 = vrot.slane %v3725_v37, %v13628_v36  ;;  %4983 = vrot.lane.b32.xlu0 %v4655_v0, %s13117_s24  ;;  %v412_v29 = vld [vmem:[%s13233_s20 + $0xb8] sm:$0xff] }
 0x125   : > { %v2688_v6 = vrot.slane %v1479_v62, %v13619_v32  ;;  %v1505_v23 = vrot.slane %v1489_v60, %v13617_v31  ;;  %4274 = vst.msk [vmem:[#allocation4 + $0x311] sm:$0xff] %vm4198_vm3, %v3724_v1  ;;  %4278 = vst.msk [vmem:[#allocation4 + $0x339] sm:$0xff] %vm4198_vm3, %v3724_v1  ;;  %v2692_v48 = vrot.slane %v1481_v2, %v13619_v32  ;;  %v4878_v62 = vpop.permute.xlu1 %4877 }
 0x126   : > { %v3742_v7 = vcombine.low %v2680_v63, %v2684_v56  ;;  %v1519_v8 = vrot.slane %v1497_v3, %v13617_v31  ;;  %v1496_v9 = vrot.slane %v1482_v61, %v13617_v31  ;;  %5239 = vst.msk [vmem:[#allocation5 + $0x78] sm:$0xff] %vm5223_vm4, %v4870_v33  ;;  %v3740_v10 = vrot.slane %v3726_v38, %v13628_v36 }
 0x127   : > { %v1527_v35 = vcombine.high %v1505_v23, %v1505_v23  ;;  %v2696_v11 = vrot.slane %v1505_v23, %v13619_v32  ;;  %v1538_v12 = vrot.slane %v14329_v4, %v13617_v31  ;;  %4985 = vrot.lane.b32.xlu1 %v4656_v30, %s13117_s24  ;;  %v3743_v14 = vcombine.low %v2688_v6, %v2692_v48 }
 0x128   : > { %v3750_v22 = vrot.slane %v3742_v7, %v13628_v36  ;;  %v1529_v39 = vcombine.high %v1519_v8, %v1519_v8  ;;  %v2700_v27 = vrot.slane %v1519_v8, %v13619_v32  ;;  %4535 = vst.msk [vmem:[#allocation5 + $0x280] sm:$0xff] %vm4198_vm3, %v4407_v13  ;;  %v3741_v18 = vcombine.low %v3733_v45, %v3740_v10  ;;  %v4404_v40 = vld [vmem:[#allocation4 + $0x300] sm:$0xff]  ;;  %v4405_v49 = vld [vmem:[#allocation4 + $0x308] sm:$0xff]  ;;  %v4409_v16 = vld [vmem:[#allocation4 + $0x330] sm:$0xff]  ;;  %v4880_v7 = vpop.permute.xlu0 %4879 }
 0x129   : > { %v2704_v19 = vrot.slane %v1527_v35, %v13619_v32  ;;  %v1498_v20 = vcombine.high %v1496_v9, %v1496_v9  ;;  %v1512_v24 = vrot.slane %v1496_v9, %v13617_v31  ;;  %5240 = vst.msk [vmem:[#allocation5 + $0x80] sm:$0xff] %vm5223_vm4, %v4872_v15  ;;  %v3757_v21 = vrot.slane %v3743_v14, %v13628_v36  ;;  %v4408_v53 = vld [vmem:[#allocation4 + $0x328] sm:$0xff] }
 0x12a   : > { %v2708_v26 = vrot.slane %v1529_v39, %v13619_v32  ;;  %v3759_v42 = vcombine.low %v2696_v11, %v2700_v27  ;;  %v1546_v44 = vcombine.high %v1538_v12, %v1538_v12  ;;  %4532 = vst.msk [vmem:[#allocation5 + $0x268] sm:$0xff] %vm4198_vm3, %v4404_v40  ;;  %4987 = vrot.lane.b32.xlu0 %v4657_v46, %s13117_s24  ;;  %4279 = vst.msk [vmem:[#allocation4 + $0x349] sm:$0xff] %vm4198_vm3, %v3741_v18  ;;  %v4660_v57 = vld [vmem:[#allocation4 + $0x301] sm:$0xff]  ;;  %v4661_v45 = vld [vmem:[#allocation4 + $0x309] sm:$0xff]  ;;  %v4882_v11 = vpop.permute.xlu1 %4881 }
 0x12b   : > { %5241 = vst.msk [vmem:[#allocation5 + $0x88] sm:$0xff] %vm5223_vm4, %v4874_v41  ;;  %v1526_v50 = vrot.slane %v1498_v20, %v13617_v31  ;;  %v1528_v51 = vcombine.high %v1512_v24, %v1512_v24  ;;  %v2712_v52 = vrot.slane %v1512_v24, %v13619_v32  ;;  %v1554_v47 = vrot.slane %v1538_v12, %v13617_v31 }
 0x12c   : > { %4283 = vst.msk [vmem:[#allocation4 + $0x371] sm:$0xff] %vm4198_vm3, %v3741_v18  ;;  %4533 = vst.msk [vmem:[#allocation5 + $0x270] sm:$0xff] %vm4198_vm3, %v4405_v49  ;;  %4989 = vrot.lane.b32.xlu1 %v4658_v17, %s13117_s24  ;;  %v3758_v25 = vcombine.low %v3750_v22, %v3757_v21  ;;  %v3760_v28 = vcombine.low %v2704_v19, %v2708_v26  ;;  %v3767_v34 = vrot.slane %v3759_v42, %v13628_v36  ;;  %v4406_v37 = vld [vmem:[#allocation4 + $0x310] sm:$0xff]  ;;  %v4410_v38 = vld [vmem:[#allocation4 + $0x338] sm:$0xff]  ;;  %v4884_v41 = vpop.permute.xlu0 %4883 }
 0x12d   : > { %v1568_v54 = vrot.slane %v1546_v44, %v13617_v31  ;;  %4536 = vst.msk [vmem:[#allocation5 + $0x288] sm:$0xff] %vm4198_vm3, %v4408_v53  ;;  %4537 = vst.msk [vmem:[#allocation5 + $0x290] sm:$0xff] %vm4198_vm3, %v4409_v16  ;;  %v1530_v58 = vcombine.high %v1526_v50, %v1526_v50  ;;  %v2716_v59 = vrot.slane %v1526_v50, %v13619_v32  ;;  %v4662_v8 = vld [vmem:[#allocation4 + $0x311] sm:$0xff]  ;;  %v4663_v18 = vld [vmem:[#allocation4 + $0x321] sm:$0xff] }
 0x12e   : > { %v2720_v60 = vrot.slane %v1528_v51, %v13619_v32  ;;  %v1576_v61 = vcombine.high %v1554_v47, %v1554_v47  ;;  %5242 = vst.msk [vmem:[#allocation5 + $0x90] sm:$0xff] %vm5223_vm4, %v4876_v55  ;;  %v3774_v63 = vrot.slane %v3760_v28, %v13628_v36  ;;  %v2728_v1 = vrot.slane %v1554_v47, %v13619_v32  ;;  %v4664_v21 = vld [vmem:[#allocation4 + $0x329] sm:$0xff] }
 0x12f   : > { %4280 = vst.msk [vmem:[#allocation4 + $0x351] sm:$0xff] %vm4198_vm3, %v3758_v25  ;;  %4284 = vst.msk [vmem:[#allocation4 + $0x379] sm:$0xff] %vm4198_vm3, %v3758_v25  ;;  %v1578_v0 = vcombine.high %v1568_v54, %v1568_v54  ;;  %v2732_v2 = vrot.slane %v1568_v54, %v13619_v32  ;;  %4991 = vrot.lane.b32.xlu0 %v4659_v43, %s13117_s24  ;;  %v2724_v56 = vrot.slane %v1530_v58, %v13619_v32  ;;  %v14409_v50 = vld [vmem:[%s13233_s20 + $0xc0] sm:$0xff] }
 0x130   : > { %4534 = vst.msk [vmem:[#allocation5 + $0x278] sm:$0xff] %vm4198_vm3, %v4406_v37  ;;  %v3776_v3 = vcombine.low %v2712_v52, %v2716_v59  ;;  %v2736_v5 = vrot.slane %v1576_v61, %v13619_v32  ;;  %v1531_v30 = vcombine.high %v14329_v4, %v14329_v4  ;;  %4993 = vrot.lane.b32.xlu1 %v4660_v57, %s13117_s24  ;;  %4538 = vst.msk [vmem:[#allocation5 + $0x298] sm:$0xff] %vm4198_vm3, %v4410_v38  ;;  %v4886_v52 = vpop.permute.xlu1 %4885  ;;  %v4665_v57 = vld [vmem:[#allocation4 + $0x331] sm:$0xff]  ;;  %v4666_v37 = vld [vmem:[#allocation4 + $0x339] sm:$0xff] }
 0x131   : > { %5243 = vst.msk [vmem:[#allocation5 + $0x98] sm:$0xff] %vm5223_vm4, %v4878_v62  ;;  %v3775_v6 = vcombine.low %v3767_v34, %v3774_v63  ;;  %v2740_v23 = vrot.slane %v1578_v0, %v13619_v32  ;;  %v3793_v33 = vcombine.low %v2728_v1, %v2732_v2  ;;  %v1587_v48 = vrot.slane %v412_v29, %v13617_v31  ;;  %v4411_v22 = vld [vmem:[#allocation4 + $0x348] sm:$0xff] }
 0x132   : > { %v3777_v9 = vcombine.low %v2720_v60, %v2724_v56  ;;  %v3784_v10 = vrot.slane %v3776_v3, %v13628_v36  ;;  %v1545_v35 = vrot.slane %v1531_v30, %v13617_v31  ;;  %v1580_v4 = vcombine.high %v412_v29, %v412_v29  ;;  %5244 = vst.msk [vmem:[#allocation5 + $0xa0] sm:$0xff] %vm5223_vm4, %v4880_v7  ;;  %v4888_v29 = vpop.permute.xlu0 %4887 }
 0x133   : > { %4281 = vst.msk [vmem:[#allocation4 + $0x359] sm:$0xff] %vm4198_vm3, %v3775_v6  ;;  %4285 = vst.msk [vmem:[#allocation4 + $0x381] sm:$0xff] %vm4198_vm3, %v3775_v6  ;;  %v3794_v12 = vcombine.low %v2736_v5, %v2740_v23  ;;  %v3801_v13 = vrot.slane %v3793_v33, %v13628_v36  ;;  %v1595_v46 = vcombine.high %v1587_v48, %v1587_v48  ;;  %4995 = vrot.lane.b32.xlu0 %v4661_v45, %s13117_s24  ;;  %v4415_v55 = vld [vmem:[#allocation4 + $0x370] sm:$0xff] }
 0x134   : > { %v1603_v14 = vrot.slane %v1587_v48, %v13617_v31  ;;  %5245 = vst.msk [vmem:[#allocation5 + $0xa8] sm:$0xff] %vm5223_vm4, %v4882_v11  ;;  %v3791_v39 = vrot.slane %v3777_v9, %v13628_v36  ;;  %v1547_v27 = vcombine.high %v1545_v35, %v1545_v35  ;;  %v1561_v15 = vrot.slane %v1545_v35, %v13617_v31  ;;  %v4890_v56 = vpop.permute.xlu1 %4889 }
 0x135   : > { %v1594_v17 = vrot.slane %v1580_v4, %v13617_v31  ;;  %4539 = vst.msk [vmem:[#allocation5 + $0x2a0] sm:$0xff] %vm4198_vm3, %v4411_v22  ;;  %4997 = vrot.lane.b32.xlu1 %v4662_v8, %s13117_s24  ;;  %v3808_v19 = vrot.slane %v3794_v12, %v13628_v36  ;;  %v1617_v20 = vrot.slane %v1595_v46, %v13617_v31  ;;  %4543 = vst.msk [vmem:[#allocation5 + $0x2c0] sm:$0xff] %vm4198_vm3, %v4415_v55  ;;  %v4667_v8 = vld [vmem:[#allocation4 + $0x349] sm:$0xff] }
 0x136   : > { %v1625_v24 = vcombine.high %v1603_v14, %v1603_v14  ;;  %v2760_v40 = vrot.slane %v1603_v14, %v13619_v32  ;;  %v3792_v26 = vcombine.low %v3784_v10, %v3791_v39  ;;  %v1575_v42 = vrot.slane %v1547_v27, %v13617_v31  ;;  %v4412_v51 = vld [vmem:[#allocation4 + $0x350] sm:$0xff]  ;;  %5246 = vst.msk [vmem:[#allocation5 + $0xb0] sm:$0xff] %vm5223_vm4, %v4884_v41  ;;  %v4416_v48 = vld [vmem:[#allocation4 + $0x378] sm:$0xff]  ;;  %v4892_v11 = vpop.permute.xlu0 %4891 }
 0x137   : > { %v1577_v44 = vcombine.high %v1561_v15, %v1561_v15  ;;  %v2744_v49 = vrot.slane %v1561_v15, %v13619_v32  ;;  %v3809_v47 = vcombine.low %v3801_v13, %v3808_v19  ;;  %v1627_v53 = vcombine.high %v1617_v20, %v1617_v20  ;;  %4540 = vst.msk [vmem:[#allocation5 + $0x2a8] sm:$0xff] %vm4198_vm3, %v4412_v51  ;;  %v4668_v12 = vld [vmem:[#allocation4 + $0x351] sm:$0xff] }
 0x138   : > { %v2764_v16 = vrot.slane %v1617_v20, %v13619_v32  ;;  %v2768_v43 = vrot.slane %v1625_v24, %v13619_v32  ;;  %4999 = vrot.lane.b32.xlu0 %v4663_v18, %s13117_s24  ;;  %5247 = vst.msk [vmem:[#allocation5 + $0xb8] sm:$0xff] %vm5223_vm4, %v4886_v52  ;;  %v1579_v25 = vcombine.high %v1575_v42, %v1575_v42  ;;  %5248 = vst.msk [vmem:[#allocation5 + $0xc0] sm:$0xff] %vm5223_vm4, %v4888_v29  ;;  %v4894_v39 = vpop.permute.xlu1 %4893  ;;  %v414_v19 = vld [vmem:[%s13233_s20 + $0xc8] sm:$0xff] }
 0x139   : > { %4282 = vst.msk [vmem:[#allocation4 + $0x361] sm:$0xff] %vm4198_vm3, %v3792_v26  ;;  %4286 = vst.msk [vmem:[#allocation4 + $0x389] sm:$0xff] %vm4198_vm3, %v3792_v26  ;;  %v2748_v28 = vrot.slane %v1575_v42, %v13619_v32  ;;  %v2752_v34 = vrot.slane %v1577_v44, %v13619_v32  ;;  %v1596_v54 = vcombine.high %v1594_v17, %v1594_v17  ;;  %5001 = vrot.lane.b32.xlu1 %v4664_v21, %s13117_s24 }
 0x13a   : > { %4287 = vst.msk [vmem:[#allocation4 + $0x399] sm:$0xff] %vm4198_vm3, %v3809_v47  ;;  %4291 = vst.msk [vmem:[#allocation4 + $0x3c1] sm:$0xff] %vm4198_vm3, %v3809_v47  ;;  %v2772_v58 = vrot.slane %v1627_v53, %v13619_v32  ;;  %v3827_v59 = vcombine.low %v2760_v40, %v2764_v16  ;;  %v1610_v60 = vrot.slane %v1594_v17, %v13617_v31  ;;  %v4413_v2 = vld [vmem:[#allocation4 + $0x358] sm:$0xff]  ;;  %v4417_v7 = vld [vmem:[#allocation4 + $0x380] sm:$0xff]  ;;  %v4896_v47 = vpop.permute.xlu0 %4895 }
 0x13b   : > { %v1636_v61 = vrot.slane %v14409_v50, %v13617_v31  ;;  %v2756_v62 = vrot.slane %v1579_v25, %v13619_v32  ;;  %v3810_v63 = vcombine.low %v2744_v49, %v2748_v28  ;;  %v1624_v0 = vrot.slane %v1596_v54, %v13617_v31  ;;  %4541 = vst.msk [vmem:[#allocation5 + $0x2b0] sm:$0xff] %vm4198_vm3, %v4413_v2  ;;  %v4669_v26 = vld [vmem:[#allocation4 + $0x359] sm:$0xff] }
 0x13c   : > { %v1629_v1 = vcombine.high %v14409_v50, %v14409_v50  ;;  %v3828_v3 = vcombine.low %v2768_v43, %v2772_v58  ;;  %v3835_v5 = vrot.slane %v3827_v59, %v13628_v36  ;;  %v1626_v30 = vcombine.high %v1610_v60, %v1610_v60  ;;  %5003 = vrot.lane.b32.xlu0 %v4665_v57, %s13117_s24 }
 0x13d   : > { %v2776_v38 = vrot.slane %v1610_v60, %v13619_v32  ;;  %5249 = vst.msk [vmem:[#allocation5 + $0xc8] sm:$0xff] %vm5223_vm4, %v4890_v56  ;;  %v3811_v45 = vcombine.low %v2752_v34, %v2756_v62  ;;  %v3818_v6 = vrot.slane %v3810_v63, %v13628_v36  ;;  %v1628_v23 = vcombine.high %v1624_v0, %v1624_v0  ;;  %v4898_v34 = vpop.permute.xlu1 %4897  ;;  %v4671_v62 = vld [vmem:[#allocation4 + $0x371] sm:$0xff] }
 0x13e   : > { %v2780_v33 = vrot.slane %v1624_v0, %v13619_v32  ;;  %5005 = vrot.lane.b32.xlu1 %v4666_v37, %s13117_s24  ;;  %v3842_v9 = vrot.slane %v3828_v3, %v13628_v36  ;;  %v2784_v10 = vrot.slane %v1626_v30, %v13619_v32  ;;  %v1644_v35 = vcombine.high %v1636_v61, %v1636_v61  ;;  %v14478_v37 = vld [vmem:[%s13233_s20 + $0xd0] sm:$0xff]  ;;  %v4900_v56 = vpop.permute.xlu0 %4899 }
 0x13f   : > { %v1652_v4 = vrot.slane %v1636_v61, %v13617_v31  ;;  %4544 = vst.msk [vmem:[#allocation5 + $0x2c8] sm:$0xff] %vm4198_vm3, %v4416_v48  ;;  %4545 = vst.msk [vmem:[#allocation5 + $0x2d0] sm:$0xff] %vm4198_vm3, %v4417_v7  ;;  %v3825_v13 = vrot.slane %v3811_v45, %v13628_v36  ;;  %v2788_v46 = vrot.slane %v1628_v23, %v13619_v32  ;;  %v4672_v3 = vld [vmem:[#allocation4 + $0x379] sm:$0xff] }
 0x140   : > { %v3844_v14 = vcombine.low %v2776_v38, %v2780_v33  ;;  %v1643_v22 = vrot.slane %v1629_v1, %v13617_v31  ;;  %5250 = vst.msk [vmem:[#allocation5 + $0xd0] sm:$0xff] %vm5223_vm4, %v4892_v11  ;;  %v3843_v27 = vcombine.low %v3835_v5, %v3842_v9  ;;  %v1666_v15 = vrot.slane %v1644_v35, %v13617_v31  ;;  %v4414_v20 = vld [vmem:[#allocation4 + $0x360] sm:$0xff]  ;;  %v4418_v51 = vld [vmem:[#allocation4 + $0x388] sm:$0xff] }
 0x141   : > { %v1674_v17 = vcombine.high %v1652_v4, %v1652_v4  ;;  %v2792_v18 = vrot.slane %v1652_v4, %v13619_v32  ;;  %5007 = vrot.lane.b32.xlu0 %v4667_v8, %s13117_s24  ;;  %5251 = vst.msk [vmem:[#allocation5 + $0xd8] sm:$0xff] %vm5223_vm4, %v4894_v39  ;;  %v3826_v24 = vcombine.low %v3818_v6, %v3825_v13  ;;  %v4419_v52 = vld [vmem:[#allocation4 + $0x398] sm:$0xff]  ;;  %v4670_v53 = vld [vmem:[#allocation4 + $0x361] sm:$0xff]  ;;  %5252 = vst.msk [vmem:[#allocation5 + $0xe0] sm:$0xff] %vm5223_vm4, %v4896_v47  ;;  %v4902_v6 = vpop.permute.xlu1 %4901 }
 0x142   : > { %v3845_v40 = vcombine.low %v2784_v10, %v2788_v46  ;;  %v3852_v41 = vrot.slane %v3844_v14, %v13628_v36  ;;  %v1645_v21 = vcombine.high %v1643_v22, %v1643_v22  ;;  %4542 = vst.msk [vmem:[#allocation5 + $0x2b8] sm:$0xff] %vm4198_vm3, %v4414_v20  ;;  %5009 = vrot.lane.b32.xlu1 %v4668_v12, %s13117_s24  ;;  %4289 = vst.msk [vmem:[#allocation4 + $0x3a9] sm:$0xff] %vm4198_vm3, %v3843_v27  ;;  %v4423_v4 = vld [vmem:[#allocation4 + $0x3c0] sm:$0xff]  ;;  %v4904_v39 = vpop.permute.xlu0 %4903 }
 0x143   : > { %4293 = vst.msk [vmem:[#allocation4 + $0x3d1] sm:$0xff] %vm4198_vm3, %v3843_v27  ;;  %v1676_v42 = vcombine.high %v1666_v15, %v1666_v15  ;;  %v2796_v44 = vrot.slane %v1666_v15, %v13619_v32  ;;  %v2800_v49 = vrot.slane %v1674_v17, %v13619_v32  ;;  %v1659_v50 = vrot.slane %v1643_v22, %v13617_v31  ;;  %v4673_v11 = vld [vmem:[#allocation4 + $0x381] sm:$0xff]  ;;  %v4674_v27 = vld [vmem:[#allocation4 + $0x389] sm:$0xff]  ;;  %v4675_v47 = vld [vmem:[#allocation4 + $0x399] sm:$0xff] }
 0x144   : > { %4288 = vst.msk [vmem:[#allocation4 + $0x3a1] sm:$0xff] %vm4198_vm3, %v3826_v24  ;;  %4292 = vst.msk [vmem:[#allocation4 + $0x3c9] sm:$0xff] %vm4198_vm3, %v3826_v24  ;;  %v3859_v16 = vrot.slane %v3845_v40, %v13628_v36  ;;  %v1673_v43 = vrot.slane %v1645_v21, %v13617_v31  ;;  %v1685_v25 = vrot.slane %v414_v19, %v13617_v31 }
 0x145   : > { %v1678_v28 = vcombine.high %v414_v19, %v414_v19  ;;  %4546 = vst.msk [vmem:[#allocation5 + $0x2d8] sm:$0xff] %vm4198_vm3, %v4418_v51  ;;  %4547 = vst.msk [vmem:[#allocation5 + $0x2e0] sm:$0xff] %vm4198_vm3, %v4419_v52  ;;  %v2804_v54 = vrot.slane %v1676_v42, %v13619_v32  ;;  %v3861_v55 = vcombine.low %v2792_v18, %v2796_v44  ;;  %5011 = vrot.lane.b32.xlu0 %v4669_v26, %s13117_s24  ;;  %v4906_v24 = vpop.permute.xlu1 %4905 }
 0x146   : > { %v1675_v57 = vcombine.high %v1659_v50, %v1659_v50  ;;  %v2808_v58 = vrot.slane %v1659_v50, %v13619_v32  ;;  %5253 = vst.msk [vmem:[#allocation5 + $0xe8] sm:$0xff] %vm5223_vm4, %v4898_v34  ;;  %v3860_v59 = vcombine.low %v3852_v41, %v3859_v16  ;;  %v1677_v60 = vcombine.high %v1673_v43, %v1673_v43 }
 0x147   : > { %v2812_v61 = vrot.slane %v1673_v43, %v13619_v32  ;;  %v1693_v29 = vcombine.high %v1685_v25, %v1685_v25  ;;  %5013 = vrot.lane.b32.xlu1 %v4670_v53, %s13117_s24  ;;  %v3862_v63 = vcombine.low %v2800_v49, %v2804_v54  ;;  %v3869_v0 = vrot.slane %v3861_v55, %v13628_v36  ;;  %v4908_v54 = vpop.permute.xlu0 %4907 }
 0x148   : > { %v2816_v1 = vrot.slane %v1675_v57, %v13619_v32  ;;  %v1701_v2 = vrot.slane %v1685_v25, %v13617_v31  ;;  %4290 = vst.msk [vmem:[#allocation4 + $0x3b1] sm:$0xff] %vm4198_vm3, %v3860_v59  ;;  %4294 = vst.msk [vmem:[#allocation4 + $0x3d9] sm:$0xff] %vm4198_vm3, %v3860_v59  ;;  %v2820_v5 = vrot.slane %v1677_v60, %v13619_v32 }
 0x149   : > { %v3878_v30 = vcombine.low %v2808_v58, %v2812_v61  ;;  %v1715_v38 = vrot.slane %v1693_v29, %v13617_v31  ;;  %v1692_v45 = vrot.slane %v1678_v28, %v13617_v31  ;;  %5254 = vst.msk [vmem:[#allocation5 + $0xf0] sm:$0xff] %vm5223_vm4, %v4900_v56  ;;  %v3876_v23 = vrot.slane %v3862_v63, %v13628_v36  ;;  %v416_v28 = vld [vmem:[%s13233_s20 + $0xd8] sm:$0xff]  ;;  %v4910_v61 = vpop.permute.xlu1 %4909 }
 0x14a   : > { %v1723_v33 = vcombine.high %v1701_v2, %v1701_v2  ;;  %v2824_v48 = vrot.slane %v1701_v2, %v13619_v32  ;;  %v1734_v7 = vrot.slane %v14478_v37, %v13617_v31  ;;  %5015 = vrot.lane.b32.xlu0 %v4671_v62, %s13117_s24  ;;  %5255 = vst.msk [vmem:[#allocation5 + $0xf8] sm:$0xff] %vm5223_vm4, %v4902_v6  ;;  %5256 = vst.msk [vmem:[#allocation5 + $0x100] sm:$0xff] %vm5223_vm4, %v4904_v39 }
 0x14b   : > { %v3879_v8 = vcombine.low %v2816_v1, %v2820_v5  ;;  %v3886_v9 = vrot.slane %v3878_v30, %v13628_v36  ;;  %v1725_v10 = vcombine.high %v1715_v38, %v1715_v38  ;;  %v2828_v35 = vrot.slane %v1715_v38, %v13619_v32  ;;  %5017 = vrot.lane.b32.xlu1 %v4672_v3, %s13117_s24  ;;  %v4420_v22 = vld [vmem:[#allocation4 + $0x3a0] sm:$0xff]  ;;  %v4421_v20 = vld [vmem:[#allocation4 + $0x3a8] sm:$0xff]  ;;  %v4425_v52 = vld [vmem:[#allocation4 + $0x3d0] sm:$0xff] }
 0x14c   : > { %v3877_v12 = vcombine.low %v3869_v0, %v3876_v23  ;;  %v2832_v13 = vrot.slane %v1723_v33, %v13619_v32  ;;  %v1694_v46 = vcombine.high %v1692_v45, %v1692_v45  ;;  %v1708_v14 = vrot.slane %v1692_v45, %v13617_v31  ;;  %4551 = vst.msk [vmem:[#allocation5 + $0x300] sm:$0xff] %vm4198_vm3, %v4423_v4  ;;  %v4424_v51 = vld [vmem:[#allocation4 + $0x3c8] sm:$0xff]  ;;  %v4912_v23 = vpop.permute.xlu0 %4911 }
 0x14d   : > { %v3893_v15 = vrot.slane %v3879_v8, %v13628_v36  ;;  %v2836_v17 = vrot.slane %v1725_v10, %v13619_v32  ;;  %v3895_v18 = vcombine.low %v2824_v48, %v2828_v35  ;;  %v1742_v19 = vcombine.high %v1734_v7, %v1734_v7  ;;  %4548 = vst.msk [vmem:[#allocation5 + $0x2e8] sm:$0xff] %vm4198_vm3, %v4420_v22  ;;  %v4676_v55 = vld [vmem:[#allocation4 + $0x3a1] sm:$0xff]  ;;  %v4677_v30 = vld [vmem:[#allocation4 + $0x3a9] sm:$0xff]  ;;  %v4914_v35 = vpop.permute.xlu1 %4913 }
 0x14e   : > { %4295 = vst.msk [vmem:[#allocation4 + $0x3e9] sm:$0xff] %vm4198_vm3, %v3877_v12  ;;  %4299 = vst.msk [vmem:[#allocation4 + $0x411] sm:$0xff] %vm4198_vm3, %v3877_v12  ;;  %v1722_v40 = vrot.slane %v1694_v46, %v13617_v31  ;;  %v1724_v41 = vcombine.high %v1708_v14, %v1708_v14  ;;  %v2840_v21 = vrot.slane %v1708_v14, %v13619_v32  ;;  %5019 = vrot.lane.b32.xlu0 %v4673_v11, %s13117_s24 }
 0x14f   : > { %v1750_v26 = vrot.slane %v1734_v7, %v13617_v31  ;;  %4549 = vst.msk [vmem:[#allocation5 + $0x2f0] sm:$0xff] %vm4198_vm3, %v4421_v20  ;;  %v3894_v42 = vcombine.low %v3886_v9, %v3893_v15  ;;  %v3896_v44 = vcombine.low %v2832_v13, %v2836_v17  ;;  %v3903_v49 = vrot.slane %v3895_v18, %v13628_v36  ;;  %v4422_v34 = vld [vmem:[#allocation4 + $0x3b0] sm:$0xff]  ;;  %v4426_v5 = vld [vmem:[#allocation4 + $0x3d8] sm:$0xff] }
 0x150   : > { %5257 = vst.msk [vmem:[#allocation5 + $0x108] sm:$0xff] %vm5223_vm4, %v4906_v24  ;;  %v1764_v50 = vrot.slane %v1742_v19, %v13617_v31  ;;  %5021 = vrot.lane.b32.xlu1 %v4674_v27, %s13117_s24  ;;  %v1726_v53 = vcombine.high %v1722_v40, %v1722_v40  ;;  %v2844_v16 = vrot.slane %v1722_v40, %v13619_v32  ;;  %5258 = vst.msk [vmem:[#allocation5 + $0x110] sm:$0xff] %vm5223_vm4, %v4908_v54  ;;  %v4678_v33 = vld [vmem:[#allocation4 + $0x3b1] sm:$0xff]  ;;  %v4679_v27 = vld [vmem:[#allocation4 + $0x3c1] sm:$0xff]  ;;  %v4916_v40 = vpop.permute.xlu0 %4915 }
 0x151   : > { %v2848_v43 = vrot.slane %v1724_v41, %v13619_v32  ;;  %v1772_v25 = vcombine.high %v1750_v26, %v1750_v26  ;;  %4552 = vst.msk [vmem:[#allocation5 + $0x308] sm:$0xff] %vm4198_vm3, %v4424_v51  ;;  %4553 = vst.msk [vmem:[#allocation5 + $0x310] sm:$0xff] %vm4198_vm3, %v4425_v52  ;;  %v3910_v57 = vrot.slane %v3896_v44, %v13628_v36  ;;  %v417_v20 = vld [vmem:[%s13233_s20 + $0xe0] sm:$0xff] }
 0x152   : > { %4296 = vst.msk [vmem:[#allocation4 + $0x3f1] sm:$0xff] %vm4198_vm3, %v3894_v42  ;;  %4300 = vst.msk [vmem:[#allocation4 + $0x419] sm:$0xff] %vm4198_vm3, %v3894_v42  ;;  %v1774_v58 = vcombine.high %v1764_v50, %v1764_v50  ;;  %v2856_v59 = vrot.slane %v1750_v26, %v13619_v32  ;;  %v2860_v60 = vrot.slane %v1764_v50, %v13619_v32  ;;  %5023 = vrot.lane.b32.xlu0 %v4675_v47, %s13117_s24  ;;  %v4680_v41 = vld [vmem:[#allocation4 + $0x3c9] sm:$0xff] }
 0x153   : > { %4550 = vst.msk [vmem:[#allocation5 + $0x2f8] sm:$0xff] %vm4198_vm3, %v4422_v34  ;;  %v2852_v29 = vrot.slane %v1726_v53, %v13619_v32  ;;  %v3912_v62 = vcombine.low %v2840_v21, %v2844_v16  ;;  %v2864_v63 = vrot.slane %v1772_v25, %v13619_v32  ;;  %v1727_v0 = vcombine.high %v14478_v37, %v14478_v37  ;;  %v4681_v34 = vld [vmem:[#allocation4 + $0x3d1] sm:$0xff] }
 0x154   : > { %5259 = vst.msk [vmem:[#allocation5 + $0x118] sm:$0xff] %vm5223_vm4, %v4910_v61  ;;  %v3911_v1 = vcombine.low %v3903_v49, %v3910_v57  ;;  %v2868_v2 = vrot.slane %v1774_v58, %v13619_v32  ;;  %v3929_v56 = vcombine.low %v2856_v59, %v2860_v60  ;;  %v1783_v3 = vrot.slane %v416_v28, %v13617_v31  ;;  %v4918_v49 = vpop.permute.xlu1 %4917  ;;  %v4920_v60 = vpop.permute.xlu0 %4919  ;;  %v4682_v61 = vld [vmem:[#allocation4 + $0x3d9] sm:$0xff] }
 0x155   : > { %5025 = vrot.lane.b32.xlu1 %v4676_v55, %s13117_s24  ;;  %v3913_v38 = vcombine.low %v2848_v43, %v2852_v29  ;;  %v3920_v45 = vrot.slane %v3912_v62, %v13628_v36  ;;  %v1741_v6 = vrot.slane %v1727_v0, %v13617_v31  ;;  %v1776_v37 = vcombine.high %v416_v28, %v416_v28  ;;  %v4427_v10 = vld [vmem:[#allocation4 + $0x3e8] sm:$0xff]  ;;  %v4431_v28 = vld [vmem:[#allocation4 + $0x410] sm:$0xff] }
 0x156   : > { %4554 = vst.msk [vmem:[#allocation5 + $0x318] sm:$0xff] %vm4198_vm3, %v4426_v5  ;;  %4297 = vst.msk [vmem:[#allocation4 + $0x3f9] sm:$0xff] %vm4198_vm3, %v3911_v1  ;;  %v3930_v48 = vcombine.low %v2864_v63, %v2868_v2  ;;  %v3937_v7 = vrot.slane %v3929_v56, %v13628_v36  ;;  %v1791_v8 = vcombine.high %v1783_v3, %v1783_v3  ;;  %5027 = vrot.lane.b32.xlu0 %v4677_v30, %s13117_s24 }
 0x157   : > { %4301 = vst.msk [vmem:[#allocation4 + $0x421] sm:$0xff] %vm4198_vm3, %v3911_v1  ;;  %v1799_v9 = vrot.slane %v1783_v3, %v13617_v31  ;;  %v3927_v4 = vrot.slane %v3913_v38, %v13628_v36  ;;  %v1743_v11 = vcombine.high %v1741_v6, %v1741_v6  ;;  %v1757_v12 = vrot.slane %v1741_v6, %v13617_v31 }
 0x158   : > { %5260 = vst.msk [vmem:[#allocation5 + $0x120] sm:$0xff] %vm5223_vm4, %v4912_v23  ;;  %v1790_v13 = vrot.slane %v1776_v37, %v13617_v31  ;;  %5261 = vst.msk [vmem:[#allocation5 + $0x128] sm:$0xff] %vm5223_vm4, %v4914_v35  ;;  %v3944_v46 = vrot.slane %v3930_v48, %v13628_v36  ;;  %v1813_v14 = vrot.slane %v1791_v8, %v13617_v31  ;;  %v4922_v1 = vpop.permute.xlu1 %4921 }
 0x159   : > { %4555 = vst.msk [vmem:[#allocation5 + $0x320] sm:$0xff] %vm4198_vm3, %v4427_v10  ;;  %v1821_v22 = vcombine.high %v1799_v9, %v1799_v9  ;;  %v2888_v39 = vrot.slane %v1799_v9, %v13619_v32  ;;  %5029 = vrot.lane.b32.xlu1 %v4678_v33, %s13117_s24  ;;  %v3928_v15 = vcombine.low %v3920_v45, %v3927_v4  ;;  %v4428_v24 = vld [vmem:[#allocation4 + $0x3f0] sm:$0xff]  ;;  %4559 = vst.msk [vmem:[#allocation5 + $0x340] sm:$0xff] %vm4198_vm3, %v4431_v28  ;;  %v4432_v37 = vld [vmem:[#allocation4 + $0x418] sm:$0xff]  ;;  %v4924_v10 = vpop.permute.xlu0 %4923 }
 0x15a   : > { %v1771_v17 = vrot.slane %v1743_v11, %v13617_v31  ;;  %v1773_v18 = vcombine.high %v1757_v12, %v1757_v12  ;;  %v2872_v19 = vrot.slane %v1757_v12, %v13619_v32  ;;  %v3945_v21 = vcombine.low %v3937_v7, %v3944_v46  ;;  %4556 = vst.msk [vmem:[#allocation5 + $0x328] sm:$0xff] %vm4198_vm3, %v4428_v24  ;;  %v4683_v33 = vld [vmem:[#allocation4 + $0x3e9] sm:$0xff]  ;;  %v4684_v35 = vld [vmem:[#allocation4 + $0x3f1] sm:$0xff] }
 0x15b   : > { %v1823_v26 = vcombine.high %v1813_v14, %v1813_v14  ;;  %v2892_v42 = vrot.slane %v1813_v14, %v13619_v32  ;;  %v2896_v44 = vrot.slane %v1821_v22, %v13619_v32  ;;  %5262 = vst.msk [vmem:[#allocation5 + $0x130] sm:$0xff] %vm5223_vm4, %v4916_v40  ;;  %v1792_v47 = vcombine.high %v1790_v13, %v1790_v13  ;;  %v418_v46 = vld [vmem:[%s13233_s20 + $0xe8] sm:$0xff] }
 0x15c   : > { %4298 = vst.msk [vmem:[#allocation4 + $0x401] sm:$0xff] %vm4198_vm3, %v3928_v15  ;;  %4302 = vst.msk [vmem:[#allocation4 + $0x429] sm:$0xff] %vm4198_vm3, %v3928_v15  ;;  %v1775_v50 = vcombine.high %v1771_v17, %v1771_v17  ;;  %v2876_v51 = vrot.slane %v1771_v17, %v13619_v32  ;;  %v2880_v52 = vrot.slane %v1773_v18, %v13619_v32  ;;  %5031 = vrot.lane.b32.xlu0 %v4679_v27, %s13117_s24  ;;  %v4926_v22 = vpop.permute.xlu1 %4925 }
 0x15d   : > { %5263 = vst.msk [vmem:[#allocation5 + $0x138] sm:$0xff] %vm5223_vm4, %v4918_v49  ;;  %v2900_v53 = vrot.slane %v1823_v26, %v13619_v32  ;;  %v3963_v16 = vcombine.low %v2888_v39, %v2892_v42  ;;  %v1806_v43 = vrot.slane %v1790_v13, %v13617_v31  ;;  %v1832_v25 = vrot.slane %v417_v20, %v13617_v31  ;;  %v4429_v59 = vld [vmem:[#allocation4 + $0x3f8] sm:$0xff] }
 0x15e   : > { %4303 = vst.msk [vmem:[#allocation4 + $0x439] sm:$0xff] %vm4198_vm3, %v3945_v21  ;;  %4307 = vst.msk [vmem:[#allocation4 + $0x461] sm:$0xff] %vm4198_vm3, %v3945_v21  ;;  %5033 = vrot.lane.b32.xlu1 %v4680_v41, %s13117_s24  ;;  %v2884_v54 = vrot.slane %v1775_v50, %v13619_v32  ;;  %v3946_v55 = vcombine.low %v2872_v19, %v2876_v51  ;;  %v1820_v57 = vrot.slane %v1792_v47, %v13617_v31  ;;  %v4433_v23 = vld [vmem:[#allocation4 + $0x420] sm:$0xff]  ;;  %v4928_v50 = vpop.permute.xlu0 %4927 }
 0x15f   : > { %v1825_v58 = vcombine.high %v417_v20, %v417_v20  ;;  %v3964_v29 = vcombine.low %v2896_v44, %v2900_v53  ;;  %v3971_v62 = vrot.slane %v3963_v16, %v13628_v36  ;;  %v1822_v63 = vcombine.high %v1806_v43, %v1806_v43  ;;  %4557 = vst.msk [vmem:[#allocation5 + $0x330] sm:$0xff] %vm4198_vm3, %v4429_v59  ;;  %v4685_v21 = vld [vmem:[#allocation4 + $0x3f9] sm:$0xff] }
 0x160   : > { %v2904_v0 = vrot.slane %v1806_v43, %v13619_v32  ;;  %5264 = vst.msk [vmem:[#allocation5 + $0x140] sm:$0xff] %vm5223_vm4, %v4920_v60  ;;  %v3947_v2 = vcombine.low %v2880_v52, %v2884_v54  ;;  %v3954_v56 = vrot.slane %v3946_v55, %v13628_v36  ;;  %v1824_v3 = vcombine.high %v1820_v57, %v1820_v57  ;;  %v4930_v43 = vpop.permute.xlu1 %4929  ;;  %v14621_v55 = vld [vmem:[%s13233_s20 + $0xf0] sm:$0xff] }
 0x161   : > { %v2908_v5 = vrot.slane %v1820_v57, %v13619_v32  ;;  %5035 = vrot.lane.b32.xlu0 %v4681_v34, %s13117_s24  ;;  %5265 = vst.msk [vmem:[#allocation5 + $0x148] sm:$0xff] %vm5223_vm4, %v4922_v1  ;;  %v3978_v30 = vrot.slane %v3964_v29, %v13628_v36  ;;  %v2912_v38 = vrot.slane %v1822_v63, %v13619_v32  ;;  %5266 = vst.msk [vmem:[#allocation5 + $0x150] sm:$0xff] %vm5223_vm4, %v4924_v10  ;;  %v4689_v10 = vld [vmem:[#allocation4 + $0x421] sm:$0xff] }
 0x162   : > { %v1840_v45 = vcombine.high %v1832_v25, %v1832_v25  ;;  %v1848_v6 = vrot.slane %v1832_v25, %v13617_v31  ;;  %5037 = vrot.lane.b32.xlu1 %v4682_v61, %s13117_s24  ;;  %v3961_v48 = vrot.slane %v3947_v2, %v13628_v36  ;;  %v2916_v7 = vrot.slane %v1824_v3, %v13619_v32  ;;  %v4687_v61 = vld [vmem:[#allocation4 + $0x411] sm:$0xff]  ;;  %v4932_v1 = vpop.permute.xlu0 %4931  ;;  %v4688_v2 = vld [vmem:[#allocation4 + $0x419] sm:$0xff] }
 0x163   : > { %v3980_v8 = vcombine.low %v2904_v0, %v2908_v5  ;;  %v1839_v9 = vrot.slane %v1825_v58, %v13617_v31  ;;  %4560 = vst.msk [vmem:[#allocation5 + $0x348] sm:$0xff] %vm4198_vm3, %v4432_v37  ;;  %4561 = vst.msk [vmem:[#allocation5 + $0x350] sm:$0xff] %vm4198_vm3, %v4433_v23  ;;  %v3979_v4 = vcombine.low %v3971_v62, %v3978_v30  ;;  %v4430_v14 = vld [vmem:[#allocation4 + $0x400] sm:$0xff]  ;;  %v4434_v40 = vld [vmem:[#allocation4 + $0x428] sm:$0xff] }
 0x164   : > { %v1862_v11 = vrot.slane %v1840_v45, %v13617_v31  ;;  %v1870_v12 = vcombine.high %v1848_v6, %v1848_v6  ;;  %v2920_v13 = vrot.slane %v1848_v6, %v13619_v32  ;;  %v3962_v39 = vcombine.low %v3954_v56, %v3961_v48  ;;  %4558 = vst.msk [vmem:[#allocation5 + $0x338] sm:$0xff] %vm4198_vm3, %v4430_v14  ;;  %v4686_v51 = vld [vmem:[#allocation4 + $0x401] sm:$0xff] }
 0x165   : > { %v3981_v27 = vcombine.low %v2912_v38, %v2916_v7  ;;  %v3988_v15 = vrot.slane %v3980_v8, %v13628_v36  ;;  %v1841_v17 = vcombine.high %v1839_v9, %v1839_v9  ;;  %5039 = vrot.lane.b32.xlu0 %v4683_v33, %s13117_s24  ;;  %5267 = vst.msk [vmem:[#allocation5 + $0x158] sm:$0xff] %vm5223_vm4, %v4926_v22  ;;  %v4435_v41 = vld [vmem:[#allocation4 + $0x438] sm:$0xff]  ;;  %5268 = vst.msk [vmem:[#allocation5 + $0x160] sm:$0xff] %vm5223_vm4, %v4928_v50  ;;  %v4934_v38 = vpop.permute.xlu1 %4933  ;;  %v4690_v22 = vld [vmem:[#allocation4 + $0x429] sm:$0xff] }
 0x166   : > { %4305 = vst.msk [vmem:[#allocation4 + $0x449] sm:$0xff] %vm4198_vm3, %v3979_v4  ;;  %4309 = vst.msk [vmem:[#allocation4 + $0x471] sm:$0xff] %vm4198_vm3, %v3979_v4  ;;  %v1872_v18 = vcombine.high %v1862_v11, %v1862_v11  ;;  %v2924_v19 = vrot.slane %v1862_v11, %v13619_v32  ;;  %v2928_v20 = vrot.slane %v1870_v12, %v13619_v32  ;;  %5041 = vrot.lane.b32.xlu1 %v4684_v35, %s13117_s24  ;;  %v4936_v14 = vpop.permute.xlu0 %4935  ;;  %v4691_v50 = vld [vmem:[#allocation4 + $0x439] sm:$0xff] }
 0x167   : > { %v1855_v24 = vrot.slane %v1839_v9, %v13617_v31  ;;  %4304 = vst.msk [vmem:[#allocation4 + $0x441] sm:$0xff] %vm4198_vm3, %v3962_v39  ;;  %4308 = vst.msk [vmem:[#allocation4 + $0x469] sm:$0xff] %vm4198_vm3, %v3962_v39  ;;  %v3995_v26 = vrot.slane %v3981_v27, %v13628_v36  ;;  %v1869_v42 = vrot.slane %v1841_v17, %v13617_v31 }
 0x168   : > { %v1881_v44 = vrot.slane %v418_v46, %v13617_v31  ;;  %v1874_v49 = vcombine.high %v418_v46, %v418_v46  ;;  %4562 = vst.msk [vmem:[#allocation5 + $0x358] sm:$0xff] %vm4198_vm3, %v4434_v40  ;;  %4563 = vst.msk [vmem:[#allocation5 + $0x360] sm:$0xff] %vm4198_vm3, %v4435_v41  ;;  %v2932_v52 = vrot.slane %v1872_v18, %v13619_v32  ;;  %v4439_v46 = vld [vmem:[#allocation4 + $0x460] sm:$0xff] }
 0x169   : > { %v3997_v47 = vcombine.low %v2920_v13, %v2924_v19  ;;  %v1871_v53 = vcombine.high %v1855_v24, %v1855_v24  ;;  %v2936_v16 = vrot.slane %v1855_v24, %v13619_v32  ;;  %v3996_v25 = vcombine.low %v3988_v15, %v3995_v26  ;;  %5043 = vrot.lane.b32.xlu0 %v4685_v21, %s13117_s24  ;;  %v4938_v18 = vpop.permute.xlu1 %4937 }
 0x16a   : > { %v1873_v28 = vcombine.high %v1869_v42, %v1869_v42  ;;  %v2940_v34 = vrot.slane %v1869_v42, %v13619_v32  ;;  %v1889_v54 = vcombine.high %v1881_v44, %v1881_v44  ;;  %5269 = vst.msk [vmem:[#allocation5 + $0x168] sm:$0xff] %vm5223_vm4, %v4930_v43  ;;  %v3998_v57 = vcombine.low %v2928_v20, %v2932_v52 }
 0x16b   : > { %v4005_v58 = vrot.slane %v3997_v47, %v13628_v36  ;;  %v2944_v59 = vrot.slane %v1871_v53, %v13619_v32  ;;  %v1897_v60 = vrot.slane %v1881_v44, %v13617_v31  ;;  %5045 = vrot.lane.b32.xlu1 %v4686_v51, %s13117_s24  ;;  %4306 = vst.msk [vmem:[#allocation4 + $0x451] sm:$0xff] %vm4198_vm3, %v3996_v25  ;;  %4310 = vst.msk [vmem:[#allocation4 + $0x479] sm:$0xff] %vm4198_vm3, %v3996_v25  ;;  %v420_v44 = vld [vmem:[%s13233_s20 + $0xf8] sm:$0xff]  ;;  %v4940_v25 = vpop.permute.xlu0 %4939 }
 0x16c   : > { %v2948_v29 = vrot.slane %v1873_v28, %v13619_v32  ;;  %v4014_v62 = vcombine.low %v2936_v16, %v2940_v34  ;;  %v1911_v63 = vrot.slane %v1889_v54, %v13617_v31  ;;  %v1888_v0 = vrot.slane %v1874_v49, %v13617_v31  ;;  %5270 = vst.msk [vmem:[#allocation5 + $0x170] sm:$0xff] %vm5223_vm4, %v4932_v1 }
 0x16d   : > { %v4012_v56 = vrot.slane %v3998_v57, %v13628_v36  ;;  %v1919_v3 = vcombine.high %v1897_v60, %v1897_v60  ;;  %v2952_v5 = vrot.slane %v1897_v60, %v13619_v32  ;;  %v1930_v30 = vrot.slane %v14621_v55, %v13617_v31  ;;  %5047 = vrot.lane.b32.xlu0 %v4687_v61, %s13117_s24 }
 0x16e   : > { %v4015_v45 = vcombine.low %v2944_v59, %v2948_v29  ;;  %v4022_v6 = vrot.slane %v4014_v62, %v13628_v36  ;;  %v1921_v37 = vcombine.high %v1911_v63, %v1911_v63  ;;  %v2956_v23 = vrot.slane %v1911_v63, %v13619_v32  ;;  %5271 = vst.msk [vmem:[#allocation5 + $0x178] sm:$0xff] %vm5223_vm4, %v4934_v38  ;;  %v4436_v9 = vld [vmem:[#allocation4 + $0x440] sm:$0xff]  ;;  %v4437_v13 = vld [vmem:[#allocation4 + $0x448] sm:$0xff]  ;;  %v4441_v43 = vld [vmem:[#allocation4 + $0x470] sm:$0xff]  ;;  %v4942_v59 = vpop.permute.xlu1 %4941 }
 0x16f   : > { %v4013_v33 = vcombine.low %v4005_v58, %v4012_v56  ;;  %v2960_v48 = vrot.slane %v1919_v3, %v13619_v32  ;;  %v1890_v7 = vcombine.high %v1888_v0, %v1888_v0  ;;  %v1904_v8 = vrot.slane %v1888_v0, %v13617_v31  ;;  %5049 = vrot.lane.b32.xlu1 %v4688_v2, %s13117_s24  ;;  %v4440_v16 = vld [vmem:[#allocation4 + $0x468] sm:$0xff] }
 0x170   : > { %v4029_v35 = vrot.slane %v4015_v45, %v13628_v36  ;;  %v2964_v4 = vrot.slane %v1921_v37, %v13619_v32  ;;  %v4031_v11 = vcombine.low %v2952_v5, %v2956_v23  ;;  %v1938_v12 = vcombine.high %v1930_v30, %v1930_v30  ;;  %4564 = vst.msk [vmem:[#allocation5 + $0x368] sm:$0xff] %vm4198_vm3, %v4436_v9  ;;  %v4692_v28 = vld [vmem:[#allocation4 + $0x441] sm:$0xff]  ;;  %v4693_v56 = vld [vmem:[#allocation4 + $0x449] sm:$0xff] }
 0x171   : > { %4311 = vst.msk [vmem:[#allocation4 + $0x489] sm:$0xff] %vm4198_vm3, %v4013_v33  ;;  %4315 = vst.msk [vmem:[#allocation4 + $0x4b1] sm:$0xff] %vm4198_vm3, %v4013_v33  ;;  %v1918_v39 = vrot.slane %v1890_v7, %v13617_v31  ;;  %v1920_v27 = vcombine.high %v1904_v8, %v1904_v8  ;;  %v2968_v15 = vrot.slane %v1904_v8, %v13619_v32  ;;  %5051 = vrot.lane.b32.xlu0 %v4689_v10, %s13117_s24 }
 0x172   : > { %v1946_v17 = vrot.slane %v1930_v30, %v13617_v31  ;;  %4565 = vst.msk [vmem:[#allocation5 + $0x370] sm:$0xff] %vm4198_vm3, %v4437_v13  ;;  %4567 = vst.msk [vmem:[#allocation5 + $0x380] sm:$0xff] %vm4198_vm3, %v4439_v46  ;;  %v4030_v19 = vcombine.low %v4022_v6, %v4029_v35  ;;  %v4032_v20 = vcombine.low %v2960_v48, %v2964_v4  ;;  %v4438_v49 = vld [vmem:[#allocation4 + $0x450] sm:$0xff]  ;;  %v4442_v2 = vld [vmem:[#allocation4 + $0x478] sm:$0xff]  ;;  %v4944_v6 = vpop.permute.xlu0 %4943  ;;  %v4946_v8 = vpop.permute.xlu1 %4945 }
 0x173   : > { %5272 = vst.msk [vmem:[#allocation5 + $0x180] sm:$0xff] %vm5223_vm4, %v4936_v14  ;;  %v4039_v24 = vrot.slane %v4031_v11, %v13628_v36  ;;  %v1960_v40 = vrot.slane %v1938_v12, %v13617_v31  ;;  %5273 = vst.msk [vmem:[#allocation5 + $0x188] sm:$0xff] %vm5223_vm4, %v4938_v18  ;;  %v1922_v41 = vcombine.high %v1918_v39, %v1918_v39  ;;  %5053 = vrot.lane.b32.xlu1 %v4690_v22, %s13117_s24  ;;  %v4694_v37 = vld [vmem:[#allocation4 + $0x451] sm:$0xff]  ;;  %v4695_v22 = vld [vmem:[#allocation4 + $0x461] sm:$0xff] }
 0x174   : > { %v2972_v21 = vrot.slane %v1918_v39, %v13619_v32  ;;  %v2976_v26 = vrot.slane %v1920_v27, %v13619_v32  ;;  %v1968_v42 = vcombine.high %v1946_v17, %v1946_v17  ;;  %4312 = vst.msk [vmem:[#allocation4 + $0x491] sm:$0xff] %vm4198_vm3, %v4030_v19  ;;  %4316 = vst.msk [vmem:[#allocation4 + $0x4b9] sm:$0xff] %vm4198_vm3, %v4030_v19  ;;  %v4696_v19 = vld [vmem:[#allocation4 + $0x469] sm:$0xff] }
 0x175   : > { %v4046_v51 = vrot.slane %v4032_v20, %v13628_v36  ;;  %v1970_v52 = vcombine.high %v1960_v40, %v1960_v40  ;;  %v2984_v47 = vrot.slane %v1946_v17, %v13619_v32  ;;  %v2988_v53 = vrot.slane %v1960_v40, %v13619_v32  ;;  %4566 = vst.msk [vmem:[#allocation5 + $0x378] sm:$0xff] %vm4198_vm3, %v4438_v49 }
 0x176   : > { %v2980_v34 = vrot.slane %v1922_v41, %v13619_v32  ;;  %v4048_v54 = vcombine.low %v2968_v15, %v2972_v21  ;;  %v2992_v57 = vrot.slane %v1968_v42, %v13619_v32  ;;  %v1923_v58 = vcombine.high %v14621_v55, %v14621_v55  ;;  %4568 = vst.msk [vmem:[#allocation5 + $0x388] sm:$0xff] %vm4198_vm3, %v4440_v16  ;;  %v4948_v18 = vpop.permute.xlu0 %4947  ;;  %v4950_v21 = vpop.permute.xlu1 %4949 }
 0x177   : > { %4569 = vst.msk [vmem:[#allocation5 + $0x390] sm:$0xff] %vm4198_vm3, %v4441_v43  ;;  %v4047_v60 = vcombine.low %v4039_v24, %v4046_v51  ;;  %v2996_v61 = vrot.slane %v1970_v52, %v13619_v32  ;;  %v4065_v29 = vcombine.low %v2984_v47, %v2988_v53  ;;  %v1979_v62 = vrot.slane %v420_v44, %v13617_v31  ;;  %v4697_v47 = vld [vmem:[#allocation4 + $0x471] sm:$0xff] }
 0x178   : > { %5274 = vst.msk [vmem:[#allocation5 + $0x190] sm:$0xff] %vm5223_vm4, %v4940_v25  ;;  %5055 = vrot.lane.b32.xlu0 %v4691_v50, %s13117_s24  ;;  %5275 = vst.msk [vmem:[#allocation5 + $0x198] sm:$0xff] %vm5223_vm4, %v4942_v59  ;;  %v4049_v63 = vcombine.low %v2976_v26, %v2980_v34  ;;  %v4056_v55 = vrot.slane %v4048_v54, %v13628_v36  ;;  %v1937_v0 = vrot.slane %v1923_v58, %v13617_v31  ;;  %v4443_v45 = vld [vmem:[#allocation4 + $0x488] sm:$0xff]  ;;  %v4698_v54 = vld [vmem:[#allocation4 + $0x479] sm:$0xff] }
 0x179   : > { %v1972_v1 = vcombine.high %v420_v44, %v420_v44  ;;  %5057 = vrot.lane.b32.xlu1 %v4692_v28, %s13117_s24  ;;  %4313 = vst.msk [vmem:[#allocation4 + $0x499] sm:$0xff] %vm4198_vm3, %v4047_v60  ;;  %4317 = vst.msk [vmem:[#allocation4 + $0x4c1] sm:$0xff] %vm4198_vm3, %v4047_v60  ;;  %v4066_v3 = vcombine.low %v2992_v57, %v2996_v61  ;;  %v4073_v5 = vrot.slane %v4065_v29, %v13628_v36  ;;  %v4447_v28 = vld [vmem:[#allocation4 + $0x4b0] sm:$0xff] }
 0x17a   : > { %v1987_v30 = vcombine.high %v1979_v62, %v1979_v62  ;;  %v1995_v38 = vrot.slane %v1979_v62, %v13617_v31  ;;  %4570 = vst.msk [vmem:[#allocation5 + $0x398] sm:$0xff] %vm4198_vm3, %v4442_v2  ;;  %v4063_v23 = vrot.slane %v4049_v63, %v13628_v36  ;;  %v1939_v33 = vcombine.high %v1937_v0, %v1937_v0  ;;  %v4952_v34 = vpop.permute.xlu0 %4951  ;;  %v4954_v60 = vpop.permute.xlu1 %4953  ;;  %v4699_v2 = vld [vmem:[#allocation4 + $0x489] sm:$0xff] }
 0x17b   : > { %v1953_v48 = vrot.slane %v1937_v0, %v13617_v31  ;;  %v1986_v7 = vrot.slane %v1972_v1, %v13617_v31  ;;  %4571 = vst.msk [vmem:[#allocation5 + $0x3a0] sm:$0xff] %vm4198_vm3, %v4443_v45  ;;  %v4080_v9 = vrot.slane %v4066_v3, %v13628_v36  ;;  %v4444_v14 = vld [vmem:[#allocation4 + $0x490] sm:$0xff]  ;;  %4575 = vst.msk [vmem:[#allocation5 + $0x3c0] sm:$0xff] %vm4198_vm3, %v4447_v28  ;;  %v4448_v0 = vld [vmem:[#allocation4 + $0x4b8] sm:$0xff] }
 0x17c   : > { %5276 = vst.msk [vmem:[#allocation5 + $0x1a0] sm:$0xff] %vm5223_vm4, %v4944_v6  ;;  %v2009_v10 = vrot.slane %v1987_v30, %v13617_v31  ;;  %v2017_v35 = vcombine.high %v1995_v38, %v1995_v38  ;;  %v3016_v4 = vrot.slane %v1995_v38, %v13619_v32  ;;  %5059 = vrot.lane.b32.xlu0 %v4693_v56, %s13117_s24  ;;  %5277 = vst.msk [vmem:[#allocation5 + $0x1a8] sm:$0xff] %vm5223_vm4, %v4946_v8  ;;  %v4700_v30 = vld [vmem:[#allocation4 + $0x491] sm:$0xff] }
 0x17d   : > { %v4064_v11 = vcombine.low %v4056_v55, %v4063_v23  ;;  %v1967_v12 = vrot.slane %v1939_v33, %v13617_v31  ;;  %v1969_v13 = vcombine.high %v1953_v48, %v1953_v48  ;;  %v3000_v46 = vrot.slane %v1953_v48, %v13619_v32  ;;  %5061 = vrot.lane.b32.xlu1 %v4694_v37, %s13117_s24 }
 0x17e   : > { %v4081_v39 = vcombine.low %v4073_v5, %v4080_v9  ;;  %v2019_v27 = vcombine.high %v2009_v10, %v2009_v10  ;;  %v3020_v15 = vrot.slane %v2009_v10, %v13619_v32  ;;  %v3024_v17 = vrot.slane %v2017_v35, %v13619_v32  ;;  %4572 = vst.msk [vmem:[#allocation5 + $0x3a8] sm:$0xff] %vm4198_vm3, %v4444_v14  ;;  %v4956_v5 = vpop.permute.xlu0 %4955 }
 0x17f   : > { %4314 = vst.msk [vmem:[#allocation4 + $0x4a1] sm:$0xff] %vm4198_vm3, %v4064_v11  ;;  %4318 = vst.msk [vmem:[#allocation4 + $0x4c9] sm:$0xff] %vm4198_vm3, %v4064_v11  ;;  %v1971_v20 = vcombine.high %v1967_v12, %v1967_v12  ;;  %v3004_v24 = vrot.slane %v1967_v12, %v13619_v32  ;;  %v3008_v40 = vrot.slane %v1969_v13, %v13619_v32 }
 0x180   : > { %v1988_v41 = vcombine.high %v1986_v7, %v1986_v7  ;;  %5278 = vst.msk [vmem:[#allocation5 + $0x1b0] sm:$0xff] %vm5223_vm4, %v4948_v18  ;;  %v3028_v26 = vrot.slane %v2019_v27, %v13619_v32  ;;  %v4099_v42 = vcombine.low %v3016_v4, %v3020_v15  ;;  %v2002_v44 = vrot.slane %v1986_v7, %v13617_v31  ;;  %v4445_v52 = vld [vmem:[#allocation4 + $0x498] sm:$0xff]  ;;  %v4449_v1 = vld [vmem:[#allocation4 + $0x4c0] sm:$0xff] }
 0x181   : > { %4319 = vst.msk [vmem:[#allocation4 + $0x4d9] sm:$0xff] %vm4198_vm3, %v4081_v39  ;;  %4323 = vst.msk [vmem:[#allocation4 + $0x501] sm:$0xff] %vm4198_vm3, %v4081_v39  ;;  %5063 = vrot.lane.b32.xlu0 %v4695_v22, %s13117_s24  ;;  %v3012_v49 = vrot.slane %v1971_v20, %v13619_v32  ;;  %v4082_v50 = vcombine.low %v3000_v46, %v3004_v24  ;;  %5065 = vrot.lane.b32.xlu1 %v4696_v19, %s13117_s24  ;;  %v4701_v48 = vld [vmem:[#allocation4 + $0x499] sm:$0xff]  ;;  %v4705_v46 = vld [vmem:[#allocation4 + $0x4c1] sm:$0xff] }
 0x182   : > { %5279 = vst.msk [vmem:[#allocation5 + $0x1b8] sm:$0xff] %vm5223_vm4, %v4950_v21  ;;  %v2016_v51 = vrot.slane %v1988_v41, %v13617_v31  ;;  %v4100_v53 = vcombine.low %v3024_v17, %v3028_v26  ;;  %v4107_v16 = vrot.slane %v4099_v42, %v13628_v36  ;;  %v2018_v43 = vcombine.high %v2002_v44, %v2002_v44  ;;  %v4960_v7 = vpop.permute.xlu0 %4959  ;;  %v4704_v4 = vld [vmem:[#allocation4 + $0x4b9] sm:$0xff]  ;;  %v5352_v21 = vld [vmem:[#allocation4 + $0x2] sm:$0xff]  ;;  %v5353_v42 = vld [vmem:[#allocation4 + $0xa] sm:$0xff] }
 0x183   : > { %v3032_v25 = vrot.slane %v2002_v44, %v13619_v32  ;;  %4573 = vst.msk [vmem:[#allocation5 + $0x3b0] sm:$0xff] %vm4198_vm3, %v4445_v52  ;;  %v4083_v57 = vcombine.low %v3008_v40, %v3012_v49  ;;  %v4090_v58 = vrot.slane %v4082_v50, %v13628_v36  ;;  %4576 = vst.msk [vmem:[#allocation5 + $0x3c8] sm:$0xff] %vm4198_vm3, %v4448_v0  ;;  %v5354_v49 = vld [vmem:[#allocation4 + $0x12] sm:$0xff]  ;;  %v5365_v0 = vld [vmem:[#allocation4 + $0x82] sm:$0xff] }
 0x184   : > { %v2020_v59 = vcombine.high %v2016_v51, %v2016_v51  ;;  %v3036_v31 = vrot.slane %v2016_v51, %v13619_v32  ;;  %5280 = vst.msk [vmem:[#allocation5 + $0x1c0] sm:$0xff] %vm5223_vm4, %v4952_v34  ;;  %v4114_v61 = vrot.slane %v4100_v53, %v13628_v36  ;;  %v3040_v29 = vrot.slane %v2018_v43, %v13619_v32  ;;  %v5355_v51 = vld [vmem:[#allocation4 + $0x1a] sm:$0xff]  ;;  %v5359_v34 = vld [vmem:[#allocation4 + $0x42] sm:$0xff] }
 0x185   : > { %5067 = vrot.lane.b32.xlu0 %v4697_v47, %s13117_s24  ;;  %5281 = vst.msk [vmem:[#allocation5 + $0x1c8] sm:$0xff] %vm5223_vm4, %v4954_v60  ;;  %v4097_v62 = vrot.slane %v4083_v57, %v13628_v36  ;;  %5069 = vrot.lane.b32.xlu1 %v4698_v54, %s13117_s24  ;;  %5282 = vst.msk [vmem:[#allocation5 + $0x1d0] sm:$0xff] %vm5223_vm4, %v4956_v5  ;;  %v5356_v47 = vld [vmem:[#allocation4 + $0x2a] sm:$0xff]  ;;  %v5360_v57 = vld [vmem:[#allocation4 + $0x52] sm:$0xff] }
 0x186   : > { %v3044_v63 = vrot.slane %v2020_v59, %v13619_v32  ;;  %v4116_v55 = vcombine.low %v3032_v25, %v3036_v31  ;;  %v4115_v56 = vcombine.low %v4107_v16, %v4114_v61  ;;  %v4446_v3 = vld [vmem:[#allocation4 + $0x4a0] sm:$0xff]  ;;  %4577 = vst.msk [vmem:[#allocation5 + $0x3d0] sm:$0xff] %vm4198_vm3, %v4449_v1  ;;  %v4958_v32 = vpop.permute.xlu1 %4957  ;;  %v4450_v23 = vld [vmem:[#allocation4 + $0x4c8] sm:$0xff]  ;;  %v4964_v35 = vpop.permute.xlu0 %4963  ;;  %v5357_v16 = vld [vmem:[#allocation4 + $0x32] sm:$0xff] }
 0x187   : > { %v4098_v38 = vcombine.low %v4090_v58, %v4097_v62  ;;  %4574 = vst.msk [vmem:[#allocation5 + $0x3b8] sm:$0xff] %vm4198_vm3, %v4446_v3  ;;  %4578 = vst.msk [vmem:[#allocation5 + $0x3d8] sm:$0xff] %vm4198_vm3, %v4450_v23  ;;  %v4702_v8 = vld [vmem:[#allocation4 + $0x4a1] sm:$0xff]  ;;  %v4706_v22 = vld [vmem:[#allocation4 + $0x4c9] sm:$0xff] }
 0x188   : > { %v4117_v45 = vcombine.low %v3040_v29, %v3044_v63  ;;  %v4124_v6 = vrot.slane %v4116_v55, %v13628_v36  ;;  %4321 = vst.msk [vmem:[#allocation4 + $0x4e9] sm:$0xff] %vm4198_vm3, %v4115_v56  ;;  %4325 = vst.msk [vmem:[#allocation4 + $0x511] sm:$0xff] %vm4198_vm3, %v4115_v56  ;;  %v4451_v33 = vld [vmem:[#allocation4 + $0x4d8] sm:$0xff]  ;;  %v5362_v60 = vld [vmem:[#allocation4 + $0x62] sm:$0xff] }
 0x189   : > { %5071 = vrot.lane.b32.xlu0 %v4699_v2, %s13117_s24  ;;  %5283 = vst.msk [vmem:[#allocation5 + $0x1d8] sm:$0xff] %vm5223_vm4, %v4958_v32  ;;  %5073 = vrot.lane.b32.xlu1 %v4700_v30, %s13117_s24  ;;  %5284 = vst.msk [vmem:[#allocation5 + $0x1e0] sm:$0xff] %vm5223_vm4, %v4960_v7  ;;  %v4707_v15 = vld [vmem:[#allocation4 + $0x4d9] sm:$0xff]  ;;  %v5363_v29 = vld [vmem:[#allocation4 + $0x6a] sm:$0xff] }
 0x18a   : > { %4320 = vst.msk [vmem:[#allocation4 + $0x4e1] sm:$0xff] %vm4198_vm3, %v4098_v38  ;;  %4324 = vst.msk [vmem:[#allocation4 + $0x509] sm:$0xff] %vm4198_vm3, %v4098_v38  ;;  %v4131_v37 = vrot.slane %v4117_v45, %v13628_v36  ;;  %v4962_v10 = vpop.permute.xlu1 %4961  ;;  %v4703_v36 = vld [vmem:[#allocation4 + $0x4b1] sm:$0xff]  ;;  %v4968_v14 = vpop.permute.xlu0 %4967  ;;  %v5358_v25 = vld [vmem:[#allocation4 + $0x3a] sm:$0xff] }
 0x18b   : > { %4579 = vst.msk [vmem:[#allocation5 + $0x3e0] sm:$0xff] %vm4198_vm3, %v4451_v33  ;;  %v5361_v59 = vld [vmem:[#allocation4 + $0x5a] sm:$0xff]  ;;  %v5366_v2 = vld [vmem:[#allocation4 + $0x8a] sm:$0xff]  ;;  %v5367_v3 = vld [vmem:[#allocation4 + $0x92] sm:$0xff] }
 0x18c   : > { %v4132_v9 = vcombine.low %v4124_v6, %v4131_v37  ;;  %5285 = vst.msk [vmem:[#allocation5 + $0x1e8] sm:$0xff] %vm5223_vm4, %v4962_v10  ;;  %5286 = vst.msk [vmem:[#allocation5 + $0x1f0] sm:$0xff] %vm5223_vm4, %v4964_v35  ;;  %v5364_v63 = vld [vmem:[#allocation4 + $0x7a] sm:$0xff]  ;;  %v5368_v30 = vld [vmem:[#allocation4 + $0xa2] sm:$0xff] }
 0x18d   : > { %5075 = vrot.lane.b32.xlu0 %v4701_v48, %s13117_s24  ;;  %5077 = vrot.lane.b32.xlu1 %v4702_v8, %s13117_s24  ;;  %5288 = vst.msk [vmem:[#allocation5 + $0x200] sm:$0xff] %vm5223_vm4, %v4968_v14  ;;  %v5369_v45 = vld [vmem:[#allocation4 + $0xaa] sm:$0xff]  ;;  %v5370_v32 = vld [vmem:[#allocation4 + $0xb2] sm:$0xff]  ;;  %v5371_v23 = vld [vmem:[#allocation4 + $0xba] sm:$0xff] }
 0x18e   : > { %4322 = vst.msk [vmem:[#allocation4 + $0x4f1] sm:$0xff] %vm4198_vm3, %v4132_v9  ;;  %4326 = vst.msk [vmem:[#allocation4 + $0x519] sm:$0xff] %vm4198_vm3, %v4132_v9  ;;  %v4966_v11 = vpop.permute.xlu1 %4965  ;;  %v4972_v17 = vpop.permute.xlu0 %4971  ;;  %v5372_v48 = vld [vmem:[#allocation4 + $0xca] sm:$0xff]  ;;  %v5373_v8 = vld [vmem:[#allocation4 + $0xd2] sm:$0xff] }
 0x18f   : > { %5287 = vst.msk [vmem:[#allocation5 + $0x1f8] sm:$0xff] %vm5223_vm4, %v4966_v11  ;;  %5290 = vst.msk [vmem:[#allocation5 + $0x210] sm:$0xff] %vm5223_vm4, %v4972_v17  ;;  %v4709_v20 = vld [vmem:[#allocation4 + $0x4e9] sm:$0xff]  ;;  %v5374_v10 = vld [vmem:[#allocation4 + $0xda] sm:$0xff] }
 0x190   : > { %v5375_v35 = vld [vmem:[#allocation4 + $0xe2] sm:$0xff]  ;;  %v5376_v11 = vld [vmem:[#allocation4 + $0xf2] sm:$0xff] }
 0x191   : > { %v4452_v12 = vld [vmem:[#allocation4 + $0x4e0] sm:$0xff]  ;;  %v4453_v13 = vld [vmem:[#allocation4 + $0x4e8] sm:$0xff]  ;;  %5079 = vrot.lane.b32.xlu0 %v4703_v36, %s13117_s24  ;;  %5081 = vrot.lane.b32.xlu1 %v4704_v4, %s13117_s24 }
 0x192   : > { %4580 = vst.msk [vmem:[#allocation5 + $0x3e8] sm:$0xff] %vm4198_vm3, %v4452_v12  ;;  %4581 = vst.msk [vmem:[#allocation5 + $0x3f0] sm:$0xff] %vm4198_vm3, %v4453_v13  ;;  %v4970_v39 = vpop.permute.xlu1 %4969  ;;  %v4708_v18 = vld [vmem:[#allocation4 + $0x4e1] sm:$0xff]  ;;  %v4976_v24 = vpop.permute.xlu0 %4975 }
 0x193   : > { %5289 = vst.msk [vmem:[#allocation5 + $0x208] sm:$0xff] %vm5223_vm4, %v4970_v39  ;;  %5292 = vst.msk [vmem:[#allocation5 + $0x220] sm:$0xff] %vm5223_vm4, %v4976_v24  ;;  %v5377_v13 = vld [vmem:[#allocation4 + $0xfa] sm:$0xff]  ;;  %v5378_v14 = vld [vmem:[#allocation4 + $0x102] sm:$0xff] }
 0x194   : > { %v5379_v39 = vld [vmem:[#allocation4 + $0x10a] sm:$0xff] }
 0x195   : > { %v4454_v27 = vld [vmem:[#allocation4 + $0x4f0] sm:$0xff]  ;;  %5083 = vrot.lane.b32.xlu0 %v4705_v46, %s13117_s24  ;;  %5085 = vrot.lane.b32.xlu1 %v4706_v22, %s13117_s24 }
 0x196   : > { %4582 = vst.msk [vmem:[#allocation5 + $0x3f8] sm:$0xff] %vm4198_vm3, %v4454_v27  ;;  %v4974_v19 = vpop.permute.xlu1 %4973  ;;  %v4710_v40 = vld [vmem:[#allocation4 + $0x4f1] sm:$0xff]  ;;  %v4980_v26 = vpop.permute.xlu0 %4979 }
 0x197   : > { %5291 = vst.msk [vmem:[#allocation5 + $0x218] sm:$0xff] %vm5223_vm4, %v4974_v19  ;;  %5294 = vst.msk [vmem:[#allocation5 + $0x230] sm:$0xff] %vm5223_vm4, %v4980_v26 }
 0x199   : > { %5087 = vrot.lane.b32.xlu0 %v4707_v15, %s13117_s24  ;;  %5089 = vrot.lane.b32.xlu1 %v4708_v18, %s13117_s24  ;;  %v5380_v15 = vld [vmem:[#allocation4 + $0x11a] sm:$0xff]  ;;  %v5381_v18 = vld [vmem:[#allocation4 + $0x122] sm:$0xff] }
 0x19a   : > { %v4978_v41 = vpop.permute.xlu1 %4977  ;;  %v4984_v50 = vpop.permute.xlu0 %4983 }
 0x19b   : > { %5293 = vst.msk [vmem:[#allocation5 + $0x228] sm:$0xff] %vm5223_vm4, %v4978_v41  ;;  %5296 = vst.msk [vmem:[#allocation5 + $0x240] sm:$0xff] %vm5223_vm4, %v4984_v50 }
 0x19d   : > { %5091 = vrot.lane.b32.xlu0 %v4709_v20, %s13117_s24  ;;  %5093 = vrot.lane.b32.xlu1 %v4710_v40, %s13117_s24  ;;  %v5382_v20 = vld [vmem:[#allocation4 + $0x12a] sm:$0xff]  ;;  %v5383_v40 = vld [vmem:[#allocation4 + $0x132] sm:$0xff] }
 0x19e   : > { %v4982_v44 = vpop.permute.xlu1 %4981  ;;  %v4988_v53 = vpop.permute.xlu0 %4987 }
 0x19f   : > { %5295 = vst.msk [vmem:[#allocation5 + $0x238] sm:$0xff] %vm5223_vm4, %v4982_v44  ;;  %5298 = vst.msk [vmem:[#allocation5 + $0x250] sm:$0xff] %vm5223_vm4, %v4988_v53 }
 0x1a1   : > { %5608 = vrot.lane.b32.xlu0 %v5352_v21, %s13120_s27  ;;  %5610 = vrot.lane.b32.xlu1 %v5353_v42, %s13120_s27  ;;  %v5384_v21 = vld [vmem:[#allocation4 + $0x142] sm:$0xff]  ;;  %v5385_v42 = vld [vmem:[#allocation4 + $0x14a] sm:$0xff] }
 0x1a2   : > { %v4986_v52 = vpop.permute.xlu1 %4985  ;;  %v4992_v28 = vpop.permute.xlu0 %4991 }
 0x1a3   : > { %5297 = vst.msk [vmem:[#allocation5 + $0x248] sm:$0xff] %vm5223_vm4, %v4986_v52  ;;  %5300 = vst.msk [vmem:[#allocation5 + $0x260] sm:$0xff] %vm5223_vm4, %v4992_v28 }
 0x1a5   : > { %5612 = vrot.lane.b32.xlu0 %v5354_v49, %s13120_s27  ;;  %5614 = vrot.lane.b32.xlu1 %v5355_v51, %s13120_s27  ;;  %v5386_v49 = vld [vmem:[#allocation4 + $0x152] sm:$0xff]  ;;  %v5387_v51 = vld [vmem:[#allocation4 + $0x15a] sm:$0xff] }
 0x1a6   : > { %v4990_v43 = vpop.permute.xlu1 %4989  ;;  %v4996_v58 = vpop.permute.xlu0 %4995 }
 0x1a7   : > { %5299 = vst.msk [vmem:[#allocation5 + $0x258] sm:$0xff] %vm5223_vm4, %v4990_v43  ;;  %5302 = vst.msk [vmem:[#allocation5 + $0x270] sm:$0xff] %vm5223_vm4, %v4996_v58 }
 0x1a9   : > { %5616 = vrot.lane.b32.xlu0 %v5356_v47, %s13120_s27  ;;  %5618 = vrot.lane.b32.xlu1 %v5357_v16, %s13120_s27  ;;  %v5388_v47 = vld [vmem:[#allocation4 + $0x16a] sm:$0xff]  ;;  %v5389_v16 = vld [vmem:[#allocation4 + $0x172] sm:$0xff] }
 0x1aa   : > { %v4994_v54 = vpop.permute.xlu1 %4993  ;;  %v5000_v61 = vpop.permute.xlu0 %4999 }
 0x1ab   : > { %5301 = vst.msk [vmem:[#allocation5 + $0x268] sm:$0xff] %vm5223_vm4, %v4994_v54  ;;  %5304 = vst.msk [vmem:[#allocation5 + $0x280] sm:$0xff] %vm5223_vm4, %v5000_v61 }
 0x1ad   : > { %5620 = vrot.lane.b32.xlu0 %v5358_v25, %s13120_s27  ;;  %5622 = vrot.lane.b32.xlu1 %v5359_v34, %s13120_s27  ;;  %v5390_v25 = vld [vmem:[#allocation4 + $0x17a] sm:$0xff]  ;;  %v5391_v34 = vld [vmem:[#allocation4 + $0x182] sm:$0xff] }
 0x1ae   : > { %v4998_v31 = vpop.permute.xlu1 %4997  ;;  %v5004_v55 = vpop.permute.xlu0 %5003 }
 0x1af   : > { %5303 = vst.msk [vmem:[#allocation5 + $0x278] sm:$0xff] %vm5223_vm4, %v4998_v31  ;;  %5306 = vst.msk [vmem:[#allocation5 + $0x290] sm:$0xff] %vm5223_vm4, %v5004_v55 }
 0x1b1   : > { %5624 = vrot.lane.b32.xlu0 %v5360_v57, %s13120_s27  ;;  %5626 = vrot.lane.b32.xlu1 %v5361_v59, %s13120_s27  ;;  %v5392_v57 = vld [vmem:[#allocation4 + $0x192] sm:$0xff]  ;;  %v5393_v59 = vld [vmem:[#allocation4 + $0x19a] sm:$0xff] }
 0x1b2   : > { %v5002_v62 = vpop.permute.xlu1 %5001 }
 0x1b3   : > { %5305 = vst.msk [vmem:[#allocation5 + $0x288] sm:$0xff] %vm5223_vm4, %v5002_v62  ;;  %v5008_v56 = vpop.permute.xlu0 %5007 }
 0x1b4   : > { %5308 = vst.msk [vmem:[#allocation5 + $0x2a0] sm:$0xff] %vm5223_vm4, %v5008_v56 }
 0x1b5   : > { %5628 = vrot.lane.b32.xlu0 %v5362_v60, %s13120_s27  ;;  %5630 = vrot.lane.b32.xlu1 %v5363_v29, %s13120_s27  ;;  %v5394_v60 = vld [vmem:[#allocation4 + $0x1a2] sm:$0xff]  ;;  %v5395_v29 = vld [vmem:[#allocation4 + $0x1aa] sm:$0xff] }
 0x1b6   : > { %v5006_v1 = vpop.permute.xlu1 %5005 }
 0x1b7   : > { %5307 = vst.msk [vmem:[#allocation5 + $0x298] sm:$0xff] %vm5223_vm4, %v5006_v1  ;;  %v5012_v38 = vpop.permute.xlu0 %5011 }
 0x1b8   : > { %5310 = vst.msk [vmem:[#allocation5 + $0x2b0] sm:$0xff] %vm5223_vm4, %v5012_v38 }
 0x1b9   : > { %5632 = vrot.lane.b32.xlu0 %v5364_v63, %s13120_s27  ;;  %5634 = vrot.lane.b32.xlu1 %v5365_v0, %s13120_s27  ;;  %v5396_v63 = vld [vmem:[#allocation4 + $0x1ba] sm:$0xff]  ;;  %v5397_v0 = vld [vmem:[#allocation4 + $0x1c2] sm:$0xff] }
 0x1ba   : > { %v5010_v5 = vpop.permute.xlu1 %5009 }
 0x1bb   : > { %5309 = vst.msk [vmem:[#allocation5 + $0x2a8] sm:$0xff] %vm5223_vm4, %v5010_v5 }
 0x1bc   : > { %v5016_v37 = vpop.permute.xlu0 %5015 }
 0x1bd   : > { %5636 = vrot.lane.b32.xlu0 %v5366_v2, %s13120_s27  ;;  %5638 = vrot.lane.b32.xlu1 %v5367_v3, %s13120_s27  ;;  %5312 = vst.msk [vmem:[#allocation5 + $0x2c0] sm:$0xff] %vm5223_vm4, %v5016_v37  ;;  %v5398_v2 = vld [vmem:[#allocation4 + $0x1ca] sm:$0xff]  ;;  %v5399_v3 = vld [vmem:[#allocation4 + $0x1d2] sm:$0xff] }
 0x1be   : > { %v5014_v6 = vpop.permute.xlu1 %5013 }
 0x1bf   : > { %5311 = vst.msk [vmem:[#allocation5 + $0x2b8] sm:$0xff] %vm5223_vm4, %v5014_v6 }
 0x1c0   : > { %v5020_v7 = vpop.permute.xlu0 %5019 }
 0x1c1   : > { %5640 = vrot.lane.b32.xlu0 %v5368_v30, %s13120_s27  ;;  %5642 = vrot.lane.b32.xlu1 %v5369_v45, %s13120_s27  ;;  %5314 = vst.msk [vmem:[#allocation5 + $0x2d0] sm:$0xff] %vm5223_vm4, %v5020_v7  ;;  %v5400_v30 = vld [vmem:[#allocation4 + $0x1e2] sm:$0xff]  ;;  %v5401_v45 = vld [vmem:[#allocation4 + $0x1ea] sm:$0xff] }
 0x1c2   : > { %v5018_v33 = vpop.permute.xlu1 %5017 }
 0x1c3   : > { %5313 = vst.msk [vmem:[#allocation5 + $0x2c8] sm:$0xff] %vm5223_vm4, %v5018_v33 }
 0x1c4   : > { %v5024_v36 = vpop.permute.xlu0 %5023 }
 0x1c5   : > { %5644 = vrot.lane.b32.xlu0 %v5370_v32, %s13120_s27  ;;  %5646 = vrot.lane.b32.xlu1 %v5371_v23, %s13120_s27  ;;  %5316 = vst.msk [vmem:[#allocation5 + $0x2e0] sm:$0xff] %vm5223_vm4, %v5024_v36  ;;  %v5402_v32 = vld [vmem:[#allocation4 + $0x1f2] sm:$0xff]  ;;  %v5403_v23 = vld [vmem:[#allocation4 + $0x1fa] sm:$0xff] }
 0x1c6   : > { %v5022_v9 = vpop.permute.xlu1 %5021 }
 0x1c7   : > { %5315 = vst.msk [vmem:[#allocation5 + $0x2d8] sm:$0xff] %vm5223_vm4, %v5022_v9 }
 0x1c8   : > { %v5028_v12 = vpop.permute.xlu0 %5027 }
 0x1c9   : > { %5648 = vrot.lane.b32.xlu0 %v5372_v48, %s13120_s27  ;;  %5650 = vrot.lane.b32.xlu1 %v5373_v8, %s13120_s27  ;;  %5318 = vst.msk [vmem:[#allocation5 + $0x2f0] sm:$0xff] %vm5223_vm4, %v5028_v12  ;;  %v5404_v48 = vld [vmem:[#allocation4 + $0x20a] sm:$0xff]  ;;  %v5405_v8 = vld [vmem:[#allocation4 + $0x212] sm:$0xff] }
 0x1ca   : > { %v5026_v4 = vpop.permute.xlu1 %5025 }
 0x1cb   : > { %5317 = vst.msk [vmem:[#allocation5 + $0x2e8] sm:$0xff] %vm5223_vm4, %v5026_v4 }
 0x1cd   : > { %5652 = vrot.lane.b32.xlu0 %v5374_v10, %s13120_s27  ;;  %5654 = vrot.lane.b32.xlu1 %v5375_v35, %s13120_s27  ;;  %v5406_v10 = vld [vmem:[#allocation4 + $0x21a] sm:$0xff]  ;;  %v5407_v35 = vld [vmem:[#allocation4 + $0x222] sm:$0xff] }
 0x1ce   : > { %v5030_v46 = vpop.permute.xlu1 %5029  ;;  %v5032_v22 = vpop.permute.xlu0 %5031 }
 0x1cf   : > { %5319 = vst.msk [vmem:[#allocation5 + $0x2f8] sm:$0xff] %vm5223_vm4, %v5030_v46  ;;  %5320 = vst.msk [vmem:[#allocation5 + $0x300] sm:$0xff] %vm5223_vm4, %v5032_v22 }
 0x1d1   : > { %5656 = vrot.lane.b32.xlu0 %v5376_v11, %s13120_s27  ;;  %5658 = vrot.lane.b32.xlu1 %v5377_v13, %s13120_s27  ;;  %v5408_v11 = vld [vmem:[#allocation4 + $0x232] sm:$0xff]  ;;  %v5409_v13 = vld [vmem:[#allocation4 + $0x23a] sm:$0xff] }
 0x1d2   : > { %v5034_v27 = vpop.permute.xlu1 %5033 }
 0x1d3   : > { %5321 = vst.msk [vmem:[#allocation5 + $0x308] sm:$0xff] %vm5223_vm4, %v5034_v27  ;;  %v5036_v17 = vpop.permute.xlu0 %5035 }
 0x1d4   : > { %5322 = vst.msk [vmem:[#allocation5 + $0x310] sm:$0xff] %vm5223_vm4, %v5036_v17 }
 0x1d5   : > { %5660 = vrot.lane.b32.xlu0 %v5378_v14, %s13120_s27  ;;  %5662 = vrot.lane.b32.xlu1 %v5379_v39, %s13120_s27  ;;  %v5410_v14 = vld [vmem:[#allocation4 + $0x242] sm:$0xff]  ;;  %v5411_v39 = vld [vmem:[#allocation4 + $0x24a] sm:$0xff] }
 0x1d6   : > { %v5038_v19 = vpop.permute.xlu1 %5037 }
 0x1d7   : > { %5323 = vst.msk [vmem:[#allocation5 + $0x318] sm:$0xff] %vm5223_vm4, %v5038_v19  ;;  %v5040_v24 = vpop.permute.xlu0 %5039 }
 0x1d8   : > { %5324 = vst.msk [vmem:[#allocation5 + $0x320] sm:$0xff] %vm5223_vm4, %v5040_v24 }
 0x1d9   : > { %5664 = vrot.lane.b32.xlu0 %v5380_v15, %s13120_s27  ;;  %5666 = vrot.lane.b32.xlu1 %v5381_v18, %s13120_s27  ;;  %v5412_v15 = vld [vmem:[#allocation4 + $0x25a] sm:$0xff]  ;;  %v5413_v18 = vld [vmem:[#allocation4 + $0x262] sm:$0xff] }
 0x1da   : > { %v5042_v41 = vpop.permute.xlu1 %5041 }
 0x1db   : > { %5325 = vst.msk [vmem:[#allocation5 + $0x328] sm:$0xff] %vm5223_vm4, %v5042_v41  ;;  %v5044_v26 = vpop.permute.xlu0 %5043 }
 0x1dc   : > { %5326 = vst.msk [vmem:[#allocation5 + $0x330] sm:$0xff] %vm5223_vm4, %v5044_v26 }
 0x1dd   : > { %5668 = vrot.lane.b32.xlu0 %v5382_v20, %s13120_s27  ;;  %5670 = vrot.lane.b32.xlu1 %v5383_v40, %s13120_s27  ;;  %v5414_v20 = vld [vmem:[#allocation4 + $0x26a] sm:$0xff]  ;;  %v5415_v40 = vld [vmem:[#allocation4 + $0x272] sm:$0xff] }
 0x1de   : > { %v5046_v44 = vpop.permute.xlu1 %5045 }
 0x1df   : > { %5327 = vst.msk [vmem:[#allocation5 + $0x338] sm:$0xff] %vm5223_vm4, %v5046_v44  ;;  %v5048_v50 = vpop.permute.xlu0 %5047 }
 0x1e0   : > { %5328 = vst.msk [vmem:[#allocation5 + $0x340] sm:$0xff] %vm5223_vm4, %v5048_v50 }
 0x1e1   : > { %5672 = vrot.lane.b32.xlu0 %v5384_v21, %s13120_s27  ;;  %5674 = vrot.lane.b32.xlu1 %v5385_v42, %s13120_s27  ;;  %v5416_v21 = vld [vmem:[#allocation4 + $0x282] sm:$0xff]  ;;  %v5417_v42 = vld [vmem:[#allocation4 + $0x28a] sm:$0xff] }
 0x1e2   : > { %v5050_v52 = vpop.permute.xlu1 %5049 }
 0x1e3   : > { %5329 = vst.msk [vmem:[#allocation5 + $0x348] sm:$0xff] %vm5223_vm4, %v5050_v52  ;;  %v5052_v53 = vpop.permute.xlu0 %5051 }
 0x1e4   : > { %5330 = vst.msk [vmem:[#allocation5 + $0x350] sm:$0xff] %vm5223_vm4, %v5052_v53 }
 0x1e5   : > { %5676 = vrot.lane.b32.xlu0 %v5386_v49, %s13120_s27  ;;  %5678 = vrot.lane.b32.xlu1 %v5387_v51, %s13120_s27  ;;  %v5418_v49 = vld [vmem:[#allocation4 + $0x292] sm:$0xff]  ;;  %v5419_v51 = vld [vmem:[#allocation4 + $0x29a] sm:$0xff] }
 0x1e6   : > { %v5054_v43 = vpop.permute.xlu1 %5053 }
 0x1e7   : > { %5331 = vst.msk [vmem:[#allocation5 + $0x358] sm:$0xff] %vm5223_vm4, %v5054_v43 }
 0x1e9   : > { %5680 = vrot.lane.b32.xlu0 %v5388_v47, %s13120_s27  ;;  %5682 = vrot.lane.b32.xlu1 %v5389_v16, %s13120_s27  ;;  %v5420_v47 = vld [vmem:[#allocation4 + $0x2aa] sm:$0xff]  ;;  %v5421_v16 = vld [vmem:[#allocation4 + $0x2b2] sm:$0xff] }
 0x1ea   : > { %v5056_v28 = vpop.permute.xlu0 %5055 }
 0x1eb   : > { %5332 = vst.msk [vmem:[#allocation5 + $0x360] sm:$0xff] %vm5223_vm4, %v5056_v28  ;;  %v5058_v54 = vpop.permute.xlu1 %5057 }
 0x1ec   : > { %5333 = vst.msk [vmem:[#allocation5 + $0x368] sm:$0xff] %vm5223_vm4, %v5058_v54 }
 0x1ed   : > { %5684 = vrot.lane.b32.xlu0 %v5390_v25, %s13120_s27  ;;  %5686 = vrot.lane.b32.xlu1 %v5391_v34, %s13120_s27  ;;  %v5422_v25 = vld [vmem:[#allocation4 + $0x2ba] sm:$0xff]  ;;  %v5423_v34 = vld [vmem:[#allocation4 + $0x2c2] sm:$0xff] }
 0x1ee   : > { %v5060_v58 = vpop.permute.xlu0 %5059 }
 0x1ef   : > { %5334 = vst.msk [vmem:[#allocation5 + $0x370] sm:$0xff] %vm5223_vm4, %v5060_v58  ;;  %v5062_v31 = vpop.permute.xlu1 %5061 }
 0x1f0   : > { %5335 = vst.msk [vmem:[#allocation5 + $0x378] sm:$0xff] %vm5223_vm4, %v5062_v31 }
 0x1f1   : > { %5688 = vrot.lane.b32.xlu0 %v5392_v57, %s13120_s27  ;;  %5690 = vrot.lane.b32.xlu1 %v5393_v59, %s13120_s27  ;;  %v5424_v57 = vld [vmem:[#allocation4 + $0x2d2] sm:$0xff]  ;;  %v5425_v59 = vld [vmem:[#allocation4 + $0x2da] sm:$0xff] }
 0x1f3   : > { %v5064_v61 = vpop.permute.xlu0 %5063  ;;  %v5066_v62 = vpop.permute.xlu1 %5065 }
 0x1f4   : > { %5336 = vst.msk [vmem:[#allocation5 + $0x380] sm:$0xff] %vm5223_vm4, %v5064_v61  ;;  %5337 = vst.msk [vmem:[#allocation5 + $0x388] sm:$0xff] %vm5223_vm4, %v5066_v62 }
 0x1f5   : > { %5692 = vrot.lane.b32.xlu0 %v5394_v60, %s13120_s27  ;;  %5694 = vrot.lane.b32.xlu1 %v5395_v29, %s13120_s27  ;;  %v5426_v60 = vld [vmem:[#allocation4 + $0x2e2] sm:$0xff]  ;;  %v5427_v29 = vld [vmem:[#allocation4 + $0x2ea] sm:$0xff] }
 0x1f7   : > { %v5068_v55 = vpop.permute.xlu0 %5067  ;;  %v5070_v1 = vpop.permute.xlu1 %5069 }
 0x1f8   : > { %5338 = vst.msk [vmem:[#allocation5 + $0x390] sm:$0xff] %vm5223_vm4, %v5068_v55  ;;  %5339 = vst.msk [vmem:[#allocation5 + $0x398] sm:$0xff] %vm5223_vm4, %v5070_v1 }
 0x1f9   : > { %5696 = vrot.lane.b32.xlu0 %v5396_v63, %s13120_s27  ;;  %5698 = vrot.lane.b32.xlu1 %v5397_v0, %s13120_s27  ;;  %v5428_v63 = vld [vmem:[#allocation4 + $0x2fa] sm:$0xff]  ;;  %v5429_v0 = vld [vmem:[#allocation4 + $0x302] sm:$0xff] }
 0x1fb   : > { %v5072_v56 = vpop.permute.xlu0 %5071  ;;  %v5074_v5 = vpop.permute.xlu1 %5073 }
 0x1fc   : > { %5340 = vst.msk [vmem:[#allocation5 + $0x3a0] sm:$0xff] %vm5223_vm4, %v5072_v56  ;;  %5341 = vst.msk [vmem:[#allocation5 + $0x3a8] sm:$0xff] %vm5223_vm4, %v5074_v5 }
 0x1fd   : > { %5700 = vrot.lane.b32.xlu0 %v5398_v2, %s13120_s27  ;;  %5702 = vrot.lane.b32.xlu1 %v5399_v3, %s13120_s27  ;;  %v5430_v2 = vld [vmem:[#allocation4 + $0x30a] sm:$0xff]  ;;  %v5431_v3 = vld [vmem:[#allocation4 + $0x312] sm:$0xff] }
 0x1ff   : > { %v5076_v38 = vpop.permute.xlu0 %5075  ;;  %v5078_v6 = vpop.permute.xlu1 %5077 }
 0x200   : > { %5342 = vst.msk [vmem:[#allocation5 + $0x3b0] sm:$0xff] %vm5223_vm4, %v5076_v38  ;;  %5343 = vst.msk [vmem:[#allocation5 + $0x3b8] sm:$0xff] %vm5223_vm4, %v5078_v6 }
 0x201   : > { %5704 = vrot.lane.b32.xlu0 %v5400_v30, %s13120_s27  ;;  %5706 = vrot.lane.b32.xlu1 %v5401_v45, %s13120_s27  ;;  %v5432_v30 = vld [vmem:[#allocation4 + $0x322] sm:$0xff]  ;;  %v5433_v45 = vld [vmem:[#allocation4 + $0x32a] sm:$0xff] }
 0x203   : > { %v5080_v37 = vpop.permute.xlu0 %5079  ;;  %v5082_v33 = vpop.permute.xlu1 %5081 }
 0x204   : > { %5344 = vst.msk [vmem:[#allocation5 + $0x3c0] sm:$0xff] %vm5223_vm4, %v5080_v37  ;;  %5345 = vst.msk [vmem:[#allocation5 + $0x3c8] sm:$0xff] %vm5223_vm4, %v5082_v33 }
 0x205   : > { %5708 = vrot.lane.b32.xlu0 %v5402_v32, %s13120_s27  ;;  %5710 = vrot.lane.b32.xlu1 %v5403_v23, %s13120_s27  ;;  %v5434_v32 = vld [vmem:[#allocation4 + $0x332] sm:$0xff]  ;;  %v5435_v23 = vld [vmem:[#allocation4 + $0x33a] sm:$0xff] }
 0x207   : > { %v5084_v7 = vpop.permute.xlu0 %5083  ;;  %v5086_v9 = vpop.permute.xlu1 %5085 }
 0x208   : > { %5346 = vst.msk [vmem:[#allocation5 + $0x3d0] sm:$0xff] %vm5223_vm4, %v5084_v7  ;;  %5347 = vst.msk [vmem:[#allocation5 + $0x3d8] sm:$0xff] %vm5223_vm4, %v5086_v9 }
 0x209   : > { %5712 = vrot.lane.b32.xlu0 %v5404_v48, %s13120_s27  ;;  %5714 = vrot.lane.b32.xlu1 %v5405_v8, %s13120_s27  ;;  %v5436_v48 = vld [vmem:[#allocation4 + $0x34a] sm:$0xff]  ;;  %v5437_v8 = vld [vmem:[#allocation4 + $0x352] sm:$0xff] }
 0x20b   : > { %v5088_v36 = vpop.permute.xlu0 %5087  ;;  %v5090_v4 = vpop.permute.xlu1 %5089 }
 0x20c   : > { %5348 = vst.msk [vmem:[#allocation5 + $0x3e0] sm:$0xff] %vm5223_vm4, %v5088_v36  ;;  %5349 = vst.msk [vmem:[#allocation5 + $0x3e8] sm:$0xff] %vm5223_vm4, %v5090_v4 }
 0x20d   : > { %5716 = vrot.lane.b32.xlu0 %v5406_v10, %s13120_s27  ;;  %5718 = vrot.lane.b32.xlu1 %v5407_v35, %s13120_s27  ;;  %v5438_v10 = vld [vmem:[#allocation4 + $0x35a] sm:$0xff]  ;;  %v5439_v35 = vld [vmem:[#allocation4 + $0x362] sm:$0xff] }
 0x20f   : > { %v5092_v12 = vpop.permute.xlu0 %5091  ;;  %v5094_v46 = vpop.permute.xlu1 %5093 }
 0x210   : > { %5350 = vst.msk [vmem:[#allocation5 + $0x3f0] sm:$0xff] %vm5223_vm4, %v5092_v12  ;;  %5351 = vst.msk [vmem:[#allocation5 + $0x3f8] sm:$0xff] %vm5223_vm4, %v5094_v46 }
 0x211   : > { %5720 = vrot.lane.b32.xlu0 %v5408_v11, %s13120_s27  ;;  %5722 = vrot.lane.b32.xlu1 %v5409_v13, %s13120_s27  ;;  %v5440_v11 = vld [vmem:[#allocation4 + $0x372] sm:$0xff]  ;;  %v5441_v13 = vld [vmem:[#allocation4 + $0x37a] sm:$0xff] }
 0x213   : > { %v5609_v22 = vpop.permute.xlu0 %5608  ;;  %v5611_v27 = vpop.permute.xlu1 %5610 }
 0x214   : > { %5993 = vst.msk [vmem:[#allocation5] sm:$0xff] %vm5992_vm5, %v5609_v22  ;;  %5994 = vst.msk [vmem:[#allocation5 + $0x8] sm:$0xff] %vm5992_vm5, %v5611_v27 }
 0x215   : > { %5724 = vrot.lane.b32.xlu0 %v5410_v14, %s13120_s27  ;;  %5726 = vrot.lane.b32.xlu1 %v5411_v39, %s13120_s27  ;;  %v5442_v14 = vld [vmem:[#allocation4 + $0x382] sm:$0xff]  ;;  %v5443_v39 = vld [vmem:[#allocation4 + $0x38a] sm:$0xff] }
 0x217   : > { %v5613_v17 = vpop.permute.xlu0 %5612  ;;  %v5615_v19 = vpop.permute.xlu1 %5614 }
 0x218   : > { %5995 = vst.msk [vmem:[#allocation5 + $0x10] sm:$0xff] %vm5992_vm5, %v5613_v17  ;;  %5996 = vst.msk [vmem:[#allocation5 + $0x18] sm:$0xff] %vm5992_vm5, %v5615_v19 }
 0x219   : > { %5728 = vrot.lane.b32.xlu0 %v5412_v15, %s13120_s27  ;;  %5730 = vrot.lane.b32.xlu1 %v5413_v18, %s13120_s27  ;;  %v5444_v15 = vld [vmem:[#allocation4 + $0x39a] sm:$0xff]  ;;  %v5445_v18 = vld [vmem:[#allocation4 + $0x3a2] sm:$0xff] }
 0x21b   : > { %v5617_v24 = vpop.permute.xlu0 %5616  ;;  %v5619_v41 = vpop.permute.xlu1 %5618 }
 0x21c   : > { %5997 = vst.msk [vmem:[#allocation5 + $0x20] sm:$0xff] %vm5992_vm5, %v5617_v24  ;;  %5998 = vst.msk [vmem:[#allocation5 + $0x28] sm:$0xff] %vm5992_vm5, %v5619_v41 }
 0x21d   : > { %5732 = vrot.lane.b32.xlu0 %v5414_v20, %s13120_s27  ;;  %5734 = vrot.lane.b32.xlu1 %v5415_v40, %s13120_s27  ;;  %v5446_v20 = vld [vmem:[#allocation4 + $0x3aa] sm:$0xff]  ;;  %v5447_v40 = vld [vmem:[#allocation4 + $0x3b2] sm:$0xff] }
 0x21f   : > { %v5621_v26 = vpop.permute.xlu0 %5620  ;;  %v5623_v44 = vpop.permute.xlu1 %5622 }
 0x220   : > { %5999 = vst.msk [vmem:[#allocation5 + $0x30] sm:$0xff] %vm5992_vm5, %v5621_v26  ;;  %6000 = vst.msk [vmem:[#allocation5 + $0x38] sm:$0xff] %vm5992_vm5, %v5623_v44 }
 0x221   : > { %5736 = vrot.lane.b32.xlu0 %v5416_v21, %s13120_s27  ;;  %5738 = vrot.lane.b32.xlu1 %v5417_v42, %s13120_s27  ;;  %v5448_v21 = vld [vmem:[#allocation4 + $0x3c2] sm:$0xff]  ;;  %v5449_v42 = vld [vmem:[#allocation4 + $0x3ca] sm:$0xff] }
 0x223   : > { %v5625_v50 = vpop.permute.xlu0 %5624  ;;  %v5627_v52 = vpop.permute.xlu1 %5626 }
 0x224   : > { %6001 = vst.msk [vmem:[#allocation5 + $0x40] sm:$0xff] %vm5992_vm5, %v5625_v50  ;;  %6002 = vst.msk [vmem:[#allocation5 + $0x48] sm:$0xff] %vm5992_vm5, %v5627_v52 }
 0x225   : > { %5740 = vrot.lane.b32.xlu0 %v5418_v49, %s13120_s27  ;;  %5742 = vrot.lane.b32.xlu1 %v5419_v51, %s13120_s27  ;;  %v5450_v49 = vld [vmem:[#allocation4 + $0x3d2] sm:$0xff]  ;;  %v5451_v51 = vld [vmem:[#allocation4 + $0x3da] sm:$0xff] }
 0x227   : > { %v5629_v53 = vpop.permute.xlu0 %5628  ;;  %v5631_v43 = vpop.permute.xlu1 %5630 }
 0x228   : > { %6003 = vst.msk [vmem:[#allocation5 + $0x50] sm:$0xff] %vm5992_vm5, %v5629_v53  ;;  %6004 = vst.msk [vmem:[#allocation5 + $0x58] sm:$0xff] %vm5992_vm5, %v5631_v43 }
 0x229   : > { %5744 = vrot.lane.b32.xlu0 %v5420_v47, %s13120_s27  ;;  %5746 = vrot.lane.b32.xlu1 %v5421_v16, %s13120_s27  ;;  %v5452_v47 = vld [vmem:[#allocation4 + $0x3ea] sm:$0xff]  ;;  %v5453_v16 = vld [vmem:[#allocation4 + $0x3f2] sm:$0xff] }
 0x22b   : > { %v5633_v28 = vpop.permute.xlu0 %5632  ;;  %v5635_v54 = vpop.permute.xlu1 %5634 }
 0x22c   : > { %6005 = vst.msk [vmem:[#allocation5 + $0x60] sm:$0xff] %vm5992_vm5, %v5633_v28  ;;  %6006 = vst.msk [vmem:[#allocation5 + $0x68] sm:$0xff] %vm5992_vm5, %v5635_v54 }
 0x22d   : > { %5748 = vrot.lane.b32.xlu0 %v5422_v25, %s13120_s27  ;;  %5750 = vrot.lane.b32.xlu1 %v5423_v34, %s13120_s27  ;;  %v5454_v25 = vld [vmem:[#allocation4 + $0x3fa] sm:$0xff]  ;;  %v5455_v34 = vld [vmem:[#allocation4 + $0x402] sm:$0xff] }
 0x22f   : > { %v5637_v58 = vpop.permute.xlu0 %5636  ;;  %v5639_v31 = vpop.permute.xlu1 %5638 }
 0x230   : > { %6007 = vst.msk [vmem:[#allocation5 + $0x70] sm:$0xff] %vm5992_vm5, %v5637_v58  ;;  %6008 = vst.msk [vmem:[#allocation5 + $0x78] sm:$0xff] %vm5992_vm5, %v5639_v31 }
 0x231   : > { %5752 = vrot.lane.b32.xlu0 %v5424_v57, %s13120_s27  ;;  %5754 = vrot.lane.b32.xlu1 %v5425_v59, %s13120_s27  ;;  %v5456_v57 = vld [vmem:[#allocation4 + $0x412] sm:$0xff]  ;;  %v5457_v59 = vld [vmem:[#allocation4 + $0x41a] sm:$0xff] }
 0x233   : > { %v5641_v61 = vpop.permute.xlu0 %5640  ;;  %v5643_v62 = vpop.permute.xlu1 %5642 }
 0x234   : > { %6009 = vst.msk [vmem:[#allocation5 + $0x80] sm:$0xff] %vm5992_vm5, %v5641_v61  ;;  %6010 = vst.msk [vmem:[#allocation5 + $0x88] sm:$0xff] %vm5992_vm5, %v5643_v62 }
 0x235   : > { %5756 = vrot.lane.b32.xlu0 %v5426_v60, %s13120_s27  ;;  %5758 = vrot.lane.b32.xlu1 %v5427_v29, %s13120_s27  ;;  %v5458_v60 = vld [vmem:[#allocation4 + $0x422] sm:$0xff]  ;;  %v5459_v29 = vld [vmem:[#allocation4 + $0x42a] sm:$0xff] }
 0x237   : > { %v5645_v55 = vpop.permute.xlu0 %5644  ;;  %v5647_v1 = vpop.permute.xlu1 %5646 }
 0x238   : > { %6011 = vst.msk [vmem:[#allocation5 + $0x90] sm:$0xff] %vm5992_vm5, %v5645_v55  ;;  %6012 = vst.msk [vmem:[#allocation5 + $0x98] sm:$0xff] %vm5992_vm5, %v5647_v1 }
 0x239   : > { %5760 = vrot.lane.b32.xlu0 %v5428_v63, %s13120_s27  ;;  %5762 = vrot.lane.b32.xlu1 %v5429_v0, %s13120_s27  ;;  %v5460_v63 = vld [vmem:[#allocation4 + $0x43a] sm:$0xff]  ;;  %v5461_v0 = vld [vmem:[#allocation4 + $0x442] sm:$0xff] }
 0x23b   : > { %v5649_v56 = vpop.permute.xlu0 %5648  ;;  %v5651_v5 = vpop.permute.xlu1 %5650 }
 0x23c   : > { %6013 = vst.msk [vmem:[#allocation5 + $0xa0] sm:$0xff] %vm5992_vm5, %v5649_v56  ;;  %6014 = vst.msk [vmem:[#allocation5 + $0xa8] sm:$0xff] %vm5992_vm5, %v5651_v5 }
 0x23d   : > { %5764 = vrot.lane.b32.xlu0 %v5430_v2, %s13120_s27  ;;  %5766 = vrot.lane.b32.xlu1 %v5431_v3, %s13120_s27  ;;  %v5462_v2 = vld [vmem:[#allocation4 + $0x44a] sm:$0xff]  ;;  %v5463_v3 = vld [vmem:[#allocation4 + $0x452] sm:$0xff] }
 0x23f   : > { %v5653_v38 = vpop.permute.xlu0 %5652  ;;  %v5655_v6 = vpop.permute.xlu1 %5654 }
 0x240   : > { %6015 = vst.msk [vmem:[#allocation5 + $0xb0] sm:$0xff] %vm5992_vm5, %v5653_v38  ;;  %6016 = vst.msk [vmem:[#allocation5 + $0xb8] sm:$0xff] %vm5992_vm5, %v5655_v6 }
 0x241   : > { %5768 = vrot.lane.b32.xlu0 %v5432_v30, %s13120_s27  ;;  %5770 = vrot.lane.b32.xlu1 %v5433_v45, %s13120_s27  ;;  %v5464_v30 = vld [vmem:[#allocation4 + $0x462] sm:$0xff]  ;;  %v5465_v45 = vld [vmem:[#allocation4 + $0x46a] sm:$0xff] }
 0x243   : > { %v5657_v37 = vpop.permute.xlu0 %5656  ;;  %v5659_v33 = vpop.permute.xlu1 %5658 }
 0x244   : > { %6017 = vst.msk [vmem:[#allocation5 + $0xc0] sm:$0xff] %vm5992_vm5, %v5657_v37  ;;  %6018 = vst.msk [vmem:[#allocation5 + $0xc8] sm:$0xff] %vm5992_vm5, %v5659_v33 }
 0x245   : > { %5772 = vrot.lane.b32.xlu0 %v5434_v32, %s13120_s27  ;;  %5774 = vrot.lane.b32.xlu1 %v5435_v23, %s13120_s27  ;;  %v5466_v32 = vld [vmem:[#allocation4 + $0x472] sm:$0xff]  ;;  %v5467_v23 = vld [vmem:[#allocation4 + $0x47a] sm:$0xff] }
 0x247   : > { %v5661_v7 = vpop.permute.xlu0 %5660  ;;  %v5663_v9 = vpop.permute.xlu1 %5662 }
 0x248   : > { %6019 = vst.msk [vmem:[#allocation5 + $0xd0] sm:$0xff] %vm5992_vm5, %v5661_v7  ;;  %6020 = vst.msk [vmem:[#allocation5 + $0xd8] sm:$0xff] %vm5992_vm5, %v5663_v9 }
 0x249   : > { %5776 = vrot.lane.b32.xlu0 %v5436_v48, %s13120_s27  ;;  %5778 = vrot.lane.b32.xlu1 %v5437_v8, %s13120_s27  ;;  %v5468_v48 = vld [vmem:[#allocation4 + $0x48a] sm:$0xff]  ;;  %v5469_v8 = vld [vmem:[#allocation4 + $0x492] sm:$0xff] }
 0x24b   : > { %v5665_v36 = vpop.permute.xlu0 %5664  ;;  %v5667_v4 = vpop.permute.xlu1 %5666 }
 0x24c   : > { %6021 = vst.msk [vmem:[#allocation5 + $0xe0] sm:$0xff] %vm5992_vm5, %v5665_v36  ;;  %6022 = vst.msk [vmem:[#allocation5 + $0xe8] sm:$0xff] %vm5992_vm5, %v5667_v4 }
 0x24d   : > { %5780 = vrot.lane.b32.xlu0 %v5438_v10, %s13120_s27  ;;  %5782 = vrot.lane.b32.xlu1 %v5439_v35, %s13120_s27  ;;  %v5470_v10 = vld [vmem:[#allocation4 + $0x49a] sm:$0xff]  ;;  %v5471_v35 = vld [vmem:[#allocation4 + $0x4a2] sm:$0xff] }
 0x24f   : > { %v5669_v12 = vpop.permute.xlu0 %5668  ;;  %v5671_v46 = vpop.permute.xlu1 %5670 }
 0x250   : > { %6023 = vst.msk [vmem:[#allocation5 + $0xf0] sm:$0xff] %vm5992_vm5, %v5669_v12  ;;  %6024 = vst.msk [vmem:[#allocation5 + $0xf8] sm:$0xff] %vm5992_vm5, %v5671_v46 }
 0x251   : > { %5784 = vrot.lane.b32.xlu0 %v5440_v11, %s13120_s27  ;;  %5786 = vrot.lane.b32.xlu1 %v5441_v13, %s13120_s27  ;;  %v5472_v11 = vld [vmem:[#allocation4 + $0x4b2] sm:$0xff]  ;;  %v5473_v13 = vld [vmem:[#allocation4 + $0x4ba] sm:$0xff] }
 0x253   : > { %v5673_v22 = vpop.permute.xlu0 %5672  ;;  %v5675_v27 = vpop.permute.xlu1 %5674 }
 0x254   : > { %6025 = vst.msk [vmem:[#allocation5 + $0x100] sm:$0xff] %vm5992_vm5, %v5673_v22  ;;  %6026 = vst.msk [vmem:[#allocation5 + $0x108] sm:$0xff] %vm5992_vm5, %v5675_v27 }
 0x255   : > { %5788 = vrot.lane.b32.xlu0 %v5442_v14, %s13120_s27  ;;  %5790 = vrot.lane.b32.xlu1 %v5443_v39, %s13120_s27  ;;  %v5474_v14 = vld [vmem:[#allocation4 + $0x4c2] sm:$0xff]  ;;  %v5475_v39 = vld [vmem:[#allocation4 + $0x4ca] sm:$0xff] }
 0x257   : > { %v5677_v17 = vpop.permute.xlu0 %5676  ;;  %v5679_v19 = vpop.permute.xlu1 %5678 }
 0x258   : > { %6027 = vst.msk [vmem:[#allocation5 + $0x110] sm:$0xff] %vm5992_vm5, %v5677_v17  ;;  %6028 = vst.msk [vmem:[#allocation5 + $0x118] sm:$0xff] %vm5992_vm5, %v5679_v19 }
 0x259   : > { %5792 = vrot.lane.b32.xlu0 %v5444_v15, %s13120_s27  ;;  %5794 = vrot.lane.b32.xlu1 %v5445_v18, %s13120_s27  ;;  %v5476_v15 = vld [vmem:[#allocation4 + $0x4da] sm:$0xff]  ;;  %v5477_v18 = vld [vmem:[#allocation4 + $0x4e2] sm:$0xff] }
 0x25b   : > { %v5681_v24 = vpop.permute.xlu0 %5680  ;;  %v5683_v41 = vpop.permute.xlu1 %5682 }
 0x25c   : > { %6029 = vst.msk [vmem:[#allocation5 + $0x120] sm:$0xff] %vm5992_vm5, %v5681_v24  ;;  %6030 = vst.msk [vmem:[#allocation5 + $0x128] sm:$0xff] %vm5992_vm5, %v5683_v41 }
 0x25d   : > { %5796 = vrot.lane.b32.xlu0 %v5446_v20, %s13120_s27  ;;  %5798 = vrot.lane.b32.xlu1 %v5447_v40, %s13120_s27  ;;  %v5478_v20 = vld [vmem:[#allocation4 + $0x4ea] sm:$0xff]  ;;  %v5479_v40 = vld [vmem:[#allocation4 + $0x4f2] sm:$0xff] }
 0x25f   : > { %v5685_v26 = vpop.permute.xlu0 %5684  ;;  %v5687_v44 = vpop.permute.xlu1 %5686 }
 0x260   : > { %6031 = vst.msk [vmem:[#allocation5 + $0x130] sm:$0xff] %vm5992_vm5, %v5685_v26  ;;  %6032 = vst.msk [vmem:[#allocation5 + $0x138] sm:$0xff] %vm5992_vm5, %v5687_v44 }
 0x261   : > { %5800 = vrot.lane.b32.xlu0 %v5448_v21, %s13120_s27  ;;  %5802 = vrot.lane.b32.xlu1 %v5449_v42, %s13120_s27  ;;  %v6121_v21 = vld [vmem:[#allocation4 + $0x28] sm:$0xff]  ;;  %v6122_v42 = vld [vmem:[#allocation4 + $0x30] sm:$0xff] }
 0x263   : > { %v5689_v50 = vpop.permute.xlu0 %5688  ;;  %v5691_v52 = vpop.permute.xlu1 %5690 }
 0x264   : > { %6033 = vst.msk [vmem:[#allocation5 + $0x140] sm:$0xff] %vm5992_vm5, %v5689_v50  ;;  %6034 = vst.msk [vmem:[#allocation5 + $0x148] sm:$0xff] %vm5992_vm5, %v5691_v52 }
 0x265   : > { %5804 = vrot.lane.b32.xlu0 %v5450_v49, %s13120_s27  ;;  %5806 = vrot.lane.b32.xlu1 %v5451_v51, %s13120_s27  ;;  %v6123_v49 = vld [vmem:[#allocation4 + $0x38] sm:$0xff]  ;;  %v6124_v51 = vld [vmem:[#allocation4 + $0x40] sm:$0xff] }
 0x267   : > { %v5693_v53 = vpop.permute.xlu0 %5692  ;;  %v5695_v43 = vpop.permute.xlu1 %5694 }
 0x268   : > { %6035 = vst.msk [vmem:[#allocation5 + $0x150] sm:$0xff] %vm5992_vm5, %v5693_v53  ;;  %6036 = vst.msk [vmem:[#allocation5 + $0x158] sm:$0xff] %vm5992_vm5, %v5695_v43 }
 0x269   : > { %5808 = vrot.lane.b32.xlu0 %v5452_v47, %s13120_s27  ;;  %5810 = vrot.lane.b32.xlu1 %v5453_v16, %s13120_s27  ;;  %v6125_v47 = vld [vmem:[#allocation4 + $0x50] sm:$0xff]  ;;  %v6126_v16 = vld [vmem:[#allocation4 + $0x58] sm:$0xff] }
 0x26b   : > { %v5697_v28 = vpop.permute.xlu0 %5696  ;;  %v5699_v54 = vpop.permute.xlu1 %5698 }
 0x26c   : > { %6037 = vst.msk [vmem:[#allocation5 + $0x160] sm:$0xff] %vm5992_vm5, %v5697_v28  ;;  %6038 = vst.msk [vmem:[#allocation5 + $0x168] sm:$0xff] %vm5992_vm5, %v5699_v54 }
 0x26d   : > { %5812 = vrot.lane.b32.xlu0 %v5454_v25, %s13120_s27  ;;  %5814 = vrot.lane.b32.xlu1 %v5455_v34, %s13120_s27  ;;  %v6127_v25 = vld [vmem:[#allocation4 + $0x60] sm:$0xff]  ;;  %v6128_v34 = vld [vmem:[#allocation4 + $0x68] sm:$0xff] }
 0x26f   : > { %v5701_v58 = vpop.permute.xlu0 %5700  ;;  %v5703_v31 = vpop.permute.xlu1 %5702 }
 0x270   : > { %6039 = vst.msk [vmem:[#allocation5 + $0x170] sm:$0xff] %vm5992_vm5, %v5701_v58  ;;  %6040 = vst.msk [vmem:[#allocation5 + $0x178] sm:$0xff] %vm5992_vm5, %v5703_v31 }
 0x271   : > { %5816 = vrot.lane.b32.xlu0 %v5456_v57, %s13120_s27  ;;  %5818 = vrot.lane.b32.xlu1 %v5457_v59, %s13120_s27  ;;  %v6129_v57 = vld [vmem:[#allocation4 + $0x78] sm:$0xff]  ;;  %v6130_v59 = vld [vmem:[#allocation4 + $0x80] sm:$0xff] }
 0x273   : > { %v5705_v61 = vpop.permute.xlu0 %5704  ;;  %v5707_v62 = vpop.permute.xlu1 %5706 }
 0x274   : > { %6041 = vst.msk [vmem:[#allocation5 + $0x180] sm:$0xff] %vm5992_vm5, %v5705_v61  ;;  %6042 = vst.msk [vmem:[#allocation5 + $0x188] sm:$0xff] %vm5992_vm5, %v5707_v62 }
 0x275   : > { %5820 = vrot.lane.b32.xlu0 %v5458_v60, %s13120_s27  ;;  %5822 = vrot.lane.b32.xlu1 %v5459_v29, %s13120_s27  ;;  %v6131_v60 = vld [vmem:[#allocation4 + $0x88] sm:$0xff]  ;;  %v6132_v29 = vld [vmem:[#allocation4 + $0x90] sm:$0xff] }
 0x277   : > { %v5709_v55 = vpop.permute.xlu0 %5708  ;;  %v5711_v1 = vpop.permute.xlu1 %5710 }
 0x278   : > { %6043 = vst.msk [vmem:[#allocation5 + $0x190] sm:$0xff] %vm5992_vm5, %v5709_v55  ;;  %6044 = vst.msk [vmem:[#allocation5 + $0x198] sm:$0xff] %vm5992_vm5, %v5711_v1 }
 0x279   : > { %5824 = vrot.lane.b32.xlu0 %v5460_v63, %s13120_s27  ;;  %5826 = vrot.lane.b32.xlu1 %v5461_v0, %s13120_s27  ;;  %v6133_v63 = vld [vmem:[#allocation4 + $0xa0] sm:$0xff]  ;;  %v6134_v0 = vld [vmem:[#allocation4 + $0xa8] sm:$0xff] }
 0x27b   : > { %v5713_v56 = vpop.permute.xlu0 %5712  ;;  %v5715_v5 = vpop.permute.xlu1 %5714 }
 0x27c   : > { %6045 = vst.msk [vmem:[#allocation5 + $0x1a0] sm:$0xff] %vm5992_vm5, %v5713_v56  ;;  %6046 = vst.msk [vmem:[#allocation5 + $0x1a8] sm:$0xff] %vm5992_vm5, %v5715_v5 }
 0x27d   : > { %5828 = vrot.lane.b32.xlu0 %v5462_v2, %s13120_s27  ;;  %5830 = vrot.lane.b32.xlu1 %v5463_v3, %s13120_s27  ;;  %v6135_v2 = vld [vmem:[#allocation4 + $0xb0] sm:$0xff]  ;;  %v6136_v3 = vld [vmem:[#allocation4 + $0xb8] sm:$0xff] }
 0x27f   : > { %v5717_v38 = vpop.permute.xlu0 %5716  ;;  %v5719_v6 = vpop.permute.xlu1 %5718 }
 0x280   : > { %6047 = vst.msk [vmem:[#allocation5 + $0x1b0] sm:$0xff] %vm5992_vm5, %v5717_v38  ;;  %6048 = vst.msk [vmem:[#allocation5 + $0x1b8] sm:$0xff] %vm5992_vm5, %v5719_v6 }
 0x281   : > { %5832 = vrot.lane.b32.xlu0 %v5464_v30, %s13120_s27  ;;  %5834 = vrot.lane.b32.xlu1 %v5465_v45, %s13120_s27  ;;  %v6137_v30 = vld [vmem:[#allocation4 + $0xc8] sm:$0xff]  ;;  %v6138_v45 = vld [vmem:[#allocation4 + $0xd0] sm:$0xff] }
 0x283   : > { %v5721_v37 = vpop.permute.xlu0 %5720  ;;  %v5723_v33 = vpop.permute.xlu1 %5722 }
 0x284   : > { %6049 = vst.msk [vmem:[#allocation5 + $0x1c0] sm:$0xff] %vm5992_vm5, %v5721_v37  ;;  %6050 = vst.msk [vmem:[#allocation5 + $0x1c8] sm:$0xff] %vm5992_vm5, %v5723_v33 }
 0x285   : > { %5836 = vrot.lane.b32.xlu0 %v5466_v32, %s13120_s27  ;;  %5838 = vrot.lane.b32.xlu1 %v5467_v23, %s13120_s27  ;;  %v6139_v32 = vld [vmem:[#allocation4 + $0xd8] sm:$0xff]  ;;  %v6140_v23 = vld [vmem:[#allocation4 + $0xe0] sm:$0xff] }
 0x287   : > { %v5725_v7 = vpop.permute.xlu0 %5724  ;;  %v5727_v9 = vpop.permute.xlu1 %5726 }
 0x288   : > { %6051 = vst.msk [vmem:[#allocation5 + $0x1d0] sm:$0xff] %vm5992_vm5, %v5725_v7  ;;  %6052 = vst.msk [vmem:[#allocation5 + $0x1d8] sm:$0xff] %vm5992_vm5, %v5727_v9 }
 0x289   : > { %5840 = vrot.lane.b32.xlu0 %v5468_v48, %s13120_s27  ;;  %5842 = vrot.lane.b32.xlu1 %v5469_v8, %s13120_s27  ;;  %v6141_v48 = vld [vmem:[#allocation4 + $0xf0] sm:$0xff]  ;;  %v6142_v8 = vld [vmem:[#allocation4 + $0xf8] sm:$0xff] }
 0x28b   : > { %v5729_v36 = vpop.permute.xlu0 %5728  ;;  %v5731_v4 = vpop.permute.xlu1 %5730 }
 0x28c   : > { %6053 = vst.msk [vmem:[#allocation5 + $0x1e0] sm:$0xff] %vm5992_vm5, %v5729_v36  ;;  %6054 = vst.msk [vmem:[#allocation5 + $0x1e8] sm:$0xff] %vm5992_vm5, %v5731_v4 }
 0x28d   : > { %5844 = vrot.lane.b32.xlu0 %v5470_v10, %s13120_s27  ;;  %5846 = vrot.lane.b32.xlu1 %v5471_v35, %s13120_s27  ;;  %v6143_v10 = vld [vmem:[#allocation4 + $0x100] sm:$0xff]  ;;  %v6144_v35 = vld [vmem:[#allocation4 + $0x108] sm:$0xff] }
 0x28f   : > { %v5733_v12 = vpop.permute.xlu0 %5732  ;;  %v5735_v46 = vpop.permute.xlu1 %5734 }
 0x290   : > { %6055 = vst.msk [vmem:[#allocation5 + $0x1f0] sm:$0xff] %vm5992_vm5, %v5733_v12  ;;  %6056 = vst.msk [vmem:[#allocation5 + $0x1f8] sm:$0xff] %vm5992_vm5, %v5735_v46 }
 0x291   : > { %5848 = vrot.lane.b32.xlu0 %v5472_v11, %s13120_s27  ;;  %5850 = vrot.lane.b32.xlu1 %v5473_v13, %s13120_s27  ;;  %v6145_v11 = vld [vmem:[#allocation4 + $0x118] sm:$0xff]  ;;  %v6146_v13 = vld [vmem:[#allocation4 + $0x120] sm:$0xff] }
 0x293   : > { %v5737_v22 = vpop.permute.xlu0 %5736  ;;  %v5739_v27 = vpop.permute.xlu1 %5738 }
 0x294   : > { %6057 = vst.msk [vmem:[#allocation5 + $0x200] sm:$0xff] %vm5992_vm5, %v5737_v22  ;;  %6058 = vst.msk [vmem:[#allocation5 + $0x208] sm:$0xff] %vm5992_vm5, %v5739_v27 }
 0x295   : > { %5852 = vrot.lane.b32.xlu0 %v5474_v14, %s13120_s27  ;;  %5854 = vrot.lane.b32.xlu1 %v5475_v39, %s13120_s27  ;;  %v6147_v14 = vld [vmem:[#allocation4 + $0x128] sm:$0xff]  ;;  %v6148_v39 = vld [vmem:[#allocation4 + $0x130] sm:$0xff] }
 0x297   : > { %v5741_v17 = vpop.permute.xlu0 %5740  ;;  %v5743_v19 = vpop.permute.xlu1 %5742 }
 0x298   : > { %6059 = vst.msk [vmem:[#allocation5 + $0x210] sm:$0xff] %vm5992_vm5, %v5741_v17  ;;  %6060 = vst.msk [vmem:[#allocation5 + $0x218] sm:$0xff] %vm5992_vm5, %v5743_v19 }
 0x299   : > { %5856 = vrot.lane.b32.xlu0 %v5476_v15, %s13120_s27  ;;  %5858 = vrot.lane.b32.xlu1 %v5477_v18, %s13120_s27  ;;  %v6149_v15 = vld [vmem:[#allocation4 + $0x140] sm:$0xff]  ;;  %v6150_v18 = vld [vmem:[#allocation4 + $0x148] sm:$0xff] }
 0x29b   : > { %v5745_v24 = vpop.permute.xlu0 %5744  ;;  %v5747_v41 = vpop.permute.xlu1 %5746 }
 0x29c   : > { %6061 = vst.msk [vmem:[#allocation5 + $0x220] sm:$0xff] %vm5992_vm5, %v5745_v24  ;;  %6062 = vst.msk [vmem:[#allocation5 + $0x228] sm:$0xff] %vm5992_vm5, %v5747_v41 }
 0x29d   : > { %5860 = vrot.lane.b32.xlu0 %v5478_v20, %s13120_s27  ;;  %5862 = vrot.lane.b32.xlu1 %v5479_v40, %s13120_s27  ;;  %v6151_v20 = vld [vmem:[#allocation4 + $0x150] sm:$0xff]  ;;  %v6152_v40 = vld [vmem:[#allocation4 + $0x158] sm:$0xff] }
 0x29f   : > { %v5749_v26 = vpop.permute.xlu0 %5748  ;;  %v5751_v44 = vpop.permute.xlu1 %5750 }
 0x2a0   : > { %6063 = vst.msk [vmem:[#allocation5 + $0x230] sm:$0xff] %vm5992_vm5, %v5749_v26  ;;  %6064 = vst.msk [vmem:[#allocation5 + $0x238] sm:$0xff] %vm5992_vm5, %v5751_v44 }
 0x2a1   : > { %6377 = vrot.lane.b32.xlu0 %v6121_v21, %s13121_s28  ;;  %6379 = vrot.lane.b32.xlu1 %v6122_v42, %s13121_s28  ;;  %v6153_v21 = vld [vmem:[#allocation4 + $0x168] sm:$0xff]  ;;  %v6154_v42 = vld [vmem:[#allocation4 + $0x170] sm:$0xff] }
 0x2a3   : > { %v5753_v50 = vpop.permute.xlu0 %5752  ;;  %v5755_v52 = vpop.permute.xlu1 %5754 }
 0x2a4   : > { %6065 = vst.msk [vmem:[#allocation5 + $0x240] sm:$0xff] %vm5992_vm5, %v5753_v50  ;;  %6066 = vst.msk [vmem:[#allocation5 + $0x248] sm:$0xff] %vm5992_vm5, %v5755_v52 }
 0x2a5   : > { %6381 = vrot.lane.b32.xlu0 %v6123_v49, %s13121_s28  ;;  %6383 = vrot.lane.b32.xlu1 %v6124_v51, %s13121_s28  ;;  %v6155_v49 = vld [vmem:[#allocation4 + $0x178] sm:$0xff]  ;;  %v6156_v51 = vld [vmem:[#allocation4 + $0x180] sm:$0xff] }
 0x2a7   : > { %v5757_v53 = vpop.permute.xlu0 %5756  ;;  %v5759_v43 = vpop.permute.xlu1 %5758 }
 0x2a8   : > { %6067 = vst.msk [vmem:[#allocation5 + $0x250] sm:$0xff] %vm5992_vm5, %v5757_v53  ;;  %6068 = vst.msk [vmem:[#allocation5 + $0x258] sm:$0xff] %vm5992_vm5, %v5759_v43 }
 0x2a9   : > { %6385 = vrot.lane.b32.xlu0 %v6125_v47, %s13121_s28  ;;  %6387 = vrot.lane.b32.xlu1 %v6126_v16, %s13121_s28  ;;  %v6157_v47 = vld [vmem:[#allocation4 + $0x190] sm:$0xff]  ;;  %v6158_v16 = vld [vmem:[#allocation4 + $0x198] sm:$0xff] }
 0x2ab   : > { %v5761_v28 = vpop.permute.xlu0 %5760  ;;  %v5763_v54 = vpop.permute.xlu1 %5762 }
 0x2ac   : > { %6069 = vst.msk [vmem:[#allocation5 + $0x260] sm:$0xff] %vm5992_vm5, %v5761_v28  ;;  %6070 = vst.msk [vmem:[#allocation5 + $0x268] sm:$0xff] %vm5992_vm5, %v5763_v54 }
 0x2ad   : > { %6389 = vrot.lane.b32.xlu0 %v6127_v25, %s13121_s28  ;;  %6391 = vrot.lane.b32.xlu1 %v6128_v34, %s13121_s28  ;;  %v6159_v25 = vld [vmem:[#allocation4 + $0x1a0] sm:$0xff]  ;;  %v6160_v34 = vld [vmem:[#allocation4 + $0x1a8] sm:$0xff] }
 0x2af   : > { %v5765_v58 = vpop.permute.xlu0 %5764  ;;  %v5767_v31 = vpop.permute.xlu1 %5766 }
 0x2b0   : > { %6071 = vst.msk [vmem:[#allocation5 + $0x270] sm:$0xff] %vm5992_vm5, %v5765_v58  ;;  %6072 = vst.msk [vmem:[#allocation5 + $0x278] sm:$0xff] %vm5992_vm5, %v5767_v31 }
 0x2b1   : > { %6393 = vrot.lane.b32.xlu0 %v6129_v57, %s13121_s28  ;;  %6395 = vrot.lane.b32.xlu1 %v6130_v59, %s13121_s28  ;;  %v6161_v57 = vld [vmem:[#allocation4 + $0x1b8] sm:$0xff]  ;;  %v6162_v59 = vld [vmem:[#allocation4 + $0x1c0] sm:$0xff] }
 0x2b3   : > { %v5769_v61 = vpop.permute.xlu0 %5768  ;;  %v5771_v62 = vpop.permute.xlu1 %5770 }
 0x2b4   : > { %6073 = vst.msk [vmem:[#allocation5 + $0x280] sm:$0xff] %vm5992_vm5, %v5769_v61  ;;  %6074 = vst.msk [vmem:[#allocation5 + $0x288] sm:$0xff] %vm5992_vm5, %v5771_v62 }
 0x2b5   : > { %6397 = vrot.lane.b32.xlu0 %v6131_v60, %s13121_s28  ;;  %6399 = vrot.lane.b32.xlu1 %v6132_v29, %s13121_s28  ;;  %v6163_v60 = vld [vmem:[#allocation4 + $0x1c8] sm:$0xff]  ;;  %v6164_v29 = vld [vmem:[#allocation4 + $0x1d0] sm:$0xff] }
 0x2b7   : > { %v5773_v55 = vpop.permute.xlu0 %5772  ;;  %v5775_v1 = vpop.permute.xlu1 %5774 }
 0x2b8   : > { %6075 = vst.msk [vmem:[#allocation5 + $0x290] sm:$0xff] %vm5992_vm5, %v5773_v55  ;;  %6076 = vst.msk [vmem:[#allocation5 + $0x298] sm:$0xff] %vm5992_vm5, %v5775_v1 }
 0x2b9   : > { %6401 = vrot.lane.b32.xlu0 %v6133_v63, %s13121_s28  ;;  %6403 = vrot.lane.b32.xlu1 %v6134_v0, %s13121_s28  ;;  %v6165_v63 = vld [vmem:[#allocation4 + $0x1e0] sm:$0xff]  ;;  %v6166_v0 = vld [vmem:[#allocation4 + $0x1e8] sm:$0xff] }
 0x2bb   : > { %v5777_v56 = vpop.permute.xlu0 %5776  ;;  %v5779_v5 = vpop.permute.xlu1 %5778 }
 0x2bc   : > { %6077 = vst.msk [vmem:[#allocation5 + $0x2a0] sm:$0xff] %vm5992_vm5, %v5777_v56  ;;  %6078 = vst.msk [vmem:[#allocation5 + $0x2a8] sm:$0xff] %vm5992_vm5, %v5779_v5 }
 0x2bd   : > { %6405 = vrot.lane.b32.xlu0 %v6135_v2, %s13121_s28  ;;  %6407 = vrot.lane.b32.xlu1 %v6136_v3, %s13121_s28  ;;  %v6167_v2 = vld [vmem:[#allocation4 + $0x1f0] sm:$0xff]  ;;  %v6168_v3 = vld [vmem:[#allocation4 + $0x1f8] sm:$0xff] }
 0x2bf   : > { %v5781_v38 = vpop.permute.xlu0 %5780  ;;  %v5783_v6 = vpop.permute.xlu1 %5782 }
 0x2c0   : > { %6079 = vst.msk [vmem:[#allocation5 + $0x2b0] sm:$0xff] %vm5992_vm5, %v5781_v38  ;;  %6080 = vst.msk [vmem:[#allocation5 + $0x2b8] sm:$0xff] %vm5992_vm5, %v5783_v6 }
 0x2c1   : > { %6409 = vrot.lane.b32.xlu0 %v6137_v30, %s13121_s28  ;;  %6411 = vrot.lane.b32.xlu1 %v6138_v45, %s13121_s28  ;;  %v6169_v30 = vld [vmem:[#allocation4 + $0x208] sm:$0xff]  ;;  %v6170_v45 = vld [vmem:[#allocation4 + $0x210] sm:$0xff] }
 0x2c3   : > { %v5785_v37 = vpop.permute.xlu0 %5784  ;;  %v5787_v33 = vpop.permute.xlu1 %5786 }
 0x2c4   : > { %6081 = vst.msk [vmem:[#allocation5 + $0x2c0] sm:$0xff] %vm5992_vm5, %v5785_v37  ;;  %6082 = vst.msk [vmem:[#allocation5 + $0x2c8] sm:$0xff] %vm5992_vm5, %v5787_v33 }
 0x2c5   : > { %6413 = vrot.lane.b32.xlu0 %v6139_v32, %s13121_s28  ;;  %6415 = vrot.lane.b32.xlu1 %v6140_v23, %s13121_s28  ;;  %v6171_v32 = vld [vmem:[#allocation4 + $0x218] sm:$0xff]  ;;  %v6172_v23 = vld [vmem:[#allocation4 + $0x220] sm:$0xff] }
 0x2c7   : > { %v5789_v7 = vpop.permute.xlu0 %5788  ;;  %v5791_v9 = vpop.permute.xlu1 %5790 }
 0x2c8   : > { %6083 = vst.msk [vmem:[#allocation5 + $0x2d0] sm:$0xff] %vm5992_vm5, %v5789_v7  ;;  %6084 = vst.msk [vmem:[#allocation5 + $0x2d8] sm:$0xff] %vm5992_vm5, %v5791_v9 }
 0x2c9   : > { %6417 = vrot.lane.b32.xlu0 %v6141_v48, %s13121_s28  ;;  %6419 = vrot.lane.b32.xlu1 %v6142_v8, %s13121_s28  ;;  %v6173_v48 = vld [vmem:[#allocation4 + $0x230] sm:$0xff]  ;;  %v6174_v8 = vld [vmem:[#allocation4 + $0x238] sm:$0xff] }
 0x2cb   : > { %v5793_v36 = vpop.permute.xlu0 %5792  ;;  %v5795_v4 = vpop.permute.xlu1 %5794 }
 0x2cc   : > { %6085 = vst.msk [vmem:[#allocation5 + $0x2e0] sm:$0xff] %vm5992_vm5, %v5793_v36  ;;  %6086 = vst.msk [vmem:[#allocation5 + $0x2e8] sm:$0xff] %vm5992_vm5, %v5795_v4 }
 0x2cd   : > { %6421 = vrot.lane.b32.xlu0 %v6143_v10, %s13121_s28  ;;  %6423 = vrot.lane.b32.xlu1 %v6144_v35, %s13121_s28  ;;  %v6175_v10 = vld [vmem:[#allocation4 + $0x240] sm:$0xff]  ;;  %v6176_v35 = vld [vmem:[#allocation4 + $0x248] sm:$0xff] }
 0x2cf   : > { %v5797_v12 = vpop.permute.xlu0 %5796  ;;  %v5799_v46 = vpop.permute.xlu1 %5798 }
 0x2d0   : > { %6087 = vst.msk [vmem:[#allocation5 + $0x2f0] sm:$0xff] %vm5992_vm5, %v5797_v12  ;;  %6088 = vst.msk [vmem:[#allocation5 + $0x2f8] sm:$0xff] %vm5992_vm5, %v5799_v46 }
 0x2d1   : > { %6425 = vrot.lane.b32.xlu0 %v6145_v11, %s13121_s28  ;;  %6427 = vrot.lane.b32.xlu1 %v6146_v13, %s13121_s28  ;;  %v6177_v11 = vld [vmem:[#allocation4 + $0x258] sm:$0xff]  ;;  %v6178_v13 = vld [vmem:[#allocation4 + $0x260] sm:$0xff] }
 0x2d3   : > { %v5801_v22 = vpop.permute.xlu0 %5800  ;;  %v5803_v27 = vpop.permute.xlu1 %5802 }
 0x2d4   : > { %6089 = vst.msk [vmem:[#allocation5 + $0x300] sm:$0xff] %vm5992_vm5, %v5801_v22  ;;  %6090 = vst.msk [vmem:[#allocation5 + $0x308] sm:$0xff] %vm5992_vm5, %v5803_v27 }
 0x2d5   : > { %6429 = vrot.lane.b32.xlu0 %v6147_v14, %s13121_s28  ;;  %6431 = vrot.lane.b32.xlu1 %v6148_v39, %s13121_s28  ;;  %v6179_v14 = vld [vmem:[#allocation4 + $0x268] sm:$0xff]  ;;  %v6180_v39 = vld [vmem:[#allocation4 + $0x270] sm:$0xff] }
 0x2d7   : > { %v5805_v17 = vpop.permute.xlu0 %5804  ;;  %v5807_v19 = vpop.permute.xlu1 %5806 }
 0x2d8   : > { %6091 = vst.msk [vmem:[#allocation5 + $0x310] sm:$0xff] %vm5992_vm5, %v5805_v17  ;;  %6092 = vst.msk [vmem:[#allocation5 + $0x318] sm:$0xff] %vm5992_vm5, %v5807_v19 }
 0x2d9   : > { %6433 = vrot.lane.b32.xlu0 %v6149_v15, %s13121_s28  ;;  %6435 = vrot.lane.b32.xlu1 %v6150_v18, %s13121_s28  ;;  %v6181_v15 = vld [vmem:[#allocation4 + $0x280] sm:$0xff]  ;;  %v6182_v18 = vld [vmem:[#allocation4 + $0x288] sm:$0xff] }
 0x2db   : > { %v5809_v24 = vpop.permute.xlu0 %5808  ;;  %v5811_v41 = vpop.permute.xlu1 %5810 }
 0x2dc   : > { %6093 = vst.msk [vmem:[#allocation5 + $0x320] sm:$0xff] %vm5992_vm5, %v5809_v24  ;;  %6094 = vst.msk [vmem:[#allocation5 + $0x328] sm:$0xff] %vm5992_vm5, %v5811_v41 }
 0x2dd   : > { %6437 = vrot.lane.b32.xlu0 %v6151_v20, %s13121_s28  ;;  %6439 = vrot.lane.b32.xlu1 %v6152_v40, %s13121_s28  ;;  %v6183_v20 = vld [vmem:[#allocation4 + $0x290] sm:$0xff]  ;;  %v6184_v40 = vld [vmem:[#allocation4 + $0x298] sm:$0xff] }
 0x2df   : > { %v5813_v26 = vpop.permute.xlu0 %5812  ;;  %v5815_v44 = vpop.permute.xlu1 %5814 }
 0x2e0   : > { %6095 = vst.msk [vmem:[#allocation5 + $0x330] sm:$0xff] %vm5992_vm5, %v5813_v26  ;;  %6096 = vst.msk [vmem:[#allocation5 + $0x338] sm:$0xff] %vm5992_vm5, %v5815_v44 }
 0x2e1   : > { %6441 = vrot.lane.b32.xlu0 %v6153_v21, %s13121_s28  ;;  %6443 = vrot.lane.b32.xlu1 %v6154_v42, %s13121_s28  ;;  %v6185_v21 = vld [vmem:[#allocation4 + $0x2a8] sm:$0xff]  ;;  %v6186_v42 = vld [vmem:[#allocation4 + $0x2b0] sm:$0xff] }
 0x2e3   : > { %v5817_v50 = vpop.permute.xlu0 %5816  ;;  %v5819_v52 = vpop.permute.xlu1 %5818 }
 0x2e4   : > { %6097 = vst.msk [vmem:[#allocation5 + $0x340] sm:$0xff] %vm5992_vm5, %v5817_v50  ;;  %6098 = vst.msk [vmem:[#allocation5 + $0x348] sm:$0xff] %vm5992_vm5, %v5819_v52 }
 0x2e5   : > { %6445 = vrot.lane.b32.xlu0 %v6155_v49, %s13121_s28  ;;  %6447 = vrot.lane.b32.xlu1 %v6156_v51, %s13121_s28  ;;  %v6187_v49 = vld [vmem:[#allocation4 + $0x2b8] sm:$0xff]  ;;  %v6188_v51 = vld [vmem:[#allocation4 + $0x2c0] sm:$0xff] }
 0x2e7   : > { %v5821_v53 = vpop.permute.xlu0 %5820  ;;  %v5823_v43 = vpop.permute.xlu1 %5822 }
 0x2e8   : > { %6099 = vst.msk [vmem:[#allocation5 + $0x350] sm:$0xff] %vm5992_vm5, %v5821_v53  ;;  %6100 = vst.msk [vmem:[#allocation5 + $0x358] sm:$0xff] %vm5992_vm5, %v5823_v43 }
 0x2e9   : > { %6449 = vrot.lane.b32.xlu0 %v6157_v47, %s13121_s28  ;;  %6451 = vrot.lane.b32.xlu1 %v6158_v16, %s13121_s28  ;;  %v6189_v47 = vld [vmem:[#allocation4 + $0x2d0] sm:$0xff]  ;;  %v6190_v16 = vld [vmem:[#allocation4 + $0x2d8] sm:$0xff] }
 0x2eb   : > { %v5825_v28 = vpop.permute.xlu0 %5824  ;;  %v5827_v54 = vpop.permute.xlu1 %5826 }
 0x2ec   : > { %6101 = vst.msk [vmem:[#allocation5 + $0x360] sm:$0xff] %vm5992_vm5, %v5825_v28  ;;  %6102 = vst.msk [vmem:[#allocation5 + $0x368] sm:$0xff] %vm5992_vm5, %v5827_v54 }
 0x2ed   : > { %6453 = vrot.lane.b32.xlu0 %v6159_v25, %s13121_s28  ;;  %6455 = vrot.lane.b32.xlu1 %v6160_v34, %s13121_s28  ;;  %v6191_v25 = vld [vmem:[#allocation4 + $0x2e0] sm:$0xff]  ;;  %v6192_v34 = vld [vmem:[#allocation4 + $0x2e8] sm:$0xff] }
 0x2ef   : > { %v5829_v58 = vpop.permute.xlu0 %5828  ;;  %v5831_v31 = vpop.permute.xlu1 %5830 }
 0x2f0   : > { %6103 = vst.msk [vmem:[#allocation5 + $0x370] sm:$0xff] %vm5992_vm5, %v5829_v58  ;;  %6104 = vst.msk [vmem:[#allocation5 + $0x378] sm:$0xff] %vm5992_vm5, %v5831_v31 }
 0x2f1   : > { %6457 = vrot.lane.b32.xlu0 %v6161_v57, %s13121_s28  ;;  %6459 = vrot.lane.b32.xlu1 %v6162_v59, %s13121_s28  ;;  %v6193_v57 = vld [vmem:[#allocation4 + $0x2f8] sm:$0xff]  ;;  %v6194_v59 = vld [vmem:[#allocation4 + $0x300] sm:$0xff] }
 0x2f3   : > { %v5833_v61 = vpop.permute.xlu0 %5832  ;;  %v5835_v62 = vpop.permute.xlu1 %5834 }
 0x2f4   : > { %6105 = vst.msk [vmem:[#allocation5 + $0x380] sm:$0xff] %vm5992_vm5, %v5833_v61  ;;  %6106 = vst.msk [vmem:[#allocation5 + $0x388] sm:$0xff] %vm5992_vm5, %v5835_v62 }
 0x2f5   : > { %6461 = vrot.lane.b32.xlu0 %v6163_v60, %s13121_s28  ;;  %6463 = vrot.lane.b32.xlu1 %v6164_v29, %s13121_s28  ;;  %v6195_v60 = vld [vmem:[#allocation4 + $0x308] sm:$0xff]  ;;  %v6196_v29 = vld [vmem:[#allocation4 + $0x310] sm:$0xff] }
 0x2f7   : > { %v5837_v55 = vpop.permute.xlu0 %5836  ;;  %v5839_v1 = vpop.permute.xlu1 %5838 }
 0x2f8   : > { %6107 = vst.msk [vmem:[#allocation5 + $0x390] sm:$0xff] %vm5992_vm5, %v5837_v55  ;;  %6108 = vst.msk [vmem:[#allocation5 + $0x398] sm:$0xff] %vm5992_vm5, %v5839_v1 }
 0x2f9   : > { %6465 = vrot.lane.b32.xlu0 %v6165_v63, %s13121_s28  ;;  %6467 = vrot.lane.b32.xlu1 %v6166_v0, %s13121_s28  ;;  %v6197_v63 = vld [vmem:[#allocation4 + $0x320] sm:$0xff]  ;;  %v6198_v0 = vld [vmem:[#allocation4 + $0x328] sm:$0xff] }
 0x2fb   : > { %v5841_v56 = vpop.permute.xlu0 %5840  ;;  %v5843_v5 = vpop.permute.xlu1 %5842 }
 0x2fc   : > { %6109 = vst.msk [vmem:[#allocation5 + $0x3a0] sm:$0xff] %vm5992_vm5, %v5841_v56  ;;  %6110 = vst.msk [vmem:[#allocation5 + $0x3a8] sm:$0xff] %vm5992_vm5, %v5843_v5 }
 0x2fd   : > { %6469 = vrot.lane.b32.xlu0 %v6167_v2, %s13121_s28  ;;  %6471 = vrot.lane.b32.xlu1 %v6168_v3, %s13121_s28  ;;  %v6199_v2 = vld [vmem:[#allocation4 + $0x330] sm:$0xff]  ;;  %v6200_v3 = vld [vmem:[#allocation4 + $0x338] sm:$0xff] }
 0x2ff   : > { %v5845_v38 = vpop.permute.xlu0 %5844  ;;  %v5847_v6 = vpop.permute.xlu1 %5846 }
 0x300   : > { %6111 = vst.msk [vmem:[#allocation5 + $0x3b0] sm:$0xff] %vm5992_vm5, %v5845_v38  ;;  %6112 = vst.msk [vmem:[#allocation5 + $0x3b8] sm:$0xff] %vm5992_vm5, %v5847_v6 }
 0x301   : > { %6473 = vrot.lane.b32.xlu0 %v6169_v30, %s13121_s28  ;;  %6475 = vrot.lane.b32.xlu1 %v6170_v45, %s13121_s28  ;;  %v6201_v30 = vld [vmem:[#allocation4 + $0x348] sm:$0xff]  ;;  %v6202_v45 = vld [vmem:[#allocation4 + $0x350] sm:$0xff] }
 0x303   : > { %v5849_v37 = vpop.permute.xlu0 %5848  ;;  %v5851_v33 = vpop.permute.xlu1 %5850 }
 0x304   : > { %6113 = vst.msk [vmem:[#allocation5 + $0x3c0] sm:$0xff] %vm5992_vm5, %v5849_v37  ;;  %6114 = vst.msk [vmem:[#allocation5 + $0x3c8] sm:$0xff] %vm5992_vm5, %v5851_v33 }
 0x305   : > { %6477 = vrot.lane.b32.xlu0 %v6171_v32, %s13121_s28  ;;  %6479 = vrot.lane.b32.xlu1 %v6172_v23, %s13121_s28  ;;  %v6203_v32 = vld [vmem:[#allocation4 + $0x358] sm:$0xff]  ;;  %v6204_v23 = vld [vmem:[#allocation4 + $0x360] sm:$0xff] }
 0x307   : > { %v5853_v7 = vpop.permute.xlu0 %5852  ;;  %v5855_v9 = vpop.permute.xlu1 %5854 }
 0x308   : > { %6115 = vst.msk [vmem:[#allocation5 + $0x3d0] sm:$0xff] %vm5992_vm5, %v5853_v7  ;;  %6116 = vst.msk [vmem:[#allocation5 + $0x3d8] sm:$0xff] %vm5992_vm5, %v5855_v9 }
 0x309   : > { %6481 = vrot.lane.b32.xlu0 %v6173_v48, %s13121_s28  ;;  %6483 = vrot.lane.b32.xlu1 %v6174_v8, %s13121_s28  ;;  %v6205_v48 = vld [vmem:[#allocation4 + $0x370] sm:$0xff]  ;;  %v6206_v8 = vld [vmem:[#allocation4 + $0x378] sm:$0xff] }
 0x30b   : > { %v5857_v36 = vpop.permute.xlu0 %5856  ;;  %v5859_v4 = vpop.permute.xlu1 %5858 }
 0x30c   : > { %6117 = vst.msk [vmem:[#allocation5 + $0x3e0] sm:$0xff] %vm5992_vm5, %v5857_v36  ;;  %6118 = vst.msk [vmem:[#allocation5 + $0x3e8] sm:$0xff] %vm5992_vm5, %v5859_v4 }
 0x30d   : > { %6485 = vrot.lane.b32.xlu0 %v6175_v10, %s13121_s28  ;;  %6487 = vrot.lane.b32.xlu1 %v6176_v35, %s13121_s28  ;;  %v6207_v10 = vld [vmem:[#allocation4 + $0x380] sm:$0xff]  ;;  %v6208_v35 = vld [vmem:[#allocation4 + $0x388] sm:$0xff] }
 0x30f   : > { %v5861_v12 = vpop.permute.xlu0 %5860  ;;  %v5863_v46 = vpop.permute.xlu1 %5862 }
 0x310   : > { %6119 = vst.msk [vmem:[#allocation5 + $0x3f0] sm:$0xff] %vm5992_vm5, %v5861_v12  ;;  %6120 = vst.msk [vmem:[#allocation5 + $0x3f8] sm:$0xff] %vm5992_vm5, %v5863_v46 }
 0x311   : > { %6489 = vrot.lane.b32.xlu0 %v6177_v11, %s13121_s28  ;;  %6491 = vrot.lane.b32.xlu1 %v6178_v13, %s13121_s28  ;;  %v6209_v11 = vld [vmem:[#allocation4 + $0x398] sm:$0xff]  ;;  %v6210_v13 = vld [vmem:[#allocation4 + $0x3a0] sm:$0xff] }
 0x313   : > { %v6378_v22 = vpop.permute.xlu0 %6377  ;;  %v6380_v27 = vpop.permute.xlu1 %6379 }
 0x314   : > { %6762 = vst.msk [vmem:[#allocation5] sm:$0xff] %vm6761_vm6, %v6378_v22  ;;  %6763 = vst.msk [vmem:[#allocation5 + $0x8] sm:$0xff] %vm6761_vm6, %v6380_v27 }
 0x315   : > { %6493 = vrot.lane.b32.xlu0 %v6179_v14, %s13121_s28  ;;  %6495 = vrot.lane.b32.xlu1 %v6180_v39, %s13121_s28  ;;  %v6211_v14 = vld [vmem:[#allocation4 + $0x3a8] sm:$0xff]  ;;  %v6212_v39 = vld [vmem:[#allocation4 + $0x3b0] sm:$0xff] }
 0x317   : > { %v6382_v17 = vpop.permute.xlu0 %6381  ;;  %v6384_v19 = vpop.permute.xlu1 %6383 }
 0x318   : > { %6764 = vst.msk [vmem:[#allocation5 + $0x10] sm:$0xff] %vm6761_vm6, %v6382_v17  ;;  %6765 = vst.msk [vmem:[#allocation5 + $0x18] sm:$0xff] %vm6761_vm6, %v6384_v19 }
 0x319   : > { %6497 = vrot.lane.b32.xlu0 %v6181_v15, %s13121_s28  ;;  %6499 = vrot.lane.b32.xlu1 %v6182_v18, %s13121_s28  ;;  %v6213_v15 = vld [vmem:[#allocation4 + $0x3c0] sm:$0xff]  ;;  %v6214_v18 = vld [vmem:[#allocation4 + $0x3c8] sm:$0xff] }
 0x31b   : > { %v6386_v24 = vpop.permute.xlu0 %6385  ;;  %v6388_v41 = vpop.permute.xlu1 %6387 }
 0x31c   : > { %6766 = vst.msk [vmem:[#allocation5 + $0x20] sm:$0xff] %vm6761_vm6, %v6386_v24  ;;  %6767 = vst.msk [vmem:[#allocation5 + $0x28] sm:$0xff] %vm6761_vm6, %v6388_v41 }
 0x31d   : > { %6501 = vrot.lane.b32.xlu0 %v6183_v20, %s13121_s28  ;;  %6503 = vrot.lane.b32.xlu1 %v6184_v40, %s13121_s28  ;;  %v6215_v20 = vld [vmem:[#allocation4 + $0x3d0] sm:$0xff]  ;;  %v6216_v40 = vld [vmem:[#allocation4 + $0x3d8] sm:$0xff] }
 0x31f   : > { %v6390_v26 = vpop.permute.xlu0 %6389  ;;  %v6392_v44 = vpop.permute.xlu1 %6391 }
 0x320   : > { %6768 = vst.msk [vmem:[#allocation5 + $0x30] sm:$0xff] %vm6761_vm6, %v6390_v26  ;;  %6769 = vst.msk [vmem:[#allocation5 + $0x38] sm:$0xff] %vm6761_vm6, %v6392_v44 }
 0x321   : > { %6505 = vrot.lane.b32.xlu0 %v6185_v21, %s13121_s28  ;;  %6507 = vrot.lane.b32.xlu1 %v6186_v42, %s13121_s28  ;;  %v6217_v21 = vld [vmem:[#allocation4 + $0x3e8] sm:$0xff]  ;;  %v6218_v42 = vld [vmem:[#allocation4 + $0x3f0] sm:$0xff] }
 0x323   : > { %v6394_v50 = vpop.permute.xlu0 %6393  ;;  %v6396_v52 = vpop.permute.xlu1 %6395 }
 0x324   : > { %6770 = vst.msk [vmem:[#allocation5 + $0x40] sm:$0xff] %vm6761_vm6, %v6394_v50  ;;  %6771 = vst.msk [vmem:[#allocation5 + $0x48] sm:$0xff] %vm6761_vm6, %v6396_v52 }
 0x325   : > { %6509 = vrot.lane.b32.xlu0 %v6187_v49, %s13121_s28  ;;  %6511 = vrot.lane.b32.xlu1 %v6188_v51, %s13121_s28  ;;  %v6219_v49 = vld [vmem:[#allocation4 + $0x3f8] sm:$0xff]  ;;  %v6220_v51 = vld [vmem:[#allocation4 + $0x400] sm:$0xff] }
 0x327   : > { %v6398_v53 = vpop.permute.xlu0 %6397  ;;  %v6400_v43 = vpop.permute.xlu1 %6399 }
 0x328   : > { %6772 = vst.msk [vmem:[#allocation5 + $0x50] sm:$0xff] %vm6761_vm6, %v6398_v53  ;;  %6773 = vst.msk [vmem:[#allocation5 + $0x58] sm:$0xff] %vm6761_vm6, %v6400_v43 }
 0x329   : > { %6513 = vrot.lane.b32.xlu0 %v6189_v47, %s13121_s28  ;;  %6515 = vrot.lane.b32.xlu1 %v6190_v16, %s13121_s28  ;;  %v6221_v47 = vld [vmem:[#allocation4 + $0x410] sm:$0xff]  ;;  %v6222_v16 = vld [vmem:[#allocation4 + $0x418] sm:$0xff] }
 0x32b   : > { %v6402_v28 = vpop.permute.xlu0 %6401  ;;  %v6404_v54 = vpop.permute.xlu1 %6403 }
 0x32c   : > { %6774 = vst.msk [vmem:[#allocation5 + $0x60] sm:$0xff] %vm6761_vm6, %v6402_v28  ;;  %6775 = vst.msk [vmem:[#allocation5 + $0x68] sm:$0xff] %vm6761_vm6, %v6404_v54 }
 0x32d   : > { %6517 = vrot.lane.b32.xlu0 %v6191_v25, %s13121_s28  ;;  %6519 = vrot.lane.b32.xlu1 %v6192_v34, %s13121_s28  ;;  %v6223_v25 = vld [vmem:[#allocation4 + $0x420] sm:$0xff]  ;;  %v6224_v34 = vld [vmem:[#allocation4 + $0x428] sm:$0xff] }
 0x32f   : > { %v6406_v58 = vpop.permute.xlu0 %6405  ;;  %v6408_v31 = vpop.permute.xlu1 %6407 }
 0x330   : > { %6776 = vst.msk [vmem:[#allocation5 + $0x70] sm:$0xff] %vm6761_vm6, %v6406_v58  ;;  %6777 = vst.msk [vmem:[#allocation5 + $0x78] sm:$0xff] %vm6761_vm6, %v6408_v31 }
 0x331   : > { %6521 = vrot.lane.b32.xlu0 %v6193_v57, %s13121_s28  ;;  %6523 = vrot.lane.b32.xlu1 %v6194_v59, %s13121_s28  ;;  %v6225_v57 = vld [vmem:[#allocation4 + $0x438] sm:$0xff]  ;;  %v6226_v59 = vld [vmem:[#allocation4 + $0x440] sm:$0xff] }
 0x333   : > { %v6410_v61 = vpop.permute.xlu0 %6409  ;;  %v6412_v62 = vpop.permute.xlu1 %6411 }
 0x334   : > { %6778 = vst.msk [vmem:[#allocation5 + $0x80] sm:$0xff] %vm6761_vm6, %v6410_v61  ;;  %6779 = vst.msk [vmem:[#allocation5 + $0x88] sm:$0xff] %vm6761_vm6, %v6412_v62 }
 0x335   : > { %6525 = vrot.lane.b32.xlu0 %v6195_v60, %s13121_s28  ;;  %6527 = vrot.lane.b32.xlu1 %v6196_v29, %s13121_s28  ;;  %v6227_v60 = vld [vmem:[#allocation4 + $0x448] sm:$0xff]  ;;  %v6228_v29 = vld [vmem:[#allocation4 + $0x450] sm:$0xff] }
 0x337   : > { %v6414_v55 = vpop.permute.xlu0 %6413  ;;  %v6416_v1 = vpop.permute.xlu1 %6415 }
 0x338   : > { %6780 = vst.msk [vmem:[#allocation5 + $0x90] sm:$0xff] %vm6761_vm6, %v6414_v55  ;;  %6781 = vst.msk [vmem:[#allocation5 + $0x98] sm:$0xff] %vm6761_vm6, %v6416_v1 }
 0x339   : > { %6529 = vrot.lane.b32.xlu0 %v6197_v63, %s13121_s28  ;;  %6531 = vrot.lane.b32.xlu1 %v6198_v0, %s13121_s28  ;;  %v6229_v63 = vld [vmem:[#allocation4 + $0x460] sm:$0xff]  ;;  %v6230_v0 = vld [vmem:[#allocation4 + $0x468] sm:$0xff] }
 0x33b   : > { %v6418_v56 = vpop.permute.xlu0 %6417  ;;  %v6420_v5 = vpop.permute.xlu1 %6419 }
 0x33c   : > { %6782 = vst.msk [vmem:[#allocation5 + $0xa0] sm:$0xff] %vm6761_vm6, %v6418_v56  ;;  %6783 = vst.msk [vmem:[#allocation5 + $0xa8] sm:$0xff] %vm6761_vm6, %v6420_v5 }
 0x33d   : > { %6533 = vrot.lane.b32.xlu0 %v6199_v2, %s13121_s28  ;;  %6535 = vrot.lane.b32.xlu1 %v6200_v3, %s13121_s28  ;;  %v6231_v2 = vld [vmem:[#allocation4 + $0x470] sm:$0xff]  ;;  %v6232_v3 = vld [vmem:[#allocation4 + $0x478] sm:$0xff] }
 0x33f   : > { %v6422_v38 = vpop.permute.xlu0 %6421  ;;  %v6424_v6 = vpop.permute.xlu1 %6423 }
 0x340   : > { %6784 = vst.msk [vmem:[#allocation5 + $0xb0] sm:$0xff] %vm6761_vm6, %v6422_v38  ;;  %6785 = vst.msk [vmem:[#allocation5 + $0xb8] sm:$0xff] %vm6761_vm6, %v6424_v6 }
 0x341   : > { %6537 = vrot.lane.b32.xlu0 %v6201_v30, %s13121_s28  ;;  %6539 = vrot.lane.b32.xlu1 %v6202_v45, %s13121_s28  ;;  %v6233_v30 = vld [vmem:[#allocation4 + $0x488] sm:$0xff]  ;;  %v6234_v45 = vld [vmem:[#allocation4 + $0x490] sm:$0xff] }
 0x343   : > { %v6426_v37 = vpop.permute.xlu0 %6425  ;;  %v6428_v33 = vpop.permute.xlu1 %6427 }
 0x344   : > { %6786 = vst.msk [vmem:[#allocation5 + $0xc0] sm:$0xff] %vm6761_vm6, %v6426_v37  ;;  %6787 = vst.msk [vmem:[#allocation5 + $0xc8] sm:$0xff] %vm6761_vm6, %v6428_v33 }
 0x345   : > { %6541 = vrot.lane.b32.xlu0 %v6203_v32, %s13121_s28  ;;  %6543 = vrot.lane.b32.xlu1 %v6204_v23, %s13121_s28  ;;  %v6235_v32 = vld [vmem:[#allocation4 + $0x498] sm:$0xff]  ;;  %v6236_v23 = vld [vmem:[#allocation4 + $0x4a0] sm:$0xff] }
 0x347   : > { %v6430_v7 = vpop.permute.xlu0 %6429  ;;  %v6432_v9 = vpop.permute.xlu1 %6431 }
 0x348   : > { %6788 = vst.msk [vmem:[#allocation5 + $0xd0] sm:$0xff] %vm6761_vm6, %v6430_v7  ;;  %6789 = vst.msk [vmem:[#allocation5 + $0xd8] sm:$0xff] %vm6761_vm6, %v6432_v9 }
 0x349   : > { %6545 = vrot.lane.b32.xlu0 %v6205_v48, %s13121_s28  ;;  %6547 = vrot.lane.b32.xlu1 %v6206_v8, %s13121_s28  ;;  %v6237_v48 = vld [vmem:[#allocation4 + $0x4b0] sm:$0xff]  ;;  %v6238_v8 = vld [vmem:[#allocation4 + $0x4b8] sm:$0xff] }
 0x34b   : > { %v6434_v36 = vpop.permute.xlu0 %6433  ;;  %v6436_v4 = vpop.permute.xlu1 %6435 }
 0x34c   : > { %6790 = vst.msk [vmem:[#allocation5 + $0xe0] sm:$0xff] %vm6761_vm6, %v6434_v36  ;;  %6791 = vst.msk [vmem:[#allocation5 + $0xe8] sm:$0xff] %vm6761_vm6, %v6436_v4 }
 0x34d   : > { %6549 = vrot.lane.b32.xlu0 %v6207_v10, %s13121_s28  ;;  %6551 = vrot.lane.b32.xlu1 %v6208_v35, %s13121_s28  ;;  %v6239_v10 = vld [vmem:[#allocation4 + $0x4c0] sm:$0xff]  ;;  %v6240_v35 = vld [vmem:[#allocation4 + $0x4c8] sm:$0xff] }
 0x34f   : > { %v6438_v12 = vpop.permute.xlu0 %6437  ;;  %v6440_v46 = vpop.permute.xlu1 %6439 }
 0x350   : > { %6792 = vst.msk [vmem:[#allocation5 + $0xf0] sm:$0xff] %vm6761_vm6, %v6438_v12  ;;  %6793 = vst.msk [vmem:[#allocation5 + $0xf8] sm:$0xff] %vm6761_vm6, %v6440_v46 }
 0x351   : > { %6553 = vrot.lane.b32.xlu0 %v6209_v11, %s13121_s28  ;;  %6555 = vrot.lane.b32.xlu1 %v6210_v13, %s13121_s28  ;;  %v6241_v11 = vld [vmem:[#allocation4 + $0x4d8] sm:$0xff]  ;;  %v6242_v13 = vld [vmem:[#allocation4 + $0x4e0] sm:$0xff] }
 0x353   : > { %v6442_v22 = vpop.permute.xlu0 %6441  ;;  %v6444_v27 = vpop.permute.xlu1 %6443 }
 0x354   : > { %6794 = vst.msk [vmem:[#allocation5 + $0x100] sm:$0xff] %vm6761_vm6, %v6442_v22  ;;  %6795 = vst.msk [vmem:[#allocation5 + $0x108] sm:$0xff] %vm6761_vm6, %v6444_v27 }
 0x355   : > { %6557 = vrot.lane.b32.xlu0 %v6211_v14, %s13121_s28  ;;  %6559 = vrot.lane.b32.xlu1 %v6212_v39, %s13121_s28  ;;  %v6243_v14 = vld [vmem:[#allocation4 + $0x4e8] sm:$0xff]  ;;  %v6244_v39 = vld [vmem:[#allocation4 + $0x4f0] sm:$0xff] }
 0x357   : > { %v6446_v17 = vpop.permute.xlu0 %6445  ;;  %v6448_v19 = vpop.permute.xlu1 %6447 }
 0x358   : > { %6796 = vst.msk [vmem:[#allocation5 + $0x110] sm:$0xff] %vm6761_vm6, %v6446_v17  ;;  %6797 = vst.msk [vmem:[#allocation5 + $0x118] sm:$0xff] %vm6761_vm6, %v6448_v19 }
 0x359   : > { %6561 = vrot.lane.b32.xlu0 %v6213_v15, %s13121_s28  ;;  %6563 = vrot.lane.b32.xlu1 %v6214_v18, %s13121_s28  ;;  %v6245_v15 = vld [vmem:[#allocation4 + $0x500] sm:$0xff]  ;;  %v6246_v18 = vld [vmem:[#allocation4 + $0x508] sm:$0xff] }
 0x35b   : > { %v6450_v24 = vpop.permute.xlu0 %6449  ;;  %v6452_v41 = vpop.permute.xlu1 %6451 }
 0x35c   : > { %6798 = vst.msk [vmem:[#allocation5 + $0x120] sm:$0xff] %vm6761_vm6, %v6450_v24  ;;  %6799 = vst.msk [vmem:[#allocation5 + $0x128] sm:$0xff] %vm6761_vm6, %v6452_v41 }
 0x35d   : > { %6565 = vrot.lane.b32.xlu0 %v6215_v20, %s13121_s28  ;;  %6567 = vrot.lane.b32.xlu1 %v6216_v40, %s13121_s28  ;;  %v6247_v20 = vld [vmem:[#allocation4 + $0x510] sm:$0xff]  ;;  %v6248_v40 = vld [vmem:[#allocation4 + $0x518] sm:$0xff] }
 0x35f   : > { %v6454_v26 = vpop.permute.xlu0 %6453  ;;  %v6456_v44 = vpop.permute.xlu1 %6455 }
 0x360   : > { %6800 = vst.msk [vmem:[#allocation5 + $0x130] sm:$0xff] %vm6761_vm6, %v6454_v26  ;;  %6801 = vst.msk [vmem:[#allocation5 + $0x138] sm:$0xff] %vm6761_vm6, %v6456_v44 }
 0x361   : > { %6569 = vrot.lane.b32.xlu0 %v6217_v21, %s13121_s28  ;;  %6571 = vrot.lane.b32.xlu1 %v6218_v42, %s13121_s28  ;;  %v6890_v21 = vld [vmem:[#allocation4 + $0x29] sm:$0xff]  ;;  %v6891_v42 = vld [vmem:[#allocation4 + $0x31] sm:$0xff] }
 0x363   : > { %v6458_v50 = vpop.permute.xlu0 %6457  ;;  %v6460_v52 = vpop.permute.xlu1 %6459 }
 0x364   : > { %6802 = vst.msk [vmem:[#allocation5 + $0x140] sm:$0xff] %vm6761_vm6, %v6458_v50  ;;  %6803 = vst.msk [vmem:[#allocation5 + $0x148] sm:$0xff] %vm6761_vm6, %v6460_v52 }
 0x365   : > { %6573 = vrot.lane.b32.xlu0 %v6219_v49, %s13121_s28  ;;  %6575 = vrot.lane.b32.xlu1 %v6220_v51, %s13121_s28  ;;  %v6892_v49 = vld [vmem:[#allocation4 + $0x39] sm:$0xff]  ;;  %v6893_v51 = vld [vmem:[#allocation4 + $0x41] sm:$0xff] }
 0x367   : > { %v6462_v53 = vpop.permute.xlu0 %6461  ;;  %v6464_v43 = vpop.permute.xlu1 %6463 }
 0x368   : > { %6804 = vst.msk [vmem:[#allocation5 + $0x150] sm:$0xff] %vm6761_vm6, %v6462_v53  ;;  %6805 = vst.msk [vmem:[#allocation5 + $0x158] sm:$0xff] %vm6761_vm6, %v6464_v43 }
 0x369   : > { %6577 = vrot.lane.b32.xlu0 %v6221_v47, %s13121_s28  ;;  %6579 = vrot.lane.b32.xlu1 %v6222_v16, %s13121_s28  ;;  %v6894_v47 = vld [vmem:[#allocation4 + $0x51] sm:$0xff]  ;;  %v6895_v16 = vld [vmem:[#allocation4 + $0x59] sm:$0xff] }
 0x36b   : > { %v6466_v28 = vpop.permute.xlu0 %6465  ;;  %v6468_v54 = vpop.permute.xlu1 %6467 }
 0x36c   : > { %6806 = vst.msk [vmem:[#allocation5 + $0x160] sm:$0xff] %vm6761_vm6, %v6466_v28  ;;  %6807 = vst.msk [vmem:[#allocation5 + $0x168] sm:$0xff] %vm6761_vm6, %v6468_v54 }
 0x36d   : > { %6581 = vrot.lane.b32.xlu0 %v6223_v25, %s13121_s28  ;;  %6583 = vrot.lane.b32.xlu1 %v6224_v34, %s13121_s28  ;;  %v6896_v25 = vld [vmem:[#allocation4 + $0x61] sm:$0xff]  ;;  %v6897_v34 = vld [vmem:[#allocation4 + $0x69] sm:$0xff] }
 0x36f   : > { %v6470_v58 = vpop.permute.xlu0 %6469  ;;  %v6472_v31 = vpop.permute.xlu1 %6471 }
 0x370   : > { %6808 = vst.msk [vmem:[#allocation5 + $0x170] sm:$0xff] %vm6761_vm6, %v6470_v58  ;;  %6809 = vst.msk [vmem:[#allocation5 + $0x178] sm:$0xff] %vm6761_vm6, %v6472_v31 }
 0x371   : > { %6585 = vrot.lane.b32.xlu0 %v6225_v57, %s13121_s28  ;;  %6587 = vrot.lane.b32.xlu1 %v6226_v59, %s13121_s28  ;;  %v6898_v57 = vld [vmem:[#allocation4 + $0x79] sm:$0xff]  ;;  %v6899_v59 = vld [vmem:[#allocation4 + $0x81] sm:$0xff] }
 0x373   : > { %v6474_v61 = vpop.permute.xlu0 %6473  ;;  %v6476_v62 = vpop.permute.xlu1 %6475 }
 0x374   : > { %6810 = vst.msk [vmem:[#allocation5 + $0x180] sm:$0xff] %vm6761_vm6, %v6474_v61  ;;  %6811 = vst.msk [vmem:[#allocation5 + $0x188] sm:$0xff] %vm6761_vm6, %v6476_v62 }
 0x375   : > { %6589 = vrot.lane.b32.xlu0 %v6227_v60, %s13121_s28  ;;  %6591 = vrot.lane.b32.xlu1 %v6228_v29, %s13121_s28  ;;  %v6900_v60 = vld [vmem:[#allocation4 + $0x89] sm:$0xff]  ;;  %v6901_v29 = vld [vmem:[#allocation4 + $0x91] sm:$0xff] }
 0x377   : > { %v6478_v55 = vpop.permute.xlu0 %6477  ;;  %v6480_v1 = vpop.permute.xlu1 %6479 }
 0x378   : > { %6812 = vst.msk [vmem:[#allocation5 + $0x190] sm:$0xff] %vm6761_vm6, %v6478_v55  ;;  %6813 = vst.msk [vmem:[#allocation5 + $0x198] sm:$0xff] %vm6761_vm6, %v6480_v1 }
 0x379   : > { %6593 = vrot.lane.b32.xlu0 %v6229_v63, %s13121_s28  ;;  %6595 = vrot.lane.b32.xlu1 %v6230_v0, %s13121_s28  ;;  %v6902_v63 = vld [vmem:[#allocation4 + $0xa1] sm:$0xff]  ;;  %v6903_v0 = vld [vmem:[#allocation4 + $0xa9] sm:$0xff] }
 0x37b   : > { %v6482_v56 = vpop.permute.xlu0 %6481  ;;  %v6484_v5 = vpop.permute.xlu1 %6483 }
 0x37c   : > { %6814 = vst.msk [vmem:[#allocation5 + $0x1a0] sm:$0xff] %vm6761_vm6, %v6482_v56  ;;  %6815 = vst.msk [vmem:[#allocation5 + $0x1a8] sm:$0xff] %vm6761_vm6, %v6484_v5 }
 0x37d   : > { %6597 = vrot.lane.b32.xlu0 %v6231_v2, %s13121_s28  ;;  %6599 = vrot.lane.b32.xlu1 %v6232_v3, %s13121_s28  ;;  %v6904_v2 = vld [vmem:[#allocation4 + $0xb1] sm:$0xff]  ;;  %v6905_v3 = vld [vmem:[#allocation4 + $0xb9] sm:$0xff] }
 0x37f   : > { %v6486_v38 = vpop.permute.xlu0 %6485  ;;  %v6488_v6 = vpop.permute.xlu1 %6487 }
 0x380   : > { %6816 = vst.msk [vmem:[#allocation5 + $0x1b0] sm:$0xff] %vm6761_vm6, %v6486_v38  ;;  %6817 = vst.msk [vmem:[#allocation5 + $0x1b8] sm:$0xff] %vm6761_vm6, %v6488_v6 }
 0x381   : > { %6601 = vrot.lane.b32.xlu0 %v6233_v30, %s13121_s28  ;;  %6603 = vrot.lane.b32.xlu1 %v6234_v45, %s13121_s28  ;;  %v6906_v30 = vld [vmem:[#allocation4 + $0xc9] sm:$0xff]  ;;  %v6907_v45 = vld [vmem:[#allocation4 + $0xd1] sm:$0xff] }
 0x383   : > { %v6490_v37 = vpop.permute.xlu0 %6489  ;;  %v6492_v33 = vpop.permute.xlu1 %6491 }
 0x384   : > { %6818 = vst.msk [vmem:[#allocation5 + $0x1c0] sm:$0xff] %vm6761_vm6, %v6490_v37  ;;  %6819 = vst.msk [vmem:[#allocation5 + $0x1c8] sm:$0xff] %vm6761_vm6, %v6492_v33 }
 0x385   : > { %6605 = vrot.lane.b32.xlu0 %v6235_v32, %s13121_s28  ;;  %6607 = vrot.lane.b32.xlu1 %v6236_v23, %s13121_s28  ;;  %v6908_v32 = vld [vmem:[#allocation4 + $0xd9] sm:$0xff]  ;;  %v6909_v23 = vld [vmem:[#allocation4 + $0xe1] sm:$0xff] }
 0x387   : > { %v6494_v7 = vpop.permute.xlu0 %6493  ;;  %v6496_v9 = vpop.permute.xlu1 %6495 }
 0x388   : > { %6820 = vst.msk [vmem:[#allocation5 + $0x1d0] sm:$0xff] %vm6761_vm6, %v6494_v7  ;;  %6821 = vst.msk [vmem:[#allocation5 + $0x1d8] sm:$0xff] %vm6761_vm6, %v6496_v9 }
 0x389   : > { %6609 = vrot.lane.b32.xlu0 %v6237_v48, %s13121_s28  ;;  %6611 = vrot.lane.b32.xlu1 %v6238_v8, %s13121_s28  ;;  %v6910_v48 = vld [vmem:[#allocation4 + $0xf1] sm:$0xff]  ;;  %v6911_v8 = vld [vmem:[#allocation4 + $0xf9] sm:$0xff] }
 0x38b   : > { %v6498_v36 = vpop.permute.xlu0 %6497  ;;  %v6500_v4 = vpop.permute.xlu1 %6499 }
 0x38c   : > { %6822 = vst.msk [vmem:[#allocation5 + $0x1e0] sm:$0xff] %vm6761_vm6, %v6498_v36  ;;  %6823 = vst.msk [vmem:[#allocation5 + $0x1e8] sm:$0xff] %vm6761_vm6, %v6500_v4 }
 0x38d   : > { %6613 = vrot.lane.b32.xlu0 %v6239_v10, %s13121_s28  ;;  %6615 = vrot.lane.b32.xlu1 %v6240_v35, %s13121_s28  ;;  %v6912_v10 = vld [vmem:[#allocation4 + $0x101] sm:$0xff]  ;;  %v6913_v35 = vld [vmem:[#allocation4 + $0x109] sm:$0xff] }
 0x38f   : > { %v6502_v12 = vpop.permute.xlu0 %6501  ;;  %v6504_v46 = vpop.permute.xlu1 %6503 }
 0x390   : > { %6824 = vst.msk [vmem:[#allocation5 + $0x1f0] sm:$0xff] %vm6761_vm6, %v6502_v12  ;;  %6825 = vst.msk [vmem:[#allocation5 + $0x1f8] sm:$0xff] %vm6761_vm6, %v6504_v46 }
 0x391   : > { %6617 = vrot.lane.b32.xlu0 %v6241_v11, %s13121_s28  ;;  %6619 = vrot.lane.b32.xlu1 %v6242_v13, %s13121_s28  ;;  %v6914_v11 = vld [vmem:[#allocation4 + $0x119] sm:$0xff]  ;;  %v6915_v13 = vld [vmem:[#allocation4 + $0x121] sm:$0xff] }
 0x393   : > { %v6506_v22 = vpop.permute.xlu0 %6505  ;;  %v6508_v27 = vpop.permute.xlu1 %6507 }
 0x394   : > { %6826 = vst.msk [vmem:[#allocation5 + $0x200] sm:$0xff] %vm6761_vm6, %v6506_v22  ;;  %6827 = vst.msk [vmem:[#allocation5 + $0x208] sm:$0xff] %vm6761_vm6, %v6508_v27 }
 0x395   : > { %6621 = vrot.lane.b32.xlu0 %v6243_v14, %s13121_s28  ;;  %6623 = vrot.lane.b32.xlu1 %v6244_v39, %s13121_s28  ;;  %v6916_v14 = vld [vmem:[#allocation4 + $0x129] sm:$0xff]  ;;  %v6917_v39 = vld [vmem:[#allocation4 + $0x131] sm:$0xff] }
 0x397   : > { %v6510_v17 = vpop.permute.xlu0 %6509  ;;  %v6512_v19 = vpop.permute.xlu1 %6511 }
 0x398   : > { %6828 = vst.msk [vmem:[#allocation5 + $0x210] sm:$0xff] %vm6761_vm6, %v6510_v17  ;;  %6829 = vst.msk [vmem:[#allocation5 + $0x218] sm:$0xff] %vm6761_vm6, %v6512_v19 }
 0x399   : > { %6625 = vrot.lane.b32.xlu0 %v6245_v15, %s13121_s28  ;;  %6627 = vrot.lane.b32.xlu1 %v6246_v18, %s13121_s28  ;;  %v6918_v15 = vld [vmem:[#allocation4 + $0x141] sm:$0xff]  ;;  %v6919_v18 = vld [vmem:[#allocation4 + $0x149] sm:$0xff] }
 0x39b   : > { %v6514_v24 = vpop.permute.xlu0 %6513  ;;  %v6516_v41 = vpop.permute.xlu1 %6515 }
 0x39c   : > { %6830 = vst.msk [vmem:[#allocation5 + $0x220] sm:$0xff] %vm6761_vm6, %v6514_v24  ;;  %6831 = vst.msk [vmem:[#allocation5 + $0x228] sm:$0xff] %vm6761_vm6, %v6516_v41 }
 0x39d   : > { %6629 = vrot.lane.b32.xlu0 %v6247_v20, %s13121_s28  ;;  %6631 = vrot.lane.b32.xlu1 %v6248_v40, %s13121_s28  ;;  %v6920_v20 = vld [vmem:[#allocation4 + $0x151] sm:$0xff]  ;;  %v6921_v40 = vld [vmem:[#allocation4 + $0x159] sm:$0xff] }
 0x39f   : > { %v6518_v26 = vpop.permute.xlu0 %6517  ;;  %v6520_v44 = vpop.permute.xlu1 %6519 }
 0x3a0   : > { %6832 = vst.msk [vmem:[#allocation5 + $0x230] sm:$0xff] %vm6761_vm6, %v6518_v26  ;;  %6833 = vst.msk [vmem:[#allocation5 + $0x238] sm:$0xff] %vm6761_vm6, %v6520_v44 }
 0x3a1   : > { %7146 = vrot.lane.b32.xlu0 %v6890_v21, %s13122_s29  ;;  %7148 = vrot.lane.b32.xlu1 %v6891_v42, %s13122_s29  ;;  %v6922_v21 = vld [vmem:[#allocation4 + $0x169] sm:$0xff]  ;;  %v6923_v42 = vld [vmem:[#allocation4 + $0x171] sm:$0xff] }
 0x3a3   : > { %v6522_v50 = vpop.permute.xlu0 %6521  ;;  %v6524_v52 = vpop.permute.xlu1 %6523 }
 0x3a4   : > { %6834 = vst.msk [vmem:[#allocation5 + $0x240] sm:$0xff] %vm6761_vm6, %v6522_v50  ;;  %6835 = vst.msk [vmem:[#allocation5 + $0x248] sm:$0xff] %vm6761_vm6, %v6524_v52 }
 0x3a5   : > { %7150 = vrot.lane.b32.xlu0 %v6892_v49, %s13122_s29  ;;  %7152 = vrot.lane.b32.xlu1 %v6893_v51, %s13122_s29  ;;  %v6924_v49 = vld [vmem:[#allocation4 + $0x179] sm:$0xff]  ;;  %v6925_v51 = vld [vmem:[#allocation4 + $0x181] sm:$0xff] }
 0x3a7   : > { %v6526_v53 = vpop.permute.xlu0 %6525  ;;  %v6528_v43 = vpop.permute.xlu1 %6527 }
 0x3a8   : > { %6836 = vst.msk [vmem:[#allocation5 + $0x250] sm:$0xff] %vm6761_vm6, %v6526_v53  ;;  %6837 = vst.msk [vmem:[#allocation5 + $0x258] sm:$0xff] %vm6761_vm6, %v6528_v43 }
 0x3a9   : > { %7154 = vrot.lane.b32.xlu0 %v6894_v47, %s13122_s29  ;;  %7156 = vrot.lane.b32.xlu1 %v6895_v16, %s13122_s29  ;;  %v6926_v47 = vld [vmem:[#allocation4 + $0x191] sm:$0xff]  ;;  %v6927_v16 = vld [vmem:[#allocation4 + $0x199] sm:$0xff] }
 0x3ab   : > { %v6530_v28 = vpop.permute.xlu0 %6529  ;;  %v6532_v54 = vpop.permute.xlu1 %6531 }
 0x3ac   : > { %6838 = vst.msk [vmem:[#allocation5 + $0x260] sm:$0xff] %vm6761_vm6, %v6530_v28  ;;  %6839 = vst.msk [vmem:[#allocation5 + $0x268] sm:$0xff] %vm6761_vm6, %v6532_v54 }
 0x3ad   : > { %7158 = vrot.lane.b32.xlu0 %v6896_v25, %s13122_s29  ;;  %7160 = vrot.lane.b32.xlu1 %v6897_v34, %s13122_s29  ;;  %v6928_v25 = vld [vmem:[#allocation4 + $0x1a1] sm:$0xff]  ;;  %v6929_v34 = vld [vmem:[#allocation4 + $0x1a9] sm:$0xff] }
 0x3af   : > { %v6534_v58 = vpop.permute.xlu0 %6533  ;;  %v6536_v31 = vpop.permute.xlu1 %6535 }
 0x3b0   : > { %6840 = vst.msk [vmem:[#allocation5 + $0x270] sm:$0xff] %vm6761_vm6, %v6534_v58  ;;  %6841 = vst.msk [vmem:[#allocation5 + $0x278] sm:$0xff] %vm6761_vm6, %v6536_v31 }
 0x3b1   : > { %7162 = vrot.lane.b32.xlu0 %v6898_v57, %s13122_s29  ;;  %7164 = vrot.lane.b32.xlu1 %v6899_v59, %s13122_s29  ;;  %v6930_v57 = vld [vmem:[#allocation4 + $0x1b9] sm:$0xff]  ;;  %v6931_v59 = vld [vmem:[#allocation4 + $0x1c1] sm:$0xff] }
 0x3b3   : > { %v6538_v61 = vpop.permute.xlu0 %6537  ;;  %v6540_v62 = vpop.permute.xlu1 %6539 }
 0x3b4   : > { %6842 = vst.msk [vmem:[#allocation5 + $0x280] sm:$0xff] %vm6761_vm6, %v6538_v61  ;;  %6843 = vst.msk [vmem:[#allocation5 + $0x288] sm:$0xff] %vm6761_vm6, %v6540_v62 }
 0x3b5   : > { %7166 = vrot.lane.b32.xlu0 %v6900_v60, %s13122_s29  ;;  %7168 = vrot.lane.b32.xlu1 %v6901_v29, %s13122_s29  ;;  %v6932_v60 = vld [vmem:[#allocation4 + $0x1c9] sm:$0xff]  ;;  %v6933_v29 = vld [vmem:[#allocation4 + $0x1d1] sm:$0xff] }
 0x3b7   : > { %v6542_v55 = vpop.permute.xlu0 %6541  ;;  %v6544_v1 = vpop.permute.xlu1 %6543 }
 0x3b8   : > { %6844 = vst.msk [vmem:[#allocation5 + $0x290] sm:$0xff] %vm6761_vm6, %v6542_v55  ;;  %6845 = vst.msk [vmem:[#allocation5 + $0x298] sm:$0xff] %vm6761_vm6, %v6544_v1 }
 0x3b9   : > { %7170 = vrot.lane.b32.xlu0 %v6902_v63, %s13122_s29  ;;  %7172 = vrot.lane.b32.xlu1 %v6903_v0, %s13122_s29  ;;  %v6934_v63 = vld [vmem:[#allocation4 + $0x1e1] sm:$0xff]  ;;  %v6935_v0 = vld [vmem:[#allocation4 + $0x1e9] sm:$0xff] }
 0x3bb   : > { %v6546_v56 = vpop.permute.xlu0 %6545  ;;  %v6548_v5 = vpop.permute.xlu1 %6547 }
 0x3bc   : > { %6846 = vst.msk [vmem:[#allocation5 + $0x2a0] sm:$0xff] %vm6761_vm6, %v6546_v56  ;;  %6847 = vst.msk [vmem:[#allocation5 + $0x2a8] sm:$0xff] %vm6761_vm6, %v6548_v5 }
 0x3bd   : > { %7174 = vrot.lane.b32.xlu0 %v6904_v2, %s13122_s29  ;;  %7176 = vrot.lane.b32.xlu1 %v6905_v3, %s13122_s29  ;;  %v6936_v2 = vld [vmem:[#allocation4 + $0x1f1] sm:$0xff]  ;;  %v6937_v3 = vld [vmem:[#allocation4 + $0x1f9] sm:$0xff] }
 0x3bf   : > { %v6550_v38 = vpop.permute.xlu0 %6549  ;;  %v6552_v6 = vpop.permute.xlu1 %6551 }
 0x3c0   : > { %6848 = vst.msk [vmem:[#allocation5 + $0x2b0] sm:$0xff] %vm6761_vm6, %v6550_v38  ;;  %6849 = vst.msk [vmem:[#allocation5 + $0x2b8] sm:$0xff] %vm6761_vm6, %v6552_v6 }
 0x3c1   : > { %7178 = vrot.lane.b32.xlu0 %v6906_v30, %s13122_s29  ;;  %7180 = vrot.lane.b32.xlu1 %v6907_v45, %s13122_s29  ;;  %v6938_v30 = vld [vmem:[#allocation4 + $0x209] sm:$0xff]  ;;  %v6939_v45 = vld [vmem:[#allocation4 + $0x211] sm:$0xff] }
 0x3c3   : > { %v6554_v37 = vpop.permute.xlu0 %6553  ;;  %v6556_v33 = vpop.permute.xlu1 %6555 }
 0x3c4   : > { %6850 = vst.msk [vmem:[#allocation5 + $0x2c0] sm:$0xff] %vm6761_vm6, %v6554_v37  ;;  %6851 = vst.msk [vmem:[#allocation5 + $0x2c8] sm:$0xff] %vm6761_vm6, %v6556_v33 }
 0x3c5   : > { %7182 = vrot.lane.b32.xlu0 %v6908_v32, %s13122_s29  ;;  %7184 = vrot.lane.b32.xlu1 %v6909_v23, %s13122_s29  ;;  %v6940_v32 = vld [vmem:[#allocation4 + $0x219] sm:$0xff]  ;;  %v6941_v23 = vld [vmem:[#allocation4 + $0x221] sm:$0xff] }
 0x3c7   : > { %v6558_v7 = vpop.permute.xlu0 %6557  ;;  %v6560_v9 = vpop.permute.xlu1 %6559 }
 0x3c8   : > { %6852 = vst.msk [vmem:[#allocation5 + $0x2d0] sm:$0xff] %vm6761_vm6, %v6558_v7  ;;  %6853 = vst.msk [vmem:[#allocation5 + $0x2d8] sm:$0xff] %vm6761_vm6, %v6560_v9 }
 0x3c9   : > { %7186 = vrot.lane.b32.xlu0 %v6910_v48, %s13122_s29  ;;  %7188 = vrot.lane.b32.xlu1 %v6911_v8, %s13122_s29  ;;  %v6942_v48 = vld [vmem:[#allocation4 + $0x231] sm:$0xff]  ;;  %v6943_v8 = vld [vmem:[#allocation4 + $0x239] sm:$0xff] }
 0x3cb   : > { %v6562_v36 = vpop.permute.xlu0 %6561  ;;  %v6564_v4 = vpop.permute.xlu1 %6563 }
 0x3cc   : > { %6854 = vst.msk [vmem:[#allocation5 + $0x2e0] sm:$0xff] %vm6761_vm6, %v6562_v36  ;;  %6855 = vst.msk [vmem:[#allocation5 + $0x2e8] sm:$0xff] %vm6761_vm6, %v6564_v4 }
 0x3cd   : > { %7190 = vrot.lane.b32.xlu0 %v6912_v10, %s13122_s29  ;;  %7192 = vrot.lane.b32.xlu1 %v6913_v35, %s13122_s29  ;;  %v6944_v10 = vld [vmem:[#allocation4 + $0x241] sm:$0xff]  ;;  %v6945_v35 = vld [vmem:[#allocation4 + $0x249] sm:$0xff] }
 0x3cf   : > { %v6566_v12 = vpop.permute.xlu0 %6565  ;;  %v6568_v46 = vpop.permute.xlu1 %6567 }
 0x3d0   : > { %6856 = vst.msk [vmem:[#allocation5 + $0x2f0] sm:$0xff] %vm6761_vm6, %v6566_v12  ;;  %6857 = vst.msk [vmem:[#allocation5 + $0x2f8] sm:$0xff] %vm6761_vm6, %v6568_v46 }
 0x3d1   : > { %7194 = vrot.lane.b32.xlu0 %v6914_v11, %s13122_s29  ;;  %7196 = vrot.lane.b32.xlu1 %v6915_v13, %s13122_s29  ;;  %v6946_v11 = vld [vmem:[#allocation4 + $0x259] sm:$0xff]  ;;  %v6947_v13 = vld [vmem:[#allocation4 + $0x261] sm:$0xff] }
 0x3d3   : > { %v6570_v22 = vpop.permute.xlu0 %6569  ;;  %v6572_v27 = vpop.permute.xlu1 %6571 }
 0x3d4   : > { %6858 = vst.msk [vmem:[#allocation5 + $0x300] sm:$0xff] %vm6761_vm6, %v6570_v22  ;;  %6859 = vst.msk [vmem:[#allocation5 + $0x308] sm:$0xff] %vm6761_vm6, %v6572_v27 }
 0x3d5   : > { %7198 = vrot.lane.b32.xlu0 %v6916_v14, %s13122_s29  ;;  %7200 = vrot.lane.b32.xlu1 %v6917_v39, %s13122_s29  ;;  %v6948_v14 = vld [vmem:[#allocation4 + $0x269] sm:$0xff]  ;;  %v6949_v39 = vld [vmem:[#allocation4 + $0x271] sm:$0xff] }
 0x3d7   : > { %v6574_v17 = vpop.permute.xlu0 %6573  ;;  %v6576_v19 = vpop.permute.xlu1 %6575 }
 0x3d8   : > { %6860 = vst.msk [vmem:[#allocation5 + $0x310] sm:$0xff] %vm6761_vm6, %v6574_v17  ;;  %6861 = vst.msk [vmem:[#allocation5 + $0x318] sm:$0xff] %vm6761_vm6, %v6576_v19 }
 0x3d9   : > { %7202 = vrot.lane.b32.xlu0 %v6918_v15, %s13122_s29  ;;  %7204 = vrot.lane.b32.xlu1 %v6919_v18, %s13122_s29  ;;  %v6950_v15 = vld [vmem:[#allocation4 + $0x281] sm:$0xff]  ;;  %v6951_v18 = vld [vmem:[#allocation4 + $0x289] sm:$0xff] }
 0x3db   : > { %v6578_v24 = vpop.permute.xlu0 %6577  ;;  %v6580_v41 = vpop.permute.xlu1 %6579 }
 0x3dc   : > { %6862 = vst.msk [vmem:[#allocation5 + $0x320] sm:$0xff] %vm6761_vm6, %v6578_v24  ;;  %6863 = vst.msk [vmem:[#allocation5 + $0x328] sm:$0xff] %vm6761_vm6, %v6580_v41 }
 0x3dd   : > { %7206 = vrot.lane.b32.xlu0 %v6920_v20, %s13122_s29  ;;  %7208 = vrot.lane.b32.xlu1 %v6921_v40, %s13122_s29  ;;  %v6952_v20 = vld [vmem:[#allocation4 + $0x291] sm:$0xff]  ;;  %v6953_v40 = vld [vmem:[#allocation4 + $0x299] sm:$0xff] }
 0x3df   : > { %v6582_v26 = vpop.permute.xlu0 %6581  ;;  %v6584_v44 = vpop.permute.xlu1 %6583 }
 0x3e0   : > { %6864 = vst.msk [vmem:[#allocation5 + $0x330] sm:$0xff] %vm6761_vm6, %v6582_v26  ;;  %6865 = vst.msk [vmem:[#allocation5 + $0x338] sm:$0xff] %vm6761_vm6, %v6584_v44 }
 0x3e1   : > { %7210 = vrot.lane.b32.xlu0 %v6922_v21, %s13122_s29  ;;  %7212 = vrot.lane.b32.xlu1 %v6923_v42, %s13122_s29  ;;  %v6954_v21 = vld [vmem:[#allocation4 + $0x2a9] sm:$0xff]  ;;  %v6955_v42 = vld [vmem:[#allocation4 + $0x2b1] sm:$0xff] }
 0x3e3   : > { %v6586_v50 = vpop.permute.xlu0 %6585  ;;  %v6588_v52 = vpop.permute.xlu1 %6587 }
 0x3e4   : > { %6866 = vst.msk [vmem:[#allocation5 + $0x340] sm:$0xff] %vm6761_vm6, %v6586_v50  ;;  %6867 = vst.msk [vmem:[#allocation5 + $0x348] sm:$0xff] %vm6761_vm6, %v6588_v52 }
 0x3e5   : > { %7214 = vrot.lane.b32.xlu0 %v6924_v49, %s13122_s29  ;;  %7216 = vrot.lane.b32.xlu1 %v6925_v51, %s13122_s29  ;;  %v6956_v49 = vld [vmem:[#allocation4 + $0x2b9] sm:$0xff]  ;;  %v6957_v51 = vld [vmem:[#allocation4 + $0x2c1] sm:$0xff] }
 0x3e7   : > { %v6590_v53 = vpop.permute.xlu0 %6589  ;;  %v6592_v43 = vpop.permute.xlu1 %6591 }
 0x3e8   : > { %6868 = vst.msk [vmem:[#allocation5 + $0x350] sm:$0xff] %vm6761_vm6, %v6590_v53  ;;  %6869 = vst.msk [vmem:[#allocation5 + $0x358] sm:$0xff] %vm6761_vm6, %v6592_v43 }
 0x3e9   : > { %7218 = vrot.lane.b32.xlu0 %v6926_v47, %s13122_s29  ;;  %7220 = vrot.lane.b32.xlu1 %v6927_v16, %s13122_s29  ;;  %v6958_v47 = vld [vmem:[#allocation4 + $0x2d1] sm:$0xff]  ;;  %v6959_v16 = vld [vmem:[#allocation4 + $0x2d9] sm:$0xff] }
 0x3eb   : > { %v6594_v28 = vpop.permute.xlu0 %6593  ;;  %v6596_v54 = vpop.permute.xlu1 %6595 }
 0x3ec   : > { %6870 = vst.msk [vmem:[#allocation5 + $0x360] sm:$0xff] %vm6761_vm6, %v6594_v28  ;;  %6871 = vst.msk [vmem:[#allocation5 + $0x368] sm:$0xff] %vm6761_vm6, %v6596_v54 }
 0x3ed   : > { %7222 = vrot.lane.b32.xlu0 %v6928_v25, %s13122_s29  ;;  %7224 = vrot.lane.b32.xlu1 %v6929_v34, %s13122_s29  ;;  %v6960_v25 = vld [vmem:[#allocation4 + $0x2e1] sm:$0xff]  ;;  %v6961_v34 = vld [vmem:[#allocation4 + $0x2e9] sm:$0xff] }
 0x3ef   : > { %v6598_v58 = vpop.permute.xlu0 %6597  ;;  %v6600_v31 = vpop.permute.xlu1 %6599 }
 0x3f0   : > { %6872 = vst.msk [vmem:[#allocation5 + $0x370] sm:$0xff] %vm6761_vm6, %v6598_v58  ;;  %6873 = vst.msk [vmem:[#allocation5 + $0x378] sm:$0xff] %vm6761_vm6, %v6600_v31 }
 0x3f1   : > { %7226 = vrot.lane.b32.xlu0 %v6930_v57, %s13122_s29  ;;  %7228 = vrot.lane.b32.xlu1 %v6931_v59, %s13122_s29  ;;  %v6962_v57 = vld [vmem:[#allocation4 + $0x2f9] sm:$0xff]  ;;  %v6963_v59 = vld [vmem:[#allocation4 + $0x301] sm:$0xff] }
 0x3f3   : > { %v6602_v61 = vpop.permute.xlu0 %6601  ;;  %v6604_v62 = vpop.permute.xlu1 %6603 }
 0x3f4   : > { %6874 = vst.msk [vmem:[#allocation5 + $0x380] sm:$0xff] %vm6761_vm6, %v6602_v61  ;;  %6875 = vst.msk [vmem:[#allocation5 + $0x388] sm:$0xff] %vm6761_vm6, %v6604_v62 }
 0x3f5   : > { %7230 = vrot.lane.b32.xlu0 %v6932_v60, %s13122_s29  ;;  %7232 = vrot.lane.b32.xlu1 %v6933_v29, %s13122_s29  ;;  %v6964_v60 = vld [vmem:[#allocation4 + $0x309] sm:$0xff]  ;;  %v6965_v29 = vld [vmem:[#allocation4 + $0x311] sm:$0xff] }
 0x3f7   : > { %v6606_v55 = vpop.permute.xlu0 %6605  ;;  %v6608_v1 = vpop.permute.xlu1 %6607 }
 0x3f8   : > { %6876 = vst.msk [vmem:[#allocation5 + $0x390] sm:$0xff] %vm6761_vm6, %v6606_v55  ;;  %6877 = vst.msk [vmem:[#allocation5 + $0x398] sm:$0xff] %vm6761_vm6, %v6608_v1 }
 0x3f9   : > { %7234 = vrot.lane.b32.xlu0 %v6934_v63, %s13122_s29  ;;  %7236 = vrot.lane.b32.xlu1 %v6935_v0, %s13122_s29  ;;  %v6966_v63 = vld [vmem:[#allocation4 + $0x321] sm:$0xff]  ;;  %v6967_v0 = vld [vmem:[#allocation4 + $0x329] sm:$0xff] }
 0x3fb   : > { %v6610_v56 = vpop.permute.xlu0 %6609  ;;  %v6612_v5 = vpop.permute.xlu1 %6611 }
 0x3fc   : > { %6878 = vst.msk [vmem:[#allocation5 + $0x3a0] sm:$0xff] %vm6761_vm6, %v6610_v56  ;;  %6879 = vst.msk [vmem:[#allocation5 + $0x3a8] sm:$0xff] %vm6761_vm6, %v6612_v5 }
 0x3fd   : > { %7238 = vrot.lane.b32.xlu0 %v6936_v2, %s13122_s29  ;;  %7240 = vrot.lane.b32.xlu1 %v6937_v3, %s13122_s29  ;;  %v6968_v2 = vld [vmem:[#allocation4 + $0x331] sm:$0xff]  ;;  %v6969_v3 = vld [vmem:[#allocation4 + $0x339] sm:$0xff] }
 0x3ff   : > { %v6614_v38 = vpop.permute.xlu0 %6613  ;;  %v6616_v6 = vpop.permute.xlu1 %6615 }
 0x400   : > { %6880 = vst.msk [vmem:[#allocation5 + $0x3b0] sm:$0xff] %vm6761_vm6, %v6614_v38  ;;  %6881 = vst.msk [vmem:[#allocation5 + $0x3b8] sm:$0xff] %vm6761_vm6, %v6616_v6 }
 0x401   : > { %7242 = vrot.lane.b32.xlu0 %v6938_v30, %s13122_s29  ;;  %7244 = vrot.lane.b32.xlu1 %v6939_v45, %s13122_s29  ;;  %v6970_v30 = vld [vmem:[#allocation4 + $0x349] sm:$0xff]  ;;  %v6971_v45 = vld [vmem:[#allocation4 + $0x351] sm:$0xff] }
 0x403   : > { %v6618_v37 = vpop.permute.xlu0 %6617  ;;  %v6620_v33 = vpop.permute.xlu1 %6619 }
 0x404   : > { %6882 = vst.msk [vmem:[#allocation5 + $0x3c0] sm:$0xff] %vm6761_vm6, %v6618_v37  ;;  %6883 = vst.msk [vmem:[#allocation5 + $0x3c8] sm:$0xff] %vm6761_vm6, %v6620_v33 }
 0x405   : > { %7246 = vrot.lane.b32.xlu0 %v6940_v32, %s13122_s29  ;;  %7248 = vrot.lane.b32.xlu1 %v6941_v23, %s13122_s29  ;;  %v6972_v32 = vld [vmem:[#allocation4 + $0x359] sm:$0xff]  ;;  %v6973_v23 = vld [vmem:[#allocation4 + $0x361] sm:$0xff] }
 0x407   : > { %v6622_v7 = vpop.permute.xlu0 %6621  ;;  %v6624_v9 = vpop.permute.xlu1 %6623 }
 0x408   : > { %6884 = vst.msk [vmem:[#allocation5 + $0x3d0] sm:$0xff] %vm6761_vm6, %v6622_v7  ;;  %6885 = vst.msk [vmem:[#allocation5 + $0x3d8] sm:$0xff] %vm6761_vm6, %v6624_v9 }
 0x409   : > { %7250 = vrot.lane.b32.xlu0 %v6942_v48, %s13122_s29  ;;  %7252 = vrot.lane.b32.xlu1 %v6943_v8, %s13122_s29  ;;  %v6974_v48 = vld [vmem:[#allocation4 + $0x371] sm:$0xff]  ;;  %v6975_v8 = vld [vmem:[#allocation4 + $0x379] sm:$0xff] }
 0x40b   : > { %v6626_v36 = vpop.permute.xlu0 %6625  ;;  %v6628_v4 = vpop.permute.xlu1 %6627 }
 0x40c   : > { %6886 = vst.msk [vmem:[#allocation5 + $0x3e0] sm:$0xff] %vm6761_vm6, %v6626_v36  ;;  %6887 = vst.msk [vmem:[#allocation5 + $0x3e8] sm:$0xff] %vm6761_vm6, %v6628_v4 }
 0x40d   : > { %7254 = vrot.lane.b32.xlu0 %v6944_v10, %s13122_s29  ;;  %7256 = vrot.lane.b32.xlu1 %v6945_v35, %s13122_s29  ;;  %v6976_v10 = vld [vmem:[#allocation4 + $0x381] sm:$0xff]  ;;  %v6977_v35 = vld [vmem:[#allocation4 + $0x389] sm:$0xff] }
 0x40f   : > { %v6630_v12 = vpop.permute.xlu0 %6629  ;;  %v6632_v46 = vpop.permute.xlu1 %6631 }
 0x410   : > { %6888 = vst.msk [vmem:[#allocation5 + $0x3f0] sm:$0xff] %vm6761_vm6, %v6630_v12  ;;  %6889 = vst.msk [vmem:[#allocation5 + $0x3f8] sm:$0xff] %vm6761_vm6, %v6632_v46 }
 0x411   : > { %7258 = vrot.lane.b32.xlu0 %v6946_v11, %s13122_s29  ;;  %7260 = vrot.lane.b32.xlu1 %v6947_v13, %s13122_s29  ;;  %v6978_v11 = vld [vmem:[#allocation4 + $0x399] sm:$0xff]  ;;  %v6979_v13 = vld [vmem:[#allocation4 + $0x3a1] sm:$0xff] }
 0x413   : > { %v7147_v22 = vpop.permute.xlu0 %7146  ;;  %v7149_v27 = vpop.permute.xlu1 %7148 }
 0x414   : > { %7531 = vst.msk [vmem:[#allocation5] sm:$0xff] %vm7530_vm7, %v7147_v22  ;;  %7532 = vst.msk [vmem:[#allocation5 + $0x8] sm:$0xff] %vm7530_vm7, %v7149_v27 }
 0x415   : > { %7262 = vrot.lane.b32.xlu0 %v6948_v14, %s13122_s29  ;;  %7264 = vrot.lane.b32.xlu1 %v6949_v39, %s13122_s29  ;;  %v6980_v14 = vld [vmem:[#allocation4 + $0x3a9] sm:$0xff]  ;;  %v6981_v39 = vld [vmem:[#allocation4 + $0x3b1] sm:$0xff] }
 0x417   : > { %v7151_v17 = vpop.permute.xlu0 %7150  ;;  %v7153_v19 = vpop.permute.xlu1 %7152 }
 0x418   : > { %7533 = vst.msk [vmem:[#allocation5 + $0x10] sm:$0xff] %vm7530_vm7, %v7151_v17  ;;  %7534 = vst.msk [vmem:[#allocation5 + $0x18] sm:$0xff] %vm7530_vm7, %v7153_v19 }
 0x419   : > { %7266 = vrot.lane.b32.xlu0 %v6950_v15, %s13122_s29  ;;  %7268 = vrot.lane.b32.xlu1 %v6951_v18, %s13122_s29  ;;  %v6982_v15 = vld [vmem:[#allocation4 + $0x3c1] sm:$0xff]  ;;  %v6983_v18 = vld [vmem:[#allocation4 + $0x3c9] sm:$0xff] }
 0x41b   : > { %v7155_v24 = vpop.permute.xlu0 %7154  ;;  %v7157_v41 = vpop.permute.xlu1 %7156 }
 0x41c   : > { %7535 = vst.msk [vmem:[#allocation5 + $0x20] sm:$0xff] %vm7530_vm7, %v7155_v24  ;;  %7536 = vst.msk [vmem:[#allocation5 + $0x28] sm:$0xff] %vm7530_vm7, %v7157_v41 }
 0x41d   : > { %7270 = vrot.lane.b32.xlu0 %v6952_v20, %s13122_s29  ;;  %7272 = vrot.lane.b32.xlu1 %v6953_v40, %s13122_s29  ;;  %v6984_v20 = vld [vmem:[#allocation4 + $0x3d1] sm:$0xff]  ;;  %v6985_v40 = vld [vmem:[#allocation4 + $0x3d9] sm:$0xff] }
 0x41f   : > { %v7159_v26 = vpop.permute.xlu0 %7158  ;;  %v7161_v44 = vpop.permute.xlu1 %7160 }
 0x420   : > { %7537 = vst.msk [vmem:[#allocation5 + $0x30] sm:$0xff] %vm7530_vm7, %v7159_v26  ;;  %7538 = vst.msk [vmem:[#allocation5 + $0x38] sm:$0xff] %vm7530_vm7, %v7161_v44 }
 0x421   : > { %7274 = vrot.lane.b32.xlu0 %v6954_v21, %s13122_s29  ;;  %7276 = vrot.lane.b32.xlu1 %v6955_v42, %s13122_s29  ;;  %v6986_v21 = vld [vmem:[#allocation4 + $0x3e9] sm:$0xff]  ;;  %v6987_v42 = vld [vmem:[#allocation4 + $0x3f1] sm:$0xff] }
 0x423   : > { %v7163_v50 = vpop.permute.xlu0 %7162  ;;  %v7165_v52 = vpop.permute.xlu1 %7164 }
 0x424   : > { %7539 = vst.msk [vmem:[#allocation5 + $0x40] sm:$0xff] %vm7530_vm7, %v7163_v50  ;;  %7540 = vst.msk [vmem:[#allocation5 + $0x48] sm:$0xff] %vm7530_vm7, %v7165_v52 }
 0x425   : > { %7278 = vrot.lane.b32.xlu0 %v6956_v49, %s13122_s29  ;;  %7280 = vrot.lane.b32.xlu1 %v6957_v51, %s13122_s29  ;;  %v6988_v49 = vld [vmem:[#allocation4 + $0x3f9] sm:$0xff]  ;;  %v6989_v51 = vld [vmem:[#allocation4 + $0x401] sm:$0xff] }
 0x427   : > { %v7167_v53 = vpop.permute.xlu0 %7166  ;;  %v7169_v43 = vpop.permute.xlu1 %7168 }
 0x428   : > { %7541 = vst.msk [vmem:[#allocation5 + $0x50] sm:$0xff] %vm7530_vm7, %v7167_v53  ;;  %7542 = vst.msk [vmem:[#allocation5 + $0x58] sm:$0xff] %vm7530_vm7, %v7169_v43 }
 0x429   : > { %7282 = vrot.lane.b32.xlu0 %v6958_v47, %s13122_s29  ;;  %7284 = vrot.lane.b32.xlu1 %v6959_v16, %s13122_s29  ;;  %v6990_v47 = vld [vmem:[#allocation4 + $0x411] sm:$0xff]  ;;  %v6991_v16 = vld [vmem:[#allocation4 + $0x419] sm:$0xff] }
 0x42b   : > { %v7171_v28 = vpop.permute.xlu0 %7170  ;;  %v7173_v54 = vpop.permute.xlu1 %7172 }
 0x42c   : > { %7543 = vst.msk [vmem:[#allocation5 + $0x60] sm:$0xff] %vm7530_vm7, %v7171_v28  ;;  %7544 = vst.msk [vmem:[#allocation5 + $0x68] sm:$0xff] %vm7530_vm7, %v7173_v54 }
 0x42d   : > { %7286 = vrot.lane.b32.xlu0 %v6960_v25, %s13122_s29  ;;  %7288 = vrot.lane.b32.xlu1 %v6961_v34, %s13122_s29  ;;  %v6992_v25 = vld [vmem:[#allocation4 + $0x421] sm:$0xff]  ;;  %v6993_v34 = vld [vmem:[#allocation4 + $0x429] sm:$0xff] }
 0x42f   : > { %v7175_v58 = vpop.permute.xlu0 %7174  ;;  %v7177_v31 = vpop.permute.xlu1 %7176 }
 0x430   : > { %7545 = vst.msk [vmem:[#allocation5 + $0x70] sm:$0xff] %vm7530_vm7, %v7175_v58  ;;  %7546 = vst.msk [vmem:[#allocation5 + $0x78] sm:$0xff] %vm7530_vm7, %v7177_v31 }
 0x431   : > { %7290 = vrot.lane.b32.xlu0 %v6962_v57, %s13122_s29  ;;  %7292 = vrot.lane.b32.xlu1 %v6963_v59, %s13122_s29  ;;  %v6994_v57 = vld [vmem:[#allocation4 + $0x439] sm:$0xff]  ;;  %v6995_v59 = vld [vmem:[#allocation4 + $0x441] sm:$0xff] }
 0x433   : > { %v7179_v61 = vpop.permute.xlu0 %7178  ;;  %v7181_v62 = vpop.permute.xlu1 %7180 }
 0x434   : > { %7547 = vst.msk [vmem:[#allocation5 + $0x80] sm:$0xff] %vm7530_vm7, %v7179_v61  ;;  %7548 = vst.msk [vmem:[#allocation5 + $0x88] sm:$0xff] %vm7530_vm7, %v7181_v62 }
 0x435   : > { %7294 = vrot.lane.b32.xlu0 %v6964_v60, %s13122_s29  ;;  %7296 = vrot.lane.b32.xlu1 %v6965_v29, %s13122_s29  ;;  %v6996_v60 = vld [vmem:[#allocation4 + $0x449] sm:$0xff]  ;;  %v6997_v29 = vld [vmem:[#allocation4 + $0x451] sm:$0xff] }
 0x437   : > { %v7183_v55 = vpop.permute.xlu0 %7182  ;;  %v7185_v1 = vpop.permute.xlu1 %7184 }
 0x438   : > { %7549 = vst.msk [vmem:[#allocation5 + $0x90] sm:$0xff] %vm7530_vm7, %v7183_v55  ;;  %7550 = vst.msk [vmem:[#allocation5 + $0x98] sm:$0xff] %vm7530_vm7, %v7185_v1 }
 0x439   : > { %7298 = vrot.lane.b32.xlu0 %v6966_v63, %s13122_s29  ;;  %7300 = vrot.lane.b32.xlu1 %v6967_v0, %s13122_s29  ;;  %v6998_v63 = vld [vmem:[#allocation4 + $0x461] sm:$0xff]  ;;  %v6999_v0 = vld [vmem:[#allocation4 + $0x469] sm:$0xff] }
 0x43b   : > { %v7187_v56 = vpop.permute.xlu0 %7186  ;;  %v7189_v5 = vpop.permute.xlu1 %7188 }
 0x43c   : > { %7551 = vst.msk [vmem:[#allocation5 + $0xa0] sm:$0xff] %vm7530_vm7, %v7187_v56  ;;  %7552 = vst.msk [vmem:[#allocation5 + $0xa8] sm:$0xff] %vm7530_vm7, %v7189_v5 }
 0x43d   : > { %7302 = vrot.lane.b32.xlu0 %v6968_v2, %s13122_s29  ;;  %7304 = vrot.lane.b32.xlu1 %v6969_v3, %s13122_s29  ;;  %v7000_v2 = vld [vmem:[#allocation4 + $0x471] sm:$0xff]  ;;  %v7001_v3 = vld [vmem:[#allocation4 + $0x479] sm:$0xff] }
 0x43f   : > { %v7191_v38 = vpop.permute.xlu0 %7190  ;;  %v7193_v6 = vpop.permute.xlu1 %7192 }
 0x440   : > { %7553 = vst.msk [vmem:[#allocation5 + $0xb0] sm:$0xff] %vm7530_vm7, %v7191_v38  ;;  %7554 = vst.msk [vmem:[#allocation5 + $0xb8] sm:$0xff] %vm7530_vm7, %v7193_v6 }
 0x441   : > { %7306 = vrot.lane.b32.xlu0 %v6970_v30, %s13122_s29  ;;  %7308 = vrot.lane.b32.xlu1 %v6971_v45, %s13122_s29  ;;  %v7002_v30 = vld [vmem:[#allocation4 + $0x489] sm:$0xff]  ;;  %v7003_v45 = vld [vmem:[#allocation4 + $0x491] sm:$0xff] }
 0x443   : > { %v7195_v37 = vpop.permute.xlu0 %7194  ;;  %v7197_v33 = vpop.permute.xlu1 %7196 }
 0x444   : > { %7555 = vst.msk [vmem:[#allocation5 + $0xc0] sm:$0xff] %vm7530_vm7, %v7195_v37  ;;  %7556 = vst.msk [vmem:[#allocation5 + $0xc8] sm:$0xff] %vm7530_vm7, %v7197_v33 }
 0x445   : > { %7310 = vrot.lane.b32.xlu0 %v6972_v32, %s13122_s29  ;;  %7312 = vrot.lane.b32.xlu1 %v6973_v23, %s13122_s29  ;;  %v7004_v32 = vld [vmem:[#allocation4 + $0x499] sm:$0xff]  ;;  %v7005_v23 = vld [vmem:[#allocation4 + $0x4a1] sm:$0xff] }
 0x447   : > { %v7199_v7 = vpop.permute.xlu0 %7198  ;;  %v7201_v9 = vpop.permute.xlu1 %7200 }
 0x448   : > { %7557 = vst.msk [vmem:[#allocation5 + $0xd0] sm:$0xff] %vm7530_vm7, %v7199_v7  ;;  %7558 = vst.msk [vmem:[#allocation5 + $0xd8] sm:$0xff] %vm7530_vm7, %v7201_v9 }
 0x449   : > { %7314 = vrot.lane.b32.xlu0 %v6974_v48, %s13122_s29  ;;  %7316 = vrot.lane.b32.xlu1 %v6975_v8, %s13122_s29  ;;  %v7006_v48 = vld [vmem:[#allocation4 + $0x4b1] sm:$0xff]  ;;  %v7007_v8 = vld [vmem:[#allocation4 + $0x4b9] sm:$0xff] }
 0x44b   : > { %v7203_v36 = vpop.permute.xlu0 %7202  ;;  %v7205_v4 = vpop.permute.xlu1 %7204 }
 0x44c   : > { %7559 = vst.msk [vmem:[#allocation5 + $0xe0] sm:$0xff] %vm7530_vm7, %v7203_v36  ;;  %7560 = vst.msk [vmem:[#allocation5 + $0xe8] sm:$0xff] %vm7530_vm7, %v7205_v4 }
 0x44d   : > { %7318 = vrot.lane.b32.xlu0 %v6976_v10, %s13122_s29  ;;  %7320 = vrot.lane.b32.xlu1 %v6977_v35, %s13122_s29  ;;  %v7008_v10 = vld [vmem:[#allocation4 + $0x4c1] sm:$0xff]  ;;  %v7009_v35 = vld [vmem:[#allocation4 + $0x4c9] sm:$0xff] }
 0x44f   : > { %v7207_v12 = vpop.permute.xlu0 %7206  ;;  %v7209_v46 = vpop.permute.xlu1 %7208 }
 0x450   : > { %7561 = vst.msk [vmem:[#allocation5 + $0xf0] sm:$0xff] %vm7530_vm7, %v7207_v12  ;;  %7562 = vst.msk [vmem:[#allocation5 + $0xf8] sm:$0xff] %vm7530_vm7, %v7209_v46 }
 0x451   : > { %7322 = vrot.lane.b32.xlu0 %v6978_v11, %s13122_s29  ;;  %7324 = vrot.lane.b32.xlu1 %v6979_v13, %s13122_s29  ;;  %v7010_v11 = vld [vmem:[#allocation4 + $0x4d9] sm:$0xff]  ;;  %v7011_v13 = vld [vmem:[#allocation4 + $0x4e1] sm:$0xff] }
 0x453   : > { %v7211_v22 = vpop.permute.xlu0 %7210  ;;  %v7213_v27 = vpop.permute.xlu1 %7212 }
 0x454   : > { %7563 = vst.msk [vmem:[#allocation5 + $0x100] sm:$0xff] %vm7530_vm7, %v7211_v22  ;;  %7564 = vst.msk [vmem:[#allocation5 + $0x108] sm:$0xff] %vm7530_vm7, %v7213_v27 }
 0x455   : > { %7326 = vrot.lane.b32.xlu0 %v6980_v14, %s13122_s29  ;;  %7328 = vrot.lane.b32.xlu1 %v6981_v39, %s13122_s29  ;;  %v7012_v14 = vld [vmem:[#allocation4 + $0x4e9] sm:$0xff]  ;;  %v7013_v39 = vld [vmem:[#allocation4 + $0x4f1] sm:$0xff] }
 0x457   : > { %v7215_v17 = vpop.permute.xlu0 %7214  ;;  %v7217_v19 = vpop.permute.xlu1 %7216 }
 0x458   : > { %7565 = vst.msk [vmem:[#allocation5 + $0x110] sm:$0xff] %vm7530_vm7, %v7215_v17  ;;  %7566 = vst.msk [vmem:[#allocation5 + $0x118] sm:$0xff] %vm7530_vm7, %v7217_v19 }
 0x459   : > { %7330 = vrot.lane.b32.xlu0 %v6982_v15, %s13122_s29  ;;  %7332 = vrot.lane.b32.xlu1 %v6983_v18, %s13122_s29  ;;  %v7014_v15 = vld [vmem:[#allocation4 + $0x501] sm:$0xff]  ;;  %v7015_v18 = vld [vmem:[#allocation4 + $0x509] sm:$0xff] }
 0x45b   : > { %v7219_v24 = vpop.permute.xlu0 %7218  ;;  %v7221_v41 = vpop.permute.xlu1 %7220 }
 0x45c   : > { %7567 = vst.msk [vmem:[#allocation5 + $0x120] sm:$0xff] %vm7530_vm7, %v7219_v24  ;;  %7568 = vst.msk [vmem:[#allocation5 + $0x128] sm:$0xff] %vm7530_vm7, %v7221_v41 }
 0x45d   : > { %7334 = vrot.lane.b32.xlu0 %v6984_v20, %s13122_s29  ;;  %7336 = vrot.lane.b32.xlu1 %v6985_v40, %s13122_s29  ;;  %v7016_v20 = vld [vmem:[#allocation4 + $0x511] sm:$0xff]  ;;  %v7017_v40 = vld [vmem:[#allocation4 + $0x519] sm:$0xff] }
 0x45f   : > { %v7223_v26 = vpop.permute.xlu0 %7222  ;;  %v7225_v44 = vpop.permute.xlu1 %7224 }
 0x460   : > { %7569 = vst.msk [vmem:[#allocation5 + $0x130] sm:$0xff] %vm7530_vm7, %v7223_v26  ;;  %7570 = vst.msk [vmem:[#allocation5 + $0x138] sm:$0xff] %vm7530_vm7, %v7225_v44 }
 0x461   : > { %7338 = vrot.lane.b32.xlu0 %v6986_v21, %s13122_s29  ;;  %7340 = vrot.lane.b32.xlu1 %v6987_v42, %s13122_s29  ;;  %v7659_v21 = vld [vmem:[#allocation4 + $0x2a] sm:$0xff]  ;;  %v7660_v42 = vld [vmem:[#allocation4 + $0x32] sm:$0xff] }
 0x463   : > { %v7227_v50 = vpop.permute.xlu0 %7226  ;;  %v7229_v52 = vpop.permute.xlu1 %7228 }
 0x464   : > { %7571 = vst.msk [vmem:[#allocation5 + $0x140] sm:$0xff] %vm7530_vm7, %v7227_v50  ;;  %7572 = vst.msk [vmem:[#allocation5 + $0x148] sm:$0xff] %vm7530_vm7, %v7229_v52 }
 0x465   : > { %7342 = vrot.lane.b32.xlu0 %v6988_v49, %s13122_s29  ;;  %7344 = vrot.lane.b32.xlu1 %v6989_v51, %s13122_s29  ;;  %v7661_v49 = vld [vmem:[#allocation4 + $0x3a] sm:$0xff]  ;;  %v7662_v51 = vld [vmem:[#allocation4 + $0x42] sm:$0xff] }
 0x467   : > { %v7231_v53 = vpop.permute.xlu0 %7230  ;;  %v7233_v43 = vpop.permute.xlu1 %7232 }
 0x468   : > { %7573 = vst.msk [vmem:[#allocation5 + $0x150] sm:$0xff] %vm7530_vm7, %v7231_v53  ;;  %7574 = vst.msk [vmem:[#allocation5 + $0x158] sm:$0xff] %vm7530_vm7, %v7233_v43 }
 0x469   : > { %7346 = vrot.lane.b32.xlu0 %v6990_v47, %s13122_s29  ;;  %7348 = vrot.lane.b32.xlu1 %v6991_v16, %s13122_s29  ;;  %v7663_v47 = vld [vmem:[#allocation4 + $0x52] sm:$0xff]  ;;  %v7664_v16 = vld [vmem:[#allocation4 + $0x5a] sm:$0xff] }
 0x46b   : > { %v7235_v28 = vpop.permute.xlu0 %7234  ;;  %v7237_v54 = vpop.permute.xlu1 %7236 }
 0x46c   : > { %7575 = vst.msk [vmem:[#allocation5 + $0x160] sm:$0xff] %vm7530_vm7, %v7235_v28  ;;  %7576 = vst.msk [vmem:[#allocation5 + $0x168] sm:$0xff] %vm7530_vm7, %v7237_v54 }
 0x46d   : > { %7350 = vrot.lane.b32.xlu0 %v6992_v25, %s13122_s29  ;;  %7352 = vrot.lane.b32.xlu1 %v6993_v34, %s13122_s29  ;;  %v7665_v25 = vld [vmem:[#allocation4 + $0x62] sm:$0xff]  ;;  %v7666_v34 = vld [vmem:[#allocation4 + $0x6a] sm:$0xff] }
 0x46f   : > { %v7239_v58 = vpop.permute.xlu0 %7238  ;;  %v7241_v31 = vpop.permute.xlu1 %7240 }
 0x470   : > { %7577 = vst.msk [vmem:[#allocation5 + $0x170] sm:$0xff] %vm7530_vm7, %v7239_v58  ;;  %7578 = vst.msk [vmem:[#allocation5 + $0x178] sm:$0xff] %vm7530_vm7, %v7241_v31 }
 0x471   : > { %7354 = vrot.lane.b32.xlu0 %v6994_v57, %s13122_s29  ;;  %7356 = vrot.lane.b32.xlu1 %v6995_v59, %s13122_s29  ;;  %v7667_v57 = vld [vmem:[#allocation4 + $0x7a] sm:$0xff]  ;;  %v7668_v59 = vld [vmem:[#allocation4 + $0x82] sm:$0xff] }
 0x473   : > { %v7243_v61 = vpop.permute.xlu0 %7242  ;;  %v7245_v62 = vpop.permute.xlu1 %7244 }
 0x474   : > { %7579 = vst.msk [vmem:[#allocation5 + $0x180] sm:$0xff] %vm7530_vm7, %v7243_v61  ;;  %7580 = vst.msk [vmem:[#allocation5 + $0x188] sm:$0xff] %vm7530_vm7, %v7245_v62 }
 0x475   : > { %7358 = vrot.lane.b32.xlu0 %v6996_v60, %s13122_s29  ;;  %7360 = vrot.lane.b32.xlu1 %v6997_v29, %s13122_s29  ;;  %v7669_v60 = vld [vmem:[#allocation4 + $0x8a] sm:$0xff]  ;;  %v7670_v29 = vld [vmem:[#allocation4 + $0x92] sm:$0xff] }
 0x477   : > { %v7247_v55 = vpop.permute.xlu0 %7246  ;;  %v7249_v1 = vpop.permute.xlu1 %7248 }
 0x478   : > { %7581 = vst.msk [vmem:[#allocation5 + $0x190] sm:$0xff] %vm7530_vm7, %v7247_v55  ;;  %7582 = vst.msk [vmem:[#allocation5 + $0x198] sm:$0xff] %vm7530_vm7, %v7249_v1 }
 0x479   : > { %7362 = vrot.lane.b32.xlu0 %v6998_v63, %s13122_s29  ;;  %7364 = vrot.lane.b32.xlu1 %v6999_v0, %s13122_s29  ;;  %v7671_v63 = vld [vmem:[#allocation4 + $0xa2] sm:$0xff]  ;;  %v7672_v0 = vld [vmem:[#allocation4 + $0xaa] sm:$0xff] }
 0x47b   : > { %v7251_v56 = vpop.permute.xlu0 %7250  ;;  %v7253_v5 = vpop.permute.xlu1 %7252 }
 0x47c   : > { %7583 = vst.msk [vmem:[#allocation5 + $0x1a0] sm:$0xff] %vm7530_vm7, %v7251_v56  ;;  %7584 = vst.msk [vmem:[#allocation5 + $0x1a8] sm:$0xff] %vm7530_vm7, %v7253_v5 }
 0x47d   : > { %7366 = vrot.lane.b32.xlu0 %v7000_v2, %s13122_s29  ;;  %7368 = vrot.lane.b32.xlu1 %v7001_v3, %s13122_s29  ;;  %v7673_v2 = vld [vmem:[#allocation4 + $0xb2] sm:$0xff]  ;;  %v7674_v3 = vld [vmem:[#allocation4 + $0xba] sm:$0xff] }
 0x47f   : > { %v7255_v38 = vpop.permute.xlu0 %7254  ;;  %v7257_v6 = vpop.permute.xlu1 %7256 }
 0x480   : > { %7585 = vst.msk [vmem:[#allocation5 + $0x1b0] sm:$0xff] %vm7530_vm7, %v7255_v38  ;;  %7586 = vst.msk [vmem:[#allocation5 + $0x1b8] sm:$0xff] %vm7530_vm7, %v7257_v6 }
 0x481   : > { %7370 = vrot.lane.b32.xlu0 %v7002_v30, %s13122_s29  ;;  %7372 = vrot.lane.b32.xlu1 %v7003_v45, %s13122_s29  ;;  %v7675_v30 = vld [vmem:[#allocation4 + $0xca] sm:$0xff]  ;;  %v7676_v45 = vld [vmem:[#allocation4 + $0xd2] sm:$0xff] }
 0x483   : > { %v7259_v37 = vpop.permute.xlu0 %7258  ;;  %v7261_v33 = vpop.permute.xlu1 %7260 }
 0x484   : > { %7587 = vst.msk [vmem:[#allocation5 + $0x1c0] sm:$0xff] %vm7530_vm7, %v7259_v37  ;;  %7588 = vst.msk [vmem:[#allocation5 + $0x1c8] sm:$0xff] %vm7530_vm7, %v7261_v33 }
 0x485   : > { %7374 = vrot.lane.b32.xlu0 %v7004_v32, %s13122_s29  ;;  %7376 = vrot.lane.b32.xlu1 %v7005_v23, %s13122_s29  ;;  %v7677_v32 = vld [vmem:[#allocation4 + $0xda] sm:$0xff]  ;;  %v7678_v23 = vld [vmem:[#allocation4 + $0xe2] sm:$0xff] }
 0x487   : > { %v7263_v7 = vpop.permute.xlu0 %7262  ;;  %v7265_v9 = vpop.permute.xlu1 %7264 }
 0x488   : > { %7589 = vst.msk [vmem:[#allocation5 + $0x1d0] sm:$0xff] %vm7530_vm7, %v7263_v7  ;;  %7590 = vst.msk [vmem:[#allocation5 + $0x1d8] sm:$0xff] %vm7530_vm7, %v7265_v9 }
 0x489   : > { %7378 = vrot.lane.b32.xlu0 %v7006_v48, %s13122_s29  ;;  %7380 = vrot.lane.b32.xlu1 %v7007_v8, %s13122_s29  ;;  %v7679_v48 = vld [vmem:[#allocation4 + $0xf2] sm:$0xff]  ;;  %v7680_v8 = vld [vmem:[#allocation4 + $0xfa] sm:$0xff] }
 0x48b   : > { %v7267_v36 = vpop.permute.xlu0 %7266  ;;  %v7269_v4 = vpop.permute.xlu1 %7268 }
 0x48c   : > { %7591 = vst.msk [vmem:[#allocation5 + $0x1e0] sm:$0xff] %vm7530_vm7, %v7267_v36  ;;  %7592 = vst.msk [vmem:[#allocation5 + $0x1e8] sm:$0xff] %vm7530_vm7, %v7269_v4 }
 0x48d   : > { %7382 = vrot.lane.b32.xlu0 %v7008_v10, %s13122_s29  ;;  %7384 = vrot.lane.b32.xlu1 %v7009_v35, %s13122_s29  ;;  %v7681_v10 = vld [vmem:[#allocation4 + $0x102] sm:$0xff]  ;;  %v7682_v35 = vld [vmem:[#allocation4 + $0x10a] sm:$0xff] }
 0x48f   : > { %v7271_v12 = vpop.permute.xlu0 %7270  ;;  %v7273_v46 = vpop.permute.xlu1 %7272 }
 0x490   : > { %7593 = vst.msk [vmem:[#allocation5 + $0x1f0] sm:$0xff] %vm7530_vm7, %v7271_v12  ;;  %7594 = vst.msk [vmem:[#allocation5 + $0x1f8] sm:$0xff] %vm7530_vm7, %v7273_v46 }
 0x491   : > { %7386 = vrot.lane.b32.xlu0 %v7010_v11, %s13122_s29  ;;  %7388 = vrot.lane.b32.xlu1 %v7011_v13, %s13122_s29  ;;  %v7683_v11 = vld [vmem:[#allocation4 + $0x11a] sm:$0xff]  ;;  %v7684_v13 = vld [vmem:[#allocation4 + $0x122] sm:$0xff] }
 0x493   : > { %v7275_v22 = vpop.permute.xlu0 %7274  ;;  %v7277_v27 = vpop.permute.xlu1 %7276 }
 0x494   : > { %7595 = vst.msk [vmem:[#allocation5 + $0x200] sm:$0xff] %vm7530_vm7, %v7275_v22  ;;  %7596 = vst.msk [vmem:[#allocation5 + $0x208] sm:$0xff] %vm7530_vm7, %v7277_v27 }
 0x495   : > { %7390 = vrot.lane.b32.xlu0 %v7012_v14, %s13122_s29  ;;  %7392 = vrot.lane.b32.xlu1 %v7013_v39, %s13122_s29  ;;  %v7685_v14 = vld [vmem:[#allocation4 + $0x12a] sm:$0xff]  ;;  %v7686_v39 = vld [vmem:[#allocation4 + $0x132] sm:$0xff] }
 0x497   : > { %v7279_v17 = vpop.permute.xlu0 %7278  ;;  %v7281_v19 = vpop.permute.xlu1 %7280 }
 0x498   : > { %7597 = vst.msk [vmem:[#allocation5 + $0x210] sm:$0xff] %vm7530_vm7, %v7279_v17  ;;  %7598 = vst.msk [vmem:[#allocation5 + $0x218] sm:$0xff] %vm7530_vm7, %v7281_v19 }
 0x499   : > { %7394 = vrot.lane.b32.xlu0 %v7014_v15, %s13122_s29  ;;  %7396 = vrot.lane.b32.xlu1 %v7015_v18, %s13122_s29  ;;  %v7687_v15 = vld [vmem:[#allocation4 + $0x142] sm:$0xff]  ;;  %v7688_v18 = vld [vmem:[#allocation4 + $0x14a] sm:$0xff] }
 0x49b   : > { %v7283_v24 = vpop.permute.xlu0 %7282  ;;  %v7285_v41 = vpop.permute.xlu1 %7284 }
 0x49c   : > { %7599 = vst.msk [vmem:[#allocation5 + $0x220] sm:$0xff] %vm7530_vm7, %v7283_v24  ;;  %7600 = vst.msk [vmem:[#allocation5 + $0x228] sm:$0xff] %vm7530_vm7, %v7285_v41 }
 0x49d   : > { %7398 = vrot.lane.b32.xlu0 %v7016_v20, %s13122_s29  ;;  %7400 = vrot.lane.b32.xlu1 %v7017_v40, %s13122_s29  ;;  %v7689_v20 = vld [vmem:[#allocation4 + $0x152] sm:$0xff]  ;;  %v7690_v40 = vld [vmem:[#allocation4 + $0x15a] sm:$0xff] }
 0x49f   : > { %v7287_v26 = vpop.permute.xlu0 %7286  ;;  %v7289_v44 = vpop.permute.xlu1 %7288 }
 0x4a0   : > { %7601 = vst.msk [vmem:[#allocation5 + $0x230] sm:$0xff] %vm7530_vm7, %v7287_v26  ;;  %7602 = vst.msk [vmem:[#allocation5 + $0x238] sm:$0xff] %vm7530_vm7, %v7289_v44 }
 0x4a1   : > { %7915 = vrot.lane.b32.xlu0 %v7659_v21, %s13123_s5  ;;  %7917 = vrot.lane.b32.xlu1 %v7660_v42, %s13123_s5  ;;  %v7691_v21 = vld [vmem:[#allocation4 + $0x16a] sm:$0xff]  ;;  %v7692_v42 = vld [vmem:[#allocation4 + $0x172] sm:$0xff] }
 0x4a3   : > { %v7291_v50 = vpop.permute.xlu0 %7290  ;;  %v7293_v52 = vpop.permute.xlu1 %7292 }
 0x4a4   : > { %7603 = vst.msk [vmem:[#allocation5 + $0x240] sm:$0xff] %vm7530_vm7, %v7291_v50  ;;  %7604 = vst.msk [vmem:[#allocation5 + $0x248] sm:$0xff] %vm7530_vm7, %v7293_v52 }
 0x4a5   : > { %7919 = vrot.lane.b32.xlu0 %v7661_v49, %s13123_s5  ;;  %7921 = vrot.lane.b32.xlu1 %v7662_v51, %s13123_s5  ;;  %v7693_v49 = vld [vmem:[#allocation4 + $0x17a] sm:$0xff]  ;;  %v7694_v51 = vld [vmem:[#allocation4 + $0x182] sm:$0xff] }
 0x4a7   : > { %v7295_v53 = vpop.permute.xlu0 %7294  ;;  %v7297_v43 = vpop.permute.xlu1 %7296 }
 0x4a8   : > { %7605 = vst.msk [vmem:[#allocation5 + $0x250] sm:$0xff] %vm7530_vm7, %v7295_v53  ;;  %7606 = vst.msk [vmem:[#allocation5 + $0x258] sm:$0xff] %vm7530_vm7, %v7297_v43 }
 0x4a9   : > { %7923 = vrot.lane.b32.xlu0 %v7663_v47, %s13123_s5  ;;  %7925 = vrot.lane.b32.xlu1 %v7664_v16, %s13123_s5  ;;  %v7695_v47 = vld [vmem:[#allocation4 + $0x192] sm:$0xff]  ;;  %v7696_v16 = vld [vmem:[#allocation4 + $0x19a] sm:$0xff] }
 0x4ab   : > { %v7299_v28 = vpop.permute.xlu0 %7298  ;;  %v7301_v54 = vpop.permute.xlu1 %7300 }
 0x4ac   : > { %7607 = vst.msk [vmem:[#allocation5 + $0x260] sm:$0xff] %vm7530_vm7, %v7299_v28  ;;  %7608 = vst.msk [vmem:[#allocation5 + $0x268] sm:$0xff] %vm7530_vm7, %v7301_v54 }
 0x4ad   : > { %7927 = vrot.lane.b32.xlu0 %v7665_v25, %s13123_s5  ;;  %7929 = vrot.lane.b32.xlu1 %v7666_v34, %s13123_s5  ;;  %v7697_v25 = vld [vmem:[#allocation4 + $0x1a2] sm:$0xff]  ;;  %v7698_v34 = vld [vmem:[#allocation4 + $0x1aa] sm:$0xff] }
 0x4af   : > { %v7303_v58 = vpop.permute.xlu0 %7302  ;;  %v7305_v31 = vpop.permute.xlu1 %7304 }
 0x4b0   : > { %7609 = vst.msk [vmem:[#allocation5 + $0x270] sm:$0xff] %vm7530_vm7, %v7303_v58  ;;  %7610 = vst.msk [vmem:[#allocation5 + $0x278] sm:$0xff] %vm7530_vm7, %v7305_v31 }
 0x4b1   : > { %7931 = vrot.lane.b32.xlu0 %v7667_v57, %s13123_s5  ;;  %7933 = vrot.lane.b32.xlu1 %v7668_v59, %s13123_s5  ;;  %v7699_v57 = vld [vmem:[#allocation4 + $0x1ba] sm:$0xff]  ;;  %v7700_v59 = vld [vmem:[#allocation4 + $0x1c2] sm:$0xff] }
 0x4b3   : > { %v7307_v61 = vpop.permute.xlu0 %7306  ;;  %v7309_v62 = vpop.permute.xlu1 %7308 }
 0x4b4   : > { %7611 = vst.msk [vmem:[#allocation5 + $0x280] sm:$0xff] %vm7530_vm7, %v7307_v61  ;;  %7612 = vst.msk [vmem:[#allocation5 + $0x288] sm:$0xff] %vm7530_vm7, %v7309_v62 }
 0x4b5   : > { %7935 = vrot.lane.b32.xlu0 %v7669_v60, %s13123_s5  ;;  %7937 = vrot.lane.b32.xlu1 %v7670_v29, %s13123_s5  ;;  %v7701_v60 = vld [vmem:[#allocation4 + $0x1ca] sm:$0xff]  ;;  %v7702_v29 = vld [vmem:[#allocation4 + $0x1d2] sm:$0xff] }
 0x4b7   : > { %v7311_v55 = vpop.permute.xlu0 %7310  ;;  %v7313_v1 = vpop.permute.xlu1 %7312 }
 0x4b8   : > { %7613 = vst.msk [vmem:[#allocation5 + $0x290] sm:$0xff] %vm7530_vm7, %v7311_v55  ;;  %7614 = vst.msk [vmem:[#allocation5 + $0x298] sm:$0xff] %vm7530_vm7, %v7313_v1 }
 0x4b9   : > { %7939 = vrot.lane.b32.xlu0 %v7671_v63, %s13123_s5  ;;  %7941 = vrot.lane.b32.xlu1 %v7672_v0, %s13123_s5  ;;  %v7703_v63 = vld [vmem:[#allocation4 + $0x1e2] sm:$0xff]  ;;  %v7704_v0 = vld [vmem:[#allocation4 + $0x1ea] sm:$0xff] }
 0x4bb   : > { %v7315_v56 = vpop.permute.xlu0 %7314  ;;  %v7317_v5 = vpop.permute.xlu1 %7316 }
 0x4bc   : > { %7615 = vst.msk [vmem:[#allocation5 + $0x2a0] sm:$0xff] %vm7530_vm7, %v7315_v56  ;;  %7616 = vst.msk [vmem:[#allocation5 + $0x2a8] sm:$0xff] %vm7530_vm7, %v7317_v5 }
 0x4bd   : > { %7943 = vrot.lane.b32.xlu0 %v7673_v2, %s13123_s5  ;;  %7945 = vrot.lane.b32.xlu1 %v7674_v3, %s13123_s5  ;;  %v7705_v2 = vld [vmem:[#allocation4 + $0x1f2] sm:$0xff]  ;;  %v7706_v3 = vld [vmem:[#allocation4 + $0x1fa] sm:$0xff] }
 0x4bf   : > { %v7319_v38 = vpop.permute.xlu0 %7318  ;;  %v7321_v6 = vpop.permute.xlu1 %7320 }
 0x4c0   : > { %7617 = vst.msk [vmem:[#allocation5 + $0x2b0] sm:$0xff] %vm7530_vm7, %v7319_v38  ;;  %7618 = vst.msk [vmem:[#allocation5 + $0x2b8] sm:$0xff] %vm7530_vm7, %v7321_v6 }
 0x4c1   : > { %7947 = vrot.lane.b32.xlu0 %v7675_v30, %s13123_s5  ;;  %7949 = vrot.lane.b32.xlu1 %v7676_v45, %s13123_s5  ;;  %v7707_v30 = vld [vmem:[#allocation4 + $0x20a] sm:$0xff]  ;;  %v7708_v45 = vld [vmem:[#allocation4 + $0x212] sm:$0xff] }
 0x4c3   : > { %v7323_v37 = vpop.permute.xlu0 %7322  ;;  %v7325_v33 = vpop.permute.xlu1 %7324 }
 0x4c4   : > { %7619 = vst.msk [vmem:[#allocation5 + $0x2c0] sm:$0xff] %vm7530_vm7, %v7323_v37  ;;  %7620 = vst.msk [vmem:[#allocation5 + $0x2c8] sm:$0xff] %vm7530_vm7, %v7325_v33 }
 0x4c5   : > { %7951 = vrot.lane.b32.xlu0 %v7677_v32, %s13123_s5  ;;  %7953 = vrot.lane.b32.xlu1 %v7678_v23, %s13123_s5  ;;  %v7709_v32 = vld [vmem:[#allocation4 + $0x21a] sm:$0xff]  ;;  %v7710_v23 = vld [vmem:[#allocation4 + $0x222] sm:$0xff] }
 0x4c7   : > { %v7327_v7 = vpop.permute.xlu0 %7326  ;;  %v7329_v9 = vpop.permute.xlu1 %7328 }
 0x4c8   : > { %7621 = vst.msk [vmem:[#allocation5 + $0x2d0] sm:$0xff] %vm7530_vm7, %v7327_v7  ;;  %7622 = vst.msk [vmem:[#allocation5 + $0x2d8] sm:$0xff] %vm7530_vm7, %v7329_v9 }
 0x4c9   : > { %7955 = vrot.lane.b32.xlu0 %v7679_v48, %s13123_s5  ;;  %7957 = vrot.lane.b32.xlu1 %v7680_v8, %s13123_s5  ;;  %v7711_v48 = vld [vmem:[#allocation4 + $0x232] sm:$0xff]  ;;  %v7712_v8 = vld [vmem:[#allocation4 + $0x23a] sm:$0xff] }
 0x4cb   : > { %v7331_v36 = vpop.permute.xlu0 %7330  ;;  %v7333_v4 = vpop.permute.xlu1 %7332 }
 0x4cc   : > { %7623 = vst.msk [vmem:[#allocation5 + $0x2e0] sm:$0xff] %vm7530_vm7, %v7331_v36  ;;  %7624 = vst.msk [vmem:[#allocation5 + $0x2e8] sm:$0xff] %vm7530_vm7, %v7333_v4 }
 0x4cd   : > { %7959 = vrot.lane.b32.xlu0 %v7681_v10, %s13123_s5  ;;  %7961 = vrot.lane.b32.xlu1 %v7682_v35, %s13123_s5  ;;  %v7713_v10 = vld [vmem:[#allocation4 + $0x242] sm:$0xff]  ;;  %v7714_v35 = vld [vmem:[#allocation4 + $0x24a] sm:$0xff] }
 0x4cf   : > { %v7335_v12 = vpop.permute.xlu0 %7334  ;;  %v7337_v46 = vpop.permute.xlu1 %7336 }
 0x4d0   : > { %7625 = vst.msk [vmem:[#allocation5 + $0x2f0] sm:$0xff] %vm7530_vm7, %v7335_v12  ;;  %7626 = vst.msk [vmem:[#allocation5 + $0x2f8] sm:$0xff] %vm7530_vm7, %v7337_v46 }
 0x4d1   : > { %7963 = vrot.lane.b32.xlu0 %v7683_v11, %s13123_s5  ;;  %7965 = vrot.lane.b32.xlu1 %v7684_v13, %s13123_s5  ;;  %v7715_v11 = vld [vmem:[#allocation4 + $0x25a] sm:$0xff]  ;;  %v7716_v13 = vld [vmem:[#allocation4 + $0x262] sm:$0xff] }
 0x4d3   : > { %v7339_v22 = vpop.permute.xlu0 %7338  ;;  %v7341_v27 = vpop.permute.xlu1 %7340 }
 0x4d4   : > { %7627 = vst.msk [vmem:[#allocation5 + $0x300] sm:$0xff] %vm7530_vm7, %v7339_v22  ;;  %7628 = vst.msk [vmem:[#allocation5 + $0x308] sm:$0xff] %vm7530_vm7, %v7341_v27 }
 0x4d5   : > { %7967 = vrot.lane.b32.xlu0 %v7685_v14, %s13123_s5  ;;  %7969 = vrot.lane.b32.xlu1 %v7686_v39, %s13123_s5  ;;  %v7717_v14 = vld [vmem:[#allocation4 + $0x26a] sm:$0xff]  ;;  %v7718_v39 = vld [vmem:[#allocation4 + $0x272] sm:$0xff] }
 0x4d7   : > { %v7343_v17 = vpop.permute.xlu0 %7342  ;;  %v7345_v19 = vpop.permute.xlu1 %7344 }
 0x4d8   : > { %7629 = vst.msk [vmem:[#allocation5 + $0x310] sm:$0xff] %vm7530_vm7, %v7343_v17  ;;  %7630 = vst.msk [vmem:[#allocation5 + $0x318] sm:$0xff] %vm7530_vm7, %v7345_v19 }
 0x4d9   : > { %7971 = vrot.lane.b32.xlu0 %v7687_v15, %s13123_s5  ;;  %7973 = vrot.lane.b32.xlu1 %v7688_v18, %s13123_s5  ;;  %v7719_v15 = vld [vmem:[#allocation4 + $0x282] sm:$0xff]  ;;  %v7720_v18 = vld [vmem:[#allocation4 + $0x28a] sm:$0xff] }
 0x4db   : > { %v7347_v24 = vpop.permute.xlu0 %7346  ;;  %v7349_v41 = vpop.permute.xlu1 %7348 }
 0x4dc   : > { %7631 = vst.msk [vmem:[#allocation5 + $0x320] sm:$0xff] %vm7530_vm7, %v7347_v24  ;;  %7632 = vst.msk [vmem:[#allocation5 + $0x328] sm:$0xff] %vm7530_vm7, %v7349_v41 }
 0x4dd   : > { %7975 = vrot.lane.b32.xlu0 %v7689_v20, %s13123_s5  ;;  %7977 = vrot.lane.b32.xlu1 %v7690_v40, %s13123_s5  ;;  %v7721_v20 = vld [vmem:[#allocation4 + $0x292] sm:$0xff]  ;;  %v7722_v40 = vld [vmem:[#allocation4 + $0x29a] sm:$0xff] }
 0x4df   : > { %v7351_v26 = vpop.permute.xlu0 %7350  ;;  %v7353_v44 = vpop.permute.xlu1 %7352 }
 0x4e0   : > { %7633 = vst.msk [vmem:[#allocation5 + $0x330] sm:$0xff] %vm7530_vm7, %v7351_v26  ;;  %7634 = vst.msk [vmem:[#allocation5 + $0x338] sm:$0xff] %vm7530_vm7, %v7353_v44 }
 0x4e1   : > { %7979 = vrot.lane.b32.xlu0 %v7691_v21, %s13123_s5  ;;  %7981 = vrot.lane.b32.xlu1 %v7692_v42, %s13123_s5  ;;  %v7723_v21 = vld [vmem:[#allocation4 + $0x2aa] sm:$0xff]  ;;  %v7724_v42 = vld [vmem:[#allocation4 + $0x2b2] sm:$0xff] }
 0x4e3   : > { %v7355_v50 = vpop.permute.xlu0 %7354  ;;  %v7357_v52 = vpop.permute.xlu1 %7356 }
 0x4e4   : > { %7635 = vst.msk [vmem:[#allocation5 + $0x340] sm:$0xff] %vm7530_vm7, %v7355_v50  ;;  %7636 = vst.msk [vmem:[#allocation5 + $0x348] sm:$0xff] %vm7530_vm7, %v7357_v52 }
 0x4e5   : > { %7983 = vrot.lane.b32.xlu0 %v7693_v49, %s13123_s5  ;;  %7985 = vrot.lane.b32.xlu1 %v7694_v51, %s13123_s5  ;;  %v7725_v49 = vld [vmem:[#allocation4 + $0x2ba] sm:$0xff]  ;;  %v7726_v51 = vld [vmem:[#allocation4 + $0x2c2] sm:$0xff] }
 0x4e7   : > { %v7359_v53 = vpop.permute.xlu0 %7358  ;;  %v7361_v43 = vpop.permute.xlu1 %7360 }
 0x4e8   : > { %7637 = vst.msk [vmem:[#allocation5 + $0x350] sm:$0xff] %vm7530_vm7, %v7359_v53  ;;  %7638 = vst.msk [vmem:[#allocation5 + $0x358] sm:$0xff] %vm7530_vm7, %v7361_v43 }
 0x4e9   : > { %7987 = vrot.lane.b32.xlu0 %v7695_v47, %s13123_s5  ;;  %7989 = vrot.lane.b32.xlu1 %v7696_v16, %s13123_s5  ;;  %v7727_v47 = vld [vmem:[#allocation4 + $0x2d2] sm:$0xff]  ;;  %v7728_v16 = vld [vmem:[#allocation4 + $0x2da] sm:$0xff] }
 0x4eb   : > { %v7363_v28 = vpop.permute.xlu0 %7362  ;;  %v7365_v54 = vpop.permute.xlu1 %7364 }
 0x4ec   : > { %7639 = vst.msk [vmem:[#allocation5 + $0x360] sm:$0xff] %vm7530_vm7, %v7363_v28  ;;  %7640 = vst.msk [vmem:[#allocation5 + $0x368] sm:$0xff] %vm7530_vm7, %v7365_v54 }
 0x4ed   : > { %7991 = vrot.lane.b32.xlu0 %v7697_v25, %s13123_s5  ;;  %7993 = vrot.lane.b32.xlu1 %v7698_v34, %s13123_s5  ;;  %v7729_v25 = vld [vmem:[#allocation4 + $0x2e2] sm:$0xff]  ;;  %v7730_v34 = vld [vmem:[#allocation4 + $0x2ea] sm:$0xff] }
 0x4ef   : > { %v7367_v58 = vpop.permute.xlu0 %7366  ;;  %v7369_v31 = vpop.permute.xlu1 %7368 }
 0x4f0   : > { %7641 = vst.msk [vmem:[#allocation5 + $0x370] sm:$0xff] %vm7530_vm7, %v7367_v58  ;;  %7642 = vst.msk [vmem:[#allocation5 + $0x378] sm:$0xff] %vm7530_vm7, %v7369_v31 }
 0x4f1   : > { %7995 = vrot.lane.b32.xlu0 %v7699_v57, %s13123_s5  ;;  %7997 = vrot.lane.b32.xlu1 %v7700_v59, %s13123_s5  ;;  %v7731_v57 = vld [vmem:[#allocation4 + $0x2fa] sm:$0xff]  ;;  %v7732_v59 = vld [vmem:[#allocation4 + $0x302] sm:$0xff] }
 0x4f3   : > { %v7371_v61 = vpop.permute.xlu0 %7370  ;;  %v7373_v62 = vpop.permute.xlu1 %7372 }
 0x4f4   : > { %7643 = vst.msk [vmem:[#allocation5 + $0x380] sm:$0xff] %vm7530_vm7, %v7371_v61  ;;  %7644 = vst.msk [vmem:[#allocation5 + $0x388] sm:$0xff] %vm7530_vm7, %v7373_v62 }
 0x4f5   : > { %7999 = vrot.lane.b32.xlu0 %v7701_v60, %s13123_s5  ;;  %8001 = vrot.lane.b32.xlu1 %v7702_v29, %s13123_s5  ;;  %v7733_v60 = vld [vmem:[#allocation4 + $0x30a] sm:$0xff]  ;;  %v7734_v29 = vld [vmem:[#allocation4 + $0x312] sm:$0xff] }
 0x4f7   : > { %v7375_v55 = vpop.permute.xlu0 %7374  ;;  %v7377_v1 = vpop.permute.xlu1 %7376 }
 0x4f8   : > { %7645 = vst.msk [vmem:[#allocation5 + $0x390] sm:$0xff] %vm7530_vm7, %v7375_v55  ;;  %7646 = vst.msk [vmem:[#allocation5 + $0x398] sm:$0xff] %vm7530_vm7, %v7377_v1 }
 0x4f9   : > { %8003 = vrot.lane.b32.xlu0 %v7703_v63, %s13123_s5  ;;  %8005 = vrot.lane.b32.xlu1 %v7704_v0, %s13123_s5  ;;  %v7735_v63 = vld [vmem:[#allocation4 + $0x322] sm:$0xff]  ;;  %v7736_v0 = vld [vmem:[#allocation4 + $0x32a] sm:$0xff] }
 0x4fb   : > { %v7379_v56 = vpop.permute.xlu0 %7378  ;;  %v7381_v5 = vpop.permute.xlu1 %7380 }
 0x4fc   : > { %7647 = vst.msk [vmem:[#allocation5 + $0x3a0] sm:$0xff] %vm7530_vm7, %v7379_v56  ;;  %7648 = vst.msk [vmem:[#allocation5 + $0x3a8] sm:$0xff] %vm7530_vm7, %v7381_v5 }
 0x4fd   : > { %8007 = vrot.lane.b32.xlu0 %v7705_v2, %s13123_s5  ;;  %8009 = vrot.lane.b32.xlu1 %v7706_v3, %s13123_s5  ;;  %v7737_v2 = vld [vmem:[#allocation4 + $0x332] sm:$0xff]  ;;  %v7738_v3 = vld [vmem:[#allocation4 + $0x33a] sm:$0xff] }
 0x4ff   : > { %v7383_v38 = vpop.permute.xlu0 %7382  ;;  %v7385_v6 = vpop.permute.xlu1 %7384 }
 0x500   : > { %7649 = vst.msk [vmem:[#allocation5 + $0x3b0] sm:$0xff] %vm7530_vm7, %v7383_v38  ;;  %7650 = vst.msk [vmem:[#allocation5 + $0x3b8] sm:$0xff] %vm7530_vm7, %v7385_v6 }
 0x501   : > { %8011 = vrot.lane.b32.xlu0 %v7707_v30, %s13123_s5  ;;  %8013 = vrot.lane.b32.xlu1 %v7708_v45, %s13123_s5  ;;  %v7739_v30 = vld [vmem:[#allocation4 + $0x34a] sm:$0xff]  ;;  %v7740_v45 = vld [vmem:[#allocation4 + $0x352] sm:$0xff] }
 0x503   : > { %v7387_v37 = vpop.permute.xlu0 %7386  ;;  %v7389_v33 = vpop.permute.xlu1 %7388 }
 0x504   : > { %7651 = vst.msk [vmem:[#allocation5 + $0x3c0] sm:$0xff] %vm7530_vm7, %v7387_v37  ;;  %7652 = vst.msk [vmem:[#allocation5 + $0x3c8] sm:$0xff] %vm7530_vm7, %v7389_v33 }
 0x505   : > { %8015 = vrot.lane.b32.xlu0 %v7709_v32, %s13123_s5  ;;  %8017 = vrot.lane.b32.xlu1 %v7710_v23, %s13123_s5  ;;  %v7741_v32 = vld [vmem:[#allocation4 + $0x35a] sm:$0xff]  ;;  %v7742_v23 = vld [vmem:[#allocation4 + $0x362] sm:$0xff] }
 0x507   : > { %v7391_v7 = vpop.permute.xlu0 %7390  ;;  %v7393_v9 = vpop.permute.xlu1 %7392 }
 0x508   : > { %7653 = vst.msk [vmem:[#allocation5 + $0x3d0] sm:$0xff] %vm7530_vm7, %v7391_v7  ;;  %7654 = vst.msk [vmem:[#allocation5 + $0x3d8] sm:$0xff] %vm7530_vm7, %v7393_v9 }
 0x509   : > { %8019 = vrot.lane.b32.xlu0 %v7711_v48, %s13123_s5  ;;  %8021 = vrot.lane.b32.xlu1 %v7712_v8, %s13123_s5  ;;  %v7743_v48 = vld [vmem:[#allocation4 + $0x372] sm:$0xff]  ;;  %v7744_v8 = vld [vmem:[#allocation4 + $0x37a] sm:$0xff] }
 0x50b   : > { %v7395_v36 = vpop.permute.xlu0 %7394  ;;  %v7397_v4 = vpop.permute.xlu1 %7396 }
 0x50c   : > { %7655 = vst.msk [vmem:[#allocation5 + $0x3e0] sm:$0xff] %vm7530_vm7, %v7395_v36  ;;  %7656 = vst.msk [vmem:[#allocation5 + $0x3e8] sm:$0xff] %vm7530_vm7, %v7397_v4 }
 0x50d   : > { %8023 = vrot.lane.b32.xlu0 %v7713_v10, %s13123_s5  ;;  %8025 = vrot.lane.b32.xlu1 %v7714_v35, %s13123_s5  ;;  %v7745_v10 = vld [vmem:[#allocation4 + $0x382] sm:$0xff]  ;;  %v7746_v35 = vld [vmem:[#allocation4 + $0x38a] sm:$0xff] }
 0x50f   : > { %v7399_v12 = vpop.permute.xlu0 %7398  ;;  %v7401_v46 = vpop.permute.xlu1 %7400 }
 0x510   : > { %7657 = vst.msk [vmem:[#allocation5 + $0x3f0] sm:$0xff] %vm7530_vm7, %v7399_v12  ;;  %7658 = vst.msk [vmem:[#allocation5 + $0x3f8] sm:$0xff] %vm7530_vm7, %v7401_v46 }
 0x511   : > { %8027 = vrot.lane.b32.xlu0 %v7715_v11, %s13123_s5  ;;  %8029 = vrot.lane.b32.xlu1 %v7716_v13, %s13123_s5  ;;  %v7747_v11 = vld [vmem:[#allocation4 + $0x39a] sm:$0xff]  ;;  %v7748_v13 = vld [vmem:[#allocation4 + $0x3a2] sm:$0xff] }
 0x513   : > { %v7916_v22 = vpop.permute.xlu0 %7915  ;;  %v7918_v27 = vpop.permute.xlu1 %7917 }
 0x514   : > { %8300 = vst.msk [vmem:[#allocation5] sm:$0xff] %vm8299_vm8, %v7916_v22  ;;  %8301 = vst.msk [vmem:[#allocation5 + $0x8] sm:$0xff] %vm8299_vm8, %v7918_v27 }
 0x515   : > { %8031 = vrot.lane.b32.xlu0 %v7717_v14, %s13123_s5  ;;  %8033 = vrot.lane.b32.xlu1 %v7718_v39, %s13123_s5  ;;  %v7749_v14 = vld [vmem:[#allocation4 + $0x3aa] sm:$0xff]  ;;  %v7750_v39 = vld [vmem:[#allocation4 + $0x3b2] sm:$0xff] }
 0x517   : > { %v7920_v17 = vpop.permute.xlu0 %7919  ;;  %v7922_v19 = vpop.permute.xlu1 %7921 }
 0x518   : > { %8302 = vst.msk [vmem:[#allocation5 + $0x10] sm:$0xff] %vm8299_vm8, %v7920_v17  ;;  %8303 = vst.msk [vmem:[#allocation5 + $0x18] sm:$0xff] %vm8299_vm8, %v7922_v19 }
 0x519   : > { %8035 = vrot.lane.b32.xlu0 %v7719_v15, %s13123_s5  ;;  %8037 = vrot.lane.b32.xlu1 %v7720_v18, %s13123_s5  ;;  %v7751_v15 = vld [vmem:[#allocation4 + $0x3c2] sm:$0xff]  ;;  %v7752_v18 = vld [vmem:[#allocation4 + $0x3ca] sm:$0xff] }
 0x51b   : > { %v7924_v24 = vpop.permute.xlu0 %7923  ;;  %v7926_v41 = vpop.permute.xlu1 %7925 }
 0x51c   : > { %8304 = vst.msk [vmem:[#allocation5 + $0x20] sm:$0xff] %vm8299_vm8, %v7924_v24  ;;  %8305 = vst.msk [vmem:[#allocation5 + $0x28] sm:$0xff] %vm8299_vm8, %v7926_v41 }
 0x51d   : > { %8039 = vrot.lane.b32.xlu0 %v7721_v20, %s13123_s5  ;;  %8041 = vrot.lane.b32.xlu1 %v7722_v40, %s13123_s5  ;;  %v7753_v20 = vld [vmem:[#allocation4 + $0x3d2] sm:$0xff]  ;;  %v7754_v40 = vld [vmem:[#allocation4 + $0x3da] sm:$0xff] }
 0x51f   : > { %v7928_v26 = vpop.permute.xlu0 %7927  ;;  %v7930_v44 = vpop.permute.xlu1 %7929 }
 0x520   : > { %8306 = vst.msk [vmem:[#allocation5 + $0x30] sm:$0xff] %vm8299_vm8, %v7928_v26  ;;  %8307 = vst.msk [vmem:[#allocation5 + $0x38] sm:$0xff] %vm8299_vm8, %v7930_v44 }
 0x521   : > { %8043 = vrot.lane.b32.xlu0 %v7723_v21, %s13123_s5  ;;  %8045 = vrot.lane.b32.xlu1 %v7724_v42, %s13123_s5  ;;  %v7755_v21 = vld [vmem:[#allocation4 + $0x3ea] sm:$0xff]  ;;  %v7756_v42 = vld [vmem:[#allocation4 + $0x3f2] sm:$0xff] }
 0x523   : > { %v7932_v50 = vpop.permute.xlu0 %7931  ;;  %v7934_v52 = vpop.permute.xlu1 %7933 }
 0x524   : > { %8308 = vst.msk [vmem:[#allocation5 + $0x40] sm:$0xff] %vm8299_vm8, %v7932_v50  ;;  %8309 = vst.msk [vmem:[#allocation5 + $0x48] sm:$0xff] %vm8299_vm8, %v7934_v52 }
 0x525   : > { %8047 = vrot.lane.b32.xlu0 %v7725_v49, %s13123_s5  ;;  %8049 = vrot.lane.b32.xlu1 %v7726_v51, %s13123_s5  ;;  %v7757_v49 = vld [vmem:[#allocation4 + $0x3fa] sm:$0xff]  ;;  %v7758_v51 = vld [vmem:[#allocation4 + $0x402] sm:$0xff] }
 0x527   : > { %v7936_v53 = vpop.permute.xlu0 %7935  ;;  %v7938_v43 = vpop.permute.xlu1 %7937 }
 0x528   : > { %8310 = vst.msk [vmem:[#allocation5 + $0x50] sm:$0xff] %vm8299_vm8, %v7936_v53  ;;  %8311 = vst.msk [vmem:[#allocation5 + $0x58] sm:$0xff] %vm8299_vm8, %v7938_v43 }
 0x529   : > { %8051 = vrot.lane.b32.xlu0 %v7727_v47, %s13123_s5  ;;  %8053 = vrot.lane.b32.xlu1 %v7728_v16, %s13123_s5  ;;  %v7759_v47 = vld [vmem:[#allocation4 + $0x412] sm:$0xff]  ;;  %v7760_v16 = vld [vmem:[#allocation4 + $0x41a] sm:$0xff] }
 0x52b   : > { %v7940_v28 = vpop.permute.xlu0 %7939  ;;  %v7942_v54 = vpop.permute.xlu1 %7941 }
 0x52c   : > { %8312 = vst.msk [vmem:[#allocation5 + $0x60] sm:$0xff] %vm8299_vm8, %v7940_v28  ;;  %8313 = vst.msk [vmem:[#allocation5 + $0x68] sm:$0xff] %vm8299_vm8, %v7942_v54 }
 0x52d   : > { %8055 = vrot.lane.b32.xlu0 %v7729_v25, %s13123_s5  ;;  %8057 = vrot.lane.b32.xlu1 %v7730_v34, %s13123_s5  ;;  %v7761_v25 = vld [vmem:[#allocation4 + $0x422] sm:$0xff]  ;;  %v7762_v34 = vld [vmem:[#allocation4 + $0x42a] sm:$0xff] }
 0x52f   : > { %v7944_v58 = vpop.permute.xlu0 %7943  ;;  %v7946_v31 = vpop.permute.xlu1 %7945 }
 0x530   : > { %8314 = vst.msk [vmem:[#allocation5 + $0x70] sm:$0xff] %vm8299_vm8, %v7944_v58  ;;  %8315 = vst.msk [vmem:[#allocation5 + $0x78] sm:$0xff] %vm8299_vm8, %v7946_v31 }
 0x531   : > { %8059 = vrot.lane.b32.xlu0 %v7731_v57, %s13123_s5  ;;  %8061 = vrot.lane.b32.xlu1 %v7732_v59, %s13123_s5  ;;  %v7763_v57 = vld [vmem:[#allocation4 + $0x43a] sm:$0xff]  ;;  %v7764_v59 = vld [vmem:[#allocation4 + $0x442] sm:$0xff] }
 0x533   : > { %v7948_v61 = vpop.permute.xlu0 %7947  ;;  %v7950_v62 = vpop.permute.xlu1 %7949 }
 0x534   : > { %8316 = vst.msk [vmem:[#allocation5 + $0x80] sm:$0xff] %vm8299_vm8, %v7948_v61  ;;  %8317 = vst.msk [vmem:[#allocation5 + $0x88] sm:$0xff] %vm8299_vm8, %v7950_v62 }
 0x535   : > { %8063 = vrot.lane.b32.xlu0 %v7733_v60, %s13123_s5  ;;  %8065 = vrot.lane.b32.xlu1 %v7734_v29, %s13123_s5  ;;  %v7765_v60 = vld [vmem:[#allocation4 + $0x44a] sm:$0xff]  ;;  %v7766_v29 = vld [vmem:[#allocation4 + $0x452] sm:$0xff] }
 0x537   : > { %v7952_v55 = vpop.permute.xlu0 %7951  ;;  %v7954_v1 = vpop.permute.xlu1 %7953 }
 0x538   : > { %8318 = vst.msk [vmem:[#allocation5 + $0x90] sm:$0xff] %vm8299_vm8, %v7952_v55  ;;  %8319 = vst.msk [vmem:[#allocation5 + $0x98] sm:$0xff] %vm8299_vm8, %v7954_v1 }
 0x539   : > { %8067 = vrot.lane.b32.xlu0 %v7735_v63, %s13123_s5  ;;  %8069 = vrot.lane.b32.xlu1 %v7736_v0, %s13123_s5  ;;  %v7767_v63 = vld [vmem:[#allocation4 + $0x462] sm:$0xff]  ;;  %v7768_v0 = vld [vmem:[#allocation4 + $0x46a] sm:$0xff] }
 0x53b   : > { %v7956_v56 = vpop.permute.xlu0 %7955  ;;  %v7958_v5 = vpop.permute.xlu1 %7957 }
 0x53c   : > { %8320 = vst.msk [vmem:[#allocation5 + $0xa0] sm:$0xff] %vm8299_vm8, %v7956_v56  ;;  %8321 = vst.msk [vmem:[#allocation5 + $0xa8] sm:$0xff] %vm8299_vm8, %v7958_v5 }
 0x53d   : > { %8071 = vrot.lane.b32.xlu0 %v7737_v2, %s13123_s5  ;;  %8073 = vrot.lane.b32.xlu1 %v7738_v3, %s13123_s5  ;;  %v7769_v2 = vld [vmem:[#allocation4 + $0x472] sm:$0xff]  ;;  %v7770_v3 = vld [vmem:[#allocation4 + $0x47a] sm:$0xff] }
 0x53f   : > { %v7960_v38 = vpop.permute.xlu0 %7959  ;;  %v7962_v6 = vpop.permute.xlu1 %7961 }
 0x540   : > { %8322 = vst.msk [vmem:[#allocation5 + $0xb0] sm:$0xff] %vm8299_vm8, %v7960_v38  ;;  %8323 = vst.msk [vmem:[#allocation5 + $0xb8] sm:$0xff] %vm8299_vm8, %v7962_v6 }
 0x541   : > { %8075 = vrot.lane.b32.xlu0 %v7739_v30, %s13123_s5  ;;  %8077 = vrot.lane.b32.xlu1 %v7740_v45, %s13123_s5  ;;  %v7771_v30 = vld [vmem:[#allocation4 + $0x48a] sm:$0xff]  ;;  %v7772_v45 = vld [vmem:[#allocation4 + $0x492] sm:$0xff] }
 0x543   : > { %v7964_v37 = vpop.permute.xlu0 %7963  ;;  %v7966_v33 = vpop.permute.xlu1 %7965 }
 0x544   : > { %8324 = vst.msk [vmem:[#allocation5 + $0xc0] sm:$0xff] %vm8299_vm8, %v7964_v37  ;;  %8325 = vst.msk [vmem:[#allocation5 + $0xc8] sm:$0xff] %vm8299_vm8, %v7966_v33 }
 0x545   : > { %8079 = vrot.lane.b32.xlu0 %v7741_v32, %s13123_s5  ;;  %8081 = vrot.lane.b32.xlu1 %v7742_v23, %s13123_s5  ;;  %v7773_v32 = vld [vmem:[#allocation4 + $0x49a] sm:$0xff]  ;;  %v7774_v23 = vld [vmem:[#allocation4 + $0x4a2] sm:$0xff] }
 0x547   : > { %v7968_v7 = vpop.permute.xlu0 %7967  ;;  %v7970_v9 = vpop.permute.xlu1 %7969 }
 0x548   : > { %8326 = vst.msk [vmem:[#allocation5 + $0xd0] sm:$0xff] %vm8299_vm8, %v7968_v7  ;;  %8327 = vst.msk [vmem:[#allocation5 + $0xd8] sm:$0xff] %vm8299_vm8, %v7970_v9 }
 0x549   : > { %8083 = vrot.lane.b32.xlu0 %v7743_v48, %s13123_s5  ;;  %8085 = vrot.lane.b32.xlu1 %v7744_v8, %s13123_s5  ;;  %v7775_v48 = vld [vmem:[#allocation4 + $0x4b2] sm:$0xff]  ;;  %v7776_v8 = vld [vmem:[#allocation4 + $0x4ba] sm:$0xff] }
 0x54b   : > { %v7972_v36 = vpop.permute.xlu0 %7971  ;;  %v7974_v4 = vpop.permute.xlu1 %7973 }
 0x54c   : > { %8328 = vst.msk [vmem:[#allocation5 + $0xe0] sm:$0xff] %vm8299_vm8, %v7972_v36  ;;  %8329 = vst.msk [vmem:[#allocation5 + $0xe8] sm:$0xff] %vm8299_vm8, %v7974_v4 }
 0x54d   : > { %8087 = vrot.lane.b32.xlu0 %v7745_v10, %s13123_s5  ;;  %8089 = vrot.lane.b32.xlu1 %v7746_v35, %s13123_s5  ;;  %v7777_v10 = vld [vmem:[#allocation4 + $0x4c2] sm:$0xff]  ;;  %v7778_v35 = vld [vmem:[#allocation4 + $0x4ca] sm:$0xff] }
 0x54f   : > { %v7976_v12 = vpop.permute.xlu0 %7975  ;;  %v7978_v46 = vpop.permute.xlu1 %7977 }
 0x550   : > { %8330 = vst.msk [vmem:[#allocation5 + $0xf0] sm:$0xff] %vm8299_vm8, %v7976_v12  ;;  %8331 = vst.msk [vmem:[#allocation5 + $0xf8] sm:$0xff] %vm8299_vm8, %v7978_v46 }
 0x551   : > { %8091 = vrot.lane.b32.xlu0 %v7747_v11, %s13123_s5  ;;  %8093 = vrot.lane.b32.xlu1 %v7748_v13, %s13123_s5  ;;  %v7779_v11 = vld [vmem:[#allocation4 + $0x4da] sm:$0xff]  ;;  %v7780_v13 = vld [vmem:[#allocation4 + $0x4e2] sm:$0xff] }
 0x553   : > { %v7980_v22 = vpop.permute.xlu0 %7979  ;;  %v7982_v27 = vpop.permute.xlu1 %7981 }
 0x554   : > { %8332 = vst.msk [vmem:[#allocation5 + $0x100] sm:$0xff] %vm8299_vm8, %v7980_v22  ;;  %8333 = vst.msk [vmem:[#allocation5 + $0x108] sm:$0xff] %vm8299_vm8, %v7982_v27 }
 0x555   : > { %8095 = vrot.lane.b32.xlu0 %v7749_v14, %s13123_s5  ;;  %8097 = vrot.lane.b32.xlu1 %v7750_v39, %s13123_s5  ;;  %v7781_v14 = vld [vmem:[#allocation4 + $0x4ea] sm:$0xff]  ;;  %v7782_v39 = vld [vmem:[#allocation4 + $0x4f2] sm:$0xff] }
 0x557   : > { %v7984_v17 = vpop.permute.xlu0 %7983  ;;  %v7986_v19 = vpop.permute.xlu1 %7985 }
 0x558   : > { %8334 = vst.msk [vmem:[#allocation5 + $0x110] sm:$0xff] %vm8299_vm8, %v7984_v17  ;;  %8335 = vst.msk [vmem:[#allocation5 + $0x118] sm:$0xff] %vm8299_vm8, %v7986_v19 }
 0x559   : > { %8099 = vrot.lane.b32.xlu0 %v7751_v15, %s13123_s5  ;;  %8101 = vrot.lane.b32.xlu1 %v7752_v18, %s13123_s5  ;;  %v7783_v15 = vld [vmem:[#allocation4 + $0x502] sm:$0xff]  ;;  %v7784_v18 = vld [vmem:[#allocation4 + $0x50a] sm:$0xff] }
 0x55b   : > { %v7988_v24 = vpop.permute.xlu0 %7987  ;;  %v7990_v41 = vpop.permute.xlu1 %7989 }
 0x55c   : > { %8336 = vst.msk [vmem:[#allocation5 + $0x120] sm:$0xff] %vm8299_vm8, %v7988_v24  ;;  %8337 = vst.msk [vmem:[#allocation5 + $0x128] sm:$0xff] %vm8299_vm8, %v7990_v41 }
 0x55d   : > { %8103 = vrot.lane.b32.xlu0 %v7753_v20, %s13123_s5  ;;  %8105 = vrot.lane.b32.xlu1 %v7754_v40, %s13123_s5  ;;  %v7785_v20 = vld [vmem:[#allocation4 + $0x512] sm:$0xff]  ;;  %v7786_v40 = vld [vmem:[#allocation4 + $0x51a] sm:$0xff] }
 0x55f   : > { %v7992_v26 = vpop.permute.xlu0 %7991  ;;  %v7994_v44 = vpop.permute.xlu1 %7993 }
 0x560   : > { %8338 = vst.msk [vmem:[#allocation5 + $0x130] sm:$0xff] %vm8299_vm8, %v7992_v26  ;;  %8339 = vst.msk [vmem:[#allocation5 + $0x138] sm:$0xff] %vm8299_vm8, %v7994_v44 }
 0x561   : > { %8107 = vrot.lane.b32.xlu0 %v7755_v21, %s13123_s5  ;;  %8109 = vrot.lane.b32.xlu1 %v7756_v42, %s13123_s5  ;;  %v8429_v21 = vld [vmem:[#allocation4 + $0x50] sm:$0xff]  ;;  %v8430_v42 = vld [vmem:[#allocation4 + $0x58] sm:$0xff] }
 0x563   : > { %v7996_v50 = vpop.permute.xlu0 %7995  ;;  %v7998_v52 = vpop.permute.xlu1 %7997 }
 0x564   : > { %8340 = vst.msk [vmem:[#allocation5 + $0x140] sm:$0xff] %vm8299_vm8, %v7996_v50  ;;  %8341 = vst.msk [vmem:[#allocation5 + $0x148] sm:$0xff] %vm8299_vm8, %v7998_v52 }
 0x565   : > { %8111 = vrot.lane.b32.xlu0 %v7757_v49, %s13123_s5  ;;  %8113 = vrot.lane.b32.xlu1 %v7758_v51, %s13123_s5  ;;  %v8431_v49 = vld [vmem:[#allocation4 + $0x60] sm:$0xff]  ;;  %v8432_v51 = vld [vmem:[#allocation4 + $0x68] sm:$0xff] }
 0x567   : > { %v8000_v53 = vpop.permute.xlu0 %7999  ;;  %v8002_v43 = vpop.permute.xlu1 %8001 }
 0x568   : > { %8342 = vst.msk [vmem:[#allocation5 + $0x150] sm:$0xff] %vm8299_vm8, %v8000_v53  ;;  %8343 = vst.msk [vmem:[#allocation5 + $0x158] sm:$0xff] %vm8299_vm8, %v8002_v43 }
 0x569   : > { %8115 = vrot.lane.b32.xlu0 %v7759_v47, %s13123_s5  ;;  %8117 = vrot.lane.b32.xlu1 %v7760_v16, %s13123_s5  ;;  %v8433_v47 = vld [vmem:[#allocation4 + $0x78] sm:$0xff]  ;;  %v8434_v16 = vld [vmem:[#allocation4 + $0x80] sm:$0xff] }
 0x56b   : > { %v8004_v28 = vpop.permute.xlu0 %8003  ;;  %v8006_v54 = vpop.permute.xlu1 %8005 }
 0x56c   : > { %8344 = vst.msk [vmem:[#allocation5 + $0x160] sm:$0xff] %vm8299_vm8, %v8004_v28  ;;  %8345 = vst.msk [vmem:[#allocation5 + $0x168] sm:$0xff] %vm8299_vm8, %v8006_v54 }
 0x56d   : > { %8119 = vrot.lane.b32.xlu0 %v7761_v25, %s13123_s5  ;;  %8121 = vrot.lane.b32.xlu1 %v7762_v34, %s13123_s5  ;;  %v8435_v25 = vld [vmem:[#allocation4 + $0x88] sm:$0xff]  ;;  %v8436_v34 = vld [vmem:[#allocation4 + $0x90] sm:$0xff] }
 0x56f   : > { %v8008_v58 = vpop.permute.xlu0 %8007  ;;  %v8010_v31 = vpop.permute.xlu1 %8009 }
 0x570   : > { %8346 = vst.msk [vmem:[#allocation5 + $0x170] sm:$0xff] %vm8299_vm8, %v8008_v58  ;;  %8347 = vst.msk [vmem:[#allocation5 + $0x178] sm:$0xff] %vm8299_vm8, %v8010_v31 }
 0x571   : > { %8123 = vrot.lane.b32.xlu0 %v7763_v57, %s13123_s5  ;;  %8125 = vrot.lane.b32.xlu1 %v7764_v59, %s13123_s5  ;;  %v8437_v57 = vld [vmem:[#allocation4 + $0xa0] sm:$0xff]  ;;  %v8438_v59 = vld [vmem:[#allocation4 + $0xa8] sm:$0xff] }
 0x573   : > { %v8012_v61 = vpop.permute.xlu0 %8011  ;;  %v8014_v62 = vpop.permute.xlu1 %8013 }
 0x574   : > { %8348 = vst.msk [vmem:[#allocation5 + $0x180] sm:$0xff] %vm8299_vm8, %v8012_v61  ;;  %8349 = vst.msk [vmem:[#allocation5 + $0x188] sm:$0xff] %vm8299_vm8, %v8014_v62 }
 0x575   : > { %8127 = vrot.lane.b32.xlu0 %v7765_v60, %s13123_s5  ;;  %8129 = vrot.lane.b32.xlu1 %v7766_v29, %s13123_s5  ;;  %v8439_v60 = vld [vmem:[#allocation4 + $0xb0] sm:$0xff]  ;;  %v8440_v29 = vld [vmem:[#allocation4 + $0xb8] sm:$0xff] }
 0x577   : > { %v8016_v55 = vpop.permute.xlu0 %8015  ;;  %v8018_v1 = vpop.permute.xlu1 %8017 }
 0x578   : > { %8350 = vst.msk [vmem:[#allocation5 + $0x190] sm:$0xff] %vm8299_vm8, %v8016_v55  ;;  %8351 = vst.msk [vmem:[#allocation5 + $0x198] sm:$0xff] %vm8299_vm8, %v8018_v1 }
 0x579   : > { %8131 = vrot.lane.b32.xlu0 %v7767_v63, %s13123_s5  ;;  %8133 = vrot.lane.b32.xlu1 %v7768_v0, %s13123_s5  ;;  %v8441_v63 = vld [vmem:[#allocation4 + $0xc8] sm:$0xff]  ;;  %v8442_v0 = vld [vmem:[#allocation4 + $0xd0] sm:$0xff] }
 0x57b   : > { %v8020_v56 = vpop.permute.xlu0 %8019  ;;  %v8022_v5 = vpop.permute.xlu1 %8021 }
 0x57c   : > { %8352 = vst.msk [vmem:[#allocation5 + $0x1a0] sm:$0xff] %vm8299_vm8, %v8020_v56  ;;  %8353 = vst.msk [vmem:[#allocation5 + $0x1a8] sm:$0xff] %vm8299_vm8, %v8022_v5 }
 0x57d   : > { %8135 = vrot.lane.b32.xlu0 %v7769_v2, %s13123_s5  ;;  %8137 = vrot.lane.b32.xlu1 %v7770_v3, %s13123_s5  ;;  %v8443_v2 = vld [vmem:[#allocation4 + $0xd8] sm:$0xff]  ;;  %v8444_v3 = vld [vmem:[#allocation4 + $0xe0] sm:$0xff] }
 0x57f   : > { %v8024_v38 = vpop.permute.xlu0 %8023  ;;  %v8026_v6 = vpop.permute.xlu1 %8025 }
 0x580   : > { %8354 = vst.msk [vmem:[#allocation5 + $0x1b0] sm:$0xff] %vm8299_vm8, %v8024_v38  ;;  %8355 = vst.msk [vmem:[#allocation5 + $0x1b8] sm:$0xff] %vm8299_vm8, %v8026_v6 }
 0x581   : > { %8139 = vrot.lane.b32.xlu0 %v7771_v30, %s13123_s5  ;;  %8141 = vrot.lane.b32.xlu1 %v7772_v45, %s13123_s5  ;;  %v8445_v30 = vld [vmem:[#allocation4 + $0xf0] sm:$0xff]  ;;  %v8446_v45 = vld [vmem:[#allocation4 + $0xf8] sm:$0xff] }
 0x583   : > { %v8028_v37 = vpop.permute.xlu0 %8027  ;;  %v8030_v33 = vpop.permute.xlu1 %8029 }
 0x584   : > { %8356 = vst.msk [vmem:[#allocation5 + $0x1c0] sm:$0xff] %vm8299_vm8, %v8028_v37  ;;  %8357 = vst.msk [vmem:[#allocation5 + $0x1c8] sm:$0xff] %vm8299_vm8, %v8030_v33 }
 0x585   : > { %8143 = vrot.lane.b32.xlu0 %v7773_v32, %s13123_s5  ;;  %8145 = vrot.lane.b32.xlu1 %v7774_v23, %s13123_s5  ;;  %v8447_v32 = vld [vmem:[#allocation4 + $0x100] sm:$0xff]  ;;  %v8448_v23 = vld [vmem:[#allocation4 + $0x108] sm:$0xff] }
 0x587   : > { %v8032_v7 = vpop.permute.xlu0 %8031  ;;  %v8034_v9 = vpop.permute.xlu1 %8033 }
 0x588   : > { %8358 = vst.msk [vmem:[#allocation5 + $0x1d0] sm:$0xff] %vm8299_vm8, %v8032_v7  ;;  %8359 = vst.msk [vmem:[#allocation5 + $0x1d8] sm:$0xff] %vm8299_vm8, %v8034_v9 }
 0x589   : > { %8147 = vrot.lane.b32.xlu0 %v7775_v48, %s13123_s5  ;;  %8149 = vrot.lane.b32.xlu1 %v7776_v8, %s13123_s5  ;;  %v8449_v48 = vld [vmem:[#allocation4 + $0x118] sm:$0xff]  ;;  %v8450_v8 = vld [vmem:[#allocation4 + $0x120] sm:$0xff] }
 0x58b   : > { %v8036_v36 = vpop.permute.xlu0 %8035  ;;  %v8038_v4 = vpop.permute.xlu1 %8037 }
 0x58c   : > { %8360 = vst.msk [vmem:[#allocation5 + $0x1e0] sm:$0xff] %vm8299_vm8, %v8036_v36  ;;  %8361 = vst.msk [vmem:[#allocation5 + $0x1e8] sm:$0xff] %vm8299_vm8, %v8038_v4 }
 0x58d   : > { %8151 = vrot.lane.b32.xlu0 %v7777_v10, %s13123_s5  ;;  %8153 = vrot.lane.b32.xlu1 %v7778_v35, %s13123_s5  ;;  %v8451_v10 = vld [vmem:[#allocation4 + $0x128] sm:$0xff]  ;;  %v8452_v35 = vld [vmem:[#allocation4 + $0x130] sm:$0xff] }
 0x58f   : > { %v8040_v12 = vpop.permute.xlu0 %8039  ;;  %v8042_v46 = vpop.permute.xlu1 %8041 }
 0x590   : > { %8362 = vst.msk [vmem:[#allocation5 + $0x1f0] sm:$0xff] %vm8299_vm8, %v8040_v12  ;;  %8363 = vst.msk [vmem:[#allocation5 + $0x1f8] sm:$0xff] %vm8299_vm8, %v8042_v46 }
 0x591   : > { %8155 = vrot.lane.b32.xlu0 %v7779_v11, %s13123_s5  ;;  %8157 = vrot.lane.b32.xlu1 %v7780_v13, %s13123_s5  ;;  %v8453_v11 = vld [vmem:[#allocation4 + $0x140] sm:$0xff]  ;;  %v8454_v13 = vld [vmem:[#allocation4 + $0x148] sm:$0xff] }
 0x593   : > { %v8044_v22 = vpop.permute.xlu0 %8043  ;;  %v8046_v27 = vpop.permute.xlu1 %8045 }
 0x594   : > { %8364 = vst.msk [vmem:[#allocation5 + $0x200] sm:$0xff] %vm8299_vm8, %v8044_v22  ;;  %8365 = vst.msk [vmem:[#allocation5 + $0x208] sm:$0xff] %vm8299_vm8, %v8046_v27 }
 0x595   : > { %8159 = vrot.lane.b32.xlu0 %v7781_v14, %s13123_s5  ;;  %8161 = vrot.lane.b32.xlu1 %v7782_v39, %s13123_s5  ;;  %v8455_v14 = vld [vmem:[#allocation4 + $0x150] sm:$0xff]  ;;  %v8456_v39 = vld [vmem:[#allocation4 + $0x158] sm:$0xff] }
 0x597   : > { %v8048_v17 = vpop.permute.xlu0 %8047  ;;  %v8050_v19 = vpop.permute.xlu1 %8049 }
 0x598   : > { %8366 = vst.msk [vmem:[#allocation5 + $0x210] sm:$0xff] %vm8299_vm8, %v8048_v17  ;;  %8367 = vst.msk [vmem:[#allocation5 + $0x218] sm:$0xff] %vm8299_vm8, %v8050_v19 }
 0x599   : > { %8163 = vrot.lane.b32.xlu0 %v7783_v15, %s13123_s5  ;;  %8165 = vrot.lane.b32.xlu1 %v7784_v18, %s13123_s5  ;;  %v8457_v15 = vld [vmem:[#allocation4 + $0x168] sm:$0xff]  ;;  %v8458_v18 = vld [vmem:[#allocation4 + $0x170] sm:$0xff] }
 0x59b   : > { %v8052_v24 = vpop.permute.xlu0 %8051  ;;  %v8054_v41 = vpop.permute.xlu1 %8053 }
 0x59c   : > { %8368 = vst.msk [vmem:[#allocation5 + $0x220] sm:$0xff] %vm8299_vm8, %v8052_v24  ;;  %8369 = vst.msk [vmem:[#allocation5 + $0x228] sm:$0xff] %vm8299_vm8, %v8054_v41 }
 0x59d   : > { %8167 = vrot.lane.b32.xlu0 %v7785_v20, %s13123_s5  ;;  %8169 = vrot.lane.b32.xlu1 %v7786_v40, %s13123_s5  ;;  %v8459_v20 = vld [vmem:[#allocation4 + $0x178] sm:$0xff]  ;;  %v8460_v40 = vld [vmem:[#allocation4 + $0x180] sm:$0xff] }
 0x59f   : > { %v8056_v26 = vpop.permute.xlu0 %8055  ;;  %v8058_v44 = vpop.permute.xlu1 %8057 }
 0x5a0   : > { %8370 = vst.msk [vmem:[#allocation5 + $0x230] sm:$0xff] %vm8299_vm8, %v8056_v26  ;;  %8371 = vst.msk [vmem:[#allocation5 + $0x238] sm:$0xff] %vm8299_vm8, %v8058_v44 }
 0x5a1   : > { %8685 = vrot.lane.b32.xlu0 %v8429_v21, %s13124_s6  ;;  %8687 = vrot.lane.b32.xlu1 %v8430_v42, %s13124_s6  ;;  %v8461_v21 = vld [vmem:[#allocation4 + $0x190] sm:$0xff]  ;;  %v8462_v42 = vld [vmem:[#allocation4 + $0x198] sm:$0xff] }
 0x5a3   : > { %v8060_v50 = vpop.permute.xlu0 %8059  ;;  %v8062_v52 = vpop.permute.xlu1 %8061 }
 0x5a4   : > { %8372 = vst.msk [vmem:[#allocation5 + $0x240] sm:$0xff] %vm8299_vm8, %v8060_v50  ;;  %8373 = vst.msk [vmem:[#allocation5 + $0x248] sm:$0xff] %vm8299_vm8, %v8062_v52 }
 0x5a5   : > { %8689 = vrot.lane.b32.xlu0 %v8431_v49, %s13124_s6  ;;  %8691 = vrot.lane.b32.xlu1 %v8432_v51, %s13124_s6  ;;  %v8463_v49 = vld [vmem:[#allocation4 + $0x1a0] sm:$0xff]  ;;  %v8464_v51 = vld [vmem:[#allocation4 + $0x1a8] sm:$0xff] }
 0x5a7   : > { %v8064_v53 = vpop.permute.xlu0 %8063  ;;  %v8066_v43 = vpop.permute.xlu1 %8065 }
 0x5a8   : > { %8374 = vst.msk [vmem:[#allocation5 + $0x250] sm:$0xff] %vm8299_vm8, %v8064_v53  ;;  %8375 = vst.msk [vmem:[#allocation5 + $0x258] sm:$0xff] %vm8299_vm8, %v8066_v43 }
 0x5a9   : > { %8693 = vrot.lane.b32.xlu0 %v8433_v47, %s13124_s6  ;;  %8695 = vrot.lane.b32.xlu1 %v8434_v16, %s13124_s6  ;;  %v8465_v47 = vld [vmem:[#allocation4 + $0x1b8] sm:$0xff]  ;;  %v8466_v16 = vld [vmem:[#allocation4 + $0x1c0] sm:$0xff] }
 0x5ab   : > { %v8068_v28 = vpop.permute.xlu0 %8067  ;;  %v8070_v54 = vpop.permute.xlu1 %8069 }
 0x5ac   : > { %8376 = vst.msk [vmem:[#allocation5 + $0x260] sm:$0xff] %vm8299_vm8, %v8068_v28  ;;  %8377 = vst.msk [vmem:[#allocation5 + $0x268] sm:$0xff] %vm8299_vm8, %v8070_v54 }
 0x5ad   : > { %8697 = vrot.lane.b32.xlu0 %v8435_v25, %s13124_s6  ;;  %8699 = vrot.lane.b32.xlu1 %v8436_v34, %s13124_s6  ;;  %v8467_v25 = vld [vmem:[#allocation4 + $0x1c8] sm:$0xff]  ;;  %v8468_v34 = vld [vmem:[#allocation4 + $0x1d0] sm:$0xff] }
 0x5af   : > { %v8072_v58 = vpop.permute.xlu0 %8071  ;;  %v8074_v31 = vpop.permute.xlu1 %8073 }
 0x5b0   : > { %8378 = vst.msk [vmem:[#allocation5 + $0x270] sm:$0xff] %vm8299_vm8, %v8072_v58  ;;  %8379 = vst.msk [vmem:[#allocation5 + $0x278] sm:$0xff] %vm8299_vm8, %v8074_v31 }
 0x5b1   : > { %8701 = vrot.lane.b32.xlu0 %v8437_v57, %s13124_s6  ;;  %8703 = vrot.lane.b32.xlu1 %v8438_v59, %s13124_s6  ;;  %v8469_v57 = vld [vmem:[#allocation4 + $0x1e0] sm:$0xff]  ;;  %v8470_v59 = vld [vmem:[#allocation4 + $0x1e8] sm:$0xff] }
 0x5b3   : > { %v8076_v61 = vpop.permute.xlu0 %8075  ;;  %v8078_v62 = vpop.permute.xlu1 %8077 }
 0x5b4   : > { %8380 = vst.msk [vmem:[#allocation5 + $0x280] sm:$0xff] %vm8299_vm8, %v8076_v61  ;;  %8381 = vst.msk [vmem:[#allocation5 + $0x288] sm:$0xff] %vm8299_vm8, %v8078_v62 }
 0x5b5   : > { %8705 = vrot.lane.b32.xlu0 %v8439_v60, %s13124_s6  ;;  %8707 = vrot.lane.b32.xlu1 %v8440_v29, %s13124_s6  ;;  %v8471_v60 = vld [vmem:[#allocation4 + $0x1f0] sm:$0xff]  ;;  %v8472_v29 = vld [vmem:[#allocation4 + $0x1f8] sm:$0xff] }
 0x5b7   : > { %v8080_v55 = vpop.permute.xlu0 %8079  ;;  %v8082_v1 = vpop.permute.xlu1 %8081 }
 0x5b8   : > { %8382 = vst.msk [vmem:[#allocation5 + $0x290] sm:$0xff] %vm8299_vm8, %v8080_v55  ;;  %8383 = vst.msk [vmem:[#allocation5 + $0x298] sm:$0xff] %vm8299_vm8, %v8082_v1 }
 0x5b9   : > { %8709 = vrot.lane.b32.xlu0 %v8441_v63, %s13124_s6  ;;  %8711 = vrot.lane.b32.xlu1 %v8442_v0, %s13124_s6  ;;  %v8473_v63 = vld [vmem:[#allocation4 + $0x208] sm:$0xff]  ;;  %v8474_v0 = vld [vmem:[#allocation4 + $0x210] sm:$0xff] }
 0x5bb   : > { %v8084_v56 = vpop.permute.xlu0 %8083  ;;  %v8086_v5 = vpop.permute.xlu1 %8085 }
 0x5bc   : > { %8384 = vst.msk [vmem:[#allocation5 + $0x2a0] sm:$0xff] %vm8299_vm8, %v8084_v56  ;;  %8385 = vst.msk [vmem:[#allocation5 + $0x2a8] sm:$0xff] %vm8299_vm8, %v8086_v5 }
 0x5bd   : > { %8713 = vrot.lane.b32.xlu0 %v8443_v2, %s13124_s6  ;;  %8715 = vrot.lane.b32.xlu1 %v8444_v3, %s13124_s6  ;;  %v8475_v2 = vld [vmem:[#allocation4 + $0x218] sm:$0xff]  ;;  %v8476_v3 = vld [vmem:[#allocation4 + $0x220] sm:$0xff] }
 0x5bf   : > { %v8088_v38 = vpop.permute.xlu0 %8087  ;;  %v8090_v6 = vpop.permute.xlu1 %8089 }
 0x5c0   : > { %8386 = vst.msk [vmem:[#allocation5 + $0x2b0] sm:$0xff] %vm8299_vm8, %v8088_v38  ;;  %8387 = vst.msk [vmem:[#allocation5 + $0x2b8] sm:$0xff] %vm8299_vm8, %v8090_v6 }
 0x5c1   : > { %8717 = vrot.lane.b32.xlu0 %v8445_v30, %s13124_s6  ;;  %8719 = vrot.lane.b32.xlu1 %v8446_v45, %s13124_s6  ;;  %v8477_v30 = vld [vmem:[#allocation4 + $0x230] sm:$0xff]  ;;  %v8478_v45 = vld [vmem:[#allocation4 + $0x238] sm:$0xff] }
 0x5c3   : > { %v8092_v37 = vpop.permute.xlu0 %8091  ;;  %v8094_v33 = vpop.permute.xlu1 %8093 }
 0x5c4   : > { %8388 = vst.msk [vmem:[#allocation5 + $0x2c0] sm:$0xff] %vm8299_vm8, %v8092_v37  ;;  %8389 = vst.msk [vmem:[#allocation5 + $0x2c8] sm:$0xff] %vm8299_vm8, %v8094_v33 }
 0x5c5   : > { %8721 = vrot.lane.b32.xlu0 %v8447_v32, %s13124_s6  ;;  %8723 = vrot.lane.b32.xlu1 %v8448_v23, %s13124_s6  ;;  %v8479_v32 = vld [vmem:[#allocation4 + $0x240] sm:$0xff]  ;;  %v8480_v23 = vld [vmem:[#allocation4 + $0x248] sm:$0xff] }
 0x5c7   : > { %v8096_v7 = vpop.permute.xlu0 %8095  ;;  %v8098_v9 = vpop.permute.xlu1 %8097 }
 0x5c8   : > { %8390 = vst.msk [vmem:[#allocation5 + $0x2d0] sm:$0xff] %vm8299_vm8, %v8096_v7  ;;  %8391 = vst.msk [vmem:[#allocation5 + $0x2d8] sm:$0xff] %vm8299_vm8, %v8098_v9 }
 0x5c9   : > { %8725 = vrot.lane.b32.xlu0 %v8449_v48, %s13124_s6  ;;  %8727 = vrot.lane.b32.xlu1 %v8450_v8, %s13124_s6  ;;  %v8481_v48 = vld [vmem:[#allocation4 + $0x258] sm:$0xff]  ;;  %v8482_v8 = vld [vmem:[#allocation4 + $0x260] sm:$0xff] }
 0x5cb   : > { %v8100_v36 = vpop.permute.xlu0 %8099  ;;  %v8102_v4 = vpop.permute.xlu1 %8101 }
 0x5cc   : > { %8392 = vst.msk [vmem:[#allocation5 + $0x2e0] sm:$0xff] %vm8299_vm8, %v8100_v36  ;;  %8393 = vst.msk [vmem:[#allocation5 + $0x2e8] sm:$0xff] %vm8299_vm8, %v8102_v4 }
 0x5cd   : > { %8729 = vrot.lane.b32.xlu0 %v8451_v10, %s13124_s6  ;;  %8731 = vrot.lane.b32.xlu1 %v8452_v35, %s13124_s6  ;;  %v8483_v10 = vld [vmem:[#allocation4 + $0x268] sm:$0xff]  ;;  %v8484_v35 = vld [vmem:[#allocation4 + $0x270] sm:$0xff] }
 0x5cf   : > { %v8104_v12 = vpop.permute.xlu0 %8103  ;;  %v8106_v46 = vpop.permute.xlu1 %8105 }
 0x5d0   : > { %8394 = vst.msk [vmem:[#allocation5 + $0x2f0] sm:$0xff] %vm8299_vm8, %v8104_v12  ;;  %8395 = vst.msk [vmem:[#allocation5 + $0x2f8] sm:$0xff] %vm8299_vm8, %v8106_v46 }
 0x5d1   : > { %8733 = vrot.lane.b32.xlu0 %v8453_v11, %s13124_s6  ;;  %8735 = vrot.lane.b32.xlu1 %v8454_v13, %s13124_s6  ;;  %v8485_v11 = vld [vmem:[#allocation4 + $0x280] sm:$0xff]  ;;  %v8486_v13 = vld [vmem:[#allocation4 + $0x288] sm:$0xff] }
 0x5d3   : > { %v8108_v22 = vpop.permute.xlu0 %8107  ;;  %v8110_v27 = vpop.permute.xlu1 %8109 }
 0x5d4   : > { %8396 = vst.msk [vmem:[#allocation5 + $0x300] sm:$0xff] %vm8299_vm8, %v8108_v22  ;;  %8397 = vst.msk [vmem:[#allocation5 + $0x308] sm:$0xff] %vm8299_vm8, %v8110_v27 }
 0x5d5   : > { %8737 = vrot.lane.b32.xlu0 %v8455_v14, %s13124_s6  ;;  %8739 = vrot.lane.b32.xlu1 %v8456_v39, %s13124_s6  ;;  %v8487_v14 = vld [vmem:[#allocation4 + $0x290] sm:$0xff]  ;;  %v8488_v39 = vld [vmem:[#allocation4 + $0x298] sm:$0xff] }
 0x5d7   : > { %v8112_v17 = vpop.permute.xlu0 %8111  ;;  %v8114_v19 = vpop.permute.xlu1 %8113 }
 0x5d8   : > { %8398 = vst.msk [vmem:[#allocation5 + $0x310] sm:$0xff] %vm8299_vm8, %v8112_v17  ;;  %8399 = vst.msk [vmem:[#allocation5 + $0x318] sm:$0xff] %vm8299_vm8, %v8114_v19 }
 0x5d9   : > { %8741 = vrot.lane.b32.xlu0 %v8457_v15, %s13124_s6  ;;  %8743 = vrot.lane.b32.xlu1 %v8458_v18, %s13124_s6  ;;  %v8489_v15 = vld [vmem:[#allocation4 + $0x2a8] sm:$0xff]  ;;  %v8490_v18 = vld [vmem:[#allocation4 + $0x2b0] sm:$0xff] }
 0x5db   : > { %v8116_v24 = vpop.permute.xlu0 %8115  ;;  %v8118_v41 = vpop.permute.xlu1 %8117 }
 0x5dc   : > { %8400 = vst.msk [vmem:[#allocation5 + $0x320] sm:$0xff] %vm8299_vm8, %v8116_v24  ;;  %8401 = vst.msk [vmem:[#allocation5 + $0x328] sm:$0xff] %vm8299_vm8, %v8118_v41 }
 0x5dd   : > { %8745 = vrot.lane.b32.xlu0 %v8459_v20, %s13124_s6  ;;  %8747 = vrot.lane.b32.xlu1 %v8460_v40, %s13124_s6  ;;  %v8491_v20 = vld [vmem:[#allocation4 + $0x2b8] sm:$0xff]  ;;  %v8492_v40 = vld [vmem:[#allocation4 + $0x2c0] sm:$0xff] }
 0x5df   : > { %v8120_v26 = vpop.permute.xlu0 %8119  ;;  %v8122_v44 = vpop.permute.xlu1 %8121 }
 0x5e0   : > { %8402 = vst.msk [vmem:[#allocation5 + $0x330] sm:$0xff] %vm8299_vm8, %v8120_v26  ;;  %8403 = vst.msk [vmem:[#allocation5 + $0x338] sm:$0xff] %vm8299_vm8, %v8122_v44 }
 0x5e1   : > { %8749 = vrot.lane.b32.xlu0 %v8461_v21, %s13124_s6  ;;  %8751 = vrot.lane.b32.xlu1 %v8462_v42, %s13124_s6  ;;  %v8493_v21 = vld [vmem:[#allocation4 + $0x2d0] sm:$0xff]  ;;  %v8494_v42 = vld [vmem:[#allocation4 + $0x2d8] sm:$0xff] }
 0x5e3   : > { %v8124_v50 = vpop.permute.xlu0 %8123  ;;  %v8126_v52 = vpop.permute.xlu1 %8125 }
 0x5e4   : > { %8404 = vst.msk [vmem:[#allocation5 + $0x340] sm:$0xff] %vm8299_vm8, %v8124_v50  ;;  %8405 = vst.msk [vmem:[#allocation5 + $0x348] sm:$0xff] %vm8299_vm8, %v8126_v52 }
 0x5e5   : > { %8753 = vrot.lane.b32.xlu0 %v8463_v49, %s13124_s6  ;;  %8755 = vrot.lane.b32.xlu1 %v8464_v51, %s13124_s6  ;;  %v8495_v49 = vld [vmem:[#allocation4 + $0x2e0] sm:$0xff]  ;;  %v8496_v51 = vld [vmem:[#allocation4 + $0x2e8] sm:$0xff] }
 0x5e7   : > { %v8128_v53 = vpop.permute.xlu0 %8127  ;;  %v8130_v43 = vpop.permute.xlu1 %8129 }
 0x5e8   : > { %8406 = vst.msk [vmem:[#allocation5 + $0x350] sm:$0xff] %vm8299_vm8, %v8128_v53  ;;  %8407 = vst.msk [vmem:[#allocation5 + $0x358] sm:$0xff] %vm8299_vm8, %v8130_v43 }
 0x5e9   : > { %8757 = vrot.lane.b32.xlu0 %v8465_v47, %s13124_s6  ;;  %8759 = vrot.lane.b32.xlu1 %v8466_v16, %s13124_s6  ;;  %v8497_v47 = vld [vmem:[#allocation4 + $0x2f8] sm:$0xff]  ;;  %v8498_v16 = vld [vmem:[#allocation4 + $0x300] sm:$0xff] }
 0x5eb   : > { %v8132_v28 = vpop.permute.xlu0 %8131  ;;  %v8134_v54 = vpop.permute.xlu1 %8133 }
 0x5ec   : > { %8408 = vst.msk [vmem:[#allocation5 + $0x360] sm:$0xff] %vm8299_vm8, %v8132_v28  ;;  %8409 = vst.msk [vmem:[#allocation5 + $0x368] sm:$0xff] %vm8299_vm8, %v8134_v54 }
 0x5ed   : > { %8761 = vrot.lane.b32.xlu0 %v8467_v25, %s13124_s6  ;;  %8763 = vrot.lane.b32.xlu1 %v8468_v34, %s13124_s6  ;;  %v8499_v25 = vld [vmem:[#allocation4 + $0x308] sm:$0xff]  ;;  %v8500_v34 = vld [vmem:[#allocation4 + $0x310] sm:$0xff] }
 0x5ef   : > { %v8136_v58 = vpop.permute.xlu0 %8135  ;;  %v8138_v31 = vpop.permute.xlu1 %8137 }
 0x5f0   : > { %8410 = vst.msk [vmem:[#allocation5 + $0x370] sm:$0xff] %vm8299_vm8, %v8136_v58  ;;  %8411 = vst.msk [vmem:[#allocation5 + $0x378] sm:$0xff] %vm8299_vm8, %v8138_v31 }
 0x5f1   : > { %8765 = vrot.lane.b32.xlu0 %v8469_v57, %s13124_s6  ;;  %8767 = vrot.lane.b32.xlu1 %v8470_v59, %s13124_s6  ;;  %v8501_v57 = vld [vmem:[#allocation4 + $0x320] sm:$0xff]  ;;  %v8502_v59 = vld [vmem:[#allocation4 + $0x328] sm:$0xff] }
 0x5f3   : > { %v8140_v61 = vpop.permute.xlu0 %8139  ;;  %v8142_v62 = vpop.permute.xlu1 %8141 }
 0x5f4   : > { %8412 = vst.msk [vmem:[#allocation5 + $0x380] sm:$0xff] %vm8299_vm8, %v8140_v61  ;;  %8413 = vst.msk [vmem:[#allocation5 + $0x388] sm:$0xff] %vm8299_vm8, %v8142_v62 }
 0x5f5   : > { %8769 = vrot.lane.b32.xlu0 %v8471_v60, %s13124_s6  ;;  %8771 = vrot.lane.b32.xlu1 %v8472_v29, %s13124_s6  ;;  %v8503_v60 = vld [vmem:[#allocation4 + $0x330] sm:$0xff]  ;;  %v8504_v29 = vld [vmem:[#allocation4 + $0x338] sm:$0xff] }
 0x5f7   : > { %v8144_v55 = vpop.permute.xlu0 %8143  ;;  %v8146_v1 = vpop.permute.xlu1 %8145 }
 0x5f8   : > { %8414 = vst.msk [vmem:[#allocation5 + $0x390] sm:$0xff] %vm8299_vm8, %v8144_v55  ;;  %8415 = vst.msk [vmem:[#allocation5 + $0x398] sm:$0xff] %vm8299_vm8, %v8146_v1 }
 0x5f9   : > { %8773 = vrot.lane.b32.xlu0 %v8473_v63, %s13124_s6  ;;  %8775 = vrot.lane.b32.xlu1 %v8474_v0, %s13124_s6  ;;  %v8505_v63 = vld [vmem:[#allocation4 + $0x348] sm:$0xff]  ;;  %v8506_v0 = vld [vmem:[#allocation4 + $0x350] sm:$0xff] }
 0x5fb   : > { %v8148_v56 = vpop.permute.xlu0 %8147  ;;  %v8150_v5 = vpop.permute.xlu1 %8149 }
 0x5fc   : > { %8416 = vst.msk [vmem:[#allocation5 + $0x3a0] sm:$0xff] %vm8299_vm8, %v8148_v56  ;;  %8417 = vst.msk [vmem:[#allocation5 + $0x3a8] sm:$0xff] %vm8299_vm8, %v8150_v5 }
 0x5fd   : > { %8777 = vrot.lane.b32.xlu0 %v8475_v2, %s13124_s6  ;;  %8779 = vrot.lane.b32.xlu1 %v8476_v3, %s13124_s6  ;;  %v8507_v2 = vld [vmem:[#allocation4 + $0x358] sm:$0xff]  ;;  %v8508_v3 = vld [vmem:[#allocation4 + $0x360] sm:$0xff] }
 0x5ff   : > { %v8152_v38 = vpop.permute.xlu0 %8151  ;;  %v8154_v6 = vpop.permute.xlu1 %8153 }
 0x600   : > { %8418 = vst.msk [vmem:[#allocation5 + $0x3b0] sm:$0xff] %vm8299_vm8, %v8152_v38  ;;  %8419 = vst.msk [vmem:[#allocation5 + $0x3b8] sm:$0xff] %vm8299_vm8, %v8154_v6 }
 0x601   : > { %8781 = vrot.lane.b32.xlu0 %v8477_v30, %s13124_s6  ;;  %8783 = vrot.lane.b32.xlu1 %v8478_v45, %s13124_s6  ;;  %v8509_v30 = vld [vmem:[#allocation4 + $0x370] sm:$0xff]  ;;  %v8510_v45 = vld [vmem:[#allocation4 + $0x378] sm:$0xff] }
 0x603   : > { %v8156_v37 = vpop.permute.xlu0 %8155  ;;  %v8158_v33 = vpop.permute.xlu1 %8157 }
 0x604   : > { %8420 = vst.msk [vmem:[#allocation5 + $0x3c0] sm:$0xff] %vm8299_vm8, %v8156_v37  ;;  %8421 = vst.msk [vmem:[#allocation5 + $0x3c8] sm:$0xff] %vm8299_vm8, %v8158_v33 }
 0x605   : > { %8785 = vrot.lane.b32.xlu0 %v8479_v32, %s13124_s6  ;;  %8787 = vrot.lane.b32.xlu1 %v8480_v23, %s13124_s6  ;;  %v8511_v32 = vld [vmem:[#allocation4 + $0x380] sm:$0xff]  ;;  %v8512_v23 = vld [vmem:[#allocation4 + $0x388] sm:$0xff] }
 0x607   : > { %v8160_v7 = vpop.permute.xlu0 %8159  ;;  %v8162_v9 = vpop.permute.xlu1 %8161 }
 0x608   : > { %8422 = vst.msk [vmem:[#allocation5 + $0x3d0] sm:$0xff] %vm8299_vm8, %v8160_v7  ;;  %8423 = vst.msk [vmem:[#allocation5 + $0x3d8] sm:$0xff] %vm8299_vm8, %v8162_v9 }
 0x609   : > { %8789 = vrot.lane.b32.xlu0 %v8481_v48, %s13124_s6  ;;  %8791 = vrot.lane.b32.xlu1 %v8482_v8, %s13124_s6  ;;  %v8513_v48 = vld [vmem:[#allocation4 + $0x398] sm:$0xff]  ;;  %v8514_v8 = vld [vmem:[#allocation4 + $0x3a0] sm:$0xff] }
 0x60b   : > { %v8164_v36 = vpop.permute.xlu0 %8163  ;;  %v8166_v4 = vpop.permute.xlu1 %8165 }
 0x60c   : > { %8424 = vst.msk [vmem:[#allocation5 + $0x3e0] sm:$0xff] %vm8299_vm8, %v8164_v36  ;;  %8425 = vst.msk [vmem:[#allocation5 + $0x3e8] sm:$0xff] %vm8299_vm8, %v8166_v4 }
 0x60d   : > { %8793 = vrot.lane.b32.xlu0 %v8483_v10, %s13124_s6  ;;  %8795 = vrot.lane.b32.xlu1 %v8484_v35, %s13124_s6  ;;  %v8515_v10 = vld [vmem:[#allocation4 + $0x3a8] sm:$0xff]  ;;  %v8516_v35 = vld [vmem:[#allocation4 + $0x3b0] sm:$0xff] }
 0x60f   : > { %v8168_v12 = vpop.permute.xlu0 %8167  ;;  %v8170_v46 = vpop.permute.xlu1 %8169 }
 0x610   : > { %8426 = vst.msk [vmem:[#allocation5 + $0x3f0] sm:$0xff] %vm8299_vm8, %v8168_v12  ;;  %8427 = vst.msk [vmem:[#allocation5 + $0x3f8] sm:$0xff] %vm8299_vm8, %v8170_v46 }
 0x611   : > { %8797 = vrot.lane.b32.xlu0 %v8485_v11, %s13124_s6  ;;  %8799 = vrot.lane.b32.xlu1 %v8486_v13, %s13124_s6  ;;  %v8517_v11 = vld [vmem:[#allocation4 + $0x3c0] sm:$0xff]  ;;  %v8518_v13 = vld [vmem:[#allocation4 + $0x3c8] sm:$0xff] }
 0x613   : > { %v8686_v22 = vpop.permute.xlu0 %8685  ;;  %v8688_v27 = vpop.permute.xlu1 %8687 }
 0x614   : > { %9070 = vst.msk [vmem:[#allocation5] sm:$0xff] %vm9069_vm9, %v8686_v22  ;;  %9071 = vst.msk [vmem:[#allocation5 + $0x8] sm:$0xff] %vm9069_vm9, %v8688_v27 }
 0x615   : > { %8801 = vrot.lane.b32.xlu0 %v8487_v14, %s13124_s6  ;;  %8803 = vrot.lane.b32.xlu1 %v8488_v39, %s13124_s6  ;;  %v8519_v14 = vld [vmem:[#allocation4 + $0x3d0] sm:$0xff]  ;;  %v8520_v39 = vld [vmem:[#allocation4 + $0x3d8] sm:$0xff] }
 0x617   : > { %v8690_v17 = vpop.permute.xlu0 %8689  ;;  %v8692_v19 = vpop.permute.xlu1 %8691 }
 0x618   : > { %9072 = vst.msk [vmem:[#allocation5 + $0x10] sm:$0xff] %vm9069_vm9, %v8690_v17  ;;  %9073 = vst.msk [vmem:[#allocation5 + $0x18] sm:$0xff] %vm9069_vm9, %v8692_v19 }
 0x619   : > { %8805 = vrot.lane.b32.xlu0 %v8489_v15, %s13124_s6  ;;  %8807 = vrot.lane.b32.xlu1 %v8490_v18, %s13124_s6  ;;  %v8521_v15 = vld [vmem:[#allocation4 + $0x3e8] sm:$0xff]  ;;  %v8522_v18 = vld [vmem:[#allocation4 + $0x3f0] sm:$0xff] }
 0x61b   : > { %v8694_v24 = vpop.permute.xlu0 %8693  ;;  %v8696_v41 = vpop.permute.xlu1 %8695 }
 0x61c   : > { %9074 = vst.msk [vmem:[#allocation5 + $0x20] sm:$0xff] %vm9069_vm9, %v8694_v24  ;;  %9075 = vst.msk [vmem:[#allocation5 + $0x28] sm:$0xff] %vm9069_vm9, %v8696_v41 }
 0x61d   : > { %8809 = vrot.lane.b32.xlu0 %v8491_v20, %s13124_s6  ;;  %8811 = vrot.lane.b32.xlu1 %v8492_v40, %s13124_s6  ;;  %v8523_v20 = vld [vmem:[#allocation4 + $0x3f8] sm:$0xff]  ;;  %v8524_v40 = vld [vmem:[#allocation4 + $0x400] sm:$0xff] }
 0x61f   : > { %v8698_v26 = vpop.permute.xlu0 %8697  ;;  %v8700_v44 = vpop.permute.xlu1 %8699 }
 0x620   : > { %9076 = vst.msk [vmem:[#allocation5 + $0x30] sm:$0xff] %vm9069_vm9, %v8698_v26  ;;  %9077 = vst.msk [vmem:[#allocation5 + $0x38] sm:$0xff] %vm9069_vm9, %v8700_v44 }
 0x621   : > { %8813 = vrot.lane.b32.xlu0 %v8493_v21, %s13124_s6  ;;  %8815 = vrot.lane.b32.xlu1 %v8494_v42, %s13124_s6  ;;  %v8525_v21 = vld [vmem:[#allocation4 + $0x410] sm:$0xff]  ;;  %v8526_v42 = vld [vmem:[#allocation4 + $0x418] sm:$0xff] }
 0x623   : > { %v8702_v50 = vpop.permute.xlu0 %8701  ;;  %v8704_v52 = vpop.permute.xlu1 %8703 }
 0x624   : > { %9078 = vst.msk [vmem:[#allocation5 + $0x40] sm:$0xff] %vm9069_vm9, %v8702_v50  ;;  %9079 = vst.msk [vmem:[#allocation5 + $0x48] sm:$0xff] %vm9069_vm9, %v8704_v52 }
 0x625   : > { %8817 = vrot.lane.b32.xlu0 %v8495_v49, %s13124_s6  ;;  %8819 = vrot.lane.b32.xlu1 %v8496_v51, %s13124_s6  ;;  %v8527_v49 = vld [vmem:[#allocation4 + $0x420] sm:$0xff]  ;;  %v8528_v51 = vld [vmem:[#allocation4 + $0x428] sm:$0xff] }
 0x627   : > { %v8706_v53 = vpop.permute.xlu0 %8705  ;;  %v8708_v43 = vpop.permute.xlu1 %8707 }
 0x628   : > { %9080 = vst.msk [vmem:[#allocation5 + $0x50] sm:$0xff] %vm9069_vm9, %v8706_v53  ;;  %9081 = vst.msk [vmem:[#allocation5 + $0x58] sm:$0xff] %vm9069_vm9, %v8708_v43 }
 0x629   : > { %8821 = vrot.lane.b32.xlu0 %v8497_v47, %s13124_s6  ;;  %8823 = vrot.lane.b32.xlu1 %v8498_v16, %s13124_s6  ;;  %v8529_v47 = vld [vmem:[#allocation4 + $0x438] sm:$0xff]  ;;  %v8530_v16 = vld [vmem:[#allocation4 + $0x440] sm:$0xff] }
 0x62b   : > { %v8710_v28 = vpop.permute.xlu0 %8709  ;;  %v8712_v54 = vpop.permute.xlu1 %8711 }
 0x62c   : > { %9082 = vst.msk [vmem:[#allocation5 + $0x60] sm:$0xff] %vm9069_vm9, %v8710_v28  ;;  %9083 = vst.msk [vmem:[#allocation5 + $0x68] sm:$0xff] %vm9069_vm9, %v8712_v54 }
 0x62d   : > { %8825 = vrot.lane.b32.xlu0 %v8499_v25, %s13124_s6  ;;  %8827 = vrot.lane.b32.xlu1 %v8500_v34, %s13124_s6  ;;  %v8531_v25 = vld [vmem:[#allocation4 + $0x448] sm:$0xff]  ;;  %v8532_v34 = vld [vmem:[#allocation4 + $0x450] sm:$0xff] }
 0x62f   : > { %v8714_v58 = vpop.permute.xlu0 %8713  ;;  %v8716_v31 = vpop.permute.xlu1 %8715 }
 0x630   : > { %9084 = vst.msk [vmem:[#allocation5 + $0x70] sm:$0xff] %vm9069_vm9, %v8714_v58  ;;  %9085 = vst.msk [vmem:[#allocation5 + $0x78] sm:$0xff] %vm9069_vm9, %v8716_v31 }
 0x631   : > { %8829 = vrot.lane.b32.xlu0 %v8501_v57, %s13124_s6  ;;  %8831 = vrot.lane.b32.xlu1 %v8502_v59, %s13124_s6  ;;  %v8533_v57 = vld [vmem:[#allocation4 + $0x460] sm:$0xff]  ;;  %v8534_v59 = vld [vmem:[#allocation4 + $0x468] sm:$0xff] }
 0x633   : > { %v8718_v61 = vpop.permute.xlu0 %8717  ;;  %v8720_v62 = vpop.permute.xlu1 %8719 }
 0x634   : > { %9086 = vst.msk [vmem:[#allocation5 + $0x80] sm:$0xff] %vm9069_vm9, %v8718_v61  ;;  %9087 = vst.msk [vmem:[#allocation5 + $0x88] sm:$0xff] %vm9069_vm9, %v8720_v62 }
 0x635   : > { %8833 = vrot.lane.b32.xlu0 %v8503_v60, %s13124_s6  ;;  %8835 = vrot.lane.b32.xlu1 %v8504_v29, %s13124_s6  ;;  %v8535_v60 = vld [vmem:[#allocation4 + $0x470] sm:$0xff]  ;;  %v8536_v29 = vld [vmem:[#allocation4 + $0x478] sm:$0xff] }
 0x637   : > { %v8722_v55 = vpop.permute.xlu0 %8721  ;;  %v8724_v1 = vpop.permute.xlu1 %8723 }
 0x638   : > { %9088 = vst.msk [vmem:[#allocation5 + $0x90] sm:$0xff] %vm9069_vm9, %v8722_v55  ;;  %9089 = vst.msk [vmem:[#allocation5 + $0x98] sm:$0xff] %vm9069_vm9, %v8724_v1 }
 0x639   : > { %8837 = vrot.lane.b32.xlu0 %v8505_v63, %s13124_s6  ;;  %8839 = vrot.lane.b32.xlu1 %v8506_v0, %s13124_s6  ;;  %v8537_v63 = vld [vmem:[#allocation4 + $0x488] sm:$0xff]  ;;  %v8538_v0 = vld [vmem:[#allocation4 + $0x490] sm:$0xff] }
 0x63b   : > { %v8726_v56 = vpop.permute.xlu0 %8725  ;;  %v8728_v5 = vpop.permute.xlu1 %8727 }
 0x63c   : > { %9090 = vst.msk [vmem:[#allocation5 + $0xa0] sm:$0xff] %vm9069_vm9, %v8726_v56  ;;  %9091 = vst.msk [vmem:[#allocation5 + $0xa8] sm:$0xff] %vm9069_vm9, %v8728_v5 }
 0x63d   : > { %8841 = vrot.lane.b32.xlu0 %v8507_v2, %s13124_s6  ;;  %8843 = vrot.lane.b32.xlu1 %v8508_v3, %s13124_s6  ;;  %v8539_v2 = vld [vmem:[#allocation4 + $0x498] sm:$0xff]  ;;  %v8540_v3 = vld [vmem:[#allocation4 + $0x4a0] sm:$0xff] }
 0x63f   : > { %v8730_v38 = vpop.permute.xlu0 %8729  ;;  %v8732_v6 = vpop.permute.xlu1 %8731 }
 0x640   : > { %9092 = vst.msk [vmem:[#allocation5 + $0xb0] sm:$0xff] %vm9069_vm9, %v8730_v38  ;;  %9093 = vst.msk [vmem:[#allocation5 + $0xb8] sm:$0xff] %vm9069_vm9, %v8732_v6 }
 0x641   : > { %8845 = vrot.lane.b32.xlu0 %v8509_v30, %s13124_s6  ;;  %8847 = vrot.lane.b32.xlu1 %v8510_v45, %s13124_s6  ;;  %v8541_v30 = vld [vmem:[#allocation4 + $0x4b0] sm:$0xff]  ;;  %v8542_v45 = vld [vmem:[#allocation4 + $0x4b8] sm:$0xff] }
 0x643   : > { %v8734_v37 = vpop.permute.xlu0 %8733  ;;  %v8736_v33 = vpop.permute.xlu1 %8735 }
 0x644   : > { %9094 = vst.msk [vmem:[#allocation5 + $0xc0] sm:$0xff] %vm9069_vm9, %v8734_v37  ;;  %9095 = vst.msk [vmem:[#allocation5 + $0xc8] sm:$0xff] %vm9069_vm9, %v8736_v33 }
 0x645   : > { %8849 = vrot.lane.b32.xlu0 %v8511_v32, %s13124_s6  ;;  %8851 = vrot.lane.b32.xlu1 %v8512_v23, %s13124_s6  ;;  %v8543_v32 = vld [vmem:[#allocation4 + $0x4c0] sm:$0xff]  ;;  %v8544_v23 = vld [vmem:[#allocation4 + $0x4c8] sm:$0xff] }
 0x647   : > { %v8738_v7 = vpop.permute.xlu0 %8737  ;;  %v8740_v9 = vpop.permute.xlu1 %8739 }
 0x648   : > { %9096 = vst.msk [vmem:[#allocation5 + $0xd0] sm:$0xff] %vm9069_vm9, %v8738_v7  ;;  %9097 = vst.msk [vmem:[#allocation5 + $0xd8] sm:$0xff] %vm9069_vm9, %v8740_v9 }
 0x649   : > { %8853 = vrot.lane.b32.xlu0 %v8513_v48, %s13124_s6  ;;  %8855 = vrot.lane.b32.xlu1 %v8514_v8, %s13124_s6  ;;  %v8545_v48 = vld [vmem:[#allocation4 + $0x4d8] sm:$0xff]  ;;  %v8546_v8 = vld [vmem:[#allocation4 + $0x4e0] sm:$0xff] }
 0x64b   : > { %v8742_v36 = vpop.permute.xlu0 %8741  ;;  %v8744_v4 = vpop.permute.xlu1 %8743 }
 0x64c   : > { %9098 = vst.msk [vmem:[#allocation5 + $0xe0] sm:$0xff] %vm9069_vm9, %v8742_v36  ;;  %9099 = vst.msk [vmem:[#allocation5 + $0xe8] sm:$0xff] %vm9069_vm9, %v8744_v4 }
 0x64d   : > { %8857 = vrot.lane.b32.xlu0 %v8515_v10, %s13124_s6  ;;  %8859 = vrot.lane.b32.xlu1 %v8516_v35, %s13124_s6  ;;  %v8547_v10 = vld [vmem:[#allocation4 + $0x4e8] sm:$0xff]  ;;  %v8548_v35 = vld [vmem:[#allocation4 + $0x4f0] sm:$0xff] }
 0x64f   : > { %v8746_v12 = vpop.permute.xlu0 %8745  ;;  %v8748_v46 = vpop.permute.xlu1 %8747 }
 0x650   : > { %9100 = vst.msk [vmem:[#allocation5 + $0xf0] sm:$0xff] %vm9069_vm9, %v8746_v12  ;;  %9101 = vst.msk [vmem:[#allocation5 + $0xf8] sm:$0xff] %vm9069_vm9, %v8748_v46 }
 0x651   : > { %8861 = vrot.lane.b32.xlu0 %v8517_v11, %s13124_s6  ;;  %8863 = vrot.lane.b32.xlu1 %v8518_v13, %s13124_s6  ;;  %v8549_v11 = vld [vmem:[#allocation4 + $0x500] sm:$0xff]  ;;  %v8550_v13 = vld [vmem:[#allocation4 + $0x508] sm:$0xff] }
 0x653   : > { %v8750_v22 = vpop.permute.xlu0 %8749  ;;  %v8752_v27 = vpop.permute.xlu1 %8751 }
 0x654   : > { %9102 = vst.msk [vmem:[#allocation5 + $0x100] sm:$0xff] %vm9069_vm9, %v8750_v22  ;;  %9103 = vst.msk [vmem:[#allocation5 + $0x108] sm:$0xff] %vm9069_vm9, %v8752_v27 }
 0x655   : > { %8865 = vrot.lane.b32.xlu0 %v8519_v14, %s13124_s6  ;;  %8867 = vrot.lane.b32.xlu1 %v8520_v39, %s13124_s6  ;;  %v8551_v14 = vld [vmem:[#allocation4 + $0x510] sm:$0xff]  ;;  %v8552_v39 = vld [vmem:[#allocation4 + $0x518] sm:$0xff] }
 0x657   : > { %v8754_v17 = vpop.permute.xlu0 %8753  ;;  %v8756_v19 = vpop.permute.xlu1 %8755 }
 0x658   : > { %9104 = vst.msk [vmem:[#allocation5 + $0x110] sm:$0xff] %vm9069_vm9, %v8754_v17  ;;  %9105 = vst.msk [vmem:[#allocation5 + $0x118] sm:$0xff] %vm9069_vm9, %v8756_v19 }
 0x659   : > { %8869 = vrot.lane.b32.xlu0 %v8521_v15, %s13124_s6  ;;  %8871 = vrot.lane.b32.xlu1 %v8522_v18, %s13124_s6  ;;  %v8553_v15 = vld [vmem:[#allocation4 + $0x528] sm:$0xff]  ;;  %v8554_v18 = vld [vmem:[#allocation4 + $0x530] sm:$0xff] }
 0x65b   : > { %v8758_v24 = vpop.permute.xlu0 %8757  ;;  %v8760_v41 = vpop.permute.xlu1 %8759 }
 0x65c   : > { %9106 = vst.msk [vmem:[#allocation5 + $0x120] sm:$0xff] %vm9069_vm9, %v8758_v24  ;;  %9107 = vst.msk [vmem:[#allocation5 + $0x128] sm:$0xff] %vm9069_vm9, %v8760_v41 }
 0x65d   : > { %8873 = vrot.lane.b32.xlu0 %v8523_v20, %s13124_s6  ;;  %8875 = vrot.lane.b32.xlu1 %v8524_v40, %s13124_s6  ;;  %v8555_v20 = vld [vmem:[#allocation4 + $0x538] sm:$0xff]  ;;  %v8556_v40 = vld [vmem:[#allocation4 + $0x540] sm:$0xff] }
 0x65f   : > { %v8762_v26 = vpop.permute.xlu0 %8761  ;;  %v8764_v44 = vpop.permute.xlu1 %8763 }
 0x660   : > { %9108 = vst.msk [vmem:[#allocation5 + $0x130] sm:$0xff] %vm9069_vm9, %v8762_v26  ;;  %9109 = vst.msk [vmem:[#allocation5 + $0x138] sm:$0xff] %vm9069_vm9, %v8764_v44 }
 0x661   : > { %8877 = vrot.lane.b32.xlu0 %v8525_v21, %s13124_s6  ;;  %8879 = vrot.lane.b32.xlu1 %v8526_v42, %s13124_s6  ;;  %v9198_v21 = vld [vmem:[#allocation4 + $0x51] sm:$0xff]  ;;  %v9199_v42 = vld [vmem:[#allocation4 + $0x59] sm:$0xff] }
 0x663   : > { %v8766_v50 = vpop.permute.xlu0 %8765  ;;  %v8768_v52 = vpop.permute.xlu1 %8767 }
 0x664   : > { %9110 = vst.msk [vmem:[#allocation5 + $0x140] sm:$0xff] %vm9069_vm9, %v8766_v50  ;;  %9111 = vst.msk [vmem:[#allocation5 + $0x148] sm:$0xff] %vm9069_vm9, %v8768_v52 }
 0x665   : > { %8881 = vrot.lane.b32.xlu0 %v8527_v49, %s13124_s6  ;;  %8883 = vrot.lane.b32.xlu1 %v8528_v51, %s13124_s6  ;;  %v9200_v49 = vld [vmem:[#allocation4 + $0x61] sm:$0xff]  ;;  %v9201_v51 = vld [vmem:[#allocation4 + $0x69] sm:$0xff] }
 0x667   : > { %v8770_v53 = vpop.permute.xlu0 %8769  ;;  %v8772_v43 = vpop.permute.xlu1 %8771 }
 0x668   : > { %9112 = vst.msk [vmem:[#allocation5 + $0x150] sm:$0xff] %vm9069_vm9, %v8770_v53  ;;  %9113 = vst.msk [vmem:[#allocation5 + $0x158] sm:$0xff] %vm9069_vm9, %v8772_v43 }
 0x669   : > { %8885 = vrot.lane.b32.xlu0 %v8529_v47, %s13124_s6  ;;  %8887 = vrot.lane.b32.xlu1 %v8530_v16, %s13124_s6  ;;  %v9202_v47 = vld [vmem:[#allocation4 + $0x79] sm:$0xff]  ;;  %v9203_v16 = vld [vmem:[#allocation4 + $0x81] sm:$0xff] }
 0x66b   : > { %v8774_v28 = vpop.permute.xlu0 %8773  ;;  %v8776_v54 = vpop.permute.xlu1 %8775 }
 0x66c   : > { %9114 = vst.msk [vmem:[#allocation5 + $0x160] sm:$0xff] %vm9069_vm9, %v8774_v28  ;;  %9115 = vst.msk [vmem:[#allocation5 + $0x168] sm:$0xff] %vm9069_vm9, %v8776_v54 }
 0x66d   : > { %8889 = vrot.lane.b32.xlu0 %v8531_v25, %s13124_s6  ;;  %8891 = vrot.lane.b32.xlu1 %v8532_v34, %s13124_s6  ;;  %v9204_v25 = vld [vmem:[#allocation4 + $0x89] sm:$0xff]  ;;  %v9205_v34 = vld [vmem:[#allocation4 + $0x91] sm:$0xff] }
 0x66f   : > { %v8778_v58 = vpop.permute.xlu0 %8777  ;;  %v8780_v31 = vpop.permute.xlu1 %8779 }
 0x670   : > { %9116 = vst.msk [vmem:[#allocation5 + $0x170] sm:$0xff] %vm9069_vm9, %v8778_v58  ;;  %9117 = vst.msk [vmem:[#allocation5 + $0x178] sm:$0xff] %vm9069_vm9, %v8780_v31 }
 0x671   : > { %8893 = vrot.lane.b32.xlu0 %v8533_v57, %s13124_s6  ;;  %8895 = vrot.lane.b32.xlu1 %v8534_v59, %s13124_s6  ;;  %v9206_v57 = vld [vmem:[#allocation4 + $0xa1] sm:$0xff]  ;;  %v9207_v59 = vld [vmem:[#allocation4 + $0xa9] sm:$0xff] }
 0x673   : > { %v8782_v61 = vpop.permute.xlu0 %8781  ;;  %v8784_v62 = vpop.permute.xlu1 %8783 }
 0x674   : > { %9118 = vst.msk [vmem:[#allocation5 + $0x180] sm:$0xff] %vm9069_vm9, %v8782_v61  ;;  %9119 = vst.msk [vmem:[#allocation5 + $0x188] sm:$0xff] %vm9069_vm9, %v8784_v62 }
 0x675   : > { %8897 = vrot.lane.b32.xlu0 %v8535_v60, %s13124_s6  ;;  %8899 = vrot.lane.b32.xlu1 %v8536_v29, %s13124_s6  ;;  %v9208_v60 = vld [vmem:[#allocation4 + $0xb1] sm:$0xff]  ;;  %v9209_v29 = vld [vmem:[#allocation4 + $0xb9] sm:$0xff] }
 0x677   : > { %v8786_v55 = vpop.permute.xlu0 %8785  ;;  %v8788_v1 = vpop.permute.xlu1 %8787 }
 0x678   : > { %9120 = vst.msk [vmem:[#allocation5 + $0x190] sm:$0xff] %vm9069_vm9, %v8786_v55  ;;  %9121 = vst.msk [vmem:[#allocation5 + $0x198] sm:$0xff] %vm9069_vm9, %v8788_v1 }
 0x679   : > { %8901 = vrot.lane.b32.xlu0 %v8537_v63, %s13124_s6  ;;  %8903 = vrot.lane.b32.xlu1 %v8538_v0, %s13124_s6  ;;  %v9210_v63 = vld [vmem:[#allocation4 + $0xc9] sm:$0xff]  ;;  %v9211_v0 = vld [vmem:[#allocation4 + $0xd1] sm:$0xff] }
 0x67b   : > { %v8790_v56 = vpop.permute.xlu0 %8789  ;;  %v8792_v5 = vpop.permute.xlu1 %8791 }
 0x67c   : > { %9122 = vst.msk [vmem:[#allocation5 + $0x1a0] sm:$0xff] %vm9069_vm9, %v8790_v56  ;;  %9123 = vst.msk [vmem:[#allocation5 + $0x1a8] sm:$0xff] %vm9069_vm9, %v8792_v5 }
 0x67d   : > { %8905 = vrot.lane.b32.xlu0 %v8539_v2, %s13124_s6  ;;  %8907 = vrot.lane.b32.xlu1 %v8540_v3, %s13124_s6  ;;  %v9212_v2 = vld [vmem:[#allocation4 + $0xd9] sm:$0xff]  ;;  %v9213_v3 = vld [vmem:[#allocation4 + $0xe1] sm:$0xff] }
 0x67f   : > { %v8794_v38 = vpop.permute.xlu0 %8793  ;;  %v8796_v6 = vpop.permute.xlu1 %8795 }
 0x680   : > { %9124 = vst.msk [vmem:[#allocation5 + $0x1b0] sm:$0xff] %vm9069_vm9, %v8794_v38  ;;  %9125 = vst.msk [vmem:[#allocation5 + $0x1b8] sm:$0xff] %vm9069_vm9, %v8796_v6 }
 0x681   : > { %8909 = vrot.lane.b32.xlu0 %v8541_v30, %s13124_s6  ;;  %8911 = vrot.lane.b32.xlu1 %v8542_v45, %s13124_s6  ;;  %v9214_v30 = vld [vmem:[#allocation4 + $0xf1] sm:$0xff]  ;;  %v9215_v45 = vld [vmem:[#allocation4 + $0xf9] sm:$0xff] }
 0x683   : > { %v8798_v37 = vpop.permute.xlu0 %8797  ;;  %v8800_v33 = vpop.permute.xlu1 %8799 }
 0x684   : > { %9126 = vst.msk [vmem:[#allocation5 + $0x1c0] sm:$0xff] %vm9069_vm9, %v8798_v37  ;;  %9127 = vst.msk [vmem:[#allocation5 + $0x1c8] sm:$0xff] %vm9069_vm9, %v8800_v33 }
 0x685   : > { %8913 = vrot.lane.b32.xlu0 %v8543_v32, %s13124_s6  ;;  %8915 = vrot.lane.b32.xlu1 %v8544_v23, %s13124_s6  ;;  %v9216_v32 = vld [vmem:[#allocation4 + $0x101] sm:$0xff]  ;;  %v9217_v23 = vld [vmem:[#allocation4 + $0x109] sm:$0xff] }
 0x687   : > { %v8802_v7 = vpop.permute.xlu0 %8801  ;;  %v8804_v9 = vpop.permute.xlu1 %8803 }
 0x688   : > { %9128 = vst.msk [vmem:[#allocation5 + $0x1d0] sm:$0xff] %vm9069_vm9, %v8802_v7  ;;  %9129 = vst.msk [vmem:[#allocation5 + $0x1d8] sm:$0xff] %vm9069_vm9, %v8804_v9 }
 0x689   : > { %8917 = vrot.lane.b32.xlu0 %v8545_v48, %s13124_s6  ;;  %8919 = vrot.lane.b32.xlu1 %v8546_v8, %s13124_s6  ;;  %v9218_v48 = vld [vmem:[#allocation4 + $0x119] sm:$0xff]  ;;  %v9219_v8 = vld [vmem:[#allocation4 + $0x121] sm:$0xff] }
 0x68b   : > { %v8806_v36 = vpop.permute.xlu0 %8805  ;;  %v8808_v4 = vpop.permute.xlu1 %8807 }
 0x68c   : > { %9130 = vst.msk [vmem:[#allocation5 + $0x1e0] sm:$0xff] %vm9069_vm9, %v8806_v36  ;;  %9131 = vst.msk [vmem:[#allocation5 + $0x1e8] sm:$0xff] %vm9069_vm9, %v8808_v4 }
 0x68d   : > { %8921 = vrot.lane.b32.xlu0 %v8547_v10, %s13124_s6  ;;  %8923 = vrot.lane.b32.xlu1 %v8548_v35, %s13124_s6  ;;  %v9220_v10 = vld [vmem:[#allocation4 + $0x129] sm:$0xff]  ;;  %v9221_v35 = vld [vmem:[#allocation4 + $0x131] sm:$0xff] }
 0x68f   : > { %v8810_v12 = vpop.permute.xlu0 %8809  ;;  %v8812_v46 = vpop.permute.xlu1 %8811 }
 0x690   : > { %9132 = vst.msk [vmem:[#allocation5 + $0x1f0] sm:$0xff] %vm9069_vm9, %v8810_v12  ;;  %9133 = vst.msk [vmem:[#allocation5 + $0x1f8] sm:$0xff] %vm9069_vm9, %v8812_v46 }
 0x691   : > { %8925 = vrot.lane.b32.xlu0 %v8549_v11, %s13124_s6  ;;  %8927 = vrot.lane.b32.xlu1 %v8550_v13, %s13124_s6  ;;  %v9222_v11 = vld [vmem:[#allocation4 + $0x141] sm:$0xff]  ;;  %v9223_v13 = vld [vmem:[#allocation4 + $0x149] sm:$0xff] }
 0x693   : > { %v8814_v22 = vpop.permute.xlu0 %8813  ;;  %v8816_v27 = vpop.permute.xlu1 %8815 }
 0x694   : > { %9134 = vst.msk [vmem:[#allocation5 + $0x200] sm:$0xff] %vm9069_vm9, %v8814_v22  ;;  %9135 = vst.msk [vmem:[#allocation5 + $0x208] sm:$0xff] %vm9069_vm9, %v8816_v27 }
 0x695   : > { %8929 = vrot.lane.b32.xlu0 %v8551_v14, %s13124_s6  ;;  %8931 = vrot.lane.b32.xlu1 %v8552_v39, %s13124_s6  ;;  %v9224_v14 = vld [vmem:[#allocation4 + $0x151] sm:$0xff]  ;;  %v9225_v39 = vld [vmem:[#allocation4 + $0x159] sm:$0xff] }
 0x697   : > { %v8818_v17 = vpop.permute.xlu0 %8817  ;;  %v8820_v19 = vpop.permute.xlu1 %8819 }
 0x698   : > { %9136 = vst.msk [vmem:[#allocation5 + $0x210] sm:$0xff] %vm9069_vm9, %v8818_v17  ;;  %9137 = vst.msk [vmem:[#allocation5 + $0x218] sm:$0xff] %vm9069_vm9, %v8820_v19 }
 0x699   : > { %8933 = vrot.lane.b32.xlu0 %v8553_v15, %s13124_s6  ;;  %8935 = vrot.lane.b32.xlu1 %v8554_v18, %s13124_s6  ;;  %v9226_v15 = vld [vmem:[#allocation4 + $0x169] sm:$0xff]  ;;  %v9227_v18 = vld [vmem:[#allocation4 + $0x171] sm:$0xff] }
 0x69b   : > { %v8822_v24 = vpop.permute.xlu0 %8821  ;;  %v8824_v41 = vpop.permute.xlu1 %8823 }
 0x69c   : > { %9138 = vst.msk [vmem:[#allocation5 + $0x220] sm:$0xff] %vm9069_vm9, %v8822_v24  ;;  %9139 = vst.msk [vmem:[#allocation5 + $0x228] sm:$0xff] %vm9069_vm9, %v8824_v41 }
 0x69d   : > { %8937 = vrot.lane.b32.xlu0 %v8555_v20, %s13124_s6  ;;  %8939 = vrot.lane.b32.xlu1 %v8556_v40, %s13124_s6  ;;  %v9228_v20 = vld [vmem:[#allocation4 + $0x179] sm:$0xff]  ;;  %v9229_v40 = vld [vmem:[#allocation4 + $0x181] sm:$0xff]  ;;  %s13126_s6 = smov 32  }
 0x69f   : > { %v8826_v26 = vpop.permute.xlu0 %8825  ;;  %v8828_v44 = vpop.permute.xlu1 %8827 }
 0x6a0   : > { %9140 = vst.msk [vmem:[#allocation5 + $0x230] sm:$0xff] %vm9069_vm9, %v8826_v26  ;;  %9141 = vst.msk [vmem:[#allocation5 + $0x238] sm:$0xff] %vm9069_vm9, %v8828_v44 }
 0x6a1   : > { %9454 = vrot.lane.b32.xlu0 %v9198_v21, %s13125_s7  ;;  %9456 = vrot.lane.b32.xlu1 %v9199_v42, %s13125_s7  ;;  %v9230_v21 = vld [vmem:[#allocation4 + $0x191] sm:$0xff]  ;;  %v9231_v42 = vld [vmem:[#allocation4 + $0x199] sm:$0xff] }
 0x6a3   : > { %v8830_v50 = vpop.permute.xlu0 %8829  ;;  %v8832_v52 = vpop.permute.xlu1 %8831 }
 0x6a4   : > { %9142 = vst.msk [vmem:[#allocation5 + $0x240] sm:$0xff] %vm9069_vm9, %v8830_v50  ;;  %9143 = vst.msk [vmem:[#allocation5 + $0x248] sm:$0xff] %vm9069_vm9, %v8832_v52 }
 0x6a5   : > { %9458 = vrot.lane.b32.xlu0 %v9200_v49, %s13125_s7  ;;  %9460 = vrot.lane.b32.xlu1 %v9201_v51, %s13125_s7  ;;  %v9232_v49 = vld [vmem:[#allocation4 + $0x1a1] sm:$0xff]  ;;  %v9233_v51 = vld [vmem:[#allocation4 + $0x1a9] sm:$0xff] }
 0x6a7   : > { %v8834_v53 = vpop.permute.xlu0 %8833  ;;  %v8836_v43 = vpop.permute.xlu1 %8835 }
 0x6a8   : > { %9144 = vst.msk [vmem:[#allocation5 + $0x250] sm:$0xff] %vm9069_vm9, %v8834_v53  ;;  %9145 = vst.msk [vmem:[#allocation5 + $0x258] sm:$0xff] %vm9069_vm9, %v8836_v43 }
 0x6a9   : > { %9462 = vrot.lane.b32.xlu0 %v9202_v47, %s13125_s7  ;;  %9464 = vrot.lane.b32.xlu1 %v9203_v16, %s13125_s7  ;;  %v9234_v47 = vld [vmem:[#allocation4 + $0x1b9] sm:$0xff]  ;;  %v9235_v16 = vld [vmem:[#allocation4 + $0x1c1] sm:$0xff] }
 0x6ab   : > { %v8838_v28 = vpop.permute.xlu0 %8837  ;;  %v8840_v54 = vpop.permute.xlu1 %8839 }
 0x6ac   : > { %9146 = vst.msk [vmem:[#allocation5 + $0x260] sm:$0xff] %vm9069_vm9, %v8838_v28  ;;  %9147 = vst.msk [vmem:[#allocation5 + $0x268] sm:$0xff] %vm9069_vm9, %v8840_v54 }
 0x6ad   : > { %9466 = vrot.lane.b32.xlu0 %v9204_v25, %s13125_s7  ;;  %9468 = vrot.lane.b32.xlu1 %v9205_v34, %s13125_s7  ;;  %v9236_v25 = vld [vmem:[#allocation4 + $0x1c9] sm:$0xff]  ;;  %v9237_v34 = vld [vmem:[#allocation4 + $0x1d1] sm:$0xff] }
 0x6af   : > { %v8842_v58 = vpop.permute.xlu0 %8841  ;;  %v8844_v31 = vpop.permute.xlu1 %8843 }
 0x6b0   : > { %9148 = vst.msk [vmem:[#allocation5 + $0x270] sm:$0xff] %vm9069_vm9, %v8842_v58  ;;  %9149 = vst.msk [vmem:[#allocation5 + $0x278] sm:$0xff] %vm9069_vm9, %v8844_v31 }
 0x6b1   : > { %9470 = vrot.lane.b32.xlu0 %v9206_v57, %s13125_s7  ;;  %9472 = vrot.lane.b32.xlu1 %v9207_v59, %s13125_s7  ;;  %v9238_v57 = vld [vmem:[#allocation4 + $0x1e1] sm:$0xff]  ;;  %v9239_v59 = vld [vmem:[#allocation4 + $0x1e9] sm:$0xff] }
 0x6b3   : > { %v8846_v61 = vpop.permute.xlu0 %8845  ;;  %v8848_v62 = vpop.permute.xlu1 %8847 }
 0x6b4   : > { %9150 = vst.msk [vmem:[#allocation5 + $0x280] sm:$0xff] %vm9069_vm9, %v8846_v61  ;;  %9151 = vst.msk [vmem:[#allocation5 + $0x288] sm:$0xff] %vm9069_vm9, %v8848_v62 }
 0x6b5   : > { %9474 = vrot.lane.b32.xlu0 %v9208_v60, %s13125_s7  ;;  %9476 = vrot.lane.b32.xlu1 %v9209_v29, %s13125_s7  ;;  %v9240_v60 = vld [vmem:[#allocation4 + $0x1f1] sm:$0xff]  ;;  %v9241_v29 = vld [vmem:[#allocation4 + $0x1f9] sm:$0xff] }
 0x6b7   : > { %v8850_v55 = vpop.permute.xlu0 %8849  ;;  %v8852_v1 = vpop.permute.xlu1 %8851 }
 0x6b8   : > { %9152 = vst.msk [vmem:[#allocation5 + $0x290] sm:$0xff] %vm9069_vm9, %v8850_v55  ;;  %9153 = vst.msk [vmem:[#allocation5 + $0x298] sm:$0xff] %vm9069_vm9, %v8852_v1 }
 0x6b9   : > { %9478 = vrot.lane.b32.xlu0 %v9210_v63, %s13125_s7  ;;  %9480 = vrot.lane.b32.xlu1 %v9211_v0, %s13125_s7  ;;  %v9242_v63 = vld [vmem:[#allocation4 + $0x209] sm:$0xff]  ;;  %v9243_v0 = vld [vmem:[#allocation4 + $0x211] sm:$0xff] }
 0x6bb   : > { %v8854_v56 = vpop.permute.xlu0 %8853  ;;  %v8856_v5 = vpop.permute.xlu1 %8855 }
 0x6bc   : > { %9154 = vst.msk [vmem:[#allocation5 + $0x2a0] sm:$0xff] %vm9069_vm9, %v8854_v56  ;;  %9155 = vst.msk [vmem:[#allocation5 + $0x2a8] sm:$0xff] %vm9069_vm9, %v8856_v5 }
 0x6bd   : > { %9482 = vrot.lane.b32.xlu0 %v9212_v2, %s13125_s7  ;;  %9484 = vrot.lane.b32.xlu1 %v9213_v3, %s13125_s7  ;;  %v9244_v2 = vld [vmem:[#allocation4 + $0x219] sm:$0xff]  ;;  %v9245_v3 = vld [vmem:[#allocation4 + $0x221] sm:$0xff] }
 0x6bf   : > { %v8858_v38 = vpop.permute.xlu0 %8857  ;;  %v8860_v6 = vpop.permute.xlu1 %8859 }
 0x6c0   : > { %9156 = vst.msk [vmem:[#allocation5 + $0x2b0] sm:$0xff] %vm9069_vm9, %v8858_v38  ;;  %9157 = vst.msk [vmem:[#allocation5 + $0x2b8] sm:$0xff] %vm9069_vm9, %v8860_v6 }
 0x6c1   : > { %9486 = vrot.lane.b32.xlu0 %v9214_v30, %s13125_s7  ;;  %9488 = vrot.lane.b32.xlu1 %v9215_v45, %s13125_s7  ;;  %v9246_v30 = vld [vmem:[#allocation4 + $0x231] sm:$0xff]  ;;  %v9247_v45 = vld [vmem:[#allocation4 + $0x239] sm:$0xff] }
 0x6c3   : > { %v8862_v37 = vpop.permute.xlu0 %8861  ;;  %v8864_v33 = vpop.permute.xlu1 %8863 }
 0x6c4   : > { %9158 = vst.msk [vmem:[#allocation5 + $0x2c0] sm:$0xff] %vm9069_vm9, %v8862_v37  ;;  %9159 = vst.msk [vmem:[#allocation5 + $0x2c8] sm:$0xff] %vm9069_vm9, %v8864_v33 }
 0x6c5   : > { %9490 = vrot.lane.b32.xlu0 %v9216_v32, %s13125_s7  ;;  %9492 = vrot.lane.b32.xlu1 %v9217_v23, %s13125_s7  ;;  %v9248_v32 = vld [vmem:[#allocation4 + $0x241] sm:$0xff]  ;;  %v9249_v23 = vld [vmem:[#allocation4 + $0x249] sm:$0xff] }
 0x6c7   : > { %v8866_v7 = vpop.permute.xlu0 %8865  ;;  %v8868_v9 = vpop.permute.xlu1 %8867 }
 0x6c8   : > { %9160 = vst.msk [vmem:[#allocation5 + $0x2d0] sm:$0xff] %vm9069_vm9, %v8866_v7  ;;  %9161 = vst.msk [vmem:[#allocation5 + $0x2d8] sm:$0xff] %vm9069_vm9, %v8868_v9 }
 0x6c9   : > { %9494 = vrot.lane.b32.xlu0 %v9218_v48, %s13125_s7  ;;  %9496 = vrot.lane.b32.xlu1 %v9219_v8, %s13125_s7  ;;  %v9250_v48 = vld [vmem:[#allocation4 + $0x259] sm:$0xff]  ;;  %v9251_v8 = vld [vmem:[#allocation4 + $0x261] sm:$0xff] }
 0x6cb   : > { %v8870_v36 = vpop.permute.xlu0 %8869  ;;  %v8872_v4 = vpop.permute.xlu1 %8871 }
 0x6cc   : > { %9162 = vst.msk [vmem:[#allocation5 + $0x2e0] sm:$0xff] %vm9069_vm9, %v8870_v36  ;;  %9163 = vst.msk [vmem:[#allocation5 + $0x2e8] sm:$0xff] %vm9069_vm9, %v8872_v4 }
 0x6cd   : > { %9498 = vrot.lane.b32.xlu0 %v9220_v10, %s13125_s7  ;;  %9500 = vrot.lane.b32.xlu1 %v9221_v35, %s13125_s7  ;;  %v9252_v10 = vld [vmem:[#allocation4 + $0x269] sm:$0xff]  ;;  %v9253_v35 = vld [vmem:[#allocation4 + $0x271] sm:$0xff] }
 0x6cf   : > { %v8874_v12 = vpop.permute.xlu0 %8873  ;;  %v8876_v46 = vpop.permute.xlu1 %8875 }
 0x6d0   : > { %9164 = vst.msk [vmem:[#allocation5 + $0x2f0] sm:$0xff] %vm9069_vm9, %v8874_v12  ;;  %9165 = vst.msk [vmem:[#allocation5 + $0x2f8] sm:$0xff] %vm9069_vm9, %v8876_v46 }
 0x6d1   : > { %9502 = vrot.lane.b32.xlu0 %v9222_v11, %s13125_s7  ;;  %9504 = vrot.lane.b32.xlu1 %v9223_v13, %s13125_s7  ;;  %v9254_v11 = vld [vmem:[#allocation4 + $0x281] sm:$0xff]  ;;  %v9255_v13 = vld [vmem:[#allocation4 + $0x289] sm:$0xff] }
 0x6d3   : > { %v8878_v22 = vpop.permute.xlu0 %8877  ;;  %v8880_v27 = vpop.permute.xlu1 %8879 }
 0x6d4   : > { %9166 = vst.msk [vmem:[#allocation5 + $0x300] sm:$0xff] %vm9069_vm9, %v8878_v22  ;;  %9167 = vst.msk [vmem:[#allocation5 + $0x308] sm:$0xff] %vm9069_vm9, %v8880_v27 }
 0x6d5   : > { %9506 = vrot.lane.b32.xlu0 %v9224_v14, %s13125_s7  ;;  %9508 = vrot.lane.b32.xlu1 %v9225_v39, %s13125_s7  ;;  %v9256_v14 = vld [vmem:[#allocation4 + $0x291] sm:$0xff]  ;;  %v9257_v39 = vld [vmem:[#allocation4 + $0x299] sm:$0xff] }
 0x6d7   : > { %v8882_v17 = vpop.permute.xlu0 %8881  ;;  %v8884_v19 = vpop.permute.xlu1 %8883 }
 0x6d8   : > { %9168 = vst.msk [vmem:[#allocation5 + $0x310] sm:$0xff] %vm9069_vm9, %v8882_v17  ;;  %9169 = vst.msk [vmem:[#allocation5 + $0x318] sm:$0xff] %vm9069_vm9, %v8884_v19 }
 0x6d9   : > { %9510 = vrot.lane.b32.xlu0 %v9226_v15, %s13125_s7  ;;  %9512 = vrot.lane.b32.xlu1 %v9227_v18, %s13125_s7  ;;  %v9258_v15 = vld [vmem:[#allocation4 + $0x2a9] sm:$0xff]  ;;  %v9259_v18 = vld [vmem:[#allocation4 + $0x2b1] sm:$0xff] }
 0x6db   : > { %v8886_v24 = vpop.permute.xlu0 %8885  ;;  %v8888_v41 = vpop.permute.xlu1 %8887 }
 0x6dc   : > { %9170 = vst.msk [vmem:[#allocation5 + $0x320] sm:$0xff] %vm9069_vm9, %v8886_v24  ;;  %9171 = vst.msk [vmem:[#allocation5 + $0x328] sm:$0xff] %vm9069_vm9, %v8888_v41 }
 0x6dd   : > { %9514 = vrot.lane.b32.xlu0 %v9228_v20, %s13125_s7  ;;  %9516 = vrot.lane.b32.xlu1 %v9229_v40, %s13125_s7  ;;  %v9260_v20 = vld [vmem:[#allocation4 + $0x2b9] sm:$0xff]  ;;  %v9261_v40 = vld [vmem:[#allocation4 + $0x2c1] sm:$0xff] }
 0x6df   : > { %v8890_v26 = vpop.permute.xlu0 %8889  ;;  %v8892_v44 = vpop.permute.xlu1 %8891 }
 0x6e0   : > { %9172 = vst.msk [vmem:[#allocation5 + $0x330] sm:$0xff] %vm9069_vm9, %v8890_v26  ;;  %9173 = vst.msk [vmem:[#allocation5 + $0x338] sm:$0xff] %vm9069_vm9, %v8892_v44 }
 0x6e1   : > { %9518 = vrot.lane.b32.xlu0 %v9230_v21, %s13125_s7  ;;  %9520 = vrot.lane.b32.xlu1 %v9231_v42, %s13125_s7  ;;  %v9262_v21 = vld [vmem:[#allocation4 + $0x2d1] sm:$0xff]  ;;  %v9263_v42 = vld [vmem:[#allocation4 + $0x2d9] sm:$0xff] }
 0x6e3   : > { %v8894_v50 = vpop.permute.xlu0 %8893  ;;  %v8896_v52 = vpop.permute.xlu1 %8895 }
 0x6e4   : > { %9174 = vst.msk [vmem:[#allocation5 + $0x340] sm:$0xff] %vm9069_vm9, %v8894_v50  ;;  %9175 = vst.msk [vmem:[#allocation5 + $0x348] sm:$0xff] %vm9069_vm9, %v8896_v52 }
 0x6e5   : > { %9522 = vrot.lane.b32.xlu0 %v9232_v49, %s13125_s7  ;;  %9524 = vrot.lane.b32.xlu1 %v9233_v51, %s13125_s7  ;;  %v9264_v49 = vld [vmem:[#allocation4 + $0x2e1] sm:$0xff]  ;;  %v9265_v51 = vld [vmem:[#allocation4 + $0x2e9] sm:$0xff] }
 0x6e7   : > { %v8898_v53 = vpop.permute.xlu0 %8897  ;;  %v8900_v43 = vpop.permute.xlu1 %8899 }
 0x6e8   : > { %9176 = vst.msk [vmem:[#allocation5 + $0x350] sm:$0xff] %vm9069_vm9, %v8898_v53  ;;  %9177 = vst.msk [vmem:[#allocation5 + $0x358] sm:$0xff] %vm9069_vm9, %v8900_v43 }
 0x6e9   : > { %9526 = vrot.lane.b32.xlu0 %v9234_v47, %s13125_s7  ;;  %9528 = vrot.lane.b32.xlu1 %v9235_v16, %s13125_s7  ;;  %v9266_v47 = vld [vmem:[#allocation4 + $0x2f9] sm:$0xff]  ;;  %v9267_v16 = vld [vmem:[#allocation4 + $0x301] sm:$0xff] }
 0x6eb   : > { %v8902_v28 = vpop.permute.xlu0 %8901  ;;  %v8904_v54 = vpop.permute.xlu1 %8903 }
 0x6ec   : > { %9178 = vst.msk [vmem:[#allocation5 + $0x360] sm:$0xff] %vm9069_vm9, %v8902_v28  ;;  %9179 = vst.msk [vmem:[#allocation5 + $0x368] sm:$0xff] %vm9069_vm9, %v8904_v54 }
 0x6ed   : > { %9530 = vrot.lane.b32.xlu0 %v9236_v25, %s13125_s7  ;;  %9532 = vrot.lane.b32.xlu1 %v9237_v34, %s13125_s7  ;;  %v9268_v25 = vld [vmem:[#allocation4 + $0x309] sm:$0xff]  ;;  %v9269_v34 = vld [vmem:[#allocation4 + $0x311] sm:$0xff] }
 0x6ef   : > { %v8906_v58 = vpop.permute.xlu0 %8905  ;;  %v8908_v31 = vpop.permute.xlu1 %8907 }
 0x6f0   : > { %9180 = vst.msk [vmem:[#allocation5 + $0x370] sm:$0xff] %vm9069_vm9, %v8906_v58  ;;  %9181 = vst.msk [vmem:[#allocation5 + $0x378] sm:$0xff] %vm9069_vm9, %v8908_v31 }
 0x6f1   : > { %9534 = vrot.lane.b32.xlu0 %v9238_v57, %s13125_s7  ;;  %9536 = vrot.lane.b32.xlu1 %v9239_v59, %s13125_s7  ;;  %v9270_v57 = vld [vmem:[#allocation4 + $0x321] sm:$0xff]  ;;  %v9271_v59 = vld [vmem:[#allocation4 + $0x329] sm:$0xff] }
 0x6f3   : > { %v8910_v61 = vpop.permute.xlu0 %8909  ;;  %v8912_v62 = vpop.permute.xlu1 %8911 }
 0x6f4   : > { %9182 = vst.msk [vmem:[#allocation5 + $0x380] sm:$0xff] %vm9069_vm9, %v8910_v61  ;;  %9183 = vst.msk [vmem:[#allocation5 + $0x388] sm:$0xff] %vm9069_vm9, %v8912_v62 }
 0x6f5   : > { %9538 = vrot.lane.b32.xlu0 %v9240_v60, %s13125_s7  ;;  %9540 = vrot.lane.b32.xlu1 %v9241_v29, %s13125_s7  ;;  %v9272_v60 = vld [vmem:[#allocation4 + $0x331] sm:$0xff]  ;;  %v9273_v29 = vld [vmem:[#allocation4 + $0x339] sm:$0xff] }
 0x6f7   : > { %v8914_v55 = vpop.permute.xlu0 %8913  ;;  %v8916_v1 = vpop.permute.xlu1 %8915 }
 0x6f8   : > { %9184 = vst.msk [vmem:[#allocation5 + $0x390] sm:$0xff] %vm9069_vm9, %v8914_v55  ;;  %9185 = vst.msk [vmem:[#allocation5 + $0x398] sm:$0xff] %vm9069_vm9, %v8916_v1 }
 0x6f9   : > { %9542 = vrot.lane.b32.xlu0 %v9242_v63, %s13125_s7  ;;  %9544 = vrot.lane.b32.xlu1 %v9243_v0, %s13125_s7  ;;  %v9274_v63 = vld [vmem:[#allocation4 + $0x349] sm:$0xff]  ;;  %v9275_v0 = vld [vmem:[#allocation4 + $0x351] sm:$0xff] }
 0x6fb   : > { %v8918_v56 = vpop.permute.xlu0 %8917  ;;  %v8920_v5 = vpop.permute.xlu1 %8919 }
 0x6fc   : > { %9186 = vst.msk [vmem:[#allocation5 + $0x3a0] sm:$0xff] %vm9069_vm9, %v8918_v56  ;;  %9187 = vst.msk [vmem:[#allocation5 + $0x3a8] sm:$0xff] %vm9069_vm9, %v8920_v5 }
 0x6fd   : > { %9546 = vrot.lane.b32.xlu0 %v9244_v2, %s13125_s7  ;;  %9548 = vrot.lane.b32.xlu1 %v9245_v3, %s13125_s7  ;;  %v9276_v2 = vld [vmem:[#allocation4 + $0x359] sm:$0xff]  ;;  %v9277_v3 = vld [vmem:[#allocation4 + $0x361] sm:$0xff] }
 0x6ff   : > { %v8922_v38 = vpop.permute.xlu0 %8921  ;;  %v8924_v6 = vpop.permute.xlu1 %8923 }
 0x700   : > { %9188 = vst.msk [vmem:[#allocation5 + $0x3b0] sm:$0xff] %vm9069_vm9, %v8922_v38  ;;  %9189 = vst.msk [vmem:[#allocation5 + $0x3b8] sm:$0xff] %vm9069_vm9, %v8924_v6 }
 0x701   : > { %9550 = vrot.lane.b32.xlu0 %v9246_v30, %s13125_s7  ;;  %9552 = vrot.lane.b32.xlu1 %v9247_v45, %s13125_s7  ;;  %v9278_v30 = vld [vmem:[#allocation4 + $0x371] sm:$0xff]  ;;  %v9279_v45 = vld [vmem:[#allocation4 + $0x379] sm:$0xff] }
 0x703   : > { %v8926_v37 = vpop.permute.xlu0 %8925  ;;  %v8928_v33 = vpop.permute.xlu1 %8927 }
 0x704   : > { %9190 = vst.msk [vmem:[#allocation5 + $0x3c0] sm:$0xff] %vm9069_vm9, %v8926_v37  ;;  %9191 = vst.msk [vmem:[#allocation5 + $0x3c8] sm:$0xff] %vm9069_vm9, %v8928_v33 }
 0x705   : > { %9554 = vrot.lane.b32.xlu0 %v9248_v32, %s13125_s7  ;;  %9556 = vrot.lane.b32.xlu1 %v9249_v23, %s13125_s7  ;;  %v9280_v32 = vld [vmem:[#allocation4 + $0x381] sm:$0xff]  ;;  %v9281_v23 = vld [vmem:[#allocation4 + $0x389] sm:$0xff] }
 0x707   : > { %v8930_v7 = vpop.permute.xlu0 %8929  ;;  %v8932_v9 = vpop.permute.xlu1 %8931 }
 0x708   : > { %9192 = vst.msk [vmem:[#allocation5 + $0x3d0] sm:$0xff] %vm9069_vm9, %v8930_v7  ;;  %9193 = vst.msk [vmem:[#allocation5 + $0x3d8] sm:$0xff] %vm9069_vm9, %v8932_v9 }
 0x709   : > { %9558 = vrot.lane.b32.xlu0 %v9250_v48, %s13125_s7  ;;  %9560 = vrot.lane.b32.xlu1 %v9251_v8, %s13125_s7  ;;  %v9282_v48 = vld [vmem:[#allocation4 + $0x399] sm:$0xff]  ;;  %v9283_v8 = vld [vmem:[#allocation4 + $0x3a1] sm:$0xff] }
 0x70b   : > { %v8934_v36 = vpop.permute.xlu0 %8933  ;;  %v8936_v4 = vpop.permute.xlu1 %8935 }
 0x70c   : > { %9194 = vst.msk [vmem:[#allocation5 + $0x3e0] sm:$0xff] %vm9069_vm9, %v8934_v36  ;;  %9195 = vst.msk [vmem:[#allocation5 + $0x3e8] sm:$0xff] %vm9069_vm9, %v8936_v4 }
 0x70d   : > { %9562 = vrot.lane.b32.xlu0 %v9252_v10, %s13125_s7  ;;  %9564 = vrot.lane.b32.xlu1 %v9253_v35, %s13125_s7  ;;  %v9284_v10 = vld [vmem:[#allocation4 + $0x3a9] sm:$0xff]  ;;  %v9285_v35 = vld [vmem:[#allocation4 + $0x3b1] sm:$0xff] }
 0x70f   : > { %v8938_v12 = vpop.permute.xlu0 %8937  ;;  %v8940_v46 = vpop.permute.xlu1 %8939 }
 0x710   : > { %9196 = vst.msk [vmem:[#allocation5 + $0x3f0] sm:$0xff] %vm9069_vm9, %v8938_v12  ;;  %9197 = vst.msk [vmem:[#allocation5 + $0x3f8] sm:$0xff] %vm9069_vm9, %v8940_v46 }
 0x711   : > { %9566 = vrot.lane.b32.xlu0 %v9254_v11, %s13125_s7  ;;  %9568 = vrot.lane.b32.xlu1 %v9255_v13, %s13125_s7  ;;  %v9286_v11 = vld [vmem:[#allocation4 + $0x3c1] sm:$0xff]  ;;  %v9287_v13 = vld [vmem:[#allocation4 + $0x3c9] sm:$0xff] }
 0x713   : > { %v9455_v22 = vpop.permute.xlu0 %9454  ;;  %v9457_v27 = vpop.permute.xlu1 %9456 }
 0x714   : > { %9839 = vst.msk [vmem:[#allocation5] sm:$0xff] %vm9838_vm10, %v9455_v22  ;;  %9840 = vst.msk [vmem:[#allocation5 + $0x8] sm:$0xff] %vm9838_vm10, %v9457_v27 }
 0x715   : > { %9570 = vrot.lane.b32.xlu0 %v9256_v14, %s13125_s7  ;;  %9572 = vrot.lane.b32.xlu1 %v9257_v39, %s13125_s7  ;;  %v9288_v14 = vld [vmem:[#allocation4 + $0x3d1] sm:$0xff]  ;;  %v9289_v39 = vld [vmem:[#allocation4 + $0x3d9] sm:$0xff] }
 0x717   : > { %v9459_v17 = vpop.permute.xlu0 %9458  ;;  %v9461_v19 = vpop.permute.xlu1 %9460 }
 0x718   : > { %9841 = vst.msk [vmem:[#allocation5 + $0x10] sm:$0xff] %vm9838_vm10, %v9459_v17  ;;  %9842 = vst.msk [vmem:[#allocation5 + $0x18] sm:$0xff] %vm9838_vm10, %v9461_v19 }
 0x719   : > { %9574 = vrot.lane.b32.xlu0 %v9258_v15, %s13125_s7  ;;  %9576 = vrot.lane.b32.xlu1 %v9259_v18, %s13125_s7  ;;  %v9290_v15 = vld [vmem:[#allocation4 + $0x3e9] sm:$0xff]  ;;  %v9291_v18 = vld [vmem:[#allocation4 + $0x3f1] sm:$0xff] }
 0x71b   : > { %v9463_v24 = vpop.permute.xlu0 %9462  ;;  %v9465_v41 = vpop.permute.xlu1 %9464 }
 0x71c   : > { %9843 = vst.msk [vmem:[#allocation5 + $0x20] sm:$0xff] %vm9838_vm10, %v9463_v24  ;;  %9844 = vst.msk [vmem:[#allocation5 + $0x28] sm:$0xff] %vm9838_vm10, %v9465_v41 }
 0x71d   : > { %9578 = vrot.lane.b32.xlu0 %v9260_v20, %s13125_s7  ;;  %9580 = vrot.lane.b32.xlu1 %v9261_v40, %s13125_s7  ;;  %v9292_v20 = vld [vmem:[#allocation4 + $0x3f9] sm:$0xff]  ;;  %v9293_v40 = vld [vmem:[#allocation4 + $0x401] sm:$0xff] }
 0x71f   : > { %v9467_v26 = vpop.permute.xlu0 %9466  ;;  %v9469_v44 = vpop.permute.xlu1 %9468 }
 0x720   : > { %9845 = vst.msk [vmem:[#allocation5 + $0x30] sm:$0xff] %vm9838_vm10, %v9467_v26  ;;  %9846 = vst.msk [vmem:[#allocation5 + $0x38] sm:$0xff] %vm9838_vm10, %v9469_v44 }
 0x721   : > { %9582 = vrot.lane.b32.xlu0 %v9262_v21, %s13125_s7  ;;  %9584 = vrot.lane.b32.xlu1 %v9263_v42, %s13125_s7  ;;  %v9294_v21 = vld [vmem:[#allocation4 + $0x411] sm:$0xff]  ;;  %v9295_v42 = vld [vmem:[#allocation4 + $0x419] sm:$0xff] }
 0x723   : > { %v9471_v50 = vpop.permute.xlu0 %9470  ;;  %v9473_v52 = vpop.permute.xlu1 %9472 }
 0x724   : > { %9847 = vst.msk [vmem:[#allocation5 + $0x40] sm:$0xff] %vm9838_vm10, %v9471_v50  ;;  %9848 = vst.msk [vmem:[#allocation5 + $0x48] sm:$0xff] %vm9838_vm10, %v9473_v52 }
 0x725   : > { %9586 = vrot.lane.b32.xlu0 %v9264_v49, %s13125_s7  ;;  %9588 = vrot.lane.b32.xlu1 %v9265_v51, %s13125_s7  ;;  %v9296_v49 = vld [vmem:[#allocation4 + $0x421] sm:$0xff]  ;;  %v9297_v51 = vld [vmem:[#allocation4 + $0x429] sm:$0xff] }
 0x727   : > { %v9475_v53 = vpop.permute.xlu0 %9474  ;;  %v9477_v43 = vpop.permute.xlu1 %9476 }
 0x728   : > { %9849 = vst.msk [vmem:[#allocation5 + $0x50] sm:$0xff] %vm9838_vm10, %v9475_v53  ;;  %9850 = vst.msk [vmem:[#allocation5 + $0x58] sm:$0xff] %vm9838_vm10, %v9477_v43 }
 0x729   : > { %9590 = vrot.lane.b32.xlu0 %v9266_v47, %s13125_s7  ;;  %9592 = vrot.lane.b32.xlu1 %v9267_v16, %s13125_s7  ;;  %v9298_v47 = vld [vmem:[#allocation4 + $0x439] sm:$0xff]  ;;  %v9299_v16 = vld [vmem:[#allocation4 + $0x441] sm:$0xff] }
 0x72b   : > { %v9479_v28 = vpop.permute.xlu0 %9478  ;;  %v9481_v54 = vpop.permute.xlu1 %9480 }
 0x72c   : > { %9851 = vst.msk [vmem:[#allocation5 + $0x60] sm:$0xff] %vm9838_vm10, %v9479_v28  ;;  %9852 = vst.msk [vmem:[#allocation5 + $0x68] sm:$0xff] %vm9838_vm10, %v9481_v54 }
 0x72d   : > { %9594 = vrot.lane.b32.xlu0 %v9268_v25, %s13125_s7  ;;  %9596 = vrot.lane.b32.xlu1 %v9269_v34, %s13125_s7  ;;  %v9300_v25 = vld [vmem:[#allocation4 + $0x449] sm:$0xff]  ;;  %v9301_v34 = vld [vmem:[#allocation4 + $0x451] sm:$0xff] }
 0x72f   : > { %v9483_v58 = vpop.permute.xlu0 %9482  ;;  %v9485_v31 = vpop.permute.xlu1 %9484 }
 0x730   : > { %9853 = vst.msk [vmem:[#allocation5 + $0x70] sm:$0xff] %vm9838_vm10, %v9483_v58  ;;  %9854 = vst.msk [vmem:[#allocation5 + $0x78] sm:$0xff] %vm9838_vm10, %v9485_v31 }
 0x731   : > { %9598 = vrot.lane.b32.xlu0 %v9270_v57, %s13125_s7  ;;  %9600 = vrot.lane.b32.xlu1 %v9271_v59, %s13125_s7  ;;  %v9302_v57 = vld [vmem:[#allocation4 + $0x461] sm:$0xff]  ;;  %v9303_v59 = vld [vmem:[#allocation4 + $0x469] sm:$0xff] }
 0x733   : > { %v9487_v61 = vpop.permute.xlu0 %9486  ;;  %v9489_v62 = vpop.permute.xlu1 %9488 }
 0x734   : > { %9855 = vst.msk [vmem:[#allocation5 + $0x80] sm:$0xff] %vm9838_vm10, %v9487_v61  ;;  %9856 = vst.msk [vmem:[#allocation5 + $0x88] sm:$0xff] %vm9838_vm10, %v9489_v62 }
 0x735   : > { %9602 = vrot.lane.b32.xlu0 %v9272_v60, %s13125_s7  ;;  %9604 = vrot.lane.b32.xlu1 %v9273_v29, %s13125_s7  ;;  %v9304_v60 = vld [vmem:[#allocation4 + $0x471] sm:$0xff]  ;;  %v9305_v29 = vld [vmem:[#allocation4 + $0x479] sm:$0xff] }
 0x737   : > { %v9491_v55 = vpop.permute.xlu0 %9490  ;;  %v9493_v1 = vpop.permute.xlu1 %9492 }
 0x738   : > { %9857 = vst.msk [vmem:[#allocation5 + $0x90] sm:$0xff] %vm9838_vm10, %v9491_v55  ;;  %9858 = vst.msk [vmem:[#allocation5 + $0x98] sm:$0xff] %vm9838_vm10, %v9493_v1 }
 0x739   : > { %9606 = vrot.lane.b32.xlu0 %v9274_v63, %s13125_s7  ;;  %9608 = vrot.lane.b32.xlu1 %v9275_v0, %s13125_s7  ;;  %v9306_v63 = vld [vmem:[#allocation4 + $0x489] sm:$0xff]  ;;  %v9307_v0 = vld [vmem:[#allocation4 + $0x491] sm:$0xff] }
 0x73b   : > { %v9495_v56 = vpop.permute.xlu0 %9494  ;;  %v9497_v5 = vpop.permute.xlu1 %9496 }
 0x73c   : > { %9859 = vst.msk [vmem:[#allocation5 + $0xa0] sm:$0xff] %vm9838_vm10, %v9495_v56  ;;  %9860 = vst.msk [vmem:[#allocation5 + $0xa8] sm:$0xff] %vm9838_vm10, %v9497_v5 }
 0x73d   : > { %9610 = vrot.lane.b32.xlu0 %v9276_v2, %s13125_s7  ;;  %9612 = vrot.lane.b32.xlu1 %v9277_v3, %s13125_s7  ;;  %v9308_v2 = vld [vmem:[#allocation4 + $0x499] sm:$0xff]  ;;  %v9309_v3 = vld [vmem:[#allocation4 + $0x4a1] sm:$0xff] }
 0x73f   : > { %v9499_v38 = vpop.permute.xlu0 %9498  ;;  %v9501_v6 = vpop.permute.xlu1 %9500 }
 0x740   : > { %9861 = vst.msk [vmem:[#allocation5 + $0xb0] sm:$0xff] %vm9838_vm10, %v9499_v38  ;;  %9862 = vst.msk [vmem:[#allocation5 + $0xb8] sm:$0xff] %vm9838_vm10, %v9501_v6 }
 0x741   : > { %9614 = vrot.lane.b32.xlu0 %v9278_v30, %s13125_s7  ;;  %9616 = vrot.lane.b32.xlu1 %v9279_v45, %s13125_s7  ;;  %v9310_v30 = vld [vmem:[#allocation4 + $0x4b1] sm:$0xff]  ;;  %v9311_v45 = vld [vmem:[#allocation4 + $0x4b9] sm:$0xff] }
 0x743   : > { %v9503_v37 = vpop.permute.xlu0 %9502  ;;  %v9505_v33 = vpop.permute.xlu1 %9504 }
 0x744   : > { %9863 = vst.msk [vmem:[#allocation5 + $0xc0] sm:$0xff] %vm9838_vm10, %v9503_v37  ;;  %9864 = vst.msk [vmem:[#allocation5 + $0xc8] sm:$0xff] %vm9838_vm10, %v9505_v33 }
 0x745   : > { %9618 = vrot.lane.b32.xlu0 %v9280_v32, %s13125_s7  ;;  %9620 = vrot.lane.b32.xlu1 %v9281_v23, %s13125_s7  ;;  %v9312_v32 = vld [vmem:[#allocation4 + $0x4c1] sm:$0xff]  ;;  %v9313_v23 = vld [vmem:[#allocation4 + $0x4c9] sm:$0xff] }
 0x747   : > { %v9507_v7 = vpop.permute.xlu0 %9506  ;;  %v9509_v9 = vpop.permute.xlu1 %9508 }
 0x748   : > { %9865 = vst.msk [vmem:[#allocation5 + $0xd0] sm:$0xff] %vm9838_vm10, %v9507_v7  ;;  %9866 = vst.msk [vmem:[#allocation5 + $0xd8] sm:$0xff] %vm9838_vm10, %v9509_v9 }
 0x749   : > { %9622 = vrot.lane.b32.xlu0 %v9282_v48, %s13125_s7  ;;  %9624 = vrot.lane.b32.xlu1 %v9283_v8, %s13125_s7  ;;  %v9314_v48 = vld [vmem:[#allocation4 + $0x4d9] sm:$0xff]  ;;  %v9315_v8 = vld [vmem:[#allocation4 + $0x4e1] sm:$0xff] }
 0x74b   : > { %v9511_v36 = vpop.permute.xlu0 %9510  ;;  %v9513_v4 = vpop.permute.xlu1 %9512 }
 0x74c   : > { %9867 = vst.msk [vmem:[#allocation5 + $0xe0] sm:$0xff] %vm9838_vm10, %v9511_v36  ;;  %9868 = vst.msk [vmem:[#allocation5 + $0xe8] sm:$0xff] %vm9838_vm10, %v9513_v4 }
 0x74d   : > { %9626 = vrot.lane.b32.xlu0 %v9284_v10, %s13125_s7  ;;  %9628 = vrot.lane.b32.xlu1 %v9285_v35, %s13125_s7  ;;  %v9316_v10 = vld [vmem:[#allocation4 + $0x4e9] sm:$0xff]  ;;  %v9317_v35 = vld [vmem:[#allocation4 + $0x4f1] sm:$0xff] }
 0x74f   : > { %v9515_v12 = vpop.permute.xlu0 %9514  ;;  %v9517_v46 = vpop.permute.xlu1 %9516 }
 0x750   : > { %9869 = vst.msk [vmem:[#allocation5 + $0xf0] sm:$0xff] %vm9838_vm10, %v9515_v12  ;;  %9870 = vst.msk [vmem:[#allocation5 + $0xf8] sm:$0xff] %vm9838_vm10, %v9517_v46 }
 0x751   : > { %9630 = vrot.lane.b32.xlu0 %v9286_v11, %s13125_s7  ;;  %9632 = vrot.lane.b32.xlu1 %v9287_v13, %s13125_s7  ;;  %v9318_v11 = vld [vmem:[#allocation4 + $0x501] sm:$0xff]  ;;  %v9319_v13 = vld [vmem:[#allocation4 + $0x509] sm:$0xff] }
 0x753   : > { %v9519_v22 = vpop.permute.xlu0 %9518  ;;  %v9521_v27 = vpop.permute.xlu1 %9520 }
 0x754   : > { %9871 = vst.msk [vmem:[#allocation5 + $0x100] sm:$0xff] %vm9838_vm10, %v9519_v22  ;;  %9872 = vst.msk [vmem:[#allocation5 + $0x108] sm:$0xff] %vm9838_vm10, %v9521_v27  ;;  %v10864_v22 = vld [vmem:[%s17035_s1] sm:$0xff] }
 0x755   : > { %9634 = vrot.lane.b32.xlu0 %v9288_v14, %s13125_s7  ;;  %9636 = vrot.lane.b32.xlu1 %v9289_v39, %s13125_s7  ;;  %v9320_v14 = vld [vmem:[#allocation4 + $0x511] sm:$0xff] }
 0x756   : > { %v10865_v39 = vld [vmem:[%s17035_s1 + $0x8] sm:$0xff] }
 0x757   : > { %v9523_v17 = vpop.permute.xlu0 %9522  ;;  %v9525_v19 = vpop.permute.xlu1 %9524 }
 0x758   : > { %9873 = vst.msk [vmem:[#allocation5 + $0x110] sm:$0xff] %vm9838_vm10, %v9523_v17  ;;  %9874 = vst.msk [vmem:[#allocation5 + $0x118] sm:$0xff] %vm9838_vm10, %v9525_v19  ;;  %v12916_v17 = vpack.c.bf16 %v10865_v39, %v10864_v22  ;;  %v9322_v19 = vld [vmem:[#allocation4 + $0x529] sm:$0xff]  ;;  %v10038_v22 = vld [vmem:[#allocation4 + $0x312] sm:$0xff] }
 0x759   : > { %9638 = vrot.lane.b32.xlu0 %v9290_v15, %s13125_s7  ;;  %9640 = vrot.lane.b32.xlu1 %v9291_v18, %s13125_s7  ;;  %v9321_v15 = vld [vmem:[#allocation4 + $0x519] sm:$0xff] }
 0x75a   : > { %12917 = vmatprep.subr.bf16.mxu0 %v12916_v17  ;;  %12924 = vmatprep.subr.bf16.mxu1 %v12916_v17 }
 0x75b   : > { %v9527_v24 = vpop.permute.xlu0 %9526  ;;  %v9529_v41 = vpop.permute.xlu1 %9528  ;;  %12919 = vmatpush3.bf16.msra.mxu0 %v12916_v17  ;;  %12927 = vmatpush3.bf16.msra.mxu1 %v12916_v17  ;;  %v10040_v17 = vld [vmem:[#allocation4 + $0x32a] sm:$0xff] }
 0x75c   : > { %9875 = vst.msk [vmem:[#allocation5 + $0x120] sm:$0xff] %vm9838_vm10, %v9527_v24  ;;  %9876 = vst.msk [vmem:[#allocation5 + $0x128] sm:$0xff] %vm9838_vm10, %v9529_v41  ;;  %v10867_v24 = vld [vmem:[%s17035_s1 + $0x18] sm:$0xff]  ;;  %v9323_v41 = vld [vmem:[#allocation4 + $0x531] sm:$0xff] }
 0x75d   : > { %9642 = vrot.lane.b32.xlu0 %v9292_v20, %s13125_s7  ;;  %9644 = vrot.lane.b32.xlu1 %v9293_v40, %s13125_s7  ;;  %v10866_v20 = vld [vmem:[%s17035_s1 + $0x10] sm:$0xff] }
 0x75f   : > { %v9531_v26 = vpop.permute.xlu0 %9530  ;;  %v9533_v44 = vpop.permute.xlu1 %9532 }
 0x760   : > { %9877 = vst.msk [vmem:[#allocation5 + $0x130] sm:$0xff] %vm9838_vm10, %v9531_v26  ;;  %9878 = vst.msk [vmem:[#allocation5 + $0x138] sm:$0xff] %vm9838_vm10, %v9533_v44 }
 0x761   : > { %9646 = vrot.lane.b32.xlu0 %v9294_v21, %s13125_s7  ;;  %9648 = vrot.lane.b32.xlu1 %v9295_v42, %s13125_s7  ;;  %v12920_v21 = vpack.c.bf16 %v10867_v24, %v10866_v20  ;;  %v9324_v42 = vld [vmem:[#allocation4 + $0x539] sm:$0xff] }
 0x762   : > { %v10042_v24 = vld [vmem:[#allocation4 + $0x33a] sm:$0xff] }
 0x763   : > { %v9535_v50 = vpop.permute.xlu0 %9534  ;;  %v9537_v52 = vpop.permute.xlu1 %9536  ;;  %12921 = vmatprep.subr.bf16.mxu0 %v12920_v21  ;;  %12925 = vmatprep.subr.bf16.mxu1 %v12920_v21 }
 0x764   : > { %9879 = vst.msk [vmem:[#allocation5 + $0x140] sm:$0xff] %vm9838_vm10, %v9535_v50  ;;  %9880 = vst.msk [vmem:[#allocation5 + $0x148] sm:$0xff] %vm9838_vm10, %v9537_v52  ;;  %12923 = vmatpush3.bf16.msra.mxu0 %v12920_v21  ;;  %12928 = vmatpush3.bf16.msra.mxu1 %v12920_v21  ;;  %v9967_v52 = vld [vmem:[#allocation4 + $0x52] sm:$0xff] }
 0x765   : > { %9650 = vrot.lane.b32.xlu0 %v9296_v49, %s13125_s7  ;;  %9652 = vrot.lane.b32.xlu1 %v9297_v51, %s13125_s7  ;;  %v9325_v49 = vld [vmem:[#allocation4 + $0x541] sm:$0xff]  ;;  %v10868_v51 = vld [vmem:[%s17035_s1 + $0x20] sm:$0xf] }
 0x766   : > { %12722 = vmatprep.subr.msk.mxu0 %vm11254_vm11, %v10868_v51  ;;  %12926 = vmatprep.subr.msk.mxu1 %vm11254_vm11, %v10868_v51 }
 0x767   : > { %v9539_v53 = vpop.permute.xlu0 %9538  ;;  %v9541_v43 = vpop.permute.xlu1 %9540 }
 0x768   : > { %9881 = vst.msk [vmem:[#allocation5 + $0x150] sm:$0xff] %vm9838_vm10, %v9539_v53  ;;  %9882 = vst.msk [vmem:[#allocation5 + $0x158] sm:$0xff] %vm9838_vm10, %v9541_v43  ;;  %12723 = vmatpush3.msk.msra.mxu0 %vm11254_vm11, %v10868_v51  ;;  %v9968_v53 = vld [vmem:[#allocation4 + $0x5a] sm:$0xff]  ;;  %12929 = vmatpush3.msk.msra.mxu1 %vm11254_vm11, %v10868_v51  ;;  %v9969_v43 = vld [vmem:[#allocation4 + $0x62] sm:$0xff] }
 0x769   : > { %9654 = vrot.lane.b32.xlu0 %v9298_v47, %s13125_s7  ;;  %9656 = vrot.lane.b32.xlu1 %v9299_v16, %s13125_s7 }
 0x76b   : > { %v9543_v28 = vpop.permute.xlu0 %9542  ;;  %v9545_v54 = vpop.permute.xlu1 %9544 }
 0x76c   : > { %9883 = vst.msk [vmem:[#allocation5 + $0x160] sm:$0xff] %vm9838_vm10, %v9543_v28  ;;  %9884 = vst.msk [vmem:[#allocation5 + $0x168] sm:$0xff] %vm9838_vm10, %v9545_v54  ;;  %v9970_v28 = vld [vmem:[#allocation4 + $0x6a] sm:$0xff]  ;;  %v9971_v54 = vld [vmem:[#allocation4 + $0x7a] sm:$0xff] }
 0x76d   : > { %9658 = vrot.lane.b32.xlu0 %v9300_v25, %s13125_s7  ;;  %9660 = vrot.lane.b32.xlu1 %v9301_v34, %s13125_s7 }
 0x76f   : > { %v9547_v58 = vpop.permute.xlu0 %9546  ;;  %v9549_v31 = vpop.permute.xlu1 %9548 }
 0x770   : > { %9885 = vst.msk [vmem:[#allocation5 + $0x170] sm:$0xff] %vm9838_vm10, %v9547_v58  ;;  %9886 = vst.msk [vmem:[#allocation5 + $0x178] sm:$0xff] %vm9838_vm10, %v9549_v31  ;;  %v9972_v58 = vld [vmem:[#allocation4 + $0x82] sm:$0xff]  ;;  %v9973_v31 = vld [vmem:[#allocation4 + $0x8a] sm:$0xff] }
 0x771   : > { %9662 = vrot.lane.b32.xlu0 %v9302_v57, %s13125_s7  ;;  %9664 = vrot.lane.b32.xlu1 %v9303_v59, %s13125_s7 }
 0x773   : > { %v9551_v61 = vpop.permute.xlu0 %9550  ;;  %v9553_v62 = vpop.permute.xlu1 %9552 }
 0x774   : > { %9887 = vst.msk [vmem:[#allocation5 + $0x180] sm:$0xff] %vm9838_vm10, %v9551_v61  ;;  %9888 = vst.msk [vmem:[#allocation5 + $0x188] sm:$0xff] %vm9838_vm10, %v9553_v62  ;;  %v9974_v61 = vld [vmem:[#allocation4 + $0x92] sm:$0xff]  ;;  %v9975_v62 = vld [vmem:[#allocation4 + $0xa2] sm:$0xff] }
 0x775   : > { %9666 = vrot.lane.b32.xlu0 %v9304_v60, %s13125_s7  ;;  %9668 = vrot.lane.b32.xlu1 %v9305_v29, %s13125_s7 }
 0x777   : > { %v9555_v55 = vpop.permute.xlu0 %9554  ;;  %v9557_v1 = vpop.permute.xlu1 %9556 }
 0x778   : > { %9889 = vst.msk [vmem:[#allocation5 + $0x190] sm:$0xff] %vm9838_vm10, %v9555_v55  ;;  %9890 = vst.msk [vmem:[#allocation5 + $0x198] sm:$0xff] %vm9838_vm10, %v9557_v1  ;;  %v9976_v55 = vld [vmem:[#allocation4 + $0xaa] sm:$0xff]  ;;  %v9977_v1 = vld [vmem:[#allocation4 + $0xb2] sm:$0xff] }
 0x779   : > { %9670 = vrot.lane.b32.xlu0 %v9306_v63, %s13125_s7  ;;  %9672 = vrot.lane.b32.xlu1 %v9307_v0, %s13125_s7 }
 0x77b   : > { %v9559_v56 = vpop.permute.xlu0 %9558  ;;  %v9561_v5 = vpop.permute.xlu1 %9560 }
 0x77c   : > { %9891 = vst.msk [vmem:[#allocation5 + $0x1a0] sm:$0xff] %vm9838_vm10, %v9559_v56  ;;  %9892 = vst.msk [vmem:[#allocation5 + $0x1a8] sm:$0xff] %vm9838_vm10, %v9561_v5  ;;  %v9978_v56 = vld [vmem:[#allocation4 + $0xba] sm:$0xff]  ;;  %v9979_v5 = vld [vmem:[#allocation4 + $0xca] sm:$0xff] }
 0x77d   : > { %9674 = vrot.lane.b32.xlu0 %v9308_v2, %s13125_s7  ;;  %9676 = vrot.lane.b32.xlu1 %v9309_v3, %s13125_s7 }
 0x77f   : > { %v9563_v38 = vpop.permute.xlu0 %9562  ;;  %v9565_v6 = vpop.permute.xlu1 %9564 }
 0x780   : > { %9893 = vst.msk [vmem:[#allocation5 + $0x1b0] sm:$0xff] %vm9838_vm10, %v9563_v38  ;;  %9894 = vst.msk [vmem:[#allocation5 + $0x1b8] sm:$0xff] %vm9838_vm10, %v9565_v6  ;;  %v9980_v38 = vld [vmem:[#allocation4 + $0xd2] sm:$0xff]  ;;  %v9981_v6 = vld [vmem:[#allocation4 + $0xda] sm:$0xff] }
 0x781   : > { %9678 = vrot.lane.b32.xlu0 %v9310_v30, %s13125_s7  ;;  %9680 = vrot.lane.b32.xlu1 %v9311_v45, %s13125_s7 }
 0x783   : > { %v9567_v37 = vpop.permute.xlu0 %9566  ;;  %v9569_v33 = vpop.permute.xlu1 %9568 }
 0x784   : > { %9895 = vst.msk [vmem:[#allocation5 + $0x1c0] sm:$0xff] %vm9838_vm10, %v9567_v37  ;;  %9896 = vst.msk [vmem:[#allocation5 + $0x1c8] sm:$0xff] %vm9838_vm10, %v9569_v33  ;;  %v9982_v37 = vld [vmem:[#allocation4 + $0xe2] sm:$0xff]  ;;  %v10031_v33 = vld [vmem:[#allocation4 + $0x2d2] sm:$0xff] }
 0x785   : > { %9682 = vrot.lane.b32.xlu0 %v9312_v32, %s13125_s7  ;;  %9684 = vrot.lane.b32.xlu1 %v9313_v23, %s13125_s7 }
 0x787   : > { %v9571_v7 = vpop.permute.xlu0 %9570  ;;  %v9573_v9 = vpop.permute.xlu1 %9572 }
 0x788   : > { %9897 = vst.msk [vmem:[#allocation5 + $0x1d0] sm:$0xff] %vm9838_vm10, %v9571_v7  ;;  %9898 = vst.msk [vmem:[#allocation5 + $0x1d8] sm:$0xff] %vm9838_vm10, %v9573_v9  ;;  %v10032_v7 = vld [vmem:[#allocation4 + $0x2da] sm:$0xff]  ;;  %v10033_v9 = vld [vmem:[#allocation4 + $0x2e2] sm:$0xff] }
 0x789   : > { %9686 = vrot.lane.b32.xlu0 %v9314_v48, %s13125_s7  ;;  %9688 = vrot.lane.b32.xlu1 %v9315_v8, %s13125_s7 }
 0x78b   : > { %v9575_v36 = vpop.permute.xlu0 %9574  ;;  %v9577_v4 = vpop.permute.xlu1 %9576 }
 0x78c   : > { %9899 = vst.msk [vmem:[#allocation5 + $0x1e0] sm:$0xff] %vm9838_vm10, %v9575_v36  ;;  %9900 = vst.msk [vmem:[#allocation5 + $0x1e8] sm:$0xff] %vm9838_vm10, %v9577_v4  ;;  %v10034_v36 = vld [vmem:[#allocation4 + $0x2ea] sm:$0xff]  ;;  %v10035_v4 = vld [vmem:[#allocation4 + $0x2fa] sm:$0xff] }
 0x78d   : > { %9690 = vrot.lane.b32.xlu0 %v9316_v10, %s13125_s7  ;;  %9692 = vrot.lane.b32.xlu1 %v9317_v35, %s13125_s7 }
 0x78f   : > { %v9579_v12 = vpop.permute.xlu0 %9578  ;;  %v9581_v46 = vpop.permute.xlu1 %9580 }
 0x790   : > { %9901 = vst.msk [vmem:[#allocation5 + $0x1f0] sm:$0xff] %vm9838_vm10, %v9579_v12  ;;  %9902 = vst.msk [vmem:[#allocation5 + $0x1f8] sm:$0xff] %vm9838_vm10, %v9581_v46  ;;  %v10036_v12 = vld [vmem:[#allocation4 + $0x302] sm:$0xff]  ;;  %v10037_v46 = vld [vmem:[#allocation4 + $0x30a] sm:$0xff] }
 0x791   : > { %9694 = vrot.lane.b32.xlu0 %v9318_v11, %s13125_s7  ;;  %9696 = vrot.lane.b32.xlu1 %v9319_v13, %s13125_s7 }
 0x793   : > { %v9583_v27 = vpop.permute.xlu0 %9582  ;;  %v9585_v18 = vpop.permute.xlu1 %9584 }
 0x794   : > { %9903 = vst.msk [vmem:[#allocation5 + $0x200] sm:$0xff] %vm9838_vm10, %v9583_v27  ;;  %9904 = vst.msk [vmem:[#allocation5 + $0x208] sm:$0xff] %vm9838_vm10, %v9585_v18  ;;  %v10039_v27 = vld [vmem:[#allocation4 + $0x322] sm:$0xff] }
 0x795   : > { %9698 = vrot.lane.b32.xlu0 %v9320_v14, %s13125_s7  ;;  %9700 = vrot.lane.b32.xlu1 %v9321_v15, %s13125_s7 }
 0x797   : > { %v9587_v40 = vpop.permute.xlu0 %9586  ;;  %v9589_v26 = vpop.permute.xlu1 %9588 }
 0x798   : > { %9905 = vst.msk [vmem:[#allocation5 + $0x210] sm:$0xff] %vm9838_vm10, %v9587_v40  ;;  %9906 = vst.msk [vmem:[#allocation5 + $0x218] sm:$0xff] %vm9838_vm10, %v9589_v26  ;;  %v10043_v26 = vld [vmem:[#allocation4 + $0x34a] sm:$0xff] }
 0x799   : > { %9702 = vrot.lane.b32.xlu0 %v9322_v19, %s13125_s7  ;;  %9704 = vrot.lane.b32.xlu1 %v9323_v41, %s13125_s7  ;;  %v10041_v19 = vld [vmem:[#allocation4 + $0x332] sm:$0xff] }
 0x79a   : > { %v9983_v41 = vld [vmem:[#allocation4 + $0xf2] sm:$0xff] }
 0x79b   : > { %v9591_v44 = vpop.permute.xlu0 %9590  ;;  %v9593_v50 = vpop.permute.xlu1 %9592 }
 0x79c   : > { %9907 = vst.msk [vmem:[#allocation5 + $0x220] sm:$0xff] %vm9838_vm10, %v9591_v44  ;;  %9908 = vst.msk [vmem:[#allocation5 + $0x228] sm:$0xff] %vm9838_vm10, %v9593_v50  ;;  %v9984_v44 = vld [vmem:[#allocation4 + $0xfa] sm:$0xff]  ;;  %v10044_v50 = vld [vmem:[#allocation4 + $0x352] sm:$0xff] }
 0x79d   : > { %9706 = vrot.lane.b32.xlu0 %v9324_v42, %s13125_s7  ;;  %9708 = vrot.lane.b32.xlu1 %v9325_v49, %s13125_s7  ;;  %s12578_s7 = sshll.u32 %s13098_s15, 6 }
 0x79e   : > { %s16908_s8 = scalar_lea.vmem [#allocation2], %s12578_s7 }
 0x79f   : > { %v9595_v47 = vpop.permute.xlu0 %9594  ;;  %v9597_v16 = vpop.permute.xlu1 %9596 }
 0x7a0   : > { %9909 = vst.msk [vmem:[#allocation5 + $0x230] sm:$0xff] %vm9838_vm10, %v9595_v47  ;;  %9910 = vst.msk [vmem:[#allocation5 + $0x238] sm:$0xff] %vm9838_vm10, %v9597_v16 }
 0x7a1   : > { %10223 = vrot.lane.b32.xlu0 %v9967_v52, %s13126_s6  ;;  %10225 = vrot.lane.b32.xlu1 %v9968_v53, %s13126_s6  ;;  %v9985_v52 = vld [vmem:[#allocation4 + $0x102] sm:$0xff]  ;;  %v10045_v53 = vld [vmem:[#allocation4 + $0x35a] sm:$0xff] }
 0x7a3   : > { %v9599_v25 = vpop.permute.xlu0 %9598  ;;  %v9601_v34 = vpop.permute.xlu1 %9600 }
 0x7a4   : > { %9911 = vst.msk [vmem:[#allocation5 + $0x240] sm:$0xff] %vm9838_vm10, %v9599_v25  ;;  %9912 = vst.msk [vmem:[#allocation5 + $0x248] sm:$0xff] %vm9838_vm10, %v9601_v34 }
 0x7a5   : > { %10227 = vrot.lane.b32.xlu0 %v9969_v43, %s13126_s6  ;;  %10229 = vrot.lane.b32.xlu1 %v9970_v28, %s13126_s6  ;;  %v9986_v43 = vld [vmem:[#allocation4 + $0x10a] sm:$0xff]  ;;  %v10046_v28 = vld [vmem:[#allocation4 + $0x362] sm:$0xff] }
 0x7a7   : > { %v9603_v57 = vpop.permute.xlu0 %9602  ;;  %v9605_v59 = vpop.permute.xlu1 %9604 }
 0x7a8   : > { %9913 = vst.msk [vmem:[#allocation5 + $0x250] sm:$0xff] %vm9838_vm10, %v9603_v57  ;;  %9914 = vst.msk [vmem:[#allocation5 + $0x258] sm:$0xff] %vm9838_vm10, %v9605_v59 }
 0x7a9   : > { %10231 = vrot.lane.b32.xlu0 %v9971_v54, %s13126_s6  ;;  %10233 = vrot.lane.b32.xlu1 %v9972_v58, %s13126_s6  ;;  %v9987_v54 = vld [vmem:[#allocation4 + $0x11a] sm:$0xff]  ;;  %v10047_v58 = vld [vmem:[#allocation4 + $0x372] sm:$0xff] }
 0x7ab   : > { %v9607_v60 = vpop.permute.xlu0 %9606  ;;  %v9609_v29 = vpop.permute.xlu1 %9608 }
 0x7ac   : > { %9915 = vst.msk [vmem:[#allocation5 + $0x260] sm:$0xff] %vm9838_vm10, %v9607_v60  ;;  %9916 = vst.msk [vmem:[#allocation5 + $0x268] sm:$0xff] %vm9838_vm10, %v9609_v29 }
 0x7ad   : > { %10235 = vrot.lane.b32.xlu0 %v9973_v31, %s13126_s6  ;;  %10237 = vrot.lane.b32.xlu1 %v9974_v61, %s13126_s6  ;;  %v9988_v31 = vld [vmem:[#allocation4 + $0x122] sm:$0xff]  ;;  %v10048_v61 = vld [vmem:[#allocation4 + $0x37a] sm:$0xff] }
 0x7af   : > { %v9611_v63 = vpop.permute.xlu0 %9610  ;;  %v9613_v0 = vpop.permute.xlu1 %9612 }
 0x7b0   : > { %9917 = vst.msk [vmem:[#allocation5 + $0x270] sm:$0xff] %vm9838_vm10, %v9611_v63  ;;  %9918 = vst.msk [vmem:[#allocation5 + $0x278] sm:$0xff] %vm9838_vm10, %v9613_v0 }
 0x7b1   : > { %10239 = vrot.lane.b32.xlu0 %v9975_v62, %s13126_s6  ;;  %10241 = vrot.lane.b32.xlu1 %v9976_v55, %s13126_s6  ;;  %v9989_v62 = vld [vmem:[#allocation4 + $0x12a] sm:$0xff]  ;;  %v10049_v55 = vld [vmem:[#allocation4 + $0x382] sm:$0xff] }
 0x7b3   : > { %v9615_v2 = vpop.permute.xlu0 %9614  ;;  %v9617_v3 = vpop.permute.xlu1 %9616 }
 0x7b4   : > { %9919 = vst.msk [vmem:[#allocation5 + $0x280] sm:$0xff] %vm9838_vm10, %v9615_v2  ;;  %9920 = vst.msk [vmem:[#allocation5 + $0x288] sm:$0xff] %vm9838_vm10, %v9617_v3 }
 0x7b5   : > { %10243 = vrot.lane.b32.xlu0 %v9977_v1, %s13126_s6  ;;  %10245 = vrot.lane.b32.xlu1 %v9978_v56, %s13126_s6  ;;  %v9990_v1 = vld [vmem:[#allocation4 + $0x132] sm:$0xff]  ;;  %v10050_v56 = vld [vmem:[#allocation4 + $0x38a] sm:$0xff] }
 0x7b7   : > { %v9619_v30 = vpop.permute.xlu0 %9618  ;;  %v9621_v45 = vpop.permute.xlu1 %9620 }
 0x7b8   : > { %9921 = vst.msk [vmem:[#allocation5 + $0x290] sm:$0xff] %vm9838_vm10, %v9619_v30  ;;  %9922 = vst.msk [vmem:[#allocation5 + $0x298] sm:$0xff] %vm9838_vm10, %v9621_v45 }
 0x7b9   : > { %10247 = vrot.lane.b32.xlu0 %v9979_v5, %s13126_s6  ;;  %10249 = vrot.lane.b32.xlu1 %v9980_v38, %s13126_s6  ;;  %v9991_v5 = vld [vmem:[#allocation4 + $0x142] sm:$0xff]  ;;  %v10051_v38 = vld [vmem:[#allocation4 + $0x39a] sm:$0xff] }
 0x7bb   : > { %v9623_v32 = vpop.permute.xlu0 %9622  ;;  %v9625_v23 = vpop.permute.xlu1 %9624 }
 0x7bc   : > { %9923 = vst.msk [vmem:[#allocation5 + $0x2a0] sm:$0xff] %vm9838_vm10, %v9623_v32  ;;  %9924 = vst.msk [vmem:[#allocation5 + $0x2a8] sm:$0xff] %vm9838_vm10, %v9625_v23 }
 0x7bd   : > { %10251 = vrot.lane.b32.xlu0 %v9981_v6, %s13126_s6  ;;  %10253 = vrot.lane.b32.xlu1 %v9982_v37, %s13126_s6  ;;  %v9992_v6 = vld [vmem:[#allocation4 + $0x14a] sm:$0xff]  ;;  %v10052_v37 = vld [vmem:[#allocation4 + $0x3a2] sm:$0xff] }
 0x7bf   : > { %v9627_v48 = vpop.permute.xlu0 %9626  ;;  %v9629_v8 = vpop.permute.xlu1 %9628 }
 0x7c0   : > { %9925 = vst.msk [vmem:[#allocation5 + $0x2b0] sm:$0xff] %vm9838_vm10, %v9627_v48  ;;  %9926 = vst.msk [vmem:[#allocation5 + $0x2b8] sm:$0xff] %vm9838_vm10, %v9629_v8 }
 0x7c1   : > { %10351 = vrot.lane.b32.xlu0 %v10031_v33, %s13126_s6  ;;  %10353 = vrot.lane.b32.xlu1 %v10032_v7, %s13126_s6  ;;  %v9993_v33 = vld [vmem:[#allocation4 + $0x152] sm:$0xff]  ;;  %v10053_v7 = vld [vmem:[#allocation4 + $0x3aa] sm:$0xff] }
 0x7c3   : > { %v9631_v10 = vpop.permute.xlu0 %9630  ;;  %v9633_v35 = vpop.permute.xlu1 %9632 }
 0x7c4   : > { %9927 = vst.msk [vmem:[#allocation5 + $0x2c0] sm:$0xff] %vm9838_vm10, %v9631_v10  ;;  %9928 = vst.msk [vmem:[#allocation5 + $0x2c8] sm:$0xff] %vm9838_vm10, %v9633_v35 }
 0x7c5   : > { %10355 = vrot.lane.b32.xlu0 %v10033_v9, %s13126_s6  ;;  %10357 = vrot.lane.b32.xlu1 %v10034_v36, %s13126_s6  ;;  %v9994_v9 = vld [vmem:[#allocation4 + $0x15a] sm:$0xff]  ;;  %v10054_v36 = vld [vmem:[#allocation4 + $0x3b2] sm:$0xff] }
 0x7c7   : > { %v9635_v11 = vpop.permute.xlu0 %9634  ;;  %v9637_v13 = vpop.permute.xlu1 %9636 }
 0x7c8   : > { %9929 = vst.msk [vmem:[#allocation5 + $0x2d0] sm:$0xff] %vm9838_vm10, %v9635_v11  ;;  %9930 = vst.msk [vmem:[#allocation5 + $0x2d8] sm:$0xff] %vm9838_vm10, %v9637_v13 }
 0x7c9   : > { %10359 = vrot.lane.b32.xlu0 %v10035_v4, %s13126_s6  ;;  %10361 = vrot.lane.b32.xlu1 %v10036_v12, %s13126_s6  ;;  %v9995_v4 = vld [vmem:[#allocation4 + $0x16a] sm:$0xff]  ;;  %v10055_v12 = vld [vmem:[#allocation4 + $0x3c2] sm:$0xff] }
 0x7cb   : > { %v9639_v14 = vpop.permute.xlu0 %9638  ;;  %v9641_v39 = vpop.permute.xlu1 %9640 }
 0x7cc   : > { %9931 = vst.msk [vmem:[#allocation5 + $0x2e0] sm:$0xff] %vm9838_vm10, %v9639_v14  ;;  %9932 = vst.msk [vmem:[#allocation5 + $0x2e8] sm:$0xff] %vm9838_vm10, %v9641_v39 }
 0x7cd   : > { %10363 = vrot.lane.b32.xlu0 %v10037_v46, %s13126_s6  ;;  %10365 = vrot.lane.b32.xlu1 %v10038_v22, %s13126_s6  ;;  %v9996_v46 = vld [vmem:[#allocation4 + $0x172] sm:$0xff]  ;;  %v10056_v22 = vld [vmem:[#allocation4 + $0x3ca] sm:$0xff] }
 0x7cf   : > { %v9643_v15 = vpop.permute.xlu0 %9642  ;;  %v9645_v18 = vpop.permute.xlu1 %9644 }
 0x7d0   : > { %9933 = vst.msk [vmem:[#allocation5 + $0x2f0] sm:$0xff] %vm9838_vm10, %v9643_v15  ;;  %9934 = vst.msk [vmem:[#allocation5 + $0x2f8] sm:$0xff] %vm9838_vm10, %v9645_v18 }
 0x7d1   : > { %10367 = vrot.lane.b32.xlu0 %v10039_v27, %s13126_s6  ;;  %10369 = vrot.lane.b32.xlu1 %v10040_v17, %s13126_s6  ;;  %v9997_v27 = vld [vmem:[#allocation4 + $0x17a] sm:$0xff]  ;;  %v10057_v17 = vld [vmem:[#allocation4 + $0x3d2] sm:$0xff] }
 0x7d3   : > { %v9647_v20 = vpop.permute.xlu0 %9646  ;;  %v9649_v40 = vpop.permute.xlu1 %9648 }
 0x7d4   : > { %9935 = vst.msk [vmem:[#allocation5 + $0x300] sm:$0xff] %vm9838_vm10, %v9647_v20  ;;  %9936 = vst.msk [vmem:[#allocation5 + $0x308] sm:$0xff] %vm9838_vm10, %v9649_v40 }
 0x7d5   : > { %10371 = vrot.lane.b32.xlu0 %v10041_v19, %s13126_s6  ;;  %10373 = vrot.lane.b32.xlu1 %v10042_v24, %s13126_s6  ;;  %v9998_v19 = vld [vmem:[#allocation4 + $0x182] sm:$0xff]  ;;  %v10058_v24 = vld [vmem:[#allocation4 + $0x3da] sm:$0xff] }
 0x7d7   : > { %v9651_v21 = vpop.permute.xlu0 %9650  ;;  %v9653_v42 = vpop.permute.xlu1 %9652 }
 0x7d8   : > { %9937 = vst.msk [vmem:[#allocation5 + $0x310] sm:$0xff] %vm9838_vm10, %v9651_v21  ;;  %9938 = vst.msk [vmem:[#allocation5 + $0x318] sm:$0xff] %vm9838_vm10, %v9653_v42 }
 0x7d9   : > { %10255 = vrot.lane.b32.xlu0 %v9983_v41, %s13126_s6  ;;  %10375 = vrot.lane.b32.xlu1 %v10043_v26, %s13126_s6  ;;  %v9999_v41 = vld [vmem:[#allocation4 + $0x192] sm:$0xff]  ;;  %v10059_v26 = vld [vmem:[#allocation4 + $0x3ea] sm:$0xff] }
 0x7db   : > { %v9655_v49 = vpop.permute.xlu0 %9654  ;;  %v9657_v51 = vpop.permute.xlu1 %9656 }
 0x7dc   : > { %9939 = vst.msk [vmem:[#allocation5 + $0x320] sm:$0xff] %vm9838_vm10, %v9655_v49  ;;  %9940 = vst.msk [vmem:[#allocation5 + $0x328] sm:$0xff] %vm9838_vm10, %v9657_v51  ;;  %v10060_v51 = vld [vmem:[#allocation4 + $0x3f2] sm:$0xff] }
 0x7dd   : > { %10257 = vrot.lane.b32.xlu0 %v9984_v44, %s13126_s6  ;;  %10377 = vrot.lane.b32.xlu1 %v10044_v50, %s13126_s6  ;;  %v10000_v44 = vld [vmem:[#allocation4 + $0x19a] sm:$0xff] }
 0x7df   : > { %v9659_v47 = vpop.permute.xlu0 %9658  ;;  %v9661_v16 = vpop.permute.xlu1 %9660 }
 0x7e0   : > { %9941 = vst.msk [vmem:[#allocation5 + $0x330] sm:$0xff] %vm9838_vm10, %v9659_v47  ;;  %9942 = vst.msk [vmem:[#allocation5 + $0x338] sm:$0xff] %vm9838_vm10, %v9661_v16 }
 0x7e1   : > { %10259 = vrot.lane.b32.xlu0 %v9985_v52, %s13126_s6  ;;  %10379 = vrot.lane.b32.xlu1 %v10045_v53, %s13126_s6  ;;  %v10001_v53 = vld [vmem:[#allocation4 + $0x1a2] sm:$0xff] }
 0x7e3   : > { %v9663_v25 = vpop.permute.xlu0 %9662  ;;  %v9665_v34 = vpop.permute.xlu1 %9664 }
 0x7e4   : > { %9943 = vst.msk [vmem:[#allocation5 + $0x340] sm:$0xff] %vm9838_vm10, %v9663_v25  ;;  %9944 = vst.msk [vmem:[#allocation5 + $0x348] sm:$0xff] %vm9838_vm10, %v9665_v34  ;;  %v10061_v25 = vld [vmem:[#allocation4 + $0x3fa] sm:$0xff] }
 0x7e5   : > { %10261 = vrot.lane.b32.xlu0 %v9986_v43, %s13126_s6  ;;  %10381 = vrot.lane.b32.xlu1 %v10046_v28, %s13126_s6 }
 0x7e7   : > { %v9667_v57 = vpop.permute.xlu0 %9666  ;;  %v9669_v59 = vpop.permute.xlu1 %9668 }
 0x7e8   : > { %9945 = vst.msk [vmem:[#allocation5 + $0x350] sm:$0xff] %vm9838_vm10, %v9667_v57  ;;  %9946 = vst.msk [vmem:[#allocation5 + $0x358] sm:$0xff] %vm9838_vm10, %v9669_v59  ;;  %v10062_v59 = vld [vmem:[#allocation4 + $0x402] sm:$0xff] }
 0x7e9   : > { %10263 = vrot.lane.b32.xlu0 %v9987_v54, %s13126_s6  ;;  %10383 = vrot.lane.b32.xlu1 %v10047_v58, %s13126_s6  ;;  %v10002_v54 = vld [vmem:[#allocation4 + $0x1aa] sm:$0xff] }
 0x7eb   : > { %v9671_v60 = vpop.permute.xlu0 %9670  ;;  %v9673_v29 = vpop.permute.xlu1 %9672 }
 0x7ec   : > { %9947 = vst.msk [vmem:[#allocation5 + $0x360] sm:$0xff] %vm9838_vm10, %v9671_v60  ;;  %9948 = vst.msk [vmem:[#allocation5 + $0x368] sm:$0xff] %vm9838_vm10, %v9673_v29 }
 0x7ed   : > { %10265 = vrot.lane.b32.xlu0 %v9988_v31, %s13126_s6  ;;  %10385 = vrot.lane.b32.xlu1 %v10048_v61, %s13126_s6  ;;  %v10003_v61 = vld [vmem:[#allocation4 + $0x1ba] sm:$0xff] }
 0x7ef   : > { %v9675_v63 = vpop.permute.xlu0 %9674  ;;  %v9677_v0 = vpop.permute.xlu1 %9676 }
 0x7f0   : > { %9949 = vst.msk [vmem:[#allocation5 + $0x370] sm:$0xff] %vm9838_vm10, %v9675_v63  ;;  %9950 = vst.msk [vmem:[#allocation5 + $0x378] sm:$0xff] %vm9838_vm10, %v9677_v0  ;;  %v10063_v63 = vld [vmem:[#allocation4 + $0x412] sm:$0xff] }
 0x7f1   : > { %10267 = vrot.lane.b32.xlu0 %v9989_v62, %s13126_s6  ;;  %10387 = vrot.lane.b32.xlu1 %v10049_v55, %s13126_s6 }
 0x7f3   : > { %v9679_v2 = vpop.permute.xlu0 %9678  ;;  %v9681_v3 = vpop.permute.xlu1 %9680 }
 0x7f4   : > { %9951 = vst.msk [vmem:[#allocation5 + $0x380] sm:$0xff] %vm9838_vm10, %v9679_v2  ;;  %9952 = vst.msk [vmem:[#allocation5 + $0x388] sm:$0xff] %vm9838_vm10, %v9681_v3  ;;  %v10064_v3 = vld [vmem:[#allocation4 + $0x41a] sm:$0xff] }
 0x7f5   : > { %10269 = vrot.lane.b32.xlu0 %v9990_v1, %s13126_s6  ;;  %10389 = vrot.lane.b32.xlu1 %v10050_v56, %s13126_s6  ;;  %v10004_v1 = vld [vmem:[#allocation4 + $0x1c2] sm:$0xff] }
 0x7f7   : > { %v9683_v30 = vpop.permute.xlu0 %9682  ;;  %v9685_v45 = vpop.permute.xlu1 %9684 }
 0x7f8   : > { %9953 = vst.msk [vmem:[#allocation5 + $0x390] sm:$0xff] %vm9838_vm10, %v9683_v30  ;;  %9954 = vst.msk [vmem:[#allocation5 + $0x398] sm:$0xff] %vm9838_vm10, %v9685_v45 }
 0x7f9   : > { %10271 = vrot.lane.b32.xlu0 %v9991_v5, %s13126_s6  ;;  %10391 = vrot.lane.b32.xlu1 %v10051_v38, %s13126_s6  ;;  %v10005_v38 = vld [vmem:[#allocation4 + $0x1ca] sm:$0xff] }
 0x7fb   : > { %v9687_v32 = vpop.permute.xlu0 %9686  ;;  %v9689_v23 = vpop.permute.xlu1 %9688 }
 0x7fc   : > { %9955 = vst.msk [vmem:[#allocation5 + $0x3a0] sm:$0xff] %vm9838_vm10, %v9687_v32  ;;  %9956 = vst.msk [vmem:[#allocation5 + $0x3a8] sm:$0xff] %vm9838_vm10, %v9689_v23  ;;  %v10065_v32 = vld [vmem:[#allocation4 + $0x422] sm:$0xff] }
 0x7fd   : > { %10273 = vrot.lane.b32.xlu0 %v9992_v6, %s13126_s6  ;;  %10393 = vrot.lane.b32.xlu1 %v10052_v37, %s13126_s6 }
 0x7ff   : > { %v9691_v48 = vpop.permute.xlu0 %9690  ;;  %v9693_v8 = vpop.permute.xlu1 %9692 }
 0x800   : > { %9957 = vst.msk [vmem:[#allocation5 + $0x3b0] sm:$0xff] %vm9838_vm10, %v9691_v48  ;;  %9958 = vst.msk [vmem:[#allocation5 + $0x3b8] sm:$0xff] %vm9838_vm10, %v9693_v8  ;;  %v10066_v8 = vld [vmem:[#allocation4 + $0x42a] sm:$0xff] }
 0x801   : > { %10275 = vrot.lane.b32.xlu0 %v9993_v33, %s13126_s6  ;;  %10395 = vrot.lane.b32.xlu1 %v10053_v7, %s13126_s6  ;;  %v10006_v33 = vld [vmem:[#allocation4 + $0x1d2] sm:$0xff] }
 0x803   : > { %v9695_v10 = vpop.permute.xlu0 %9694  ;;  %v9697_v35 = vpop.permute.xlu1 %9696 }
 0x804   : > { %9959 = vst.msk [vmem:[#allocation5 + $0x3c0] sm:$0xff] %vm9838_vm10, %v9695_v10  ;;  %9960 = vst.msk [vmem:[#allocation5 + $0x3c8] sm:$0xff] %vm9838_vm10, %v9697_v35 }
 0x805   : > { %10277 = vrot.lane.b32.xlu0 %v9994_v9, %s13126_s6  ;;  %10397 = vrot.lane.b32.xlu1 %v10054_v36, %s13126_s6  ;;  %v10007_v36 = vld [vmem:[#allocation4 + $0x1e2] sm:$0xff] }
 0x807   : > { %v9699_v11 = vpop.permute.xlu0 %9698  ;;  %v9701_v13 = vpop.permute.xlu1 %9700 }
 0x808   : > { %9961 = vst.msk [vmem:[#allocation5 + $0x3d0] sm:$0xff] %vm9838_vm10, %v9699_v11  ;;  %9962 = vst.msk [vmem:[#allocation5 + $0x3d8] sm:$0xff] %vm9838_vm10, %v9701_v13  ;;  %v10067_v11 = vld [vmem:[#allocation4 + $0x43a] sm:$0xff] }
 0x809   : > { %10279 = vrot.lane.b32.xlu0 %v9995_v4, %s13126_s6  ;;  %10399 = vrot.lane.b32.xlu1 %v10055_v12, %s13126_s6 }
 0x80b   : > { %v9703_v14 = vpop.permute.xlu0 %9702  ;;  %v9705_v39 = vpop.permute.xlu1 %9704 }
 0x80c   : > { %9963 = vst.msk [vmem:[#allocation5 + $0x3e0] sm:$0xff] %vm9838_vm10, %v9703_v14  ;;  %9964 = vst.msk [vmem:[#allocation5 + $0x3e8] sm:$0xff] %vm9838_vm10, %v9705_v39  ;;  %v10068_v39 = vld [vmem:[#allocation4 + $0x442] sm:$0xff] }
 0x80d   : > { %10281 = vrot.lane.b32.xlu0 %v9996_v46, %s13126_s6  ;;  %10401 = vrot.lane.b32.xlu1 %v10056_v22, %s13126_s6  ;;  %v10008_v46 = vld [vmem:[#allocation4 + $0x1ea] sm:$0xff] }
 0x80f   : > { %v9707_v15 = vpop.permute.xlu0 %9706  ;;  %v9709_v18 = vpop.permute.xlu1 %9708 }
 0x810   : > { %9965 = vst.msk [vmem:[#allocation5 + $0x3f0] sm:$0xff] %vm9838_vm10, %v9707_v15  ;;  %9966 = vst.msk [vmem:[#allocation5 + $0x3f8] sm:$0xff] %vm9838_vm10, %v9709_v18 }
 0x811   : > { %10283 = vrot.lane.b32.xlu0 %v9997_v27, %s13126_s6  ;;  %10403 = vrot.lane.b32.xlu1 %v10057_v17, %s13126_s6  ;;  %v10009_v17 = vld [vmem:[#allocation4 + $0x1f2] sm:$0xff] }
 0x813   : > { %v10224_v20 = vpop.permute.xlu0 %10223  ;;  %v10226_v40 = vpop.permute.xlu1 %10225 }
 0x814   : > { %10608 = vst.msk [vmem:[#allocation5] sm:$0xff] %vm10607_vm12, %v10224_v20  ;;  %10609 = vst.msk [vmem:[#allocation5 + $0x8] sm:$0xff] %vm10607_vm12, %v10226_v40  ;;  %v10069_v20 = vld [vmem:[#allocation4 + $0x44a] sm:$0xff] }
 0x815   : > { %10285 = vrot.lane.b32.xlu0 %v9998_v19, %s13126_s6  ;;  %10405 = vrot.lane.b32.xlu1 %v10058_v24, %s13126_s6 }
 0x817   : > { %v10228_v21 = vpop.permute.xlu0 %10227  ;;  %v10230_v42 = vpop.permute.xlu1 %10229 }
 0x818   : > { %10610 = vst.msk [vmem:[#allocation5 + $0x10] sm:$0xff] %vm10607_vm12, %v10228_v21  ;;  %10611 = vst.msk [vmem:[#allocation5 + $0x18] sm:$0xff] %vm10607_vm12, %v10230_v42  ;;  %v10070_v42 = vld [vmem:[#allocation4 + $0x452] sm:$0xff] }
 0x819   : > { %10287 = vrot.lane.b32.xlu0 %v9999_v41, %s13126_s6  ;;  %10407 = vrot.lane.b32.xlu1 %v10059_v26, %s13126_s6  ;;  %v10010_v41 = vld [vmem:[#allocation4 + $0x1fa] sm:$0xff] }
 0x81b   : > { %v10232_v49 = vpop.permute.xlu0 %10231  ;;  %v10736_v50 = vld [vmem:[#allocation5] sm:$0xff]  ;;  %v10234_v52 = vpop.permute.xlu1 %10233  ;;  %v10737_v47 = vld [vmem:[#allocation5 + $0x8] sm:$0xff] }
 0x81c   : > { %10612 = vst.msk [vmem:[#allocation5 + $0x20] sm:$0xff] %vm10607_vm12, %v10232_v49  ;;  %12724 = vmatprep.mubr.msk.f32.mxu0 %vm10869_vm13, %v10736_v50  ;;  %10613 = vst.msk [vmem:[#allocation5 + $0x28] sm:$0xff] %vm10607_vm12, %v10234_v52  ;;  %v10011_v50 = vld [vmem:[#allocation4 + $0x20a] sm:$0xff] }
 0x81d   : > { %10289 = vrot.lane.b32.xlu0 %v10000_v44, %s13126_s6  ;;  %12725 = vmatmul.mubr.msk.f32.vlgmr.msra.gmra.mrb[0].mxu0 %vm10869_vm13, %v10737_v47  ;;  %v10071_v47 = vld [vmem:[#allocation4 + $0x462] sm:$0xff] }
 0x81e   : > { %10409 = vrot.lane.b32.xlu1 %v10060_v51, %s13126_s6 }
 0x81f   : > { %v10236_v16 = vpop.permute.xlu0 %10235  ;;  %v10738_v43 = vld [vmem:[#allocation5 + $0x10] sm:$0xff]  ;;  %v10238_v28 = vpop.permute.xlu1 %10237  ;;  %v10739_v34 = vld [vmem:[#allocation5 + $0x18] sm:$0xff] }
 0x820   : > { %10614 = vst.msk [vmem:[#allocation5 + $0x30] sm:$0xff] %vm10607_vm12, %v10236_v16  ;;  %12727 = vmatprep.mubr.msk.f32.mxu0 %vm10869_vm13, %v10738_v43  ;;  %10615 = vst.msk [vmem:[#allocation5 + $0x38] sm:$0xff] %vm10607_vm12, %v10238_v28  ;;  %v10012_v43 = vld [vmem:[#allocation4 + $0x212] sm:$0xff] }
 0x821   : > { %10291 = vrot.lane.b32.xlu0 %v10001_v53, %s13126_s6  ;;  %12728 = vmatmul.mubr.msk.f32.gmra.mrb[2].mxu0 %vm10869_vm13, %v10739_v34  ;;  %v10072_v34 = vld [vmem:[#allocation4 + $0x46a] sm:$0xff] }
 0x822   : > { %10411 = vrot.lane.b32.xlu1 %v10061_v25, %s13126_s6 }
 0x823   : > { %v10240_v57 = vpop.permute.xlu0 %10239  ;;  %v10740_v58 = vld [vmem:[#allocation5 + $0x20] sm:$0xff]  ;;  %v10242_v31 = vpop.permute.xlu1 %10241  ;;  %v10741_v60 = vld [vmem:[#allocation5 + $0x28] sm:$0xff] }
 0x824   : > { %10616 = vst.msk [vmem:[#allocation5 + $0x40] sm:$0xff] %vm10607_vm12, %v10240_v57  ;;  %12730 = vmatprep.mubr.msk.f32.mxu0 %vm10869_vm13, %v10740_v58  ;;  %10617 = vst.msk [vmem:[#allocation5 + $0x48] sm:$0xff] %vm10607_vm12, %v10242_v31  ;;  %v10013_v58 = vld [vmem:[#allocation4 + $0x21a] sm:$0xff] }
 0x825   : > { %10293 = vrot.lane.b32.xlu0 %v10002_v54, %s13126_s6  ;;  %12731 = vmatmul.mubr.msk.f32.gmra.mrb[4].mxu0 %vm10869_vm13, %v10741_v60  ;;  %v10073_v60 = vld [vmem:[#allocation4 + $0x472] sm:$0xff] }
 0x826   : > { %10413 = vrot.lane.b32.xlu1 %v10062_v59, %s13126_s6 }
 0x827   : > { %v10244_v29 = vpop.permute.xlu0 %10243  ;;  %v10742_v62 = vld [vmem:[#allocation5 + $0x30] sm:$0xff]  ;;  %v10246_v55 = vpop.permute.xlu1 %10245  ;;  %v10743_v0 = vld [vmem:[#allocation5 + $0x38] sm:$0xff] }
 0x828   : > { %10618 = vst.msk [vmem:[#allocation5 + $0x50] sm:$0xff] %vm10607_vm12, %v10244_v29  ;;  %12733 = vmatprep.mubr.msk.f32.mxu0 %vm10869_vm13, %v10742_v62  ;;  %10619 = vst.msk [vmem:[#allocation5 + $0x58] sm:$0xff] %vm10607_vm12, %v10246_v55  ;;  %v10014_v62 = vld [vmem:[#allocation4 + $0x222] sm:$0xff] }
 0x829   : > { %10295 = vrot.lane.b32.xlu0 %v10003_v61, %s13126_s6  ;;  %12734 = vmatmul.mubr.msk.f32.gmra.mrb[6].mxu0 %vm10869_vm13, %v10743_v0  ;;  %v10074_v0 = vld [vmem:[#allocation4 + $0x47a] sm:$0xff] }
 0x82a   : > { %10415 = vrot.lane.b32.xlu1 %v10063_v63, %s13126_s6 }
 0x82b   : > { %v10248_v2 = vpop.permute.xlu0 %10247  ;;  %v10744_v56 = vld [vmem:[#allocation5 + $0x40] sm:$0xff]  ;;  %v10250_v5 = vpop.permute.xlu1 %10249  ;;  %v10745_v30 = vld [vmem:[#allocation5 + $0x48] sm:$0xff] }
 0x82c   : > { %10620 = vst.msk [vmem:[#allocation5 + $0x60] sm:$0xff] %vm10607_vm12, %v10248_v2  ;;  %12736 = vmatprep.mubr.msk.f32.mxu0 %vm10869_vm13, %v10744_v56  ;;  %10621 = vst.msk [vmem:[#allocation5 + $0x68] sm:$0xff] %vm10607_vm12, %v10250_v5  ;;  %v10015_v56 = vld [vmem:[#allocation4 + $0x232] sm:$0xff] }
 0x82d   : > { %10297 = vrot.lane.b32.xlu0 %v10004_v1, %s13126_s6  ;;  %12737 = vmatmul.mubr.msk.f32.gmra.mrb[8].mxu0 %vm10869_vm13, %v10745_v30  ;;  %v10075_v30 = vld [vmem:[#allocation4 + $0x48a] sm:$0xff] }
 0x82e   : > { %10417 = vrot.lane.b32.xlu1 %v10064_v3, %s13126_s6 }
 0x82f   : > { %v10252_v45 = vpop.permute.xlu0 %10251  ;;  %v10746_v6 = vld [vmem:[#allocation5 + $0x50] sm:$0xff]  ;;  %v10254_v37 = vpop.permute.xlu1 %10253  ;;  %v10747_v23 = vld [vmem:[#allocation5 + $0x58] sm:$0xff] }
 0x830   : > { %10622 = vst.msk [vmem:[#allocation5 + $0x70] sm:$0xff] %vm10607_vm12, %v10252_v45  ;;  %12739 = vmatprep.mubr.msk.f32.mxu0 %vm10869_vm13, %v10746_v6  ;;  %10623 = vst.msk [vmem:[#allocation5 + $0x78] sm:$0xff] %vm10607_vm12, %v10254_v37  ;;  %v10016_v6 = vld [vmem:[#allocation4 + $0x23a] sm:$0xff] }
 0x831   : > { %10299 = vrot.lane.b32.xlu0 %v10005_v38, %s13126_s6  ;;  %12740 = vmatmul.mubr.msk.f32.gmra.mrb[10].mxu0 %vm10869_vm13, %v10747_v23  ;;  %v10076_v23 = vld [vmem:[#allocation4 + $0x492] sm:$0xff] }
 0x832   : > { %10419 = vrot.lane.b32.xlu1 %v10065_v32, %s13126_s6 }
 0x833   : > { %v10352_v48 = vpop.permute.xlu0 %10351  ;;  %v10748_v7 = vld [vmem:[#allocation5 + $0x60] sm:$0xff]  ;;  %v10354_v9 = vpop.permute.xlu1 %10353  ;;  %v10749_v10 = vld [vmem:[#allocation5 + $0x68] sm:$0xff] }
 0x834   : > { %10672 = vst.msk [vmem:[#allocation5 + $0x200] sm:$0xff] %vm10607_vm12, %v10352_v48  ;;  %12742 = vmatprep.mubr.msk.f32.mxu0 %vm10869_vm13, %v10748_v7  ;;  %10673 = vst.msk [vmem:[#allocation5 + $0x208] sm:$0xff] %vm10607_vm12, %v10354_v9  ;;  %v10017_v7 = vld [vmem:[#allocation4 + $0x242] sm:$0xff] }
 0x835   : > { %10301 = vrot.lane.b32.xlu0 %v10006_v33, %s13126_s6  ;;  %12743 = vmatmul.mubr.msk.f32.gmra.mrb[12].mxu0 %vm10869_vm13, %v10749_v10  ;;  %v10077_v10 = vld [vmem:[#allocation4 + $0x49a] sm:$0xff] }
 0x836   : > { %10421 = vrot.lane.b32.xlu1 %v10066_v8, %s13126_s6 }
 0x837   : > { %v10356_v35 = vpop.permute.xlu0 %10355  ;;  %v10750_v4 = vld [vmem:[#allocation5 + $0x70] sm:$0xff]  ;;  %v10358_v12 = vpop.permute.xlu1 %10357  ;;  %v10751_v13 = vld [vmem:[#allocation5 + $0x78] sm:$0xff] }
 0x838   : > { %10674 = vst.msk [vmem:[#allocation5 + $0x210] sm:$0xff] %vm10607_vm12, %v10356_v35  ;;  %12745 = vmatprep.mubr.msk.f32.mxu0 %vm10869_vm13, %v10750_v4  ;;  %10675 = vst.msk [vmem:[#allocation5 + $0x218] sm:$0xff] %vm10607_vm12, %v10358_v12  ;;  %v10018_v4 = vld [vmem:[#allocation4 + $0x24a] sm:$0xff] }
 0x839   : > { %10303 = vrot.lane.b32.xlu0 %v10007_v36, %s13126_s6  ;;  %12746 = vmatmul.mubr.msk.f32.gmra.mrb[14].mxu0 %vm10869_vm13, %v10751_v13  ;;  %v10078_v13 = vld [vmem:[#allocation4 + $0x4a2] sm:$0xff] }
 0x83a   : > { %10423 = vrot.lane.b32.xlu1 %v10067_v11, %s13126_s6 }
 0x83b   : > { %v10360_v14 = vpop.permute.xlu0 %10359  ;;  %v10800_v22 = vld [vmem:[#allocation5 + $0x200] sm:$0xff]  ;;  %v10362_v27 = vpop.permute.xlu1 %10361  ;;  %v10801_v15 = vld [vmem:[#allocation5 + $0x208] sm:$0xff] }
 0x83c   : > { %10676 = vst.msk [vmem:[#allocation5 + $0x220] sm:$0xff] %vm10607_vm12, %v10360_v14  ;;  %12820 = vmatprep.mubr.msk.f32.mxu1 %vm10869_vm13, %v10800_v22  ;;  %10677 = vst.msk [vmem:[#allocation5 + $0x228] sm:$0xff] %vm10607_vm12, %v10362_v27  ;;  %v10019_v22 = vld [vmem:[#allocation4 + $0x25a] sm:$0xff] }
 0x83d   : > { %10305 = vrot.lane.b32.xlu0 %v10008_v46, %s13126_s6  ;;  %12821 = vmatmul.mubr.msk.f32.vlgmr.msra.gmra.mrb[0].mxu1 %vm10869_vm13, %v10801_v15  ;;  %v10079_v15 = vld [vmem:[#allocation4 + $0x4b2] sm:$0xff] }
 0x83e   : > { %10425 = vrot.lane.b32.xlu1 %v10068_v39, %s13126_s6 }
 0x83f   : > { %v10364_v18 = vpop.permute.xlu0 %10363  ;;  %v10802_v19 = vld [vmem:[#allocation5 + $0x210] sm:$0xff]  ;;  %v10366_v24 = vpop.permute.xlu1 %10365  ;;  %v10803_v40 = vld [vmem:[#allocation5 + $0x218] sm:$0xff] }
 0x840   : > { %10678 = vst.msk [vmem:[#allocation5 + $0x230] sm:$0xff] %vm10607_vm12, %v10364_v18  ;;  %12823 = vmatprep.mubr.msk.f32.mxu1 %vm10869_vm13, %v10802_v19  ;;  %10679 = vst.msk [vmem:[#allocation5 + $0x238] sm:$0xff] %vm10607_vm12, %v10366_v24  ;;  %v10020_v19 = vld [vmem:[#allocation4 + $0x262] sm:$0xff] }
 0x841   : > { %10307 = vrot.lane.b32.xlu0 %v10009_v17, %s13126_s6  ;;  %12824 = vmatmul.mubr.msk.f32.gmra.mrb[2].mxu1 %vm10869_vm13, %v10803_v40  ;;  %v10080_v40 = vld [vmem:[#allocation4 + $0x4ba] sm:$0xff] }
 0x842   : > { %10427 = vrot.lane.b32.xlu1 %v10069_v20, %s13126_s6 }
 0x843   : > { %v10368_v21 = vpop.permute.xlu0 %10367  ;;  %v10804_v26 = vld [vmem:[#allocation5 + $0x220] sm:$0xff]  ;;  %v10370_v44 = vpop.permute.xlu1 %10369  ;;  %v10805_v49 = vld [vmem:[#allocation5 + $0x228] sm:$0xff] }
 0x844   : > { %10680 = vst.msk [vmem:[#allocation5 + $0x240] sm:$0xff] %vm10607_vm12, %v10368_v21  ;;  %12826 = vmatprep.mubr.msk.f32.mxu1 %vm10869_vm13, %v10804_v26  ;;  %10681 = vst.msk [vmem:[#allocation5 + $0x248] sm:$0xff] %vm10607_vm12, %v10370_v44  ;;  %v10021_v26 = vld [vmem:[#allocation4 + $0x26a] sm:$0xff] }
 0x845   : > { %10309 = vrot.lane.b32.xlu0 %v10010_v41, %s13126_s6  ;;  %12827 = vmatmul.mubr.msk.f32.gmra.mrb[4].mxu1 %vm10869_vm13, %v10805_v49  ;;  %v10081_v49 = vld [vmem:[#allocation4 + $0x4c2] sm:$0xff] }
 0x846   : > { %10429 = vrot.lane.b32.xlu1 %v10070_v42, %s13126_s6 }
 0x847   : > { %v10372_v51 = vpop.permute.xlu0 %10371  ;;  %v10806_v52 = vld [vmem:[#allocation5 + $0x230] sm:$0xff]  ;;  %v10807_v53 = vld [vmem:[#allocation5 + $0x238] sm:$0xff]  ;;  %v10374_v16 = vpop.permute.xlu1 %10373 }
 0x848   : > { %10682 = vst.msk [vmem:[#allocation5 + $0x250] sm:$0xff] %vm10607_vm12, %v10372_v51  ;;  %12829 = vmatprep.mubr.msk.f32.mxu1 %vm10869_vm13, %v10806_v52  ;;  %10683 = vst.msk [vmem:[#allocation5 + $0x258] sm:$0xff] %vm10607_vm12, %v10374_v16  ;;  %v10022_v52 = vld [vmem:[#allocation4 + $0x272] sm:$0xff]  ;;  %v10082_v16 = vld [vmem:[#allocation4 + $0x4ca] sm:$0xff] }
 0x849   : > { %10311 = vrot.lane.b32.xlu0 %v10011_v50, %s13126_s6  ;;  %12830 = vmatmul.mubr.msk.f32.gmra.mrb[6].mxu1 %vm10869_vm13, %v10807_v53 }
 0x84a   : > { %10431 = vrot.lane.b32.xlu1 %v10071_v47, %s13126_s6 }
 0x84b   : > { %v10256_v25 = vpop.permute.xlu0 %10255  ;;  %v10808_v28 = vld [vmem:[#allocation5 + $0x240] sm:$0xff]  ;;  %v10809_v54 = vld [vmem:[#allocation5 + $0x248] sm:$0xff]  ;;  %v10376_v57 = vpop.permute.xlu1 %10375 }
 0x84c   : > { %10624 = vst.msk [vmem:[#allocation5 + $0x80] sm:$0xff] %vm10607_vm12, %v10256_v25  ;;  %12832 = vmatprep.mubr.msk.f32.mxu1 %vm10869_vm13, %v10808_v28  ;;  %10684 = vst.msk [vmem:[#allocation5 + $0x260] sm:$0xff] %vm10607_vm12, %v10376_v57  ;;  %v10023_v28 = vld [vmem:[#allocation4 + $0x282] sm:$0xff]  ;;  %v10083_v57 = vld [vmem:[#allocation4 + $0x4da] sm:$0xff] }
 0x84d   : > { %10313 = vrot.lane.b32.xlu0 %v10012_v43, %s13126_s6  ;;  %12833 = vmatmul.mubr.msk.f32.gmra.mrb[8].mxu1 %vm10869_vm13, %v10809_v54 }
 0x84e   : > { %10433 = vrot.lane.b32.xlu1 %v10072_v34, %s13126_s6 }
 0x84f   : > { %v10258_v59 = vpop.permute.xlu0 %10257  ;;  %v10810_v31 = vld [vmem:[#allocation5 + $0x250] sm:$0xff]  ;;  %v10378_v61 = vpop.permute.xlu1 %10377  ;;  %v10811_v29 = vld [vmem:[#allocation5 + $0x258] sm:$0xff] }
 0x850   : > { %10625 = vst.msk [vmem:[#allocation5 + $0x88] sm:$0xff] %vm10607_vm12, %v10258_v59  ;;  %12835 = vmatprep.mubr.msk.f32.mxu1 %vm10869_vm13, %v10810_v31  ;;  %10685 = vst.msk [vmem:[#allocation5 + $0x268] sm:$0xff] %vm10607_vm12, %v10378_v61  ;;  %v10024_v31 = vld [vmem:[#allocation4 + $0x28a] sm:$0xff] }
 0x851   : > { %10315 = vrot.lane.b32.xlu0 %v10013_v58, %s13126_s6  ;;  %12836 = vmatmul.mubr.msk.f32.gmra.mrb[10].mxu1 %vm10869_vm13, %v10811_v29  ;;  %v10084_v29 = vld [vmem:[#allocation4 + $0x4e2] sm:$0xff] }
 0x852   : > { %10435 = vrot.lane.b32.xlu1 %v10073_v60, %s13126_s6 }
 0x853   : > { %v10260_v63 = vpop.permute.xlu0 %10259  ;;  %v10752_v55 = vld [vmem:[#allocation5 + $0x80] sm:$0xff]  ;;  %v10380_v1 = vpop.permute.xlu1 %10379 }
 0x854   : > { %10626 = vst.msk [vmem:[#allocation5 + $0x90] sm:$0xff] %vm10607_vm12, %v10260_v63  ;;  %12748 = vmatprep.mubr.msk.f32.mxu0 %vm10869_vm13, %v10752_v55  ;;  %v10812_v2 = vld [vmem:[#allocation5 + $0x260] sm:$0xff]  ;;  %10686 = vst.msk [vmem:[#allocation5 + $0x270] sm:$0xff] %vm10607_vm12, %v10380_v1 }
 0x855   : > { %10317 = vrot.lane.b32.xlu0 %v10014_v62, %s13126_s6  ;;  %12838 = vmatprep.mubr.msk.f32.mxu1 %vm10869_vm13, %v10812_v2  ;;  %v10025_v55 = vld [vmem:[#allocation4 + $0x292] sm:$0xff]  ;;  %v10085_v2 = vld [vmem:[#allocation4 + $0x4ea] sm:$0xff] }
 0x856   : > { %10437 = vrot.lane.b32.xlu1 %v10074_v0, %s13126_s6 }
 0x857   : > { %v10262_v3 = vpop.permute.xlu0 %10261  ;;  %v10753_v5 = vld [vmem:[#allocation5 + $0x88] sm:$0xff]  ;;  %v10382_v38 = vpop.permute.xlu1 %10381 }
 0x858   : > { %10627 = vst.msk [vmem:[#allocation5 + $0x98] sm:$0xff] %vm10607_vm12, %v10262_v3  ;;  %12749 = vmatmul.mubr.msk.f32.gmra.mrb[16].mxu0 %vm10869_vm13, %v10753_v5  ;;  %v10813_v45 = vld [vmem:[#allocation5 + $0x268] sm:$0xff]  ;;  %10687 = vst.msk [vmem:[#allocation5 + $0x278] sm:$0xff] %vm10607_vm12, %v10382_v38 }
 0x859   : > { %10319 = vrot.lane.b32.xlu0 %v10015_v56, %s13126_s6  ;;  %12839 = vmatmul.mubr.msk.f32.gmra.mrb[12].mxu1 %vm10869_vm13, %v10813_v45  ;;  %v10026_v5 = vld [vmem:[#allocation4 + $0x29a] sm:$0xff]  ;;  %v10086_v45 = vld [vmem:[#allocation4 + $0x4f2] sm:$0xff] }
 0x85a   : > { %10439 = vrot.lane.b32.xlu1 %v10075_v30, %s13126_s6 }
 0x85b   : > { %v10264_v32 = vpop.permute.xlu0 %10263  ;;  %v10754_v37 = vld [vmem:[#allocation5 + $0x90] sm:$0xff]  ;;  %v10384_v33 = vpop.permute.xlu1 %10383 }
 0x85c   : > { %10628 = vst.msk [vmem:[#allocation5 + $0xa0] sm:$0xff] %vm10607_vm12, %v10264_v32  ;;  %12751 = vmatprep.mubr.msk.f32.mxu0 %vm10869_vm13, %v10754_v37  ;;  %v10814_v48 = vld [vmem:[#allocation5 + $0x270] sm:$0xff]  ;;  %10688 = vst.msk [vmem:[#allocation5 + $0x280] sm:$0xff] %vm10607_vm12, %v10384_v33  ;;  %v10027_v37 = vld [vmem:[#allocation4 + $0x2aa] sm:$0xff] }
 0x85d   : > { %10321 = vrot.lane.b32.xlu0 %v10016_v6, %s13126_s6  ;;  %12841 = vmatprep.mubr.msk.f32.mxu1 %vm10869_vm13, %v10814_v48  ;;  %v10087_v48 = vld [vmem:[#allocation4 + $0x502] sm:$0xff] }
 0x85e   : > { %10441 = vrot.lane.b32.xlu1 %v10076_v23, %s13126_s6 }
 0x85f   : > { %v10266_v8 = vpop.permute.xlu0 %10265  ;;  %v10755_v9 = vld [vmem:[#allocation5 + $0x98] sm:$0xff]  ;;  %v10386_v36 = vpop.permute.xlu1 %10385 }
 0x860   : > { %10629 = vst.msk [vmem:[#allocation5 + $0xa8] sm:$0xff] %vm10607_vm12, %v10266_v8  ;;  %12752 = vmatmul.mubr.msk.f32.gmra.mrb[18].mxu0 %vm10869_vm13, %v10755_v9  ;;  %v10815_v35 = vld [vmem:[#allocation5 + $0x278] sm:$0xff]  ;;  %10689 = vst.msk [vmem:[#allocation5 + $0x288] sm:$0xff] %vm10607_vm12, %v10386_v36  ;;  %v10028_v9 = vld [vmem:[#allocation4 + $0x2b2] sm:$0xff] }
 0x861   : > { %10323 = vrot.lane.b32.xlu0 %v10017_v7, %s13126_s6  ;;  %12842 = vmatmul.mubr.msk.f32.gmra.mrb[14].mxu1 %vm10869_vm13, %v10815_v35  ;;  %v10088_v35 = vld [vmem:[#allocation4 + $0x50a] sm:$0xff] }
 0x862   : > { %10443 = vrot.lane.b32.xlu1 %v10077_v10, %s13126_s6 }
 0x863   : > { %v10268_v11 = vpop.permute.xlu0 %10267  ;;  %v10756_v12 = vld [vmem:[#allocation5 + $0xa0] sm:$0xff]  ;;  %v10388_v46 = vpop.permute.xlu1 %10387 }
 0x864   : > { %10630 = vst.msk [vmem:[#allocation5 + $0xb0] sm:$0xff] %vm10607_vm12, %v10268_v11  ;;  %12754 = vmatprep.mubr.msk.f32.mxu0 %vm10869_vm13, %v10756_v12  ;;  %v10816_v14 = vld [vmem:[#allocation5 + $0x280] sm:$0xff]  ;;  %10690 = vst.msk [vmem:[#allocation5 + $0x290] sm:$0xff] %vm10607_vm12, %v10388_v46  ;;  %v10029_v12 = vld [vmem:[#allocation4 + $0x2ba] sm:$0xff] }
 0x865   : > { %10325 = vrot.lane.b32.xlu0 %v10018_v4, %s13126_s6  ;;  %12844 = vmatprep.mubr.msk.f32.mxu1 %vm10869_vm13, %v10816_v14  ;;  %v10089_v14 = vld [vmem:[#allocation4 + $0x512] sm:$0xff] }
 0x866   : > { %10445 = vrot.lane.b32.xlu1 %v10078_v13, %s13126_s6 }
 0x867   : > { %v10270_v39 = vpop.permute.xlu0 %10269  ;;  %v10757_v27 = vld [vmem:[#allocation5 + $0xa8] sm:$0xff]  ;;  %v10390_v17 = vpop.permute.xlu1 %10389 }
 0x868   : > { %10631 = vst.msk [vmem:[#allocation5 + $0xb8] sm:$0xff] %vm10607_vm12, %v10270_v39  ;;  %12755 = vmatmul.mubr.msk.f32.gmra.mrb[20].mxu0 %vm10869_vm13, %v10757_v27  ;;  %v10817_v18 = vld [vmem:[#allocation5 + $0x288] sm:$0xff]  ;;  %10691 = vst.msk [vmem:[#allocation5 + $0x298] sm:$0xff] %vm10607_vm12, %v10390_v17  ;;  %v10030_v27 = vld [vmem:[#allocation4 + $0x2c2] sm:$0xff] }
 0x869   : > { %10327 = vrot.lane.b32.xlu0 %v10019_v22, %s13126_s6  ;;  %12845 = vmatmul.mubr.msk.f32.gmra.mrb[16].mxu1 %vm10869_vm13, %v10817_v18  ;;  %v10090_v18 = vld [vmem:[#allocation4 + $0x51a] sm:$0xff] }
 0x86a   : > { %10447 = vrot.lane.b32.xlu1 %v10079_v15, %s13126_s6 }
 0x86b   : > { %v10272_v20 = vpop.permute.xlu0 %10271  ;;  %v10758_v24 = vld [vmem:[#allocation5 + $0xb0] sm:$0xff]  ;;  %v10392_v41 = vpop.permute.xlu1 %10391 }
 0x86c   : > { %10632 = vst.msk [vmem:[#allocation5 + $0xc0] sm:$0xff] %vm10607_vm12, %v10272_v20  ;;  %12757 = vmatprep.mubr.msk.f32.mxu0 %vm10869_vm13, %v10758_v24  ;;  %v10818_v21 = vld [vmem:[#allocation5 + $0x290] sm:$0xff]  ;;  %10692 = vst.msk [vmem:[#allocation5 + $0x2a0] sm:$0xff] %vm10607_vm12, %v10392_v41  ;;  %v10091_v24 = vld [vmem:[#allocation4 + $0x52a] sm:$0xff] }
 0x86d   : > { %10329 = vrot.lane.b32.xlu0 %v10020_v19, %s13126_s6  ;;  %12847 = vmatprep.mubr.msk.f32.mxu1 %vm10869_vm13, %v10818_v21  ;;  %v10092_v21 = vld [vmem:[#allocation4 + $0x532] sm:$0xff] }
 0x86e   : > { %10449 = vrot.lane.b32.xlu1 %v10080_v40, %s13126_s6 }
 0x86f   : > { %v10274_v42 = vpop.permute.xlu0 %10273  ;;  %v10759_v44 = vld [vmem:[#allocation5 + $0xb8] sm:$0xff]  ;;  %v10394_v50 = vpop.permute.xlu1 %10393 }
 0x870   : > { %10633 = vst.msk [vmem:[#allocation5 + $0xc8] sm:$0xff] %vm10607_vm12, %v10274_v42  ;;  %12758 = vmatmul.mubr.msk.f32.gmra.mrb[22].mxu0 %vm10869_vm13, %v10759_v44  ;;  %v10819_v51 = vld [vmem:[#allocation5 + $0x298] sm:$0xff]  ;;  %10693 = vst.msk [vmem:[#allocation5 + $0x2a8] sm:$0xff] %vm10607_vm12, %v10394_v50  ;;  %v10093_v44 = vld [vmem:[#allocation4 + $0x53a] sm:$0xff] }
 0x871   : > { %10331 = vrot.lane.b32.xlu0 %v10021_v26, %s13126_s6  ;;  %12848 = vmatmul.mubr.msk.f32.gmra.mrb[18].mxu1 %vm10869_vm13, %v10819_v51  ;;  %v10094_v51 = vld [vmem:[#allocation4 + $0x542] sm:$0xff] }
 0x872   : > { %10451 = vrot.lane.b32.xlu1 %v10081_v49, %s13126_s6 }
 0x873   : > { %v10276_v47 = vpop.permute.xlu0 %10275  ;;  %v10760_v53 = vld [vmem:[#allocation5 + $0xc0] sm:$0xff]  ;;  %v10396_v43 = vpop.permute.xlu1 %10395 }
 0x874   : > { %10634 = vst.msk [vmem:[#allocation5 + $0xd0] sm:$0xff] %vm10607_vm12, %v10276_v47  ;;  %12760 = vmatprep.mubr.msk.f32.mxu0 %vm10869_vm13, %v10760_v53  ;;  %v10820_v25 = vld [vmem:[#allocation5 + $0x2a0] sm:$0xff]  ;;  %10694 = vst.msk [vmem:[#allocation5 + $0x2b0] sm:$0xff] %vm10607_vm12, %v10396_v43 }
 0x875   : > { %10333 = vrot.lane.b32.xlu0 %v10022_v52, %s13126_s6  ;;  %12850 = vmatprep.mubr.msk.f32.mxu1 %vm10869_vm13, %v10820_v25 }
 0x876   : > { %10453 = vrot.lane.b32.xlu1 %v10082_v16, %s13126_s6 }
 0x877   : > { %v10278_v34 = vpop.permute.xlu0 %10277  ;;  %v10761_v54 = vld [vmem:[#allocation5 + $0xc8] sm:$0xff]  ;;  %v10398_v58 = vpop.permute.xlu1 %10397 }
 0x878   : > { %10635 = vst.msk [vmem:[#allocation5 + $0xd8] sm:$0xff] %vm10607_vm12, %v10278_v34  ;;  %12761 = vmatmul.mubr.msk.f32.gmra.mrb[24].mxu0 %vm10869_vm13, %v10761_v54  ;;  %v10821_v59 = vld [vmem:[#allocation5 + $0x2a8] sm:$0xff]  ;;  %10695 = vst.msk [vmem:[#allocation5 + $0x2b8] sm:$0xff] %vm10607_vm12, %v10398_v58 }
 0x879   : > { %10335 = vrot.lane.b32.xlu0 %v10023_v28, %s13126_s6  ;;  %12851 = vmatmul.mubr.msk.f32.gmra.mrb[20].mxu1 %vm10869_vm13, %v10821_v59 }
 0x87a   : > { %10455 = vrot.lane.b32.xlu1 %v10083_v57, %s13126_s6 }
 0x87b   : > { %v10280_v60 = vpop.permute.xlu0 %10279  ;;  %v10762_v61 = vld [vmem:[#allocation5 + $0xd0] sm:$0xff]  ;;  %v10400_v62 = vpop.permute.xlu1 %10399 }
 0x87c   : > { %10636 = vst.msk [vmem:[#allocation5 + $0xe0] sm:$0xff] %vm10607_vm12, %v10280_v60  ;;  %12763 = vmatprep.mubr.msk.f32.mxu0 %vm10869_vm13, %v10762_v61  ;;  %v10822_v63 = vld [vmem:[#allocation5 + $0x2b0] sm:$0xff]  ;;  %10696 = vst.msk [vmem:[#allocation5 + $0x2c0] sm:$0xff] %vm10607_vm12, %v10400_v62 }
 0x87d   : > { %10337 = vrot.lane.b32.xlu0 %v10024_v31, %s13126_s6  ;;  %12853 = vmatprep.mubr.msk.f32.mxu1 %vm10869_vm13, %v10822_v63 }
 0x87e   : > { %10457 = vrot.lane.b32.xlu1 %v10084_v29, %s13126_s6 }
 0x87f   : > { %v10282_v0 = vpop.permute.xlu0 %10281  ;;  %v10763_v1 = vld [vmem:[#allocation5 + $0xd8] sm:$0xff]  ;;  %v10402_v56 = vpop.permute.xlu1 %10401 }
 0x880   : > { %10637 = vst.msk [vmem:[#allocation5 + $0xe8] sm:$0xff] %vm10607_vm12, %v10282_v0  ;;  %12764 = vmatmul.mubr.msk.f32.gmra.mrb[26].mxu0 %vm10869_vm13, %v10763_v1  ;;  %v10823_v3 = vld [vmem:[#allocation5 + $0x2b8] sm:$0xff]  ;;  %10697 = vst.msk [vmem:[#allocation5 + $0x2c8] sm:$0xff] %vm10607_vm12, %v10402_v56 }
 0x881   : > { %10339 = vrot.lane.b32.xlu0 %v10025_v55, %s13126_s6  ;;  %12854 = vmatmul.mubr.msk.f32.gmra.mrb[22].mxu1 %vm10869_vm13, %v10823_v3 }
 0x882   : > { %10459 = vrot.lane.b32.xlu1 %v10085_v2, %s13126_s6 }
 0x883   : > { %v10284_v30 = vpop.permute.xlu0 %10283  ;;  %v10764_v38 = vld [vmem:[#allocation5 + $0xe0] sm:$0xff]  ;;  %v10404_v6 = vpop.permute.xlu1 %10403 }
 0x884   : > { %10638 = vst.msk [vmem:[#allocation5 + $0xf0] sm:$0xff] %vm10607_vm12, %v10284_v30  ;;  %12766 = vmatprep.mubr.msk.f32.mxu0 %vm10869_vm13, %v10764_v38  ;;  %v10824_v32 = vld [vmem:[#allocation5 + $0x2c0] sm:$0xff]  ;;  %10698 = vst.msk [vmem:[#allocation5 + $0x2d0] sm:$0xff] %vm10607_vm12, %v10404_v6 }
 0x885   : > { %10341 = vrot.lane.b32.xlu0 %v10026_v5, %s13126_s6  ;;  %12856 = vmatprep.mubr.msk.f32.mxu1 %vm10869_vm13, %v10824_v32 }
 0x886   : > { %10461 = vrot.lane.b32.xlu1 %v10086_v45, %s13126_s6 }
 0x887   : > { %v10286_v23 = vpop.permute.xlu0 %10285  ;;  %v10765_v33 = vld [vmem:[#allocation5 + $0xe8] sm:$0xff]  ;;  %v10406_v7 = vpop.permute.xlu1 %10405 }
 0x888   : > { %10639 = vst.msk [vmem:[#allocation5 + $0xf8] sm:$0xff] %vm10607_vm12, %v10286_v23  ;;  %12767 = vmatmul.mubr.msk.f32.gmra.mrb[28].mxu0 %vm10869_vm13, %v10765_v33  ;;  %v10825_v8 = vld [vmem:[#allocation5 + $0x2c8] sm:$0xff]  ;;  %10699 = vst.msk [vmem:[#allocation5 + $0x2d8] sm:$0xff] %vm10607_vm12, %v10406_v7 }
 0x889   : > { %10343 = vrot.lane.b32.xlu0 %v10027_v37, %s13126_s6  ;;  %12857 = vmatmul.mubr.msk.f32.gmra.mrb[24].mxu1 %vm10869_vm13, %v10825_v8 }
 0x88a   : > { %10463 = vrot.lane.b32.xlu1 %v10087_v48, %s13126_s6 }
 0x88b   : > { %v10288_v10 = vpop.permute.xlu0 %10287  ;;  %v10766_v36 = vld [vmem:[#allocation5 + $0xf0] sm:$0xff]  ;;  %v10408_v4 = vpop.permute.xlu1 %10407 }
 0x88c   : > { %10640 = vst.msk [vmem:[#allocation5 + $0x100] sm:$0xff] %vm10607_vm12, %v10288_v10  ;;  %12769 = vmatprep.mubr.msk.f32.mxu0 %vm10869_vm13, %v10766_v36  ;;  %v10826_v11 = vld [vmem:[#allocation5 + $0x2d0] sm:$0xff]  ;;  %10700 = vst.msk [vmem:[#allocation5 + $0x2e0] sm:$0xff] %vm10607_vm12, %v10408_v4 }
 0x88d   : > { %10345 = vrot.lane.b32.xlu0 %v10028_v9, %s13126_s6  ;;  %12859 = vmatprep.mubr.msk.f32.mxu1 %vm10869_vm13, %v10826_v11 }
 0x88e   : > { %10465 = vrot.lane.b32.xlu1 %v10088_v35, %s13126_s6 }
 0x88f   : > { %v10290_v13 = vpop.permute.xlu0 %10289  ;;  %v10767_v46 = vld [vmem:[#allocation5 + $0xf8] sm:$0xff] }
 0x890   : > { %10641 = vst.msk [vmem:[#allocation5 + $0x108] sm:$0xff] %vm10607_vm12, %v10290_v13  ;;  %12770 = vmatmul.mubr.msk.f32.gmra.mrb[30].mxu0 %vm10869_vm13, %v10767_v46  ;;  %v10410_v22 = vpop.permute.xlu1 %10409  ;;  %v10827_v39 = vld [vmem:[#allocation5 + $0x2d8] sm:$0xff] }
 0x891   : > { %10347 = vrot.lane.b32.xlu0 %v10029_v12, %s13126_s6  ;;  %10701 = vst.msk [vmem:[#allocation5 + $0x2e8] sm:$0xff] %vm10607_vm12, %v10410_v22  ;;  %12860 = vmatmul.mubr.msk.f32.gmra.mrb[26].mxu1 %vm10869_vm13, %v10827_v39 }
 0x892   : > { %10467 = vrot.lane.b32.xlu1 %v10089_v14, %s13126_s6 }
 0x893   : > { %v10292_v15 = vpop.permute.xlu0 %10291  ;;  %v10768_v17 = vld [vmem:[#allocation5 + $0x100] sm:$0xff] }
 0x894   : > { %10642 = vst.msk [vmem:[#allocation5 + $0x110] sm:$0xff] %vm10607_vm12, %v10292_v15  ;;  %12772 = vmatprep.mubr.msk.f32.mxu0 %vm10869_vm13, %v10768_v17  ;;  %v10412_v19 = vpop.permute.xlu1 %10411  ;;  %v10828_v20 = vld [vmem:[#allocation5 + $0x2e0] sm:$0xff] }
 0x895   : > { %10349 = vrot.lane.b32.xlu0 %v10030_v27, %s13126_s6  ;;  %10702 = vst.msk [vmem:[#allocation5 + $0x2f0] sm:$0xff] %vm10607_vm12, %v10412_v19  ;;  %12862 = vmatprep.mubr.msk.f32.mxu1 %vm10869_vm13, %v10828_v20 }
 0x896   : > { %10469 = vrot.lane.b32.xlu1 %v10090_v18, %s13126_s6 }
 0x897   : > { %v10294_v40 = vpop.permute.xlu0 %10293  ;;  %v10769_v41 = vld [vmem:[#allocation5 + $0x108] sm:$0xff] }
 0x898   : > { %10643 = vst.msk [vmem:[#allocation5 + $0x118] sm:$0xff] %vm10607_vm12, %v10294_v40  ;;  %12773 = vmatmul.mubr.msk.f32.gmra.mrb[32].mxu0 %vm10869_vm13, %v10769_v41  ;;  %v10414_v26 = vpop.permute.xlu1 %10413  ;;  %v10829_v42 = vld [vmem:[#allocation5 + $0x2e8] sm:$0xff] }
 0x899   : > { %10703 = vst.msk [vmem:[#allocation5 + $0x2f8] sm:$0xff] %vm10607_vm12, %v10414_v26  ;;  %12863 = vmatmul.mubr.msk.f32.gmra.mrb[28].mxu1 %vm10869_vm13, %v10829_v42  ;;  %10471 = vrot.lane.b32.xlu0 %v10091_v24, %s13126_s6 }
 0x89a   : > { %10473 = vrot.lane.b32.xlu1 %v10092_v21, %s13126_s6 }
 0x89b   : > { %v10296_v49 = vpop.permute.xlu0 %10295  ;;  %v10770_v50 = vld [vmem:[#allocation5 + $0x110] sm:$0xff] }
 0x89c   : > { %10644 = vst.msk [vmem:[#allocation5 + $0x120] sm:$0xff] %vm10607_vm12, %v10296_v49  ;;  %12775 = vmatprep.mubr.msk.f32.mxu0 %vm10869_vm13, %v10770_v50  ;;  %v10416_v52 = vpop.permute.xlu1 %10415  ;;  %v10830_v47 = vld [vmem:[#allocation5 + $0x2f0] sm:$0xff] }
 0x89d   : > { %10704 = vst.msk [vmem:[#allocation5 + $0x300] sm:$0xff] %vm10607_vm12, %v10416_v52  ;;  %12865 = vmatprep.mubr.msk.f32.mxu1 %vm10869_vm13, %v10830_v47  ;;  %10475 = vrot.lane.b32.xlu0 %v10093_v44, %s13126_s6 }
 0x89e   : > { %10477 = vrot.lane.b32.xlu1 %v10094_v51, %s13126_s6 }
 0x89f   : > { %v10298_v53 = vpop.permute.xlu0 %10297  ;;  %v10771_v16 = vld [vmem:[#allocation5 + $0x118] sm:$0xff] }
 0x8a0   : > { %10645 = vst.msk [vmem:[#allocation5 + $0x128] sm:$0xff] %vm10607_vm12, %v10298_v53  ;;  %12776 = vmatmul.mubr.msk.f32.gmra.mrb[34].mxu0 %vm10869_vm13, %v10771_v16  ;;  %v10418_v43 = vpop.permute.xlu1 %10417  ;;  %v10831_v25 = vld [vmem:[#allocation5 + $0x2f8] sm:$0xff] }
 0x8a1   : > { %10705 = vst.msk [vmem:[#allocation5 + $0x308] sm:$0xff] %vm10607_vm12, %v10418_v43  ;;  %12866 = vmatmul.mubr.msk.f32.gmra.mrb[30].mxu1 %vm10869_vm13, %v10831_v25 }
 0x8a3   : > { %v10300_v28 = vpop.permute.xlu0 %10299  ;;  %v10772_v34 = vld [vmem:[#allocation5 + $0x120] sm:$0xff] }
 0x8a4   : > { %10646 = vst.msk [vmem:[#allocation5 + $0x130] sm:$0xff] %vm10607_vm12, %v10300_v28  ;;  %12778 = vmatprep.mubr.msk.f32.mxu0 %vm10869_vm13, %v10772_v34  ;;  %v10420_v54 = vpop.permute.xlu1 %10419  ;;  %v10832_v57 = vld [vmem:[#allocation5 + $0x300] sm:$0xff] }
 0x8a5   : > { %10706 = vst.msk [vmem:[#allocation5 + $0x310] sm:$0xff] %vm10607_vm12, %v10420_v54  ;;  %12868 = vmatprep.mubr.msk.f32.mxu1 %vm10869_vm13, %v10832_v57 }
 0x8a7   : > { %v10302_v58 = vpop.permute.xlu0 %10301  ;;  %v10773_v59 = vld [vmem:[#allocation5 + $0x128] sm:$0xff] }
 0x8a8   : > { %10647 = vst.msk [vmem:[#allocation5 + $0x138] sm:$0xff] %vm10607_vm12, %v10302_v58  ;;  %12779 = vmatmul.mubr.msk.f32.gmra.mrb[36].mxu0 %vm10869_vm13, %v10773_v59  ;;  %v10422_v31 = vpop.permute.xlu1 %10421  ;;  %v10833_v60 = vld [vmem:[#allocation5 + $0x308] sm:$0xff] }
 0x8a9   : > { %10707 = vst.msk [vmem:[#allocation5 + $0x318] sm:$0xff] %vm10607_vm12, %v10422_v31  ;;  %12869 = vmatmul.mubr.msk.f32.gmra.mrb[32].mxu1 %vm10869_vm13, %v10833_v60 }
 0x8ab   : > { %v10304_v61 = vpop.permute.xlu0 %10303  ;;  %v10774_v29 = vld [vmem:[#allocation5 + $0x130] sm:$0xff] }
 0x8ac   : > { %10648 = vst.msk [vmem:[#allocation5 + $0x140] sm:$0xff] %vm10607_vm12, %v10304_v61  ;;  %12781 = vmatprep.mubr.msk.f32.mxu0 %vm10869_vm13, %v10774_v29  ;;  %v10424_v62 = vpop.permute.xlu1 %10423  ;;  %v10834_v63 = vld [vmem:[#allocation5 + $0x310] sm:$0xff] }
 0x8ad   : > { %10708 = vst.msk [vmem:[#allocation5 + $0x320] sm:$0xff] %vm10607_vm12, %v10424_v62  ;;  %12871 = vmatprep.mubr.msk.f32.mxu1 %vm10869_vm13, %v10834_v63 }
 0x8af   : > { %v10306_v55 = vpop.permute.xlu0 %10305  ;;  %v10775_v0 = vld [vmem:[#allocation5 + $0x138] sm:$0xff] }
 0x8b0   : > { %10649 = vst.msk [vmem:[#allocation5 + $0x148] sm:$0xff] %vm10607_vm12, %v10306_v55  ;;  %12782 = vmatmul.mubr.msk.f32.gmra.mrb[38].mxu0 %vm10869_vm13, %v10775_v0  ;;  %v10426_v1 = vpop.permute.xlu1 %10425  ;;  %v10835_v2 = vld [vmem:[#allocation5 + $0x318] sm:$0xff] }
 0x8b1   : > { %10709 = vst.msk [vmem:[#allocation5 + $0x328] sm:$0xff] %vm10607_vm12, %v10426_v1  ;;  %12872 = vmatmul.mubr.msk.f32.gmra.mrb[34].mxu1 %vm10869_vm13, %v10835_v2 }
 0x8b3   : > { %v10308_v56 = vpop.permute.xlu0 %10307  ;;  %v10776_v3 = vld [vmem:[#allocation5 + $0x140] sm:$0xff] }
 0x8b4   : > { %10650 = vst.msk [vmem:[#allocation5 + $0x150] sm:$0xff] %vm10607_vm12, %v10308_v56  ;;  %12784 = vmatprep.mubr.msk.f32.mxu0 %vm10869_vm13, %v10776_v3  ;;  %v10428_v5 = vpop.permute.xlu1 %10427  ;;  %v10836_v30 = vld [vmem:[#allocation5 + $0x320] sm:$0xff] }
 0x8b5   : > { %10710 = vst.msk [vmem:[#allocation5 + $0x330] sm:$0xff] %vm10607_vm12, %v10428_v5  ;;  %12874 = vmatprep.mubr.msk.f32.mxu1 %vm10869_vm13, %v10836_v30 }
 0x8b7   : > { %v10310_v38 = vpop.permute.xlu0 %10309  ;;  %v10777_v45 = vld [vmem:[#allocation5 + $0x148] sm:$0xff] }
 0x8b8   : > { %10651 = vst.msk [vmem:[#allocation5 + $0x158] sm:$0xff] %vm10607_vm12, %v10310_v38  ;;  %12785 = vmatmul.mubr.msk.f32.gmra.mrb[40].mxu0 %vm10869_vm13, %v10777_v45  ;;  %v10430_v6 = vpop.permute.xlu1 %10429  ;;  %v10837_v32 = vld [vmem:[#allocation5 + $0x328] sm:$0xff] }
 0x8b9   : > { %10711 = vst.msk [vmem:[#allocation5 + $0x338] sm:$0xff] %vm10607_vm12, %v10430_v6  ;;  %12875 = vmatmul.mubr.msk.f32.gmra.mrb[36].mxu1 %vm10869_vm13, %v10837_v32 }
 0x8bb   : > { %v10312_v37 = vpop.permute.xlu0 %10311  ;;  %v10778_v23 = vld [vmem:[#allocation5 + $0x150] sm:$0xff] }
 0x8bc   : > { %10652 = vst.msk [vmem:[#allocation5 + $0x160] sm:$0xff] %vm10607_vm12, %v10312_v37  ;;  %12787 = vmatprep.mubr.msk.f32.mxu0 %vm10869_vm13, %v10778_v23  ;;  %v10432_v33 = vpop.permute.xlu1 %10431  ;;  %v10838_v48 = vld [vmem:[#allocation5 + $0x330] sm:$0xff] }
 0x8bd   : > { %10712 = vst.msk [vmem:[#allocation5 + $0x340] sm:$0xff] %vm10607_vm12, %v10432_v33  ;;  %12877 = vmatprep.mubr.msk.f32.mxu1 %vm10869_vm13, %v10838_v48 }
 0x8bf   : > { %v10314_v7 = vpop.permute.xlu0 %10313  ;;  %v10779_v8 = vld [vmem:[#allocation5 + $0x158] sm:$0xff] }
 0x8c0   : > { %10653 = vst.msk [vmem:[#allocation5 + $0x168] sm:$0xff] %vm10607_vm12, %v10314_v7  ;;  %12788 = vmatmul.mubr.msk.f32.gmra.mrb[42].mxu0 %vm10869_vm13, %v10779_v8  ;;  %v10434_v9 = vpop.permute.xlu1 %10433  ;;  %v10839_v10 = vld [vmem:[#allocation5 + $0x338] sm:$0xff] }
 0x8c1   : > { %10713 = vst.msk [vmem:[#allocation5 + $0x348] sm:$0xff] %vm10607_vm12, %v10434_v9  ;;  %12878 = vmatmul.mubr.msk.f32.gmra.mrb[38].mxu1 %vm10869_vm13, %v10839_v10 }
 0x8c3   : > { %v10316_v36 = vpop.permute.xlu0 %10315  ;;  %v10780_v35 = vld [vmem:[#allocation5 + $0x160] sm:$0xff] }
 0x8c4   : > { %10654 = vst.msk [vmem:[#allocation5 + $0x170] sm:$0xff] %vm10607_vm12, %v10316_v36  ;;  %12790 = vmatprep.mubr.msk.f32.mxu0 %vm10869_vm13, %v10780_v35  ;;  %v10436_v4 = vpop.permute.xlu1 %10435  ;;  %v10840_v11 = vld [vmem:[#allocation5 + $0x340] sm:$0xff] }
 0x8c5   : > { %10714 = vst.msk [vmem:[#allocation5 + $0x350] sm:$0xff] %vm10607_vm12, %v10436_v4  ;;  %12880 = vmatprep.mubr.msk.f32.mxu1 %vm10869_vm13, %v10840_v11 }
 0x8c7   : > { %v10318_v12 = vpop.permute.xlu0 %10317  ;;  %v10781_v13 = vld [vmem:[#allocation5 + $0x168] sm:$0xff] }
 0x8c8   : > { %10655 = vst.msk [vmem:[#allocation5 + $0x178] sm:$0xff] %vm10607_vm12, %v10318_v12  ;;  %12791 = vmatmul.mubr.msk.f32.gmra.mrb[44].mxu0 %vm10869_vm13, %v10781_v13  ;;  %v10438_v46 = vpop.permute.xlu1 %10437  ;;  %v10841_v14 = vld [vmem:[#allocation5 + $0x348] sm:$0xff] }
 0x8c9   : > { %10715 = vst.msk [vmem:[#allocation5 + $0x358] sm:$0xff] %vm10607_vm12, %v10438_v46  ;;  %12881 = vmatmul.mubr.msk.f32.gmra.mrb[40].mxu1 %vm10869_vm13, %v10841_v14 }
 0x8cb   : > { %v10320_v22 = vpop.permute.xlu0 %10319  ;;  %v10782_v39 = vld [vmem:[#allocation5 + $0x170] sm:$0xff] }
 0x8cc   : > { %10656 = vst.msk [vmem:[#allocation5 + $0x180] sm:$0xff] %vm10607_vm12, %v10320_v22  ;;  %12793 = vmatprep.mubr.msk.f32.mxu0 %vm10869_vm13, %v10782_v39  ;;  %v10440_v27 = vpop.permute.xlu1 %10439  ;;  %v10842_v15 = vld [vmem:[#allocation5 + $0x350] sm:$0xff] }
 0x8cd   : > { %10716 = vst.msk [vmem:[#allocation5 + $0x360] sm:$0xff] %vm10607_vm12, %v10440_v27  ;;  %12883 = vmatprep.mubr.msk.f32.mxu1 %vm10869_vm13, %v10842_v15 }
 0x8cf   : > { %v10322_v17 = vpop.permute.xlu0 %10321  ;;  %v10783_v18 = vld [vmem:[#allocation5 + $0x178] sm:$0xff] }
 0x8d0   : > { %10657 = vst.msk [vmem:[#allocation5 + $0x188] sm:$0xff] %vm10607_vm12, %v10322_v17  ;;  %12794 = vmatmul.mubr.msk.f32.gmra.mrb[46].mxu0 %vm10869_vm13, %v10783_v18  ;;  %v10442_v19 = vpop.permute.xlu1 %10441  ;;  %v10843_v20 = vld [vmem:[#allocation5 + $0x358] sm:$0xff] }
 0x8d1   : > { %10717 = vst.msk [vmem:[#allocation5 + $0x368] sm:$0xff] %vm10607_vm12, %v10442_v19  ;;  %12884 = vmatmul.mubr.msk.f32.gmra.mrb[42].mxu1 %vm10869_vm13, %v10843_v20 }
 0x8d3   : > { %v10324_v24 = vpop.permute.xlu0 %10323  ;;  %v10784_v40 = vld [vmem:[#allocation5 + $0x180] sm:$0xff] }
 0x8d4   : > { %10658 = vst.msk [vmem:[#allocation5 + $0x190] sm:$0xff] %vm10607_vm12, %v10324_v24  ;;  %12796 = vmatprep.mubr.msk.f32.mxu0 %vm10869_vm13, %v10784_v40  ;;  %v10444_v41 = vpop.permute.xlu1 %10443  ;;  %v10844_v21 = vld [vmem:[#allocation5 + $0x360] sm:$0xff] }
 0x8d5   : > { %10718 = vst.msk [vmem:[#allocation5 + $0x370] sm:$0xff] %vm10607_vm12, %v10444_v41  ;;  %12886 = vmatprep.mubr.msk.f32.mxu1 %vm10869_vm13, %v10844_v21 }
 0x8d7   : > { %v10326_v26 = vpop.permute.xlu0 %10325  ;;  %v10785_v42 = vld [vmem:[#allocation5 + $0x188] sm:$0xff] }
 0x8d8   : > { %10659 = vst.msk [vmem:[#allocation5 + $0x198] sm:$0xff] %vm10607_vm12, %v10326_v26  ;;  %12797 = vmatmul.mubr.msk.f32.gmra.mrb[48].mxu0 %vm10869_vm13, %v10785_v42  ;;  %v10446_v44 = vpop.permute.xlu1 %10445  ;;  %v10845_v49 = vld [vmem:[#allocation5 + $0x368] sm:$0xff] }
 0x8d9   : > { %10719 = vst.msk [vmem:[#allocation5 + $0x378] sm:$0xff] %vm10607_vm12, %v10446_v44  ;;  %12887 = vmatmul.mubr.msk.f32.gmra.mrb[44].mxu1 %vm10869_vm13, %v10845_v49 }
 0x8db   : > { %v10328_v50 = vpop.permute.xlu0 %10327  ;;  %v10786_v51 = vld [vmem:[#allocation5 + $0x190] sm:$0xff] }
 0x8dc   : > { %10660 = vst.msk [vmem:[#allocation5 + $0x1a0] sm:$0xff] %vm10607_vm12, %v10328_v50  ;;  %12799 = vmatprep.mubr.msk.f32.mxu0 %vm10869_vm13, %v10786_v51  ;;  %v10448_v52 = vpop.permute.xlu1 %10447  ;;  %v10846_v47 = vld [vmem:[#allocation5 + $0x370] sm:$0xff] }
 0x8dd   : > { %10720 = vst.msk [vmem:[#allocation5 + $0x380] sm:$0xff] %vm10607_vm12, %v10448_v52  ;;  %12889 = vmatprep.mubr.msk.f32.mxu1 %vm10869_vm13, %v10846_v47 }
 0x8df   : > { %v10330_v53 = vpop.permute.xlu0 %10329  ;;  %v10787_v16 = vld [vmem:[#allocation5 + $0x198] sm:$0xff] }
 0x8e0   : > { %10661 = vst.msk [vmem:[#allocation5 + $0x1a8] sm:$0xff] %vm10607_vm12, %v10330_v53  ;;  %12800 = vmatmul.mubr.msk.f32.gmra.mrb[50].mxu0 %vm10869_vm13, %v10787_v16  ;;  %v10450_v43 = vpop.permute.xlu1 %10449  ;;  %v10847_v25 = vld [vmem:[#allocation5 + $0x378] sm:$0xff] }
 0x8e1   : > { %10721 = vst.msk [vmem:[#allocation5 + $0x388] sm:$0xff] %vm10607_vm12, %v10450_v43  ;;  %12890 = vmatmul.mubr.msk.f32.gmra.mrb[46].mxu1 %vm10869_vm13, %v10847_v25 }
 0x8e3   : > { %v10332_v28 = vpop.permute.xlu0 %10331  ;;  %v10788_v34 = vld [vmem:[#allocation5 + $0x1a0] sm:$0xff] }
 0x8e4   : > { %10662 = vst.msk [vmem:[#allocation5 + $0x1b0] sm:$0xff] %vm10607_vm12, %v10332_v28  ;;  %12802 = vmatprep.mubr.msk.f32.mxu0 %vm10869_vm13, %v10788_v34  ;;  %v10452_v54 = vpop.permute.xlu1 %10451  ;;  %v10848_v57 = vld [vmem:[#allocation5 + $0x380] sm:$0xff] }
 0x8e5   : > { %10722 = vst.msk [vmem:[#allocation5 + $0x390] sm:$0xff] %vm10607_vm12, %v10452_v54  ;;  %12892 = vmatprep.mubr.msk.f32.mxu1 %vm10869_vm13, %v10848_v57 }
 0x8e7   : > { %v10334_v58 = vpop.permute.xlu0 %10333  ;;  %v10789_v59 = vld [vmem:[#allocation5 + $0x1a8] sm:$0xff] }
 0x8e8   : > { %10663 = vst.msk [vmem:[#allocation5 + $0x1b8] sm:$0xff] %vm10607_vm12, %v10334_v58  ;;  %12803 = vmatmul.mubr.msk.f32.gmra.mrb[52].mxu0 %vm10869_vm13, %v10789_v59  ;;  %v10454_v31 = vpop.permute.xlu1 %10453  ;;  %v10849_v60 = vld [vmem:[#allocation5 + $0x388] sm:$0xff] }
 0x8e9   : > { %10723 = vst.msk [vmem:[#allocation5 + $0x398] sm:$0xff] %vm10607_vm12, %v10454_v31  ;;  %12893 = vmatmul.mubr.msk.f32.gmra.mrb[48].mxu1 %vm10869_vm13, %v10849_v60 }
 0x8eb   : > { %v10336_v61 = vpop.permute.xlu0 %10335  ;;  %v10790_v29 = vld [vmem:[#allocation5 + $0x1b0] sm:$0xff] }
 0x8ec   : > { %10664 = vst.msk [vmem:[#allocation5 + $0x1c0] sm:$0xff] %vm10607_vm12, %v10336_v61  ;;  %12805 = vmatprep.mubr.msk.f32.mxu0 %vm10869_vm13, %v10790_v29  ;;  %v10456_v62 = vpop.permute.xlu1 %10455  ;;  %v10850_v63 = vld [vmem:[#allocation5 + $0x390] sm:$0xff] }
 0x8ed   : > { %10724 = vst.msk [vmem:[#allocation5 + $0x3a0] sm:$0xff] %vm10607_vm12, %v10456_v62  ;;  %12895 = vmatprep.mubr.msk.f32.mxu1 %vm10869_vm13, %v10850_v63 }
 0x8ef   : > { %v10338_v55 = vpop.permute.xlu0 %10337  ;;  %v10791_v0 = vld [vmem:[#allocation5 + $0x1b8] sm:$0xff] }
 0x8f0   : > { %10665 = vst.msk [vmem:[#allocation5 + $0x1c8] sm:$0xff] %vm10607_vm12, %v10338_v55  ;;  %12806 = vmatmul.mubr.msk.f32.gmra.mrb[54].mxu0 %vm10869_vm13, %v10791_v0  ;;  %v12726_v1 = vpop.f32.mrb[0].mxu0  ;;  %v10458_v2 = vpop.permute.xlu1 %10457  ;;  %v10851_v56 = vld [vmem:[#allocation5 + $0x398] sm:$0xff] }
 0x8f1   : > { %v11324_v3 = vpop.f32.mrb[1].mxu0  ;;  %10725 = vst.msk [vmem:[#allocation5 + $0x3a8] sm:$0xff] %vm10607_vm12, %v10458_v2  ;;  %12896 = vmatmul.mubr.msk.f32.gmra.mrb[50].mxu1 %vm10869_vm13, %v10851_v56 }
 0x8f2   : > { %11963 = vxpose.xlu0.b32.start [1/16] (narrow) %v11324_v3, 8 }
 0x8f3   : > { %v10340_v5 = vpop.permute.xlu0 %10339  ;;  %v10792_v30 = vld [vmem:[#allocation5 + $0x1c0] sm:$0xff] }
 0x8f4   : > { %10666 = vst.msk [vmem:[#allocation5 + $0x1d0] sm:$0xff] %vm10607_vm12, %v10340_v5  ;;  %12808 = vmatprep.mubr.msk.f32.mxu0 %vm10869_vm13, %v10792_v30  ;;  %v12729_v38 = vpop.f32.mrb[2].mxu0  ;;  %v10460_v45 = vpop.permute.xlu1 %10459  ;;  %v10852_v6 = vld [vmem:[#allocation5 + $0x3a0] sm:$0xff] }
 0x8f5   : > { %v11334_v32 = vpop.f32.mrb[3].mxu0  ;;  %10726 = vst.msk [vmem:[#allocation5 + $0x3b0] sm:$0xff] %vm10607_vm12, %v10460_v45  ;;  %12898 = vmatprep.mubr.msk.f32.mxu1 %vm10869_vm13, %v10852_v6 }
 0x8f6   : > { %11964 = vxpose.xlu0.b32.cont [2/16] (narrow) %v12726_v1, 8 }
 0x8f7   : > { %v10342_v37 = vpop.permute.xlu0 %10341  ;;  %v10793_v23 = vld [vmem:[#allocation5 + $0x1c8] sm:$0xff] }
 0x8f8   : > { %10667 = vst.msk [vmem:[#allocation5 + $0x1d8] sm:$0xff] %vm10607_vm12, %v10342_v37  ;;  %12809 = vmatmul.mubr.msk.f32.gmra.mrb[56].mxu0 %vm10869_vm13, %v10793_v23  ;;  %v12732_v33 = vpop.f32.mrb[4].mxu0  ;;  %v10462_v48 = vpop.permute.xlu1 %10461  ;;  %v10853_v7 = vld [vmem:[#allocation5 + $0x3a8] sm:$0xff] }
 0x8f9   : > { %v11344_v8 = vpop.f32.mrb[5].mxu0  ;;  %10727 = vst.msk [vmem:[#allocation5 + $0x3b8] sm:$0xff] %vm10607_vm12, %v10462_v48  ;;  %12899 = vmatmul.mubr.msk.f32.gmra.mrb[52].mxu1 %vm10869_vm13, %v10853_v7 }
 0x8fa   : > { %11965 = vxpose.xlu0.b32.cont [3/16] (narrow) %v11334_v32, 8 }
 0x8fb   : > { %v10344_v9 = vpop.permute.xlu0 %10343  ;;  %v10794_v10 = vld [vmem:[#allocation5 + $0x1d0] sm:$0xff] }
 0x8fc   : > { %10668 = vst.msk [vmem:[#allocation5 + $0x1e0] sm:$0xff] %vm10607_vm12, %v10344_v9  ;;  %12811 = vmatprep.mubr.msk.f32.mxu0 %vm10869_vm13, %v10794_v10  ;;  %v12735_v36 = vpop.f32.mrb[6].mxu0  ;;  %v10464_v35 = vpop.permute.xlu1 %10463  ;;  %v10854_v4 = vld [vmem:[#allocation5 + $0x3b0] sm:$0xff] }
 0x8fd   : > { %v11354_v11 = vpop.f32.mrb[7].mxu0  ;;  %10728 = vst.msk [vmem:[#allocation5 + $0x3c0] sm:$0xff] %vm10607_vm12, %v10464_v35  ;;  %12901 = vmatprep.mubr.msk.f32.mxu1 %vm10869_vm13, %v10854_v4 }
 0x8fe   : > { %11966 = vxpose.xlu0.b32.cont [4/16] (narrow) %v12729_v38, 8 }
 0x8ff   : > { %v10346_v12 = vpop.permute.xlu0 %10345  ;;  %v10795_v13 = vld [vmem:[#allocation5 + $0x1d8] sm:$0xff] }
 0x900   : > { %10669 = vst.msk [vmem:[#allocation5 + $0x1e8] sm:$0xff] %vm10607_vm12, %v10346_v12  ;;  %12812 = vmatmul.mubr.msk.f32.gmra.mrb[58].mxu0 %vm10869_vm13, %v10795_v13  ;;  %v12738_v46 = vpop.f32.mrb[8].mxu0  ;;  %v10466_v14 = vpop.permute.xlu1 %10465  ;;  %v10855_v22 = vld [vmem:[#allocation5 + $0x3b8] sm:$0xff] }
 0x901   : > { %v11364_v39 = vpop.f32.mrb[9].mxu0  ;;  %10729 = vst.msk [vmem:[#allocation5 + $0x3c8] sm:$0xff] %vm10607_vm12, %v10466_v14  ;;  %12902 = vmatmul.mubr.msk.f32.gmra.mrb[54].mxu1 %vm10869_vm13, %v10855_v22 }
 0x902   : > { %11967 = vxpose.xlu0.b32.cont [5/16] (narrow) %v11344_v8, 8 }
 0x903   : > { %v10348_v27 = vpop.permute.xlu0 %10347  ;;  %v10796_v15 = vld [vmem:[#allocation5 + $0x1e0] sm:$0xff] }
 0x904   : > { %10670 = vst.msk [vmem:[#allocation5 + $0x1f0] sm:$0xff] %vm10607_vm12, %v10348_v27  ;;  %12814 = vmatprep.mubr.msk.f32.mxu0 %vm10869_vm13, %v10796_v15  ;;  %v12741_v17 = vpop.f32.mrb[10].mxu0  ;;  %v10468_v18 = vpop.permute.xlu1 %10467  ;;  %v10856_v19 = vld [vmem:[#allocation5 + $0x3c0] sm:$0xff] }
 0x905   : > { %v11374_v20 = vpop.f32.mrb[11].mxu0  ;;  %10730 = vst.msk [vmem:[#allocation5 + $0x3d0] sm:$0xff] %vm10607_vm12, %v10468_v18  ;;  %12904 = vmatprep.mubr.msk.f32.mxu1 %vm10869_vm13, %v10856_v19 }
 0x906   : > { %11968 = vxpose.xlu0.b32.cont [6/16] (narrow) %v12732_v33, 8 }
 0x907   : > { %v10350_v24 = vpop.permute.xlu0 %10349  ;;  %v10797_v40 = vld [vmem:[#allocation5 + $0x1e8] sm:$0xff] }
 0x908   : > { %10671 = vst.msk [vmem:[#allocation5 + $0x1f8] sm:$0xff] %vm10607_vm12, %v10350_v24  ;;  %12815 = vmatmul.mubr.msk.f32.gmra.mrb[60].mxu0 %vm10869_vm13, %v10797_v40  ;;  %v12744_v41 = vpop.f32.mrb[12].mxu0  ;;  %v10470_v21 = vpop.permute.xlu1 %10469  ;;  %v10857_v26 = vld [vmem:[#allocation5 + $0x3c8] sm:$0xff] }
 0x909   : > { %v11384_v42 = vpop.f32.mrb[13].mxu0  ;;  %10731 = vst.msk [vmem:[#allocation5 + $0x3d8] sm:$0xff] %vm10607_vm12, %v10470_v21  ;;  %12905 = vmatmul.mubr.msk.f32.gmra.mrb[56].mxu1 %vm10869_vm13, %v10857_v26 }
 0x90a   : > { %11969 = vxpose.xlu0.b32.cont [7/16] (narrow) %v11354_v11, 8 }
 0x90b   : > { %v10798_v44 = vld [vmem:[#allocation5 + $0x1f0] sm:$0xff]  ;;  %v10472_v49 = vpop.permute.xlu0 %10471 }
 0x90c   : > { %12817 = vmatprep.mubr.msk.f32.mxu0 %vm10869_vm13, %v10798_v44  ;;  %v12747_v50 = vpop.f32.mrb[14].mxu0  ;;  %v10858_v51 = vld [vmem:[#allocation5 + $0x3d0] sm:$0xff]  ;;  %10732 = vst.msk [vmem:[#allocation5 + $0x3e0] sm:$0xff] %vm10607_vm12, %v10472_v49  ;;  %v10474_v52 = vpop.permute.xlu1 %10473 }
 0x90d   : > { %v11394_v47 = vpop.f32.mrb[15].mxu0  ;;  %12907 = vmatprep.mubr.msk.f32.mxu1 %vm10869_vm13, %v10858_v51  ;;  %10733 = vst.msk [vmem:[#allocation5 + $0x3e8] sm:$0xff] %vm10607_vm12, %v10474_v52 }
 0x90e   : > { %11970 = vxpose.xlu0.b32.cont [8/16] (narrow) %v12735_v36, 8 }
 0x90f   : > { %v10799_v53 = vld [vmem:[#allocation5 + $0x1f8] sm:$0xff]  ;;  %v10476_v16 = vpop.permute.xlu0 %10475 }
 0x910   : > { %12818 = vmatmul.mubr.msk.f32.gmra.mrb[62].mxu0 %vm10869_vm13, %v10799_v53  ;;  %v16760_v43 = vpop.f32.mrb[0].mxu1  ;;  %v10859_v25 = vld [vmem:[#allocation5 + $0x3d8] sm:$0xff]  ;;  %10734 = vst.msk [vmem:[#allocation5 + $0x3f0] sm:$0xff] %vm10607_vm12, %v10476_v16  ;;  %v10478_v28 = vpop.permute.xlu1 %10477 }
 0x911   : > { %v16763_v34 = vpop.f32.mrb[1].mxu1  ;;  %12908 = vmatmul.mubr.msk.f32.gmra.mrb[58].mxu1 %vm10869_vm13, %v10859_v25  ;;  %10735 = vst.msk [vmem:[#allocation5 + $0x3f8] sm:$0xff] %vm10607_vm12, %v10478_v28 }
 0x912   : > { %11971 = vxpose.xlu0.b32.cont [9/16] (narrow) %v11364_v39, 8 }
 0x913   : > { %v10860_v54 = vld [vmem:[#allocation5 + $0x3e0] sm:$0xff] }
 0x914   : > { %v16767_v57 = vpop.f32.mrb[2].mxu1  ;;  %12910 = vmatprep.mubr.msk.f32.mxu1 %vm10869_vm13, %v10860_v54  ;;  %v10861_v58 = vld [vmem:[#allocation5 + $0x3e8] sm:$0xff] }
 0x915   : > { %v16770_v59 = vpop.f32.mrb[3].mxu1  ;;  %12911 = vmatmul.mubr.msk.f32.gmra.mrb[60].mxu1 %vm10869_vm13, %v10861_v58 }
 0x916   : > { %11972 = vxpose.xlu0.b32.cont [10/16] (narrow) %v12738_v46, 8 }
 0x917   : > { %v10862_v31 = vld [vmem:[#allocation5 + $0x3f0] sm:$0xff] }
 0x918   : > { %v16773_v60 = vpop.f32.mrb[4].mxu1  ;;  %12913 = vmatprep.mubr.msk.f32.mxu1 %vm10869_vm13, %v10862_v31  ;;  %v10863_v61 = vld [vmem:[#allocation5 + $0x3f8] sm:$0xff] }
 0x919   : > { %v16776_v29 = vpop.f32.mrb[5].mxu1  ;;  %12914 = vmatmul.mubr.msk.f32.gmra.mrb[62].mxu1 %vm10869_vm13, %v10863_v61 }
 0x91a   : > { %11973 = vxpose.xlu0.b32.cont [11/16] (narrow) %v11374_v20, 8 }
 0x91c   : > { %v16779_v62 = vpop.f32.mrb[6].mxu1 }
 0x91d   : > { %v16781_v63 = vpop.f32.mrb[7].mxu1 }
 0x91e   : > { %11974 = vxpose.xlu0.b32.cont [12/16] (narrow) %v12741_v17, 8 }
 0x920   : > { %v16783_v55 = vpop.f32.mrb[8].mxu1 }
 0x921   : > { %v16785_v0 = vpop.f32.mrb[9].mxu1 }
 0x922   : > { %11975 = vxpose.xlu0.b32.cont [13/16] (narrow) %v11384_v42, 8 }
 0x924   : > { %v16787_v1 = vpop.f32.mrb[10].mxu1 }
 0x925   : > { %v16789_v2 = vpop.f32.mrb[11].mxu1 }
 0x926   : > { %11976 = vxpose.xlu0.b32.cont [14/16] (narrow) %v12744_v41, 8 }
 0x92a   : > { %11977 = vxpose.xlu0.b32.cont [15/16] (narrow) %v11394_v47, 8 }
 0x92b   : > { %v12750_v56 = vpop.f32.mrb[16].mxu0 }
 0x92c   : > { %v11404_v3 = vpop.f32.mrb[17].mxu0  ;;  %v16791_v5 = vpop.f32.mrb[12].mxu1 }
 0x92d   : > { %11995 = vxpose.xlu1.b32.start [1/16] (narrow) %v11404_v3, 8  ;;  %v16793_v30 = vpop.f32.mrb[13].mxu1 }
 0x92e   : > { %11978 = vxpose.xlu0.b32.end [16/16] (narrow) %v12747_v50, 8 }
 0x931   : > { %11996 = vxpose.xlu1.b32.cont [2/16] (narrow) %v12750_v56, 8 }
 0x933   : > { %v12753_v38 = vpop.f32.mrb[18].mxu0 }
 0x934   : > { %v11414_v45 = vpop.f32.mrb[19].mxu0  ;;  %v16795_v6 = vpop.f32.mrb[14].mxu1 }
 0x935   : > { %11997 = vxpose.xlu1.b32.cont [3/16] (narrow) %v11414_v45, 8  ;;  %v16797_v32 = vpop.f32.mrb[15].mxu1 }
 0x939   : > { %11998 = vxpose.xlu1.b32.cont [4/16] (narrow) %v12753_v38, 8 }
 0x93b   : > { %v12756_v37 = vpop.f32.mrb[20].mxu0 }
 0x93c   : > { %v11424_v23 = vpop.f32.mrb[21].mxu0  ;;  %v16799_v33 = vpop.f32.mrb[16].mxu1 }
 0x93d   : > { %11999 = vxpose.xlu1.b32.cont [5/16] (narrow) %v11424_v23, 8  ;;  %v16801_v48 = vpop.f32.mrb[17].mxu1 }
 0x941   : > { %12000 = vxpose.xlu1.b32.cont [6/16] (narrow) %v12756_v37, 8 }
 0x943   : > { %v12759_v7 = vpop.f32.mrb[22].mxu0 }
 0x944   : > { %v11434_v8 = vpop.f32.mrb[23].mxu0  ;;  %v16803_v9 = vpop.f32.mrb[18].mxu1 }
 0x945   : > { %12001 = vxpose.xlu1.b32.cont [7/16] (narrow) %v11434_v8, 8  ;;  %v16805_v10 = vpop.f32.mrb[19].mxu1 }
 0x949   : > { %12002 = vxpose.xlu1.b32.cont [8/16] (narrow) %v12759_v7, 8 }
 0x94b   : > { %v12762_v36 = vpop.f32.mrb[24].mxu0 }
 0x94c   : > { %v11444_v35 = vpop.f32.mrb[25].mxu0  ;;  %v16807_v4 = vpop.f32.mrb[20].mxu1 }
 0x94d   : > { %12003 = vxpose.xlu1.b32.cont [9/16] (narrow) %v11444_v35, 8  ;;  %v16809_v11 = vpop.f32.mrb[21].mxu1 }
 0x951   : > { %12004 = vxpose.xlu1.b32.cont [10/16] (narrow) %v12762_v36, 8 }
 0x953   : > { %v12765_v12 = vpop.f32.mrb[26].mxu0 }
 0x954   : > { %v11454_v13 = vpop.f32.mrb[27].mxu0  ;;  %v16811_v46 = vpop.f32.mrb[22].mxu1 }
 0x955   : > { %12005 = vxpose.xlu1.b32.cont [11/16] (narrow) %v11454_v13, 8  ;;  %v16813_v14 = vpop.f32.mrb[23].mxu1 }
 0x959   : > { %12006 = vxpose.xlu1.b32.cont [12/16] (narrow) %v12765_v12, 8 }
 0x95b   : > { %v12768_v22 = vpop.f32.mrb[28].mxu0 }
 0x95c   : > { %v11464_v39 = vpop.f32.mrb[29].mxu0  ;;  %v16815_v27 = vpop.f32.mrb[24].mxu1 }
 0x95d   : > { %12007 = vxpose.xlu1.b32.cont [13/16] (narrow) %v11464_v39, 8  ;;  %v16817_v15 = vpop.f32.mrb[25].mxu1 }
 0x961   : > { %12008 = vxpose.xlu1.b32.cont [14/16] (narrow) %v12768_v22, 8 }
 0x963   : > { %v12771_v17 = vpop.f32.mrb[30].mxu0 }
 0x964   : > { %v11474_v18 = vpop.f32.mrb[31].mxu0  ;;  %v16819_v19 = vpop.f32.mrb[26].mxu1 }
 0x965   : > { %12009 = vxpose.xlu1.b32.cont [15/16] (narrow) %v11474_v18, 8  ;;  %v16821_v20 = vpop.f32.mrb[27].mxu1 }
 0x969   : > { %12010 = vxpose.xlu1.b32.end [16/16] (narrow) %v12771_v17, 8 }
 0x96b   : > { %v12774_v24 = vpop.f32.mrb[32].mxu0 }
 0x96c   : > { %v11484_v40 = vpop.f32.mrb[33].mxu0  ;;  %v16823_v41 = vpop.f32.mrb[28].mxu1 }
 0x96d   : > { %12027 = vxpose.xlu0.b32.start [1/16] (narrow) %v11484_v40, 8  ;;  %v16825_v21 = vpop.f32.mrb[29].mxu1 }
 0x971   : > { %12028 = vxpose.xlu0.b32.cont [2/16] (narrow) %v12774_v24, 8 }
 0x973   : > { %v12777_v26 = vpop.f32.mrb[34].mxu0 }
 0x974   : > { %v11494_v42 = vpop.f32.mrb[35].mxu0  ;;  %v16827_v44 = vpop.f32.mrb[30].mxu1 }
 0x975   : > { %12029 = vxpose.xlu0.b32.cont [3/16] (narrow) %v11494_v42, 8  ;;  %v16829_v49 = vpop.f32.mrb[31].mxu1 }
 0x979   : > { %12030 = vxpose.xlu0.b32.cont [4/16] (narrow) %v12777_v26, 8 }
 0x97b   : > { %v12780_v50 = vpop.f32.mrb[36].mxu0 }
 0x97c   : > { %v11504_v51 = vpop.f32.mrb[37].mxu0  ;;  %v16831_v52 = vpop.f32.mrb[32].mxu1 }
 0x97d   : > { %12031 = vxpose.xlu0.b32.cont [5/16] (narrow) %v11504_v51, 8  ;;  %v16833_v47 = vpop.f32.mrb[33].mxu1 }
 0x981   : > { %12032 = vxpose.xlu0.b32.cont [6/16] (narrow) %v12780_v50, 8 }
 0x983   : > { %v12783_v53 = vpop.f32.mrb[38].mxu0 }
 0x984   : > { %v11514_v16 = vpop.f32.mrb[39].mxu0  ;;  %v16835_v25 = vpop.f32.mrb[34].mxu1 }
 0x985   : > { %12033 = vxpose.xlu0.b32.cont [7/16] (narrow) %v11514_v16, 8  ;;  %v16837_v28 = vpop.f32.mrb[35].mxu1 }
 0x989   : > { %12034 = vxpose.xlu0.b32.cont [8/16] (narrow) %v12783_v53, 8 }
 0x98b   : > { %v12786_v54 = vpop.f32.mrb[40].mxu0 }
 0x98c   : > { %v11524_v58 = vpop.f32.mrb[41].mxu0  ;;  %v16839_v31 = vpop.f32.mrb[36].mxu1 }
 0x98d   : > { %12035 = vxpose.xlu0.b32.cont [9/16] (narrow) %v11524_v58, 8  ;;  %v16841_v61 = vpop.f32.mrb[37].mxu1 }
 0x991   : > { %12036 = vxpose.xlu0.b32.cont [10/16] (narrow) %v12786_v54, 8 }
 0x993   : > { %v12789_v56 = vpop.f32.mrb[42].mxu0 }
 0x994   : > { %v11534_v3 = vpop.f32.mrb[43].mxu0  ;;  %v16843_v38 = vpop.f32.mrb[38].mxu1 }
 0x995   : > { %12037 = vxpose.xlu0.b32.cont [11/16] (narrow) %v11534_v3, 8  ;;  %v16845_v45 = vpop.f32.mrb[39].mxu1 }
 0x999   : > { %12038 = vxpose.xlu0.b32.cont [12/16] (narrow) %v12789_v56, 8 }
 0x99b   : > { %v12792_v37 = vpop.f32.mrb[44].mxu0 }
 0x99c   : > { %v11544_v23 = vpop.f32.mrb[45].mxu0  ;;  %v16847_v7 = vpop.f32.mrb[40].mxu1 }
 0x99d   : > { %12039 = vxpose.xlu0.b32.cont [13/16] (narrow) %v11544_v23, 8  ;;  %v16849_v8 = vpop.f32.mrb[41].mxu1 }
 0x9a1   : > { %12040 = vxpose.xlu0.b32.cont [14/16] (narrow) %v12792_v37, 8 }
 0x9a3   : > { %v12795_v36 = vpop.f32.mrb[46].mxu0 }
 0x9a4   : > { %v11554_v35 = vpop.f32.mrb[47].mxu0  ;;  %v16851_v12 = vpop.f32.mrb[42].mxu1 }
 0x9a5   : > { %12041 = vxpose.xlu0.b32.cont [15/16] (narrow) %v11554_v35, 8  ;;  %v16853_v13 = vpop.f32.mrb[43].mxu1 }
 0x9a9   : > { %12042 = vxpose.xlu0.b32.end [16/16] (narrow) %v12795_v36, 8 }
 0x9ab   : > { %v12798_v22 = vpop.f32.mrb[48].mxu0 }
 0x9ac   : > { %v11564_v39 = vpop.f32.mrb[49].mxu0  ;;  %v16855_v17 = vpop.f32.mrb[44].mxu1 }
 0x9ad   : > { %12091 = vxpose.xlu0.b32.start [1/16] (narrow) %v16763_v34, 8  ;;  %12059 = vxpose.xlu1.b32.start [1/16] (narrow) %v11564_v39, 8  ;;  %v16858_v18 = vpop.f32.mrb[45].mxu1  ;;  %v11979_v39 = vpop.trf.xlu0 }
 0x9ae   : > { %12222 = vst [vmem:[%s16908_s8] sm:$0xff] %v11979_v39 }
 0x9b1   : > { %12092 = vxpose.xlu0.b32.cont [2/16] (narrow) %v16760_v43, 8  ;;  %12060 = vxpose.xlu1.b32.cont [2/16] (narrow) %v12798_v22, 8 }
 0x9b3   : > { %v12801_v24 = vpop.f32.mrb[50].mxu0 }
 0x9b4   : > { %v11574_v40 = vpop.f32.mrb[51].mxu0  ;;  %v16861_v26 = vpop.f32.mrb[46].mxu1 }
 0x9b5   : > { %12093 = vxpose.xlu0.b32.cont [3/16] (narrow) %v16770_v59, 8  ;;  %12061 = vxpose.xlu1.b32.cont [3/16] (narrow) %v11574_v40, 8  ;;  %v16864_v42 = vpop.f32.mrb[47].mxu1 }
 0x9b9   : > { %12094 = vxpose.xlu0.b32.cont [4/16] (narrow) %v16767_v57, 8  ;;  %12062 = vxpose.xlu1.b32.cont [4/16] (narrow) %v12801_v24, 8  ;;  %v12011_v24 = vpop.trf.xlu1 }
 0x9ba   : > { %12223 = vst [vmem:[%s16908_s8 + $0x8] sm:$0xff] %v12011_v24  ;;  %v12246_v40 = vmul.f32 %v12011_v24, %v12011_v24 }
 0x9bb   : > { %v12804_v50 = vpop.f32.mrb[52].mxu0 }
 0x9bc   : > { %v11584_v34 = vpop.f32.mrb[53].mxu0  ;;  %v16867_v51 = vpop.f32.mrb[48].mxu1 }
 0x9bd   : > { %12095 = vxpose.xlu0.b32.cont [5/16] (narrow) %v16776_v29, 8  ;;  %12063 = vxpose.xlu1.b32.cont [5/16] (narrow) %v11584_v34, 8  ;;  %v16870_v43 = vpop.f32.mrb[49].mxu1 }
 0x9c1   : > { %12096 = vxpose.xlu0.b32.cont [6/16] (narrow) %v16773_v60, 8  ;;  %12064 = vxpose.xlu1.b32.cont [6/16] (narrow) %v12804_v50, 8 }
 0x9c3   : > { %v12807_v53 = vpop.f32.mrb[54].mxu0 }
 0x9c4   : > { %v11594_v59 = vpop.f32.mrb[55].mxu0  ;;  %v16873_v16 = vpop.f32.mrb[50].mxu1 }
 0x9c5   : > { %12097 = vxpose.xlu0.b32.cont [7/16] (narrow) %v16781_v63, 8  ;;  %12065 = vxpose.xlu1.b32.cont [7/16] (narrow) %v11594_v59, 8  ;;  %v16876_v57 = vpop.f32.mrb[51].mxu1 }
 0x9c9   : > { %12098 = vxpose.xlu0.b32.cont [8/16] (narrow) %v16779_v62, 8  ;;  %12066 = vxpose.xlu1.b32.cont [8/16] (narrow) %v12807_v53, 8 }
 0x9cb   : > { %v12810_v54 = vpop.f32.mrb[56].mxu0 }
 0x9cc   : > { %v11604_v29 = vpop.f32.mrb[57].mxu0  ;;  %v16879_v58 = vpop.f32.mrb[52].mxu1 }
 0x9cd   : > { %12099 = vxpose.xlu0.b32.cont [9/16] (narrow) %v16785_v0, 8  ;;  %12067 = vxpose.xlu1.b32.cont [9/16] (narrow) %v11604_v29, 8  ;;  %v16882_v60 = vpop.f32.mrb[53].mxu1 }
 0x9d1   : > { %12100 = vxpose.xlu0.b32.cont [10/16] (narrow) %v16783_v55, 8  ;;  %12068 = vxpose.xlu1.b32.cont [10/16] (narrow) %v12810_v54, 8 }
 0x9d3   : > { %v12813_v56 = vpop.f32.mrb[58].mxu0 }
 0x9d4   : > { %v11614_v63 = vpop.f32.mrb[59].mxu0  ;;  %v16885_v3 = vpop.f32.mrb[54].mxu1 }
 0x9d5   : > { %12101 = vxpose.xlu0.b32.cont [11/16] (narrow) %v16789_v2, 8  ;;  %12069 = vxpose.xlu1.b32.cont [11/16] (narrow) %v11614_v63, 8  ;;  %v16888_v62 = vpop.f32.mrb[55].mxu1 }
 0x9d9   : > { %12102 = vxpose.xlu0.b32.cont [12/16] (narrow) %v16787_v1, 8  ;;  %12070 = vxpose.xlu1.b32.cont [12/16] (narrow) %v12813_v56, 8 }
 0x9db   : > { %v12816_v37 = vpop.f32.mrb[60].mxu0 }
 0x9dc   : > { %v11624_v0 = vpop.f32.mrb[61].mxu0  ;;  %v16891_v23 = vpop.f32.mrb[56].mxu1 }
 0x9dd   : > { %12103 = vxpose.xlu0.b32.cont [13/16] (narrow) %v16793_v30, 8  ;;  %12071 = vxpose.xlu1.b32.cont [13/16] (narrow) %v11624_v0, 8  ;;  %v16894_v55 = vpop.f32.mrb[57].mxu1 }
 0x9e1   : > { %12104 = vxpose.xlu0.b32.cont [14/16] (narrow) %v16791_v5, 8  ;;  %12072 = vxpose.xlu1.b32.cont [14/16] (narrow) %v12816_v37, 8  ;;  %v12245_v5 = vmul.f32 %v11979_v39, %v11979_v39 }
 0x9e3   : > { %v12819_v2 = vpop.f32.mrb[62].mxu0  ;;  %v12253_v34 = vadd.f32 %v12246_v40, %v12245_v5 }
 0x9e4   : > { %v11634_v36 = vpop.f32.mrb[63].mxu0  ;;  %v16897_v35 = vpop.f32.mrb[58].mxu1 }
 0x9e5   : > { %12105 = vxpose.xlu0.b32.cont [15/16] (narrow) %v16797_v32, 8  ;;  %12073 = vxpose.xlu1.b32.cont [15/16] (narrow) %v11634_v36, 8  ;;  %v16900_v1 = vpop.f32.mrb[59].mxu1  ;;  %v12231_v32 = vadd.f32 %v12011_v24, %v11979_v39 }
 0x9e8   : > { %v16902_v22 = vpop.f32.mrb[60].mxu1 }
 0x9e9   : > { %12106 = vxpose.xlu0.b32.end [16/16] (narrow) %v16795_v6, 8  ;;  %12074 = vxpose.xlu1.b32.end [16/16] (narrow) %v12819_v2, 8  ;;  %v16905_v30 = vpop.f32.mrb[61].mxu1 }
 0x9ec   : > { %v16912_v50 = vpop.f32.mrb[62].mxu1 }
 0x9ed   : > { %12155 = vxpose.xlu0.b32.start [1/16] (narrow) %v16833_v47, 8  ;;  %12123 = vxpose.xlu1.b32.start [1/16] (narrow) %v16801_v48, 8  ;;  %v11954_v6 = vpop.f32.mrb[63].mxu1  ;;  %v12043_v53 = vpop.trf.xlu0 }
 0x9ee   : > { %12224 = vst [vmem:[%s16908_s8 + $0x10] sm:$0xff] %v12043_v53  ;;  %v12232_v59 = vadd.f32 %v12231_v32, %v12043_v53  ;;  %v12247_v54 = vmul.f32 %v12043_v53, %v12043_v53 }
 0x9f0   : > { %v12254_v29 = vadd.f32 %v12253_v34, %v12247_v54 }
 0x9f1   : > { %12156 = vxpose.xlu0.b32.cont [2/16] (narrow) %v16831_v52, 8  ;;  %12124 = vxpose.xlu1.b32.cont [2/16] (narrow) %v16799_v33, 8 }
 0x9f5   : > { %12157 = vxpose.xlu0.b32.cont [3/16] (narrow) %v16837_v28, 8  ;;  %12125 = vxpose.xlu1.b32.cont [3/16] (narrow) %v16805_v10, 8 }
 0x9f9   : > { %12158 = vxpose.xlu0.b32.cont [4/16] (narrow) %v16835_v25, 8  ;;  %12126 = vxpose.xlu1.b32.cont [4/16] (narrow) %v16803_v9, 8 }
 0x9fd   : > { %12159 = vxpose.xlu0.b32.cont [5/16] (narrow) %v16841_v61, 8  ;;  %12127 = vxpose.xlu1.b32.cont [5/16] (narrow) %v16809_v11, 8 }
 0xa01   : > { %12160 = vxpose.xlu0.b32.cont [6/16] (narrow) %v16839_v31, 8  ;;  %12128 = vxpose.xlu1.b32.cont [6/16] (narrow) %v16807_v4, 8  ;;  %v12230_v31 = vld [vmem:[#allocation3] sm:$0xff] }
 0xa05   : > { %12161 = vxpose.xlu0.b32.cont [7/16] (narrow) %v16845_v45, 8  ;;  %12129 = vxpose.xlu1.b32.cont [7/16] (narrow) %v16813_v14, 8 }
 0xa09   : > { %12162 = vxpose.xlu0.b32.cont [8/16] (narrow) %v16843_v38, 8  ;;  %12130 = vxpose.xlu1.b32.cont [8/16] (narrow) %v16811_v46, 8  ;;  %v12244_v38 = vld [vmem:[#allocation3 + $0x8] sm:$0xff] }
 0xa0d   : > { %12163 = vxpose.xlu0.b32.cont [9/16] (narrow) %v16849_v8, 8  ;;  %12131 = vxpose.xlu1.b32.cont [9/16] (narrow) %v16817_v15, 8 }
 0xa11   : > { %12164 = vxpose.xlu0.b32.cont [10/16] (narrow) %v16847_v7, 8  ;;  %12132 = vxpose.xlu1.b32.cont [10/16] (narrow) %v16815_v27, 8 }
 0xa15   : > { %12165 = vxpose.xlu0.b32.cont [11/16] (narrow) %v16853_v13, 8  ;;  %12133 = vxpose.xlu1.b32.cont [11/16] (narrow) %v16821_v20, 8 }
 0xa19   : > { %12166 = vxpose.xlu0.b32.cont [12/16] (narrow) %v16851_v12, 8  ;;  %12134 = vxpose.xlu1.b32.cont [12/16] (narrow) %v16819_v19, 8 }
 0xa1d   : > { %12167 = vxpose.xlu0.b32.cont [13/16] (narrow) %v16858_v18, 8  ;;  %12135 = vxpose.xlu1.b32.cont [13/16] (narrow) %v16825_v21, 8 }
 0xa21   : > { %12168 = vxpose.xlu0.b32.cont [14/16] (narrow) %v16855_v17, 8  ;;  %12136 = vxpose.xlu1.b32.cont [14/16] (narrow) %v16823_v41, 8 }
 0xa25   : > { %12169 = vxpose.xlu0.b32.cont [15/16] (narrow) %v16864_v42, 8  ;;  %12137 = vxpose.xlu1.b32.cont [15/16] (narrow) %v16829_v49, 8 }
 0xa29   : > { %12170 = vxpose.xlu0.b32.end [16/16] (narrow) %v16861_v26, 8  ;;  %12138 = vxpose.xlu1.b32.end [16/16] (narrow) %v16827_v44, 8 }
 0xa2d   : > { %12187 = vxpose.xlu1.b32.start [1/16] (narrow) %v16870_v43, 8  ;;  %v12075_v33 = vpop.trf.xlu1  ;;  %v12107_v48 = vpop.trf.xlu0 }
 0xa2e   : > { %12225 = vst [vmem:[%s16908_s8 + $0x18] sm:$0xff] %v12075_v33  ;;  %v12233_v9 = vadd.f32 %v12232_v59, %v12075_v33  ;;  %v12248_v10 = vmul.f32 %v12075_v33, %v12075_v33  ;;  %12226 = vst [vmem:[%s16908_s8 + $0x20] sm:$0xff] %v12107_v48  ;;  %v12249_v4 = vmul.f32 %v12107_v48, %v12107_v48 }
 0xa30   : > { %v12255_v11 = vadd.f32 %v12254_v29, %v12248_v10  ;;  %v12234_v46 = vadd.f32 %v12233_v9, %v12107_v48 }
 0xa31   : > { %12188 = vxpose.xlu1.b32.cont [2/16] (narrow) %v16867_v51, 8 }
 0xa32   : > { %v12256_v14 = vadd.f32 %v12255_v11, %v12249_v4 }
 0xa35   : > { %12189 = vxpose.xlu1.b32.cont [3/16] (narrow) %v16876_v57, 8 }
 0xa39   : > { %12190 = vxpose.xlu1.b32.cont [4/16] (narrow) %v16873_v16, 8 }
 0xa3d   : > { %12191 = vxpose.xlu1.b32.cont [5/16] (narrow) %v16882_v60, 8 }
 0xa41   : > { %12192 = vxpose.xlu1.b32.cont [6/16] (narrow) %v16879_v58, 8 }
 0xa45   : > { %12193 = vxpose.xlu1.b32.cont [7/16] (narrow) %v16888_v62, 8 }
 0xa49   : > { %12194 = vxpose.xlu1.b32.cont [8/16] (narrow) %v16885_v3, 8 }
 0xa4d   : > { %12195 = vxpose.xlu1.b32.cont [9/16] (narrow) %v16894_v55, 8 }
 0xa51   : > { %12196 = vxpose.xlu1.b32.cont [10/16] (narrow) %v16891_v23, 8 }
 0xa55   : > { %12197 = vxpose.xlu1.b32.cont [11/16] (narrow) %v16900_v1, 8 }
 0xa59   : > { %12198 = vxpose.xlu1.b32.cont [12/16] (narrow) %v16897_v35, 8 }
 0xa5d   : > { %12199 = vxpose.xlu1.b32.cont [13/16] (narrow) %v16905_v30, 8 }
 0xa61   : > { %12200 = vxpose.xlu1.b32.cont [14/16] (narrow) %v16902_v22, 8 }
 0xa65   : > { %12201 = vxpose.xlu1.b32.cont [15/16] (narrow) %v11954_v6, 8 }
 0xa69   : > { %12202 = vxpose.xlu1.b32.end [16/16] (narrow) %v16912_v50, 8 }
 0xa6d   : > { %v12139_v27 = vpop.trf.xlu1  ;;  %v12171_v15 = vpop.trf.xlu0 }
 0xa6e   : > { %12227 = vst [vmem:[%s16908_s8 + $0x28] sm:$0xff] %v12139_v27  ;;  %12228 = vst [vmem:[%s16908_s8 + $0x30] sm:$0xff] %v12171_v15  ;;  %v12250_v19 = vmul.f32 %v12139_v27, %v12139_v27  ;;  %v12235_v20 = vadd.f32 %v12234_v46, %v12139_v27  ;;  %v12251_v21 = vmul.f32 %v12171_v15, %v12171_v15 }
 0xa70   : > { %v12257_v41 = vadd.f32 %v12256_v14, %v12250_v19  ;;  %v12236_v44 = vadd.f32 %v12235_v20, %v12171_v15 }
 0xa72   : > { %v12258_v52 = vadd.f32 %v12257_v41, %v12251_v21 }
 0xaad   : > { %v12203_v49 = vpop.trf.xlu1 }
 0xaae   : > { %12229 = vst [vmem:[%s16908_s8 + $0x38] sm:$0xff] %v12203_v49  ;;  %v12237_v47 = vadd.f32 %v12236_v44, %v12203_v49  ;;  %v12252_v25 = vmul.f32 %v12203_v49, %v12203_v49 }
 0xab0   : > { %12238 = vadd.xlane.f32.xlu0 %v12237_v47  ;;  %v12259_v28 = vadd.f32 %v12258_v52, %v12252_v25 }
 0xab2   : > { %12260 = vadd.xlane.f32.xlu1 %v12259_v28 }
 0xb3d   : > { %v12239_v61 = vpop.xlane.xlu0 %12238 }
 0xb3e   : > { %v12240_v45 = vadd.f32 %v12239_v61, %v12230_v31 }
 0xb3f   : > { %v12261_v7 = vpop.xlane.xlu1 %12260 }
 0xb40   : > { %12242 = vst.msk [vmem:[#allocation3] sm:$0xff] %vm12241_vm14, %v12240_v45  ;;  %v12262_v8 = vadd.f32 %v12261_v7, %v12244_v38 }
 0xb42   : > { %12263 = vst.msk [vmem:[#allocation3 + $0x8] sm:$0xff] %vm12241_vm14, %v12262_v8 }
 0xb43 PF: > { %p12569_p3 = scmp.ne.s32.totalorder %s13102_s16, 1 }
 0xb44   : > { %v13127_v26 = vmov (!%p12569_p3), 0   ;;  %v13128_v57 = vmov (!%p12569_p3), 1   ;;  %v12276_v58 = vld [vmem:[%s17036_s2] sm:$0xff] (!%p12569_p3)  ;;  %s13129_s11 = smov (!%p12569_p3), 1   ;;  %s12579_s20 = sshll.u32 (!%p12569_p3), %s13098_s15, 6 }
 0xb45   : > { %12267 = sbr.rel (%p12569_p3) target bundleno = 3166 (0xc5e), region = 44  ;;  %13015 = vset.pattern.permute.xlu0 (!%p12569_p3), %v13127_v26  ;;  %13016 = vset.pattern.permute.xlu1 (!%p12569_p3), %v13128_v57  ;;  %s12288_s24 = scalar_lea.vmem (!%p12569_p3), [#allocation2], %s12579_s20 }
 0xb46   : > { %v12289_v37 = vld [vmem:[%s12288_s24] sm:$0xff] (!%p12569_p3)  ;;  %v12290_v0 = vld [vmem:[%s12288_s24 + $0x8] sm:$0xff] (!%p12569_p3)  ;;  %v12291_v23 = vld [vmem:[%s12288_s24 + $0x10] sm:$0xff] (!%p12569_p3) }
 0xb47   : > { %v12268_v12 = vld [vmem:[#allocation3] sm:$0xff] (!%p12569_p3)  ;;  %v12292_v55 = vld [vmem:[%s12288_s24 + $0x18] sm:$0xff] (!%p12569_p3)  ;;  %v12294_v35 = vld [vmem:[%s12288_s24 + $0x28] sm:$0xff] (!%p12569_p3) }
 0xb48   : > { %v12269_v17 = vmul.f32 (!%p12569_p3), 0.00048828125, %v12268_v12  ;;  %v12293_v2 = vld [vmem:[%s12288_s24 + $0x20] sm:$0xff] (!%p12569_p3)  ;;  %v12295_v1 = vld [vmem:[%s12288_s24 + $0x30] sm:$0xff] (!%p12569_p3)  ;;  %v12296_v22 = vld [vmem:[%s12288_s24 + $0x38] sm:$0xff] (!%p12569_p3) }
 0xb49   : > { %v12271_v13 = vld [vmem:[#allocation3 + $0x8] sm:$0xff] (!%p12569_p3) }
 0xb4a   : > { %v12272_v18 = vmul.f32 (!%p12569_p3), 0.00048828125, %v12271_v13  ;;  %v12273_v42 = vmul.f32 (!%p12569_p3), %v12269_v17, %v12269_v17 }
 0xb4c   : > { %v12274_v51 = vsub.f32 %v12272_v18, %v12273_v42 }
 0xb4e   : > { %v12275_v43 = vmax.f32 %v12274_v51, 0.0 }
 0xb50   : > { %v12277_v16 = vadd.f32 1e-05, %v12275_v43 }
 0xb52   : > { %13018 = vrsqrt.f32 %v12277_v16 }
 0xb5c   : > { %v13019_v60 = vpop.eup %13018 }
 0xb5d   : > { %v12279_v56 = vmul.f32 %v13019_v60, %v12276_v58 }
 0xb5f   : > { %v12280_v63 = vmul.f32 %v12279_v56, %v12269_v17 }
 0xb61   : > { %12282 = vrot.lane.b32.xlu0 %v12280_v63, %s13129_s11 }
 0xb65   : > { %12299 = vperm.xlu0 %13015, %v12279_v56  }
 0xb69   : > { %13017 = vset.pattern.permute.xlu0 %v13128_v57 }
 0xbd3   : > { %v12283_v3 = vpop.permute.xlu0 %12282 }
 0xbd4   : > { %v12285_v62 = vsub.f32 %v12276_v58, %v12283_v3 }
 0xbd6   : > { %12312 = vperm.xlu1 %13016, %v12285_v62  }
 0xbe4   : > { %v12300_v36 = vpop.permute.xlu0 %12299 }
 0xbe5   : > { %v12302_v30 = vmul.f32 %v12300_v36, %v12289_v37  ;;  %v12303_v39 = vmul.f32 %v12300_v36, %v12290_v0  ;;  %v12304_v5 = vmul.f32 %v12300_v36, %v12291_v23  ;;  %v12305_v24 = vmul.f32 %v12300_v36, %v12292_v55 }
 0xbe6   : > { %v12306_v32 = vmul.f32 %v12300_v36, %v12293_v2  ;;  %v12307_v40 = vmul.f32 %v12300_v36, %v12294_v35  ;;  %v12308_v50 = vmul.f32 %v12300_v36, %v12295_v1  ;;  %v12309_v6 = vmul.f32 %v12300_v36, %v12296_v22 }
 0xc55   : > { %v12313_v34 = vpop.permute.xlu1 %12312 }
 0xc56   : > { %v12315_v53 = vadd.f32 %v12313_v34, %v12302_v30  ;;  %v12316_v59 = vadd.f32 %v12313_v34, %v12303_v39  ;;  %v12317_v54 = vadd.f32 %v12313_v34, %v12304_v5  ;;  %v12318_v29 = vadd.f32 %v12313_v34, %v12305_v24 }
 0xc57   : > { %v12319_v33 = vadd.f32 %v12313_v34, %v12306_v32  ;;  %v12320_v48 = vadd.f32 %v12313_v34, %v12307_v40  ;;  %v12321_v9 = vadd.f32 %v12313_v34, %v12308_v50  ;;  %v12322_v10 = vadd.f32 %v12313_v34, %v12309_v6 }
 0xc58   : > { %v12323_v4 = vmax.f32 %v12315_v53, 0.0  ;;  %v12324_v11 = vmax.f32 %v12316_v59, 0.0  ;;  %v12325_v46 = vmax.f32 %v12317_v54, 0.0  ;;  %v12326_v14 = vmax.f32 %v12318_v29, 0.0 }
 0xc59   : > { %v12327_v27 = vmax.f32 %v12319_v33, 0.0  ;;  %v12328_v15 = vmax.f32 %v12320_v48, 0.0  ;;  %v12329_v19 = vmax.f32 %v12321_v9, 0.0  ;;  %v12330_v20 = vmax.f32 %v12322_v10, 0.0 }
 0xc5a   : > { %12331 = vst [vmem:[%s13235_s21] sm:$0xff] %v12323_v4  ;;  %12332 = vst [vmem:[%s13235_s21 + $0x8] sm:$0xff] %v12324_v11 }
 0xc5b   : > { %12333 = vst [vmem:[%s13235_s21 + $0x10] sm:$0xff] %v12325_v46  ;;  %12334 = vst [vmem:[%s13235_s21 + $0x18] sm:$0xff] %v12326_v14 }
 0xc5c   : > { %12335 = vst [vmem:[%s13235_s21 + $0x20] sm:$0xff] %v12327_v27  ;;  %12336 = vst [vmem:[%s13235_s21 + $0x28] sm:$0xff] %v12328_v15 }
 0xc5d   : > { %12337 = vst [vmem:[%s13235_s21 + $0x30] sm:$0xff] %v12329_v19  ;;  %12338 = vst [vmem:[%s13235_s21 + $0x38] sm:$0xff] %v12330_v20 }
 0xc5e PF: > { %s12347_s27 = smul.u32 %s13098_s15, %s13102_s16  ;;  %s12355_s28 = sshll.u32 %s13235_s21, 4  ;;  %s16983_s28 = int_to_ptr.vmem [resolvable:$true] %s12355_s28 }
 0xc5f   : > { %s12340_s8 = scalar_lea.sflag [#allocation7], %s190_s4  ;;  %s13020_s9 = scalar_lea.vmem %s16983_s28, 1024 }
 0xc60   : > { %s12580_s29 = sshll.u32 %s12347_s27, 10  ;;  %p13021_p4 = scmp.ne.s32.totalorder %s16983_s28, %s13020_s9 }
 0xc61   : > { %s12353_s7 = scalar_lea.hbm %s17037_s3, %s12580_s29  ;;  %s13130_s10 = smov [#allocation6]  }
 0xc62   : > { %p13022_p5 = pnand %p13021_p4, %p13204_p6  ;;  %s13024_s15 = sshll.u32 %s13130_s10, 4  ;;  %s13025_s15 = int_to_ptr.vmem [resolvable:$false] %s13024_s15 }
 0xc63   : > { %s13026_s16 = scalar_lea.vmem %s13025_s15, 2048  ;;  %p13027_p9 = scmp.lt.s32.totalorder %s16983_s28, %s13025_s15 }
 0xc64   : > { %p13023_p7 = pneg %p13022_p5  ;;  %p13028_p10 = scmp.lt.s32.totalorder %s13026_s16, %s13020_s9 }
 0xc66   : > { %p13029_p11 = por %p13028_p10, %p13027_p9 }
 0xc68   : > { %p13030_p12 = pnand %p13029_p11, %p13023_p7 }
 0xc6a   : > { %13033 = shalt.err (!%p13030_p12)
}
 0xc6b   : > { %s13034_s21 = scalar_lea.hbm %s12353_s7, 1024  ;;  %s13038_s20 = scalar_lea.hbm %s17037_s3, 2048 }
 0xc6c   : > { %p13035_p13 = scmp.ne.s32.totalorder %s12353_s7, %s13034_s21  ;;  %p13039_p2 = scmp.lt.u32.totalorder %s12353_s7, %s17037_s3 }
 0xc6d   : > { %p13040_p3 = scmp.lt.u32.totalorder %s13038_s20, %s13034_s21  ;;  %p13042_p5 = scmp.lt.u32.totalorder %s13034_s21, %s12353_s7 }
 0xc6e   : > { %p13036_p0 = pnand %p13035_p13, %p13204_p6 }
 0xc6f   : > { %p13041_p4 = por %p13040_p3, %p13039_p2 }
 0xc70   : > { %p13037_p1 = pneg %p13036_p0 }
 0xc71   : > { %p13043_p9 = por %p13042_p5, %p13041_p4 }
 0xc73   : > { %p13044_p7 = pnand %p13043_p9, %p13037_p1 }
 0xc75   : > { %13047 = shalt.err (!%p13044_p7)
}
 0xc76   : > { %12930 = dma.vmem_to_hbm [thread:$0]  (%p13204_p6), %s16983_s28, 1024, %s12353_s7, %s12340_s8  }
 0xc77 PF: > { %p12936_p10 = scmp.ge.s32.totalorder %s13114_s19, 2  ;;  %s12367_s29 = sand.u32 1, %s13086_s12  }
 0xc78   : > { %s12368_s5 = scalar_lea.sflag [#allocation7], %s12367_s29 }
 0xc79   : > { %p12933_p11 = pnand %p12936_p10, %p13211_p8 }
 0xc7b   : > { %13081 = dma.done.wait (!%p12933_p11), %s12368_s5, 1024  }
 0xc7c   : > { %13083 = vsyncadd (!%p12933_p11), %s12368_s5, 4294966272  ;;  %s16_s19 = sadd.s32 1, %s13114_s19   ;;  %s17040_s12 = smov %s13090_s13 }
 0xc7d   : > { %p13_p12 = scmp.ge.s32.totalorder %s16_s19, 6   ;;  %s17041_s13 = smov %s13094_s14 }
 0xc7e   : > { %s17042_s14 = smov %s13220_s30  ;;  %s17043_s15 = smov %s13106_s17 }
 0xc7f   : > { %s17044_s16 = smov %s13110_s18  ;;  %s17045_s17 = smov %s17048_s22 }
 0xc80   : > { %s17046_s18 = smov %s17052_s23  ;;  %15 = sbr.rel (!%p13_p12) target bundleno = 5 (0x5), region = 85 }
 0xc87   :  { %12373 = vsyncpa [#allocation7], 1 }
 0xc88   :  { %12375 = vsyncpa [#allocation7 + $0x1], 1 }

</bundles_post_ra>
